<compile_context>
chip_gen: v6e
topology: v6e:2x2x1
jax: 0.10.0
libtpu: 0.0.40
codegen_flags: <defaults>
</compile_context>

<pallas_src>
import jax
import jax.numpy as jnp
from jax.experimental import pallas as pl
from jax.experimental.pallas import tpu as pltpu

HIDDEN = 64     # logical hidden_size (module default)
HPAD = 128      # hidden size padded to one full lane group per gate
BATCH = 2
STEPS = 8       # number of fused ODE-function evaluations per pallas_call
LN_EPS = 1e-5


def rnn_ode_kernel(x_ref, h0_ref, h1_ref,
                   wi0_ref, wh0_ref, b0rz_ref, bi0n_ref, bh0n_ref,
                   w1x_ref, w1h_ref, b1rz_ref, bi1n_ref, bh1n_ref,
                   lng_ref, lnb_ref,
                   w1_ref, b1_ref, w2_ref, b2_ref, wo_ref, bo_ref,
                   dx_ref, h0_out_ref, h1_out_ref,
                   gi0_scr, hs_scr):
    HP = h0_ref.shape[-1]
    B = h0_ref.shape[0]
    TB = x_ref.shape[0]
    T = TB // B
    two_hp = 2 * HP

    # ---- Hoisted layer-0 input transform: one full-sublane VPU multiply ----
    # gi0 for ALL steps: (T*B, 1) * (1, 3*HP) -> (T*B, 3*HP)
    gi0_scr[...] = x_ref[...] * wi0_ref[...]

    h0 = h0_ref[...]                                     # (B, HP)
    h1 = h1_ref[...]                                     # (B, HP)

    # ---- Serial recurrence only (fully unrolled, T is static) -------------
    for t in range(T):
        rs, re = t * B, (t + 1) * B

        # GRU layer 0 (input size 1; input product was hoisted above)
        gi0 = gi0_scr[rs:re, :]                          # (B, 3*HP)
        gh0 = jnp.dot(h0, wh0_ref[...],
                      preferred_element_type=jnp.float32)
        rz0 = jax.nn.sigmoid(gi0[:, :two_hp] + gh0[:, :two_hp] + b0rz_ref[...])
        r0 = rz0[:, :HP]
        z0 = rz0[:, HP:]
        n0 = jnp.tanh(gi0[:, two_hp:] + bi0n_ref[...]
                      + r0 * (gh0[:, two_hp:] + bh0n_ref[...]))
        h0 = (1.0 - z0) * n0 + z0 * h0
        # dropout between GRU layers: identity in eval mode

        # GRU layer 1: two K=HP dots (no concatenate / no fused K=2*HP dot)
        gx1 = jnp.dot(h0, w1x_ref[...],
                      preferred_element_type=jnp.float32)
        gh1 = jnp.dot(h1, w1h_ref[...],
                      preferred_element_type=jnp.float32)
        rz1 = jax.nn.sigmoid(gx1[:, :two_hp] + gh1[:, :two_hp] + b1rz_ref[...])
        r1 = rz1[:, :HP]
        z1 = rz1[:, HP:]
        n1 = jnp.tanh(gx1[:, two_hp:] + bi1n_ref[...]
                      + r1 * (gh1[:, two_hp:] + bh1n_ref[...]))
        h1 = (1.0 - z1) * n1 + z1 * h1

        # stash h1' for the batched LayerNorm + head after the loop
        hs_scr[rs:re, :] = h1

    h0_out_ref[...] = h0
    h1_out_ref[...] = h1

    # ---- LayerNorm + MLP head, once, on the whole (T*B, HP) slab ----------
    lane = jax.lax.broadcasted_iota(jnp.int32, (1, HP), 1)
    mask = (lane < HIDDEN).astype(jnp.float32)
    inv_h = 1.0 / HIDDEN

    h_all = hs_scr[...] * mask                           # explicit pad mask
    mean = jnp.sum(h_all, axis=-1, keepdims=True) * inv_h
    cen = (h_all - mean) * mask
    var = jnp.sum(cen * cen, axis=-1, keepdims=True) * inv_h
    hn = cen * jax.lax.rsqrt(var + LN_EPS) * lng_ref[...] + lnb_ref[...]

    a1 = jnp.tanh(jnp.dot(hn, w1_ref[...],
                          preferred_element_type=jnp.float32) + b1_ref[...])
    a2 = jnp.maximum(jnp.dot(a1, w2_ref[...],
                             preferred_element_type=jnp.float32)
                     + b2_ref[...], 0.0)
    # N=1 output projection as a VPU multiply + lane reduction (no 1-lane MXU)
    dx = jnp.sum(a2 * wo_ref[...], axis=-1, keepdims=True) + bo_ref[...]
    dx_ref[...] = dx                                     # single store


def _rnn_ode_seq(x_seq, h0, h1, packed):
    """Runs STEPS fused forward evaluations. Returns (dx_traj, h0_new, h1_new)."""
    T, B, _ = x_seq.shape
    HP = h0.shape[-1]
    x_flat = x_seq.reshape(T * B, 1)
    args = (x_flat, h0, h1,
            packed["wi0"], packed["wh0"], packed["b0_rz"],
            packed["bi0_n"], packed["bh0_n"],
            packed["w1x"], packed["w1h"], packed["b1_rz"],
            packed["bi1_n"], packed["bh1_n"],
            packed["ln_g"], packed["ln_b"],
            packed["w1"], packed["b1"], packed["w2"], packed["b2"],
            packed["wo"], packed["bo"])
    vmem = pl.BlockSpec(memory_space=pltpu.MemorySpace.VMEM)
    dx_flat, h0n, h1n = pl.pallas_call(
        rnn_ode_kernel,
        out_shape=(jax.ShapeDtypeStruct((T * B, 1), jnp.float32),
                   jax.ShapeDtypeStruct((B, HP), jnp.float32),
                   jax.ShapeDtypeStruct((B, HP), jnp.float32)),
        in_specs=[vmem] * len(args),
        out_specs=(vmem, vmem, vmem),
        scratch_shapes=[
            pltpu.VMEM((T * B, 3 * HP), jnp.float32),   # hoisted gi0, all steps
            pltpu.VMEM((T * B, HP), jnp.float32),       # h1' stash for LN+head
        ],
        input_output_aliases={1: 1, 2: 2},   # h0 -> h0_out, h1 -> h1_out
    )(*args)
    return dx_flat.reshape(T, B, 1), h0n, h1n


# Donate the hidden-state buffers so the aliased outputs reuse them in place.
rnn_ode_forward_seq = jax.jit(_rnn_ode_seq, donate_argnums=(1, 2))


def init_params(key, hidden_size=HIDDEN):
    """Natural params: PyTorch layouts, weights transposed to (in, out)."""
    H = hidden_size
    ks = jax.random.split(key, 16)
    kg = 1.0 / jnp.sqrt(H)
    k1 = 1.0 / jnp.sqrt(2 * H)

    def u(k, shape, bound):
        return jax.random.uniform(k, shape, jnp.float32, -bound, bound)

    return {
        "wi0": u(ks[0], (1, 3 * H), kg),
        "wh0": u(ks[1], (H, 3 * H), kg),
        "bi0": u(ks[2], (1, 3 * H), kg),
        "bh0": u(ks[3], (1, 3 * H), kg),
        "wi1": u(ks[4], (H, 3 * H), kg),
        "wh1": u(ks[5], (H, 3 * H), kg),
        "bi1": u(ks[6], (1, 3 * H), kg),
        "bh1": u(ks[7], (1, 3 * H), kg),
        "ln_g": jnp.ones((1, H), jnp.float32),
        "ln_b": jnp.zeros((1, H), jnp.float32),
        "w1": u(ks[8], (H, 2 * H), kg),
        "b1": u(ks[9], (1, 2 * H), kg),
        "w2": u(ks[10], (2 * H, H), k1),
        "b2": u(ks[11], (1, H), k1),
        "wo": u(ks[12], (H, 1), kg),
        "bo": u(ks[13], (1, 1), kg),
    }


def pack_params(p, hidden_size=HIDDEN, hp=HPAD):
    """Re-layout the natural params for the kernel.

    * each GRU gate is padded from H to HPAD columns (128-lane aligned slices),
    * layer-1 keeps SEPARATE input / hidden weight matrices (two K=HPAD dots),
    * r/z biases are pre-combined, the n-gate biases stay separate,
    * the output projection is stored as a (1, HP) row for a VPU reduction.
    All padded rows/cols are zero, which keeps padded hidden lanes exactly 0.
    """
    H, HP = hidden_size, hp
    f32 = jnp.float32

    def pad_gate_cols(w, ngates):
        w3 = w.reshape(w.shape[0], ngates, H)
        out = jnp.zeros((w.shape[0], ngates, HP), f32).at[:, :, :H].set(w3)
        return out.reshape(w.shape[0], ngates * HP)

    def pad_rows(w, rows):
        return jnp.zeros((rows, w.shape[1]), f32).at[: w.shape[0], :].set(w)

    # --- GRU layer 0 ---
    wi0 = pad_gate_cols(p["wi0"], 3)                         # (1, 3*HP)
    wh0 = pad_rows(pad_gate_cols(p["wh0"], 3), HP)           # (HP, 3*HP)
    b0 = p["bi0"] + p["bh0"]
    b0_rz = pad_gate_cols(b0[:, : 2 * H], 2)                 # (1, 2*HP)
    bi0_n = pad_gate_cols(p["bi0"][:, 2 * H:], 1)            # (1, HP)
    bh0_n = pad_gate_cols(p["bh0"][:, 2 * H:], 1)            # (1, HP)

    # --- GRU layer 1 (separate input / hidden weights, two K=HP dots) ---
    w1x = pad_rows(pad_gate_cols(p["wi1"], 3), HP)           # (HP, 3*HP)
    w1h = pad_rows(pad_gate_cols(p["wh1"], 3), HP)           # (HP, 3*HP)
    b1g = p["bi1"] + p["bh1"]
    b1_rz = pad_gate_cols(b1g[:, : 2 * H], 2)                # (1, 2*HP)
    bi1_n = pad_gate_cols(p["bi1"][:, 2 * H:], 1)            # (1, HP)
    bh1_n = pad_gate_cols(p["bh1"][:, 2 * H:], 1)            # (1, HP)

    # --- LayerNorm / MLP head ---
    ln_g = jnp.zeros((1, HP), f32).at[:, :H].set(p["ln_g"])
    ln_b = jnp.zeros((1, HP), f32).at[:, :H].set(p["ln_b"])
    w1 = pad_rows(p["w1"], HP)                               # (HP, 2*H)
    w2 = jnp.zeros((2 * H, HP), f32).at[:, :H].set(p["w2"])  # (2*H, HP)
    b2 = jnp.zeros((1, HP), f32).at[:, :H].set(p["b2"])      # (1, HP)
    wo = jnp.zeros((1, HP), f32).at[:, :H].set(p["wo"].T)    # (1, HP)

    return {
        "wi0": wi0, "wh0": wh0, "b0_rz": b0_rz, "bi0_n": bi0_n, "bh0_n": bh0_n,
        "w1x": w1x, "w1h": w1h, "b1_rz": b1_rz, "bi1_n": bi1_n, "bh1_n": bh1_n,
        "ln_g": ln_g, "ln_b": ln_b,
        "w1": w1, "b1": p["b1"], "w2": w2, "b2": b2,
        "wo": wo, "bo": p["bo"],
    }


def reference_step(x, h0, h1, p):
    """Pure-JAX single forward step on the natural (unpadded) params."""
    H = h0.shape[-1]

    def gru(xin, h, wi, wh, bi, bh):
        gi = xin @ wi + bi
        gh = h @ wh + bh
        r = jax.nn.sigmoid(gi[:, :H] + gh[:, :H])
        z = jax.nn.sigmoid(gi[:, H:2 * H] + gh[:, H:2 * H])
        n = jnp.tanh(gi[:, 2 * H:] + r * gh[:, 2 * H:])
        return (1 - z) * n + z * h

    h0n = gru(x, h0, p["wi0"], p["wh0"], p["bi0"], p["bh0"])
    h1n = gru(h0n, h1, p["wi1"], p["wh1"], p["bi1"], p["bh1"])
    m = jnp.mean(h1n, axis=-1, keepdims=True)
    v = jnp.mean((h1n - m) ** 2, axis=-1, keepdims=True)
    hn = (h1n - m) / jnp.sqrt(v + LN_EPS) * p["ln_g"] + p["ln_b"]
    a1 = jnp.tanh(hn @ p["w1"] + p["b1"])
    a2 = jnp.maximum(a1 @ p["w2"] + p["b2"], 0.0)
    return a2 @ p["wo"] + p["bo"], h0n, h1n


def reference_forward_seq(x_seq, h0, h1, p):
    dxs = []
    for t in range(x_seq.shape[0]):
        dx, h0, h1 = reference_step(x_seq[t], h0, h1, p)
        dxs.append(dx)
    return jnp.stack(dxs, axis=0), h0, h1


if __name__ == "__main__":
    key = jax.random.PRNGKey(0)
    kp, kx = jax.random.split(key)
    params = init_params(kp, HIDDEN)
    packed = pack_params(params)

    # ODE state at each integrator step: (T, B, 1). Hidden states start at 0.
    x_seq = jax.random.normal(kx, (STEPS, BATCH, 1), jnp.float32)
    h0_nat = jnp.zeros((BATCH, HIDDEN), jnp.float32)
    h1_nat = jnp.zeros((BATCH, HIDDEN), jnp.float32)
    h0_pad = jnp.zeros((BATCH, HPAD), jnp.float32)
    h1_pad = jnp.zeros((BATCH, HPAD), jnp.float32)

    # Compute the reference first (h0_pad / h1_pad are donated to the kernel).
    dx_expect, h0_expect, h1_expect = reference_forward_seq(
        x_seq, h0_nat, h1_nat, params)

    dx, h0_new, h1_new = rnn_ode_forward_seq(x_seq, h0_pad, h1_pad, packed)
    jax.block_until_ready((dx, h0_new, h1_new))

    assert jnp.allclose(dx, dx_expect, atol=1e-4, rtol=1e-4)
    assert jnp.allclose(h0_new[:, :HIDDEN], h0_expect, atol=1e-4, rtol=1e-4)
    assert jnp.allclose(h1_new[:, :HIDDEN], h1_expect, atol=1e-4, rtol=1e-4)

    print("KERNEL_OK")
</pallas_src>

<mosaic_0001>
module attributes {stable_mosaic.version = 11 : i64} {
  func.func @rnn_ode_kernel(%arg0: memref<16x1xf32, #tpu.memory_space<vmem>>, %arg1: memref<2x128xf32, #tpu.memory_space<vmem>>, %arg2: memref<2x128xf32, #tpu.memory_space<vmem>>, %arg3: memref<1x384xf32, #tpu.memory_space<vmem>>, %arg4: memref<128x384xf32, #tpu.memory_space<vmem>>, %arg5: memref<1x256xf32, #tpu.memory_space<vmem>>, %arg6: memref<1x128xf32, #tpu.memory_space<vmem>>, %arg7: memref<1x128xf32, #tpu.memory_space<vmem>>, %arg8: memref<128x384xf32, #tpu.memory_space<vmem>>, %arg9: memref<128x384xf32, #tpu.memory_space<vmem>>, %arg10: memref<1x256xf32, #tpu.memory_space<vmem>>, %arg11: memref<1x128xf32, #tpu.memory_space<vmem>>, %arg12: memref<1x128xf32, #tpu.memory_space<vmem>>, %arg13: memref<1x128xf32, #tpu.memory_space<vmem>>, %arg14: memref<1x128xf32, #tpu.memory_space<vmem>>, %arg15: memref<128x128xf32, #tpu.memory_space<vmem>>, %arg16: memref<1x128xf32, #tpu.memory_space<vmem>>, %arg17: memref<128x128xf32, #tpu.memory_space<vmem>>, %arg18: memref<1x128xf32, #tpu.memory_space<vmem>>, %arg19: memref<1x128xf32, #tpu.memory_space<vmem>>, %arg20: memref<1x1xf32, #tpu.memory_space<vmem>>, %arg21: memref<16x1xf32, #tpu.memory_space<vmem>>, %arg22: memref<2x128xf32, #tpu.memory_space<vmem>>, %arg23: memref<2x128xf32, #tpu.memory_space<vmem>>, %arg24: memref<16x384xf32, #tpu.memory_space<vmem>>, %arg25: memref<16x128xf32, #tpu.memory_space<vmem>>) attributes {dimension_semantics = [], scalar_prefetch = 0 : i64, scratch_operands = 2 : i64, tpu.core_type = #tpu.core_type<tc>} {
    %c0 = arith.constant 0 : index
    %c0_0 = arith.constant 0 : index
    %0 = vector.load %arg0[%c0, %c0_0] : memref<16x1xf32, #tpu.memory_space<vmem>>, vector<16x1xf32>
    %c0_1 = arith.constant 0 : index
    %c0_2 = arith.constant 0 : index
    %1 = vector.load %arg3[%c0_1, %c0_2] : memref<1x384xf32, #tpu.memory_space<vmem>>, vector<1x384xf32>
    %2 = vector.broadcast %0 : vector<16x1xf32> to vector<16x384xf32>
    %3 = vector.broadcast %1 : vector<1x384xf32> to vector<16x384xf32>
    %4 = arith.mulf %2, %3 : vector<16x384xf32>
    %c0_3 = arith.constant 0 : index
    %c0_4 = arith.constant 0 : index
    %5 = vector.load %arg24[%c0_3, %c0_4] : memref<16x384xf32, #tpu.memory_space<vmem>>, vector<16x384xf32>
    tpu.vector_store %arg24[%c0_3, %c0_4], %4 {strides = array<i32>} : memref<16x384xf32, #tpu.memory_space<vmem>>, vector<16x384xf32>,
    %c0_5 = arith.constant 0 : index
    %c0_6 = arith.constant 0 : index
    %6 = vector.load %arg1[%c0_5, %c0_6] : memref<2x128xf32, #tpu.memory_space<vmem>>, vector<2x128xf32>
    %c0_7 = arith.constant 0 : index
    %c0_8 = arith.constant 0 : index
    %7 = vector.load %arg2[%c0_7, %c0_8] : memref<2x128xf32, #tpu.memory_space<vmem>>, vector<2x128xf32>
    %c0_9 = arith.constant 0 : index
    %c0_10 = arith.constant 0 : index
    %8 = vector.load %arg24[%c0_9, %c0_10] : memref<16x384xf32, #tpu.memory_space<vmem>>, vector<2x384xf32>
    %c0_11 = arith.constant 0 : index
    %c0_12 = arith.constant 0 : index
    %9 = vector.load %arg4[%c0_11, %c0_12] : memref<128x384xf32, #tpu.memory_space<vmem>>, vector<128x384xf32>
    %cst = arith.constant dense<0.000000e+00> : vector<2x384xf32>
    %10 = tpu.matmul %6, %9, %cst {dimension_numbers = #tpu.dot_dimension_numbers<[1], [0], [0], [1], [0, 0, 1, 1], [], []>} : vector<2x128xf32>, vector<128x384xf32>, vector<2x384xf32> -> vector<2x384xf32>
    %11 = vector.extract_strided_slice %8 {offsets = [0, 0], sizes = [2, 256], strides = [1, 1]} : vector<2x384xf32> to vector<2x256xf32>
    %12 = vector.extract_strided_slice %10 {offsets = [0, 0], sizes = [2, 256], strides = [1, 1]} : vector<2x384xf32> to vector<2x256xf32>
    %13 = arith.addf %11, %12 : vector<2x256xf32>
    %c0_13 = arith.constant 0 : index
    %c0_14 = arith.constant 0 : index
    %14 = vector.load %arg5[%c0_13, %c0_14] : memref<1x256xf32, #tpu.memory_space<vmem>>, vector<1x256xf32>
    %15 = vector.broadcast %14 : vector<1x256xf32> to vector<2x256xf32>
    %16 = arith.addf %13, %15 : vector<2x256xf32>
    %17 = arith.negf %16 : vector<2x256xf32>
    %18 = math.exp %17 : vector<2x256xf32>
    %cst_15 = arith.constant 1.000000e+00 : f32
    %19 = vector.broadcast %cst_15 : f32 to vector<2x256xf32>
    %20 = arith.addf %19, %18 : vector<2x256xf32>
    %21 = arith.divf %19, %20 : vector<2x256xf32>
    %22 = vector.extract_strided_slice %21 {offsets = [0, 0], sizes = [2, 128], strides = [1, 1]} : vector<2x256xf32> to vector<2x128xf32>
    %23 = vector.extract_strided_slice %21 {offsets = [0, 128], sizes = [2, 128], strides = [1, 1]} : vector<2x256xf32> to vector<2x128xf32>
    %24 = vector.extract_strided_slice %8 {offsets = [0, 256], sizes = [2, 128], strides = [1, 1]} : vector<2x384xf32> to vector<2x128xf32>
    %c0_16 = arith.constant 0 : index
    %c0_17 = arith.constant 0 : index
    %25 = vector.load %arg6[%c0_16, %c0_17] : memref<1x128xf32, #tpu.memory_space<vmem>>, vector<1x128xf32>
    %26 = vector.broadcast %25 : vector<1x128xf32> to vector<2x128xf32>
    %27 = arith.addf %24, %26 : vector<2x128xf32>
    %28 = vector.extract_strided_slice %10 {offsets = [0, 256], sizes = [2, 128], strides = [1, 1]} : vector<2x384xf32> to vector<2x128xf32>
    %c0_18 = arith.constant 0 : index
    %c0_19 = arith.constant 0 : index
    %29 = vector.load %arg7[%c0_18, %c0_19] : memref<1x128xf32, #tpu.memory_space<vmem>>, vector<1x128xf32>
    %30 = vector.broadcast %29 : vector<1x128xf32> to vector<2x128xf32>
    %31 = arith.addf %28, %30 : vector<2x128xf32>
    %32 = arith.mulf %22, %31 : vector<2x128xf32>
    %33 = arith.addf %27, %32 : vector<2x128xf32>
    %34 = math.tanh %33 : vector<2x128xf32>
    %cst_20 = arith.constant 1.000000e+00 : f32
    %35 = vector.broadcast %cst_20 : f32 to vector<2x128xf32>
    %36 = arith.subf %35, %23 : vector<2x128xf32>
    %37 = arith.mulf %36, %34 : vector<2x128xf32>
    %38 = arith.mulf %23, %6 : vector<2x128xf32>
    %39 = arith.addf %37, %38 : vector<2x128xf32>
    %c0_21 = arith.constant 0 : index
    %c0_22 = arith.constant 0 : index
    %40 = vector.load %arg8[%c0_21, %c0_22] : memref<128x384xf32, #tpu.memory_space<vmem>>, vector<128x384xf32>
    %cst_23 = arith.constant dense<0.000000e+00> : vector<2x384xf32>
    %41 = tpu.matmul %39, %40, %cst_23 {dimension_numbers = #tpu.dot_dimension_numbers<[1], [0], [0], [1], [0, 0, 1, 1], [], []>} : vector<2x128xf32>, vector<128x384xf32>, vector<2x384xf32> -> vector<2x384xf32>
    %c0_24 = arith.constant 0 : index
    %c0_25 = arith.constant 0 : index
    %42 = vector.load %arg9[%c0_24, %c0_25] : memref<128x384xf32, #tpu.memory_space<vmem>>, vector<128x384xf32>
    %cst_26 = arith.constant dense<0.000000e+00> : vector<2x384xf32>
    %43 = tpu.matmul %7, %42, %cst_26 {dimension_numbers = #tpu.dot_dimension_numbers<[1], [0], [0], [1], [0, 0, 1, 1], [], []>} : vector<2x128xf32>, vector<128x384xf32>, vector<2x384xf32> -> vector<2x384xf32>
    %44 = vector.extract_strided_slice %41 {offsets = [0, 0], sizes = [2, 256], strides = [1, 1]} : vector<2x384xf32> to vector<2x256xf32>
    %45 = vector.extract_strided_slice %43 {offsets = [0, 0], sizes = [2, 256], strides = [1, 1]} : vector<2x384xf32> to vector<2x256xf32>
    %46 = arith.addf %44, %45 : vector<2x256xf32>
    %c0_27 = arith.constant 0 : index
    %c0_28 = arith.constant 0 : index
    %47 = vector.load %arg10[%c0_27, %c0_28] : memref<1x256xf32, #tpu.memory_space<vmem>>, vector<1x256xf32>
    %48 = vector.broadcast %47 : vector<1x256xf32> to vector<2x256xf32>
    %49 = arith.addf %46, %48 : vector<2x256xf32>
    %50 = arith.negf %49 : vector<2x256xf32>
    %51 = math.exp %50 : vector<2x256xf32>
    %cst_29 = arith.constant 1.000000e+00 : f32
    %52 = vector.broadcast %cst_29 : f32 to vector<2x256xf32>
    %53 = arith.addf %52, %51 : vector<2x256xf32>
    %54 = arith.divf %52, %53 : vector<2x256xf32>
    %55 = vector.extract_strided_slice %54 {offsets = [0, 0], sizes = [2, 128], strides = [1, 1]} : vector<2x256xf32> to vector<2x128xf32>
    %56 = vector.extract_strided_slice %54 {offsets = [0, 128], sizes = [2, 128], strides = [1, 1]} : vector<2x256xf32> to vector<2x128xf32>
    %57 = vector.extract_strided_slice %41 {offsets = [0, 256], sizes = [2, 128], strides = [1, 1]} : vector<2x384xf32> to vector<2x128xf32>
    %c0_30 = arith.constant 0 : index
    %c0_31 = arith.constant 0 : index
    %58 = vector.load %arg11[%c0_30, %c0_31] : memref<1x128xf32, #tpu.memory_space<vmem>>, vector<1x128xf32>
    %59 = vector.broadcast %58 : vector<1x128xf32> to vector<2x128xf32>
    %60 = arith.addf %57, %59 : vector<2x128xf32>
    %61 = vector.extract_strided_slice %43 {offsets = [0, 256], sizes = [2, 128], strides = [1, 1]} : vector<2x384xf32> to vector<2x128xf32>
    %c0_32 = arith.constant 0 : index
    %c0_33 = arith.constant 0 : index
    %62 = vector.load %arg12[%c0_32, %c0_33] : memref<1x128xf32, #tpu.memory_space<vmem>>, vector<1x128xf32>
    %63 = vector.broadcast %62 : vector<1x128xf32> to vector<2x128xf32>
    %64 = arith.addf %61, %63 : vector<2x128xf32>
    %65 = arith.mulf %55, %64 : vector<2x128xf32>
    %66 = arith.addf %60, %65 : vector<2x128xf32>
    %67 = math.tanh %66 : vector<2x128xf32>
    %cst_34 = arith.constant 1.000000e+00 : f32
    %68 = vector.broadcast %cst_34 : f32 to vector<2x128xf32>
    %69 = arith.subf %68, %56 : vector<2x128xf32>
    %70 = arith.mulf %69, %67 : vector<2x128xf32>
    %71 = arith.mulf %56, %7 : vector<2x128xf32>
    %72 = arith.addf %70, %71 : vector<2x128xf32>
    %c0_35 = arith.constant 0 : index
    %c0_36 = arith.constant 0 : index
    %73 = vector.load %arg25[%c0_35, %c0_36] : memref<16x128xf32, #tpu.memory_space<vmem>>, vector<2x128xf32>
    tpu.vector_store %arg25[%c0_35, %c0_36], %72 {strides = array<i32>} : memref<16x128xf32, #tpu.memory_space<vmem>>, vector<2x128xf32>,
    %c2 = arith.constant 2 : index
    %c0_37 = arith.constant 0 : index
    %74 = vector.load %arg24[%c2, %c0_37] : memref<16x384xf32, #tpu.memory_space<vmem>>, vector<2x384xf32>
    %c0_38 = arith.constant 0 : index
    %c0_39 = arith.constant 0 : index
    %75 = vector.load %arg4[%c0_38, %c0_39] : memref<128x384xf32, #tpu.memory_space<vmem>>, vector<128x384xf32>
    %cst_40 = arith.constant dense<0.000000e+00> : vector<2x384xf32>
    %76 = tpu.matmul %39, %75, %cst_40 {dimension_numbers = #tpu.dot_dimension_numbers<[1], [0], [0], [1], [0, 0, 1, 1], [], []>} : vector<2x128xf32>, vector<128x384xf32>, vector<2x384xf32> -> vector<2x384xf32>
    %77 = vector.extract_strided_slice %74 {offsets = [0, 0], sizes = [2, 256], strides = [1, 1]} : vector<2x384xf32> to vector<2x256xf32>
    %78 = vector.extract_strided_slice %76 {offsets = [0, 0], sizes = [2, 256], strides = [1, 1]} : vector<2x384xf32> to vector<2x256xf32>
    %79 = arith.addf %77, %78 : vector<2x256xf32>
    %c0_41 = arith.constant 0 : index
    %c0_42 = arith.constant 0 : index
    %80 = vector.load %arg5[%c0_41, %c0_42] : memref<1x256xf32, #tpu.memory_space<vmem>>, vector<1x256xf32>
    %81 = vector.broadcast %80 : vector<1x256xf32> to vector<2x256xf32>
    %82 = arith.addf %79, %81 : vector<2x256xf32>
    %83 = arith.negf %82 : vector<2x256xf32>
    %84 = math.exp %83 : vector<2x256xf32>
    %cst_43 = arith.constant 1.000000e+00 : f32
    %85 = vector.broadcast %cst_43 : f32 to vector<2x256xf32>
    %86 = arith.addf %85, %84 : vector<2x256xf32>
    %87 = arith.divf %85, %86 : vector<2x256xf32>
    %88 = vector.extract_strided_slice %87 {offsets = [0, 0], sizes = [2, 128], strides = [1, 1]} : vector<2x256xf32> to vector<2x128xf32>
    %89 = vector.extract_strided_slice %87 {offsets = [0, 128], sizes = [2, 128], strides = [1, 1]} : vector<2x256xf32> to vector<2x128xf32>
    %90 = vector.extract_strided_slice %74 {offsets = [0, 256], sizes = [2, 128], strides = [1, 1]} : vector<2x384xf32> to vector<2x128xf32>
    %c0_44 = arith.constant 0 : index
    %c0_45 = arith.constant 0 : index
    %91 = vector.load %arg6[%c0_44, %c0_45] : memref<1x128xf32, #tpu.memory_space<vmem>>, vector<1x128xf32>
    %92 = vector.broadcast %91 : vector<1x128xf32> to vector<2x128xf32>
    %93 = arith.addf %90, %92 : vector<2x128xf32>
    %94 = vector.extract_strided_slice %76 {offsets = [0, 256], sizes = [2, 128], strides = [1, 1]} : vector<2x384xf32> to vector<2x128xf32>
    %c0_46 = arith.constant 0 : index
    %c0_47 = arith.constant 0 : index
    %95 = vector.load %arg7[%c0_46, %c0_47] : memref<1x128xf32, #tpu.memory_space<vmem>>, vector<1x128xf32>
    %96 = vector.broadcast %95 : vector<1x128xf32> to vector<2x128xf32>
    %97 = arith.addf %94, %96 : vector<2x128xf32>
    %98 = arith.mulf %88, %97 : vector<2x128xf32>
    %99 = arith.addf %93, %98 : vector<2x128xf32>
    %100 = math.tanh %99 : vector<2x128xf32>
    %cst_48 = arith.constant 1.000000e+00 : f32
    %101 = vector.broadcast %cst_48 : f32 to vector<2x128xf32>
    %102 = arith.subf %101, %89 : vector<2x128xf32>
    %103 = arith.mulf %102, %100 : vector<2x128xf32>
    %104 = arith.mulf %89, %39 : vector<2x128xf32>
    %105 = arith.addf %103, %104 : vector<2x128xf32>
    %c0_49 = arith.constant 0 : index
    %c0_50 = arith.constant 0 : index
    %106 = vector.load %arg8[%c0_49, %c0_50] : memref<128x384xf32, #tpu.memory_space<vmem>>, vector<128x384xf32>
    %cst_51 = arith.constant dense<0.000000e+00> : vector<2x384xf32>
    %107 = tpu.matmul %105, %106, %cst_51 {dimension_numbers = #tpu.dot_dimension_numbers<[1], [0], [0], [1], [0, 0, 1, 1], [], []>} : vector<2x128xf32>, vector<128x384xf32>, vector<2x384xf32> -> vector<2x384xf32>
    %c0_52 = arith.constant 0 : index
    %c0_53 = arith.constant 0 : index
    %108 = vector.load %arg9[%c0_52, %c0_53] : memref<128x384xf32, #tpu.memory_space<vmem>>, vector<128x384xf32>
    %cst_54 = arith.constant dense<0.000000e+00> : vector<2x384xf32>
    %109 = tpu.matmul %72, %108, %cst_54 {dimension_numbers = #tpu.dot_dimension_numbers<[1], [0], [0], [1], [0, 0, 1, 1], [], []>} : vector<2x128xf32>, vector<128x384xf32>, vector<2x384xf32> -> vector<2x384xf32>
    %110 = vector.extract_strided_slice %107 {offsets = [0, 0], sizes = [2, 256], strides = [1, 1]} : vector<2x384xf32> to vector<2x256xf32>
    %111 = vector.extract_strided_slice %109 {offsets = [0, 0], sizes = [2, 256], strides = [1, 1]} : vector<2x384xf32> to vector<2x256xf32>
    %112 = arith.addf %110, %111 : vector<2x256xf32>
    %c0_55 = arith.constant 0 : index
    %c0_56 = arith.constant 0 : index
    %113 = vector.load %arg10[%c0_55, %c0_56] : memref<1x256xf32, #tpu.memory_space<vmem>>, vector<1x256xf32>
    %114 = vector.broadcast %113 : vector<1x256xf32> to vector<2x256xf32>
    %115 = arith.addf %112, %114 : vector<2x256xf32>
    %116 = arith.negf %115 : vector<2x256xf32>
    %117 = math.exp %116 : vector<2x256xf32>
    %cst_57 = arith.constant 1.000000e+00 : f32
    %118 = vector.broadcast %cst_57 : f32 to vector<2x256xf32>
    %119 = arith.addf %118, %117 : vector<2x256xf32>
    %120 = arith.divf %118, %119 : vector<2x256xf32>
    %121 = vector.extract_strided_slice %120 {offsets = [0, 0], sizes = [2, 128], strides = [1, 1]} : vector<2x256xf32> to vector<2x128xf32>
    %122 = vector.extract_strided_slice %120 {offsets = [0, 128], sizes = [2, 128], strides = [1, 1]} : vector<2x256xf32> to vector<2x128xf32>
    %123 = vector.extract_strided_slice %107 {offsets = [0, 256], sizes = [2, 128], strides = [1, 1]} : vector<2x384xf32> to vector<2x128xf32>
    %c0_58 = arith.constant 0 : index
    %c0_59 = arith.constant 0 : index
    %124 = vector.load %arg11[%c0_58, %c0_59] : memref<1x128xf32, #tpu.memory_space<vmem>>, vector<1x128xf32>
    %125 = vector.broadcast %124 : vector<1x128xf32> to vector<2x128xf32>
    %126 = arith.addf %123, %125 : vector<2x128xf32>
    %127 = vector.extract_strided_slice %109 {offsets = [0, 256], sizes = [2, 128], strides = [1, 1]} : vector<2x384xf32> to vector<2x128xf32>
    %c0_60 = arith.constant 0 : index
    %c0_61 = arith.constant 0 : index
    %128 = vector.load %arg12[%c0_60, %c0_61] : memref<1x128xf32, #tpu.memory_space<vmem>>, vector<1x128xf32>
    %129 = vector.broadcast %128 : vector<1x128xf32> to vector<2x128xf32>
    %130 = arith.addf %127, %129 : vector<2x128xf32>
    %131 = arith.mulf %121, %130 : vector<2x128xf32>
    %132 = arith.addf %126, %131 : vector<2x128xf32>
    %133 = math.tanh %132 : vector<2x128xf32>
    %cst_62 = arith.constant 1.000000e+00 : f32
    %134 = vector.broadcast %cst_62 : f32 to vector<2x128xf32>
    %135 = arith.subf %134, %122 : vector<2x128xf32>
    %136 = arith.mulf %135, %133 : vector<2x128xf32>
    %137 = arith.mulf %122, %72 : vector<2x128xf32>
    %138 = arith.addf %136, %137 : vector<2x128xf32>
    %c2_63 = arith.constant 2 : index
    %c0_64 = arith.constant 0 : index
    %139 = vector.load %arg25[%c2_63, %c0_64] : memref<16x128xf32, #tpu.memory_space<vmem>>, vector<2x128xf32>
    tpu.vector_store %arg25[%c2_63, %c0_64], %138 {strides = array<i32>} : memref<16x128xf32, #tpu.memory_space<vmem>>, vector<2x128xf32>,
    %c4 = arith.constant 4 : index
    %c0_65 = arith.constant 0 : index
    %140 = vector.load %arg24[%c4, %c0_65] : memref<16x384xf32, #tpu.memory_space<vmem>>, vector<2x384xf32>
    %c0_66 = arith.constant 0 : index
    %c0_67 = arith.constant 0 : index
    %141 = vector.load %arg4[%c0_66, %c0_67] : memref<128x384xf32, #tpu.memory_space<vmem>>, vector<128x384xf32>
    %cst_68 = arith.constant dense<0.000000e+00> : vector<2x384xf32>
    %142 = tpu.matmul %105, %141, %cst_68 {dimension_numbers = #tpu.dot_dimension_numbers<[1], [0], [0], [1], [0, 0, 1, 1], [], []>} : vector<2x128xf32>, vector<128x384xf32>, vector<2x384xf32> -> vector<2x384xf32>
    %143 = vector.extract_strided_slice %140 {offsets = [0, 0], sizes = [2, 256], strides = [1, 1]} : vector<2x384xf32> to vector<2x256xf32>
    %144 = vector.extract_strided_slice %142 {offsets = [0, 0], sizes = [2, 256], strides = [1, 1]} : vector<2x384xf32> to vector<2x256xf32>
    %145 = arith.addf %143, %144 : vector<2x256xf32>
    %c0_69 = arith.constant 0 : index
    %c0_70 = arith.constant 0 : index
    %146 = vector.load %arg5[%c0_69, %c0_70] : memref<1x256xf32, #tpu.memory_space<vmem>>, vector<1x256xf32>
    %147 = vector.broadcast %146 : vector<1x256xf32> to vector<2x256xf32>
    %148 = arith.addf %145, %147 : vector<2x256xf32>
    %149 = arith.negf %148 : vector<2x256xf32>
    %150 = math.exp %149 : vector<2x256xf32>
    %cst_71 = arith.constant 1.000000e+00 : f32
    %151 = vector.broadcast %cst_71 : f32 to vector<2x256xf32>
    %152 = arith.addf %151, %150 : vector<2x256xf32>
    %153 = arith.divf %151, %152 : vector<2x256xf32>
    %154 = vector.extract_strided_slice %153 {offsets = [0, 0], sizes = [2, 128], strides = [1, 1]} : vector<2x256xf32> to vector<2x128xf32>
    %155 = vector.extract_strided_slice %153 {offsets = [0, 128], sizes = [2, 128], strides = [1, 1]} : vector<2x256xf32> to vector<2x128xf32>
    %156 = vector.extract_strided_slice %140 {offsets = [0, 256], sizes = [2, 128], strides = [1, 1]} : vector<2x384xf32> to vector<2x128xf32>
    %c0_72 = arith.constant 0 : index
    %c0_73 = arith.constant 0 : index
    %157 = vector.load %arg6[%c0_72, %c0_73] : memref<1x128xf32, #tpu.memory_space<vmem>>, vector<1x128xf32>
    %158 = vector.broadcast %157 : vector<1x128xf32> to vector<2x128xf32>
    %159 = arith.addf %156, %158 : vector<2x128xf32>
    %160 = vector.extract_strided_slice %142 {offsets = [0, 256], sizes = [2, 128], strides = [1, 1]} : vector<2x384xf32> to vector<2x128xf32>
    %c0_74 = arith.constant 0 : index
    %c0_75 = arith.constant 0 : index
    %161 = vector.load %arg7[%c0_74, %c0_75] : memref<1x128xf32, #tpu.memory_space<vmem>>, vector<1x128xf32>
    %162 = vector.broadcast %161 : vector<1x128xf32> to vector<2x128xf32>
    %163 = arith.addf %160, %162 : vector<2x128xf32>
    %164 = arith.mulf %154, %163 : vector<2x128xf32>
    %165 = arith.addf %159, %164 : vector<2x128xf32>
    %166 = math.tanh %165 : vector<2x128xf32>
    %cst_76 = arith.constant 1.000000e+00 : f32
    %167 = vector.broadcast %cst_76 : f32 to vector<2x128xf32>
    %168 = arith.subf %167, %155 : vector<2x128xf32>
    %169 = arith.mulf %168, %166 : vector<2x128xf32>
    %170 = arith.mulf %155, %105 : vector<2x128xf32>
    %171 = arith.addf %169, %170 : vector<2x128xf32>
    %c0_77 = arith.constant 0 : index
    %c0_78 = arith.constant 0 : index
    %172 = vector.load %arg8[%c0_77, %c0_78] : memref<128x384xf32, #tpu.memory_space<vmem>>, vector<128x384xf32>
    %cst_79 = arith.constant dense<0.000000e+00> : vector<2x384xf32>
    %173 = tpu.matmul %171, %172, %cst_79 {dimension_numbers = #tpu.dot_dimension_numbers<[1], [0], [0], [1], [0, 0, 1, 1], [], []>} : vector<2x128xf32>, vector<128x384xf32>, vector<2x384xf32> -> vector<2x384xf32>
    %c0_80 = arith.constant 0 : index
    %c0_81 = arith.constant 0 : index
    %174 = vector.load %arg9[%c0_80, %c0_81] : memref<128x384xf32, #tpu.memory_space<vmem>>, vector<128x384xf32>
    %cst_82 = arith.constant dense<0.000000e+00> : vector<2x384xf32>
    %175 = tpu.matmul %138, %174, %cst_82 {dimension_numbers = #tpu.dot_dimension_numbers<[1], [0], [0], [1], [0, 0, 1, 1], [], []>} : vector<2x128xf32>, vector<128x384xf32>, vector<2x384xf32> -> vector<2x384xf32>
    %176 = vector.extract_strided_slice %173 {offsets = [0, 0], sizes = [2, 256], strides = [1, 1]} : vector<2x384xf32> to vector<2x256xf32>
    %177 = vector.extract_strided_slice %175 {offsets = [0, 0], sizes = [2, 256], strides = [1, 1]} : vector<2x384xf32> to vector<2x256xf32>
    %178 = arith.addf %176, %177 : vector<2x256xf32>
    %c0_83 = arith.constant 0 : index
    %c0_84 = arith.constant 0 : index
    %179 = vector.load %arg10[%c0_83, %c0_84] : memref<1x256xf32, #tpu.memory_space<vmem>>, vector<1x256xf32>
    %180 = vector.broadcast %179 : vector<1x256xf32> to vector<2x256xf32>
    %181 = arith.addf %178, %180 : vector<2x256xf32>
    %182 = arith.negf %181 : vector<2x256xf32>
    %183 = math.exp %182 : vector<2x256xf32>
    %cst_85 = arith.constant 1.000000e+00 : f32
    %184 = vector.broadcast %cst_85 : f32 to vector<2x256xf32>
    %185 = arith.addf %184, %183 : vector<2x256xf32>
    %186 = arith.divf %184, %185 : vector<2x256xf32>
    %187 = vector.extract_strided_slice %186 {offsets = [0, 0], sizes = [2, 128], strides = [1, 1]} : vector<2x256xf32> to vector<2x128xf32>
    %188 = vector.extract_strided_slice %186 {offsets = [0, 128], sizes = [2, 128], strides = [1, 1]} : vector<2x256xf32> to vector<2x128xf32>
    %189 = vector.extract_strided_slice %173 {offsets = [0, 256], sizes = [2, 128], strides = [1, 1]} : vector<2x384xf32> to vector<2x128xf32>
    %c0_86 = arith.constant 0 : index
    %c0_87 = arith.constant 0 : index
    %190 = vector.load %arg11[%c0_86, %c0_87] : memref<1x128xf32, #tpu.memory_space<vmem>>, vector<1x128xf32>
    %191 = vector.broadcast %190 : vector<1x128xf32> to vector<2x128xf32>
    %192 = arith.addf %189, %191 : vector<2x128xf32>
    %193 = vector.extract_strided_slice %175 {offsets = [0, 256], sizes = [2, 128], strides = [1, 1]} : vector<2x384xf32> to vector<2x128xf32>
    %c0_88 = arith.constant 0 : index
    %c0_89 = arith.constant 0 : index
    %194 = vector.load %arg12[%c0_88, %c0_89] : memref<1x128xf32, #tpu.memory_space<vmem>>, vector<1x128xf32>
    %195 = vector.broadcast %194 : vector<1x128xf32> to vector<2x128xf32>
    %196 = arith.addf %193, %195 : vector<2x128xf32>
    %197 = arith.mulf %187, %196 : vector<2x128xf32>
    %198 = arith.addf %192, %197 : vector<2x128xf32>
    %199 = math.tanh %198 : vector<2x128xf32>
    %cst_90 = arith.constant 1.000000e+00 : f32
    %200 = vector.broadcast %cst_90 : f32 to vector<2x128xf32>
    %201 = arith.subf %200, %188 : vector<2x128xf32>
    %202 = arith.mulf %201, %199 : vector<2x128xf32>
    %203 = arith.mulf %188, %138 : vector<2x128xf32>
    %204 = arith.addf %202, %203 : vector<2x128xf32>
    %c4_91 = arith.constant 4 : index
    %c0_92 = arith.constant 0 : index
    %205 = vector.load %arg25[%c4_91, %c0_92] : memref<16x128xf32, #tpu.memory_space<vmem>>, vector<2x128xf32>
    tpu.vector_store %arg25[%c4_91, %c0_92], %204 {strides = array<i32>} : memref<16x128xf32, #tpu.memory_space<vmem>>, vector<2x128xf32>,
    %c6 = arith.constant 6 : index
    %c0_93 = arith.constant 0 : index
    %206 = vector.load %arg24[%c6, %c0_93] : memref<16x384xf32, #tpu.memory_space<vmem>>, vector<2x384xf32>
    %c0_94 = arith.constant 0 : index
    %c0_95 = arith.constant 0 : index
    %207 = vector.load %arg4[%c0_94, %c0_95] : memref<128x384xf32, #tpu.memory_space<vmem>>, vector<128x384xf32>
    %cst_96 = arith.constant dense<0.000000e+00> : vector<2x384xf32>
    %208 = tpu.matmul %171, %207, %cst_96 {dimension_numbers = #tpu.dot_dimension_numbers<[1], [0], [0], [1], [0, 0, 1, 1], [], []>} : vector<2x128xf32>, vector<128x384xf32>, vector<2x384xf32> -> vector<2x384xf32>
    %209 = vector.extract_strided_slice %206 {offsets = [0, 0], sizes = [2, 256], strides = [1, 1]} : vector<2x384xf32> to vector<2x256xf32>
    %210 = vector.extract_strided_slice %208 {offsets = [0, 0], sizes = [2, 256], strides = [1, 1]} : vector<2x384xf32> to vector<2x256xf32>
    %211 = arith.addf %209, %210 : vector<2x256xf32>
    %c0_97 = arith.constant 0 : index
    %c0_98 = arith.constant 0 : index
    %212 = vector.load %arg5[%c0_97, %c0_98] : memref<1x256xf32, #tpu.memory_space<vmem>>, vector<1x256xf32>
    %213 = vector.broadcast %212 : vector<1x256xf32> to vector<2x256xf32>
    %214 = arith.addf %211, %213 : vector<2x256xf32>
    %215 = arith.negf %214 : vector<2x256xf32>
    %216 = math.exp %215 : vector<2x256xf32>
    %cst_99 = arith.constant 1.000000e+00 : f32
    %217 = vector.broadcast %cst_99 : f32 to vector<2x256xf32>
    %218 = arith.addf %217, %216 : vector<2x256xf32>
    %219 = arith.divf %217, %218 : vector<2x256xf32>
    %220 = vector.extract_strided_slice %219 {offsets = [0, 0], sizes = [2, 128], strides = [1, 1]} : vector<2x256xf32> to vector<2x128xf32>
    %221 = vector.extract_strided_slice %219 {offsets = [0, 128], sizes = [2, 128], strides = [1, 1]} : vector<2x256xf32> to vector<2x128xf32>
    %222 = vector.extract_strided_slice %206 {offsets = [0, 256], sizes = [2, 128], strides = [1, 1]} : vector<2x384xf32> to vector<2x128xf32>
    %c0_100 = arith.constant 0 : index
    %c0_101 = arith.constant 0 : index
    %223 = vector.load %arg6[%c0_100, %c0_101] : memref<1x128xf32, #tpu.memory_space<vmem>>, vector<1x128xf32>
    %224 = vector.broadcast %223 : vector<1x128xf32> to vector<2x128xf32>
    %225 = arith.addf %222, %224 : vector<2x128xf32>
    %226 = vector.extract_strided_slice %208 {offsets = [0, 256], sizes = [2, 128], strides = [1, 1]} : vector<2x384xf32> to vector<2x128xf32>
    %c0_102 = arith.constant 0 : index
    %c0_103 = arith.constant 0 : index
    %227 = vector.load %arg7[%c0_102, %c0_103] : memref<1x128xf32, #tpu.memory_space<vmem>>, vector<1x128xf32>
    %228 = vector.broadcast %227 : vector<1x128xf32> to vector<2x128xf32>
    %229 = arith.addf %226, %228 : vector<2x128xf32>
    %230 = arith.mulf %220, %229 : vector<2x128xf32>
    %231 = arith.addf %225, %230 : vector<2x128xf32>
    %232 = math.tanh %231 : vector<2x128xf32>
    %cst_104 = arith.constant 1.000000e+00 : f32
    %233 = vector.broadcast %cst_104 : f32 to vector<2x128xf32>
    %234 = arith.subf %233, %221 : vector<2x128xf32>
    %235 = arith.mulf %234, %232 : vector<2x128xf32>
    %236 = arith.mulf %221, %171 : vector<2x128xf32>
    %237 = arith.addf %235, %236 : vector<2x128xf32>
    %c0_105 = arith.constant 0 : index
    %c0_106 = arith.constant 0 : index
    %238 = vector.load %arg8[%c0_105, %c0_106] : memref<128x384xf32, #tpu.memory_space<vmem>>, vector<128x384xf32>
    %cst_107 = arith.constant dense<0.000000e+00> : vector<2x384xf32>
    %239 = tpu.matmul %237, %238, %cst_107 {dimension_numbers = #tpu.dot_dimension_numbers<[1], [0], [0], [1], [0, 0, 1, 1], [], []>} : vector<2x128xf32>, vector<128x384xf32>, vector<2x384xf32> -> vector<2x384xf32>
    %c0_108 = arith.constant 0 : index
    %c0_109 = arith.constant 0 : index
    %240 = vector.load %arg9[%c0_108, %c0_109] : memref<128x384xf32, #tpu.memory_space<vmem>>, vector<128x384xf32>
    %cst_110 = arith.constant dense<0.000000e+00> : vector<2x384xf32>
    %241 = tpu.matmul %204, %240, %cst_110 {dimension_numbers = #tpu.dot_dimension_numbers<[1], [0], [0], [1], [0, 0, 1, 1], [], []>} : vector<2x128xf32>, vector<128x384xf32>, vector<2x384xf32> -> vector<2x384xf32>
    %242 = vector.extract_strided_slice %239 {offsets = [0, 0], sizes = [2, 256], strides = [1, 1]} : vector<2x384xf32> to vector<2x256xf32>
    %243 = vector.extract_strided_slice %241 {offsets = [0, 0], sizes = [2, 256], strides = [1, 1]} : vector<2x384xf32> to vector<2x256xf32>
    %244 = arith.addf %242, %243 : vector<2x256xf32>
    %c0_111 = arith.constant 0 : index
    %c0_112 = arith.constant 0 : index
    %245 = vector.load %arg10[%c0_111, %c0_112] : memref<1x256xf32, #tpu.memory_space<vmem>>, vector<1x256xf32>
    %246 = vector.broadcast %245 : vector<1x256xf32> to vector<2x256xf32>
    %247 = arith.addf %244, %246 : vector<2x256xf32>
    %248 = arith.negf %247 : vector<2x256xf32>
    %249 = math.exp %248 : vector<2x256xf32>
    %cst_113 = arith.constant 1.000000e+00 : f32
    %250 = vector.broadcast %cst_113 : f32 to vector<2x256xf32>
    %251 = arith.addf %250, %249 : vector<2x256xf32>
    %252 = arith.divf %250, %251 : vector<2x256xf32>
    %253 = vector.extract_strided_slice %252 {offsets = [0, 0], sizes = [2, 128], strides = [1, 1]} : vector<2x256xf32> to vector<2x128xf32>
    %254 = vector.extract_strided_slice %252 {offsets = [0, 128], sizes = [2, 128], strides = [1, 1]} : vector<2x256xf32> to vector<2x128xf32>
    %255 = vector.extract_strided_slice %239 {offsets = [0, 256], sizes = [2, 128], strides = [1, 1]} : vector<2x384xf32> to vector<2x128xf32>
    %c0_114 = arith.constant 0 : index
    %c0_115 = arith.constant 0 : index
    %256 = vector.load %arg11[%c0_114, %c0_115] : memref<1x128xf32, #tpu.memory_space<vmem>>, vector<1x128xf32>
    %257 = vector.broadcast %256 : vector<1x128xf32> to vector<2x128xf32>
    %258 = arith.addf %255, %257 : vector<2x128xf32>
    %259 = vector.extract_strided_slice %241 {offsets = [0, 256], sizes = [2, 128], strides = [1, 1]} : vector<2x384xf32> to vector<2x128xf32>
    %c0_116 = arith.constant 0 : index
    %c0_117 = arith.constant 0 : index
    %260 = vector.load %arg12[%c0_116, %c0_117] : memref<1x128xf32, #tpu.memory_space<vmem>>, vector<1x128xf32>
    %261 = vector.broadcast %260 : vector<1x128xf32> to vector<2x128xf32>
    %262 = arith.addf %259, %261 : vector<2x128xf32>
    %263 = arith.mulf %253, %262 : vector<2x128xf32>
    %264 = arith.addf %258, %263 : vector<2x128xf32>
    %265 = math.tanh %264 : vector<2x128xf32>
    %cst_118 = arith.constant 1.000000e+00 : f32
    %266 = vector.broadcast %cst_118 : f32 to vector<2x128xf32>
    %267 = arith.subf %266, %254 : vector<2x128xf32>
    %268 = arith.mulf %267, %265 : vector<2x128xf32>
    %269 = arith.mulf %254, %204 : vector<2x128xf32>
    %270 = arith.addf %268, %269 : vector<2x128xf32>
    %c6_119 = arith.constant 6 : index
    %c0_120 = arith.constant 0 : index
    %271 = vector.load %arg25[%c6_119, %c0_120] : memref<16x128xf32, #tpu.memory_space<vmem>>, vector<2x128xf32>
    tpu.vector_store %arg25[%c6_119, %c0_120], %270 {strides = array<i32>} : memref<16x128xf32, #tpu.memory_space<vmem>>, vector<2x128xf32>,
    %c8 = arith.constant 8 : index
    %c0_121 = arith.constant 0 : index
    %272 = vector.load %arg24[%c8, %c0_121] : memref<16x384xf32, #tpu.memory_space<vmem>>, vector<2x384xf32>
    %c0_122 = arith.constant 0 : index
    %c0_123 = arith.constant 0 : index
    %273 = vector.load %arg4[%c0_122, %c0_123] : memref<128x384xf32, #tpu.memory_space<vmem>>, vector<128x384xf32>
    %cst_124 = arith.constant dense<0.000000e+00> : vector<2x384xf32>
    %274 = tpu.matmul %237, %273, %cst_124 {dimension_numbers = #tpu.dot_dimension_numbers<[1], [0], [0], [1], [0, 0, 1, 1], [], []>} : vector<2x128xf32>, vector<128x384xf32>, vector<2x384xf32> -> vector<2x384xf32>
    %275 = vector.extract_strided_slice %272 {offsets = [0, 0], sizes = [2, 256], strides = [1, 1]} : vector<2x384xf32> to vector<2x256xf32>
    %276 = vector.extract_strided_slice %274 {offsets = [0, 0], sizes = [2, 256], strides = [1, 1]} : vector<2x384xf32> to vector<2x256xf32>
    %277 = arith.addf %275, %276 : vector<2x256xf32>
    %c0_125 = arith.constant 0 : index
    %c0_126 = arith.constant 0 : index
    %278 = vector.load %arg5[%c0_125, %c0_126] : memref<1x256xf32, #tpu.memory_space<vmem>>, vector<1x256xf32>
    %279 = vector.broadcast %278 : vector<1x256xf32> to vector<2x256xf32>
    %280 = arith.addf %277, %279 : vector<2x256xf32>
    %281 = arith.negf %280 : vector<2x256xf32>
    %282 = math.exp %281 : vector<2x256xf32>
    %cst_127 = arith.constant 1.000000e+00 : f32
    %283 = vector.broadcast %cst_127 : f32 to vector<2x256xf32>
    %284 = arith.addf %283, %282 : vector<2x256xf32>
    %285 = arith.divf %283, %284 : vector<2x256xf32>
    %286 = vector.extract_strided_slice %285 {offsets = [0, 0], sizes = [2, 128], strides = [1, 1]} : vector<2x256xf32> to vector<2x128xf32>
    %287 = vector.extract_strided_slice %285 {offsets = [0, 128], sizes = [2, 128], strides = [1, 1]} : vector<2x256xf32> to vector<2x128xf32>
    %288 = vector.extract_strided_slice %272 {offsets = [0, 256], sizes = [2, 128], strides = [1, 1]} : vector<2x384xf32> to vector<2x128xf32>
    %c0_128 = arith.constant 0 : index
    %c0_129 = arith.constant 0 : index
    %289 = vector.load %arg6[%c0_128, %c0_129] : memref<1x128xf32, #tpu.memory_space<vmem>>, vector<1x128xf32>
    %290 = vector.broadcast %289 : vector<1x128xf32> to vector<2x128xf32>
    %291 = arith.addf %288, %290 : vector<2x128xf32>
    %292 = vector.extract_strided_slice %274 {offsets = [0, 256], sizes = [2, 128], strides = [1, 1]} : vector<2x384xf32> to vector<2x128xf32>
    %c0_130 = arith.constant 0 : index
    %c0_131 = arith.constant 0 : index
    %293 = vector.load %arg7[%c0_130, %c0_131] : memref<1x128xf32, #tpu.memory_space<vmem>>, vector<1x128xf32>
    %294 = vector.broadcast %293 : vector<1x128xf32> to vector<2x128xf32>
    %295 = arith.addf %292, %294 : vector<2x128xf32>
    %296 = arith.mulf %286, %295 : vector<2x128xf32>
    %297 = arith.addf %291, %296 : vector<2x128xf32>
    %298 = math.tanh %297 : vector<2x128xf32>
    %cst_132 = arith.constant 1.000000e+00 : f32
    %299 = vector.broadcast %cst_132 : f32 to vector<2x128xf32>
    %300 = arith.subf %299, %287 : vector<2x128xf32>
    %301 = arith.mulf %300, %298 : vector<2x128xf32>
    %302 = arith.mulf %287, %237 : vector<2x128xf32>
    %303 = arith.addf %301, %302 : vector<2x128xf32>
    %c0_133 = arith.constant 0 : index
    %c0_134 = arith.constant 0 : index
    %304 = vector.load %arg8[%c0_133, %c0_134] : memref<128x384xf32, #tpu.memory_space<vmem>>, vector<128x384xf32>
    %cst_135 = arith.constant dense<0.000000e+00> : vector<2x384xf32>
    %305 = tpu.matmul %303, %304, %cst_135 {dimension_numbers = #tpu.dot_dimension_numbers<[1], [0], [0], [1], [0, 0, 1, 1], [], []>} : vector<2x128xf32>, vector<128x384xf32>, vector<2x384xf32> -> vector<2x384xf32>
    %c0_136 = arith.constant 0 : index
    %c0_137 = arith.constant 0 : index
    %306 = vector.load %arg9[%c0_136, %c0_137] : memref<128x384xf32, #tpu.memory_space<vmem>>, vector<128x384xf32>
    %cst_138 = arith.constant dense<0.000000e+00> : vector<2x384xf32>
    %307 = tpu.matmul %270, %306, %cst_138 {dimension_numbers = #tpu.dot_dimension_numbers<[1], [0], [0], [1], [0, 0, 1, 1], [], []>} : vector<2x128xf32>, vector<128x384xf32>, vector<2x384xf32> -> vector<2x384xf32>
    %308 = vector.extract_strided_slice %305 {offsets = [0, 0], sizes = [2, 256], strides = [1, 1]} : vector<2x384xf32> to vector<2x256xf32>
    %309 = vector.extract_strided_slice %307 {offsets = [0, 0], sizes = [2, 256], strides = [1, 1]} : vector<2x384xf32> to vector<2x256xf32>
    %310 = arith.addf %308, %309 : vector<2x256xf32>
    %c0_139 = arith.constant 0 : index
    %c0_140 = arith.constant 0 : index
    %311 = vector.load %arg10[%c0_139, %c0_140] : memref<1x256xf32, #tpu.memory_space<vmem>>, vector<1x256xf32>
    %312 = vector.broadcast %311 : vector<1x256xf32> to vector<2x256xf32>
    %313 = arith.addf %310, %312 : vector<2x256xf32>
    %314 = arith.negf %313 : vector<2x256xf32>
    %315 = math.exp %314 : vector<2x256xf32>
    %cst_141 = arith.constant 1.000000e+00 : f32
    %316 = vector.broadcast %cst_141 : f32 to vector<2x256xf32>
    %317 = arith.addf %316, %315 : vector<2x256xf32>
    %318 = arith.divf %316, %317 : vector<2x256xf32>
    %319 = vector.extract_strided_slice %318 {offsets = [0, 0], sizes = [2, 128], strides = [1, 1]} : vector<2x256xf32> to vector<2x128xf32>
    %320 = vector.extract_strided_slice %318 {offsets = [0, 128], sizes = [2, 128], strides = [1, 1]} : vector<2x256xf32> to vector<2x128xf32>
    %321 = vector.extract_strided_slice %305 {offsets = [0, 256], sizes = [2, 128], strides = [1, 1]} : vector<2x384xf32> to vector<2x128xf32>
    %c0_142 = arith.constant 0 : index
    %c0_143 = arith.constant 0 : index
    %322 = vector.load %arg11[%c0_142, %c0_143] : memref<1x128xf32, #tpu.memory_space<vmem>>, vector<1x128xf32>
    %323 = vector.broadcast %322 : vector<1x128xf32> to vector<2x128xf32>
    %324 = arith.addf %321, %323 : vector<2x128xf32>
    %325 = vector.extract_strided_slice %307 {offsets = [0, 256], sizes = [2, 128], strides = [1, 1]} : vector<2x384xf32> to vector<2x128xf32>
    %c0_144 = arith.constant 0 : index
    %c0_145 = arith.constant 0 : index
    %326 = vector.load %arg12[%c0_144, %c0_145] : memref<1x128xf32, #tpu.memory_space<vmem>>, vector<1x128xf32>
    %327 = vector.broadcast %326 : vector<1x128xf32> to vector<2x128xf32>
    %328 = arith.addf %325, %327 : vector<2x128xf32>
    %329 = arith.mulf %319, %328 : vector<2x128xf32>
    %330 = arith.addf %324, %329 : vector<2x128xf32>
    %331 = math.tanh %330 : vector<2x128xf32>
    %cst_146 = arith.constant 1.000000e+00 : f32
    %332 = vector.broadcast %cst_146 : f32 to vector<2x128xf32>
    %333 = arith.subf %332, %320 : vector<2x128xf32>
    %334 = arith.mulf %333, %331 : vector<2x128xf32>
    %335 = arith.mulf %320, %270 : vector<2x128xf32>
    %336 = arith.addf %334, %335 : vector<2x128xf32>
    %c8_147 = arith.constant 8 : index
    %c0_148 = arith.constant 0 : index
    %337 = vector.load %arg25[%c8_147, %c0_148] : memref<16x128xf32, #tpu.memory_space<vmem>>, vector<2x128xf32>
    tpu.vector_store %arg25[%c8_147, %c0_148], %336 {strides = array<i32>} : memref<16x128xf32, #tpu.memory_space<vmem>>, vector<2x128xf32>,
    %c10 = arith.constant 10 : index
    %c0_149 = arith.constant 0 : index
    %338 = vector.load %arg24[%c10, %c0_149] : memref<16x384xf32, #tpu.memory_space<vmem>>, vector<2x384xf32>
    %c0_150 = arith.constant 0 : index
    %c0_151 = arith.constant 0 : index
    %339 = vector.load %arg4[%c0_150, %c0_151] : memref<128x384xf32, #tpu.memory_space<vmem>>, vector<128x384xf32>
    %cst_152 = arith.constant dense<0.000000e+00> : vector<2x384xf32>
    %340 = tpu.matmul %303, %339, %cst_152 {dimension_numbers = #tpu.dot_dimension_numbers<[1], [0], [0], [1], [0, 0, 1, 1], [], []>} : vector<2x128xf32>, vector<128x384xf32>, vector<2x384xf32> -> vector<2x384xf32>
    %341 = vector.extract_strided_slice %338 {offsets = [0, 0], sizes = [2, 256], strides = [1, 1]} : vector<2x384xf32> to vector<2x256xf32>
    %342 = vector.extract_strided_slice %340 {offsets = [0, 0], sizes = [2, 256], strides = [1, 1]} : vector<2x384xf32> to vector<2x256xf32>
    %343 = arith.addf %341, %342 : vector<2x256xf32>
    %c0_153 = arith.constant 0 : index
    %c0_154 = arith.constant 0 : index
    %344 = vector.load %arg5[%c0_153, %c0_154] : memref<1x256xf32, #tpu.memory_space<vmem>>, vector<1x256xf32>
    %345 = vector.broadcast %344 : vector<1x256xf32> to vector<2x256xf32>
    %346 = arith.addf %343, %345 : vector<2x256xf32>
    %347 = arith.negf %346 : vector<2x256xf32>
    %348 = math.exp %347 : vector<2x256xf32>
    %cst_155 = arith.constant 1.000000e+00 : f32
    %349 = vector.broadcast %cst_155 : f32 to vector<2x256xf32>
    %350 = arith.addf %349, %348 : vector<2x256xf32>
    %351 = arith.divf %349, %350 : vector<2x256xf32>
    %352 = vector.extract_strided_slice %351 {offsets = [0, 0], sizes = [2, 128], strides = [1, 1]} : vector<2x256xf32> to vector<2x128xf32>
    %353 = vector.extract_strided_slice %351 {offsets = [0, 128], sizes = [2, 128], strides = [1, 1]} : vector<2x256xf32> to vector<2x128xf32>
    %354 = vector.extract_strided_slice %338 {offsets = [0, 256], sizes = [2, 128], strides = [1, 1]} : vector<2x384xf32> to vector<2x128xf32>
    %c0_156 = arith.constant 0 : index
    %c0_157 = arith.constant 0 : index
    %355 = vector.load %arg6[%c0_156, %c0_157] : memref<1x128xf32, #tpu.memory_space<vmem>>, vector<1x128xf32>
    %356 = vector.broadcast %355 : vector<1x128xf32> to vector<2x128xf32>
    %357 = arith.addf %354, %356 : vector<2x128xf32>
    %358 = vector.extract_strided_slice %340 {offsets = [0, 256], sizes = [2, 128], strides = [1, 1]} : vector<2x384xf32> to vector<2x128xf32>
    %c0_158 = arith.constant 0 : index
    %c0_159 = arith.constant 0 : index
    %359 = vector.load %arg7[%c0_158, %c0_159] : memref<1x128xf32, #tpu.memory_space<vmem>>, vector<1x128xf32>
    %360 = vector.broadcast %359 : vector<1x128xf32> to vector<2x128xf32>
    %361 = arith.addf %358, %360 : vector<2x128xf32>
    %362 = arith.mulf %352, %361 : vector<2x128xf32>
    %363 = arith.addf %357, %362 : vector<2x128xf32>
    %364 = math.tanh %363 : vector<2x128xf32>
    %cst_160 = arith.constant 1.000000e+00 : f32
    %365 = vector.broadcast %cst_160 : f32 to vector<2x128xf32>
    %366 = arith.subf %365, %353 : vector<2x128xf32>
    %367 = arith.mulf %366, %364 : vector<2x128xf32>
    %368 = arith.mulf %353, %303 : vector<2x128xf32>
    %369 = arith.addf %367, %368 : vector<2x128xf32>
    %c0_161 = arith.constant 0 : index
    %c0_162 = arith.constant 0 : index
    %370 = vector.load %arg8[%c0_161, %c0_162] : memref<128x384xf32, #tpu.memory_space<vmem>>, vector<128x384xf32>
    %cst_163 = arith.constant dense<0.000000e+00> : vector<2x384xf32>
    %371 = tpu.matmul %369, %370, %cst_163 {dimension_numbers = #tpu.dot_dimension_numbers<[1], [0], [0], [1], [0, 0, 1, 1], [], []>} : vector<2x128xf32>, vector<128x384xf32>, vector<2x384xf32> -> vector<2x384xf32>
    %c0_164 = arith.constant 0 : index
    %c0_165 = arith.constant 0 : index
    %372 = vector.load %arg9[%c0_164, %c0_165] : memref<128x384xf32, #tpu.memory_space<vmem>>, vector<128x384xf32>
    %cst_166 = arith.constant dense<0.000000e+00> : vector<2x384xf32>
    %373 = tpu.matmul %336, %372, %cst_166 {dimension_numbers = #tpu.dot_dimension_numbers<[1], [0], [0], [1], [0, 0, 1, 1], [], []>} : vector<2x128xf32>, vector<128x384xf32>, vector<2x384xf32> -> vector<2x384xf32>
    %374 = vector.extract_strided_slice %371 {offsets = [0, 0], sizes = [2, 256], strides = [1, 1]} : vector<2x384xf32> to vector<2x256xf32>
    %375 = vector.extract_strided_slice %373 {offsets = [0, 0], sizes = [2, 256], strides = [1, 1]} : vector<2x384xf32> to vector<2x256xf32>
    %376 = arith.addf %374, %375 : vector<2x256xf32>
    %c0_167 = arith.constant 0 : index
    %c0_168 = arith.constant 0 : index
    %377 = vector.load %arg10[%c0_167, %c0_168] : memref<1x256xf32, #tpu.memory_space<vmem>>, vector<1x256xf32>
    %378 = vector.broadcast %377 : vector<1x256xf32> to vector<2x256xf32>
    %379 = arith.addf %376, %378 : vector<2x256xf32>
    %380 = arith.negf %379 : vector<2x256xf32>
    %381 = math.exp %380 : vector<2x256xf32>
    %cst_169 = arith.constant 1.000000e+00 : f32
    %382 = vector.broadcast %cst_169 : f32 to vector<2x256xf32>
    %383 = arith.addf %382, %381 : vector<2x256xf32>
    %384 = arith.divf %382, %383 : vector<2x256xf32>
    %385 = vector.extract_strided_slice %384 {offsets = [0, 0], sizes = [2, 128], strides = [1, 1]} : vector<2x256xf32> to vector<2x128xf32>
    %386 = vector.extract_strided_slice %384 {offsets = [0, 128], sizes = [2, 128], strides = [1, 1]} : vector<2x256xf32> to vector<2x128xf32>
    %387 = vector.extract_strided_slice %371 {offsets = [0, 256], sizes = [2, 128], strides = [1, 1]} : vector<2x384xf32> to vector<2x128xf32>
    %c0_170 = arith.constant 0 : index
    %c0_171 = arith.constant 0 : index
    %388 = vector.load %arg11[%c0_170, %c0_171] : memref<1x128xf32, #tpu.memory_space<vmem>>, vector<1x128xf32>
    %389 = vector.broadcast %388 : vector<1x128xf32> to vector<2x128xf32>
    %390 = arith.addf %387, %389 : vector<2x128xf32>
    %391 = vector.extract_strided_slice %373 {offsets = [0, 256], sizes = [2, 128], strides = [1, 1]} : vector<2x384xf32> to vector<2x128xf32>
    %c0_172 = arith.constant 0 : index
    %c0_173 = arith.constant 0 : index
    %392 = vector.load %arg12[%c0_172, %c0_173] : memref<1x128xf32, #tpu.memory_space<vmem>>, vector<1x128xf32>
    %393 = vector.broadcast %392 : vector<1x128xf32> to vector<2x128xf32>
    %394 = arith.addf %391, %393 : vector<2x128xf32>
    %395 = arith.mulf %385, %394 : vector<2x128xf32>
    %396 = arith.addf %390, %395 : vector<2x128xf32>
    %397 = math.tanh %396 : vector<2x128xf32>
    %cst_174 = arith.constant 1.000000e+00 : f32
    %398 = vector.broadcast %cst_174 : f32 to vector<2x128xf32>
    %399 = arith.subf %398, %386 : vector<2x128xf32>
    %400 = arith.mulf %399, %397 : vector<2x128xf32>
    %401 = arith.mulf %386, %336 : vector<2x128xf32>
    %402 = arith.addf %400, %401 : vector<2x128xf32>
    %c10_175 = arith.constant 10 : index
    %c0_176 = arith.constant 0 : index
    %403 = vector.load %arg25[%c10_175, %c0_176] : memref<16x128xf32, #tpu.memory_space<vmem>>, vector<2x128xf32>
    tpu.vector_store %arg25[%c10_175, %c0_176], %402 {strides = array<i32>} : memref<16x128xf32, #tpu.memory_space<vmem>>, vector<2x128xf32>,
    %c12 = arith.constant 12 : index
    %c0_177 = arith.constant 0 : index
    %404 = vector.load %arg24[%c12, %c0_177] : memref<16x384xf32, #tpu.memory_space<vmem>>, vector<2x384xf32>
    %c0_178 = arith.constant 0 : index
    %c0_179 = arith.constant 0 : index
    %405 = vector.load %arg4[%c0_178, %c0_179] : memref<128x384xf32, #tpu.memory_space<vmem>>, vector<128x384xf32>
    %cst_180 = arith.constant dense<0.000000e+00> : vector<2x384xf32>
    %406 = tpu.matmul %369, %405, %cst_180 {dimension_numbers = #tpu.dot_dimension_numbers<[1], [0], [0], [1], [0, 0, 1, 1], [], []>} : vector<2x128xf32>, vector<128x384xf32>, vector<2x384xf32> -> vector<2x384xf32>
    %407 = vector.extract_strided_slice %404 {offsets = [0, 0], sizes = [2, 256], strides = [1, 1]} : vector<2x384xf32> to vector<2x256xf32>
    %408 = vector.extract_strided_slice %406 {offsets = [0, 0], sizes = [2, 256], strides = [1, 1]} : vector<2x384xf32> to vector<2x256xf32>
    %409 = arith.addf %407, %408 : vector<2x256xf32>
    %c0_181 = arith.constant 0 : index
    %c0_182 = arith.constant 0 : index
    %410 = vector.load %arg5[%c0_181, %c0_182] : memref<1x256xf32, #tpu.memory_space<vmem>>, vector<1x256xf32>
    %411 = vector.broadcast %410 : vector<1x256xf32> to vector<2x256xf32>
    %412 = arith.addf %409, %411 : vector<2x256xf32>
    %413 = arith.negf %412 : vector<2x256xf32>
    %414 = math.exp %413 : vector<2x256xf32>
    %cst_183 = arith.constant 1.000000e+00 : f32
    %415 = vector.broadcast %cst_183 : f32 to vector<2x256xf32>
    %416 = arith.addf %415, %414 : vector<2x256xf32>
    %417 = arith.divf %415, %416 : vector<2x256xf32>
    %418 = vector.extract_strided_slice %417 {offsets = [0, 0], sizes = [2, 128], strides = [1, 1]} : vector<2x256xf32> to vector<2x128xf32>
    %419 = vector.extract_strided_slice %417 {offsets = [0, 128], sizes = [2, 128], strides = [1, 1]} : vector<2x256xf32> to vector<2x128xf32>
    %420 = vector.extract_strided_slice %404 {offsets = [0, 256], sizes = [2, 128], strides = [1, 1]} : vector<2x384xf32> to vector<2x128xf32>
    %c0_184 = arith.constant 0 : index
    %c0_185 = arith.constant 0 : index
    %421 = vector.load %arg6[%c0_184, %c0_185] : memref<1x128xf32, #tpu.memory_space<vmem>>, vector<1x128xf32>
    %422 = vector.broadcast %421 : vector<1x128xf32> to vector<2x128xf32>
    %423 = arith.addf %420, %422 : vector<2x128xf32>
    %424 = vector.extract_strided_slice %406 {offsets = [0, 256], sizes = [2, 128], strides = [1, 1]} : vector<2x384xf32> to vector<2x128xf32>
    %c0_186 = arith.constant 0 : index
    %c0_187 = arith.constant 0 : index
    %425 = vector.load %arg7[%c0_186, %c0_187] : memref<1x128xf32, #tpu.memory_space<vmem>>, vector<1x128xf32>
    %426 = vector.broadcast %425 : vector<1x128xf32> to vector<2x128xf32>
    %427 = arith.addf %424, %426 : vector<2x128xf32>
    %428 = arith.mulf %418, %427 : vector<2x128xf32>
    %429 = arith.addf %423, %428 : vector<2x128xf32>
    %430 = math.tanh %429 : vector<2x128xf32>
    %cst_188 = arith.constant 1.000000e+00 : f32
    %431 = vector.broadcast %cst_188 : f32 to vector<2x128xf32>
    %432 = arith.subf %431, %419 : vector<2x128xf32>
    %433 = arith.mulf %432, %430 : vector<2x128xf32>
    %434 = arith.mulf %419, %369 : vector<2x128xf32>
    %435 = arith.addf %433, %434 : vector<2x128xf32>
    %c0_189 = arith.constant 0 : index
    %c0_190 = arith.constant 0 : index
    %436 = vector.load %arg8[%c0_189, %c0_190] : memref<128x384xf32, #tpu.memory_space<vmem>>, vector<128x384xf32>
    %cst_191 = arith.constant dense<0.000000e+00> : vector<2x384xf32>
    %437 = tpu.matmul %435, %436, %cst_191 {dimension_numbers = #tpu.dot_dimension_numbers<[1], [0], [0], [1], [0, 0, 1, 1], [], []>} : vector<2x128xf32>, vector<128x384xf32>, vector<2x384xf32> -> vector<2x384xf32>
    %c0_192 = arith.constant 0 : index
    %c0_193 = arith.constant 0 : index
    %438 = vector.load %arg9[%c0_192, %c0_193] : memref<128x384xf32, #tpu.memory_space<vmem>>, vector<128x384xf32>
    %cst_194 = arith.constant dense<0.000000e+00> : vector<2x384xf32>
    %439 = tpu.matmul %402, %438, %cst_194 {dimension_numbers = #tpu.dot_dimension_numbers<[1], [0], [0], [1], [0, 0, 1, 1], [], []>} : vector<2x128xf32>, vector<128x384xf32>, vector<2x384xf32> -> vector<2x384xf32>
    %440 = vector.extract_strided_slice %437 {offsets = [0, 0], sizes = [2, 256], strides = [1, 1]} : vector<2x384xf32> to vector<2x256xf32>
    %441 = vector.extract_strided_slice %439 {offsets = [0, 0], sizes = [2, 256], strides = [1, 1]} : vector<2x384xf32> to vector<2x256xf32>
    %442 = arith.addf %440, %441 : vector<2x256xf32>
    %c0_195 = arith.constant 0 : index
    %c0_196 = arith.constant 0 : index
    %443 = vector.load %arg10[%c0_195, %c0_196] : memref<1x256xf32, #tpu.memory_space<vmem>>, vector<1x256xf32>
    %444 = vector.broadcast %443 : vector<1x256xf32> to vector<2x256xf32>
    %445 = arith.addf %442, %444 : vector<2x256xf32>
    %446 = arith.negf %445 : vector<2x256xf32>
    %447 = math.exp %446 : vector<2x256xf32>
    %cst_197 = arith.constant 1.000000e+00 : f32
    %448 = vector.broadcast %cst_197 : f32 to vector<2x256xf32>
    %449 = arith.addf %448, %447 : vector<2x256xf32>
    %450 = arith.divf %448, %449 : vector<2x256xf32>
    %451 = vector.extract_strided_slice %450 {offsets = [0, 0], sizes = [2, 128], strides = [1, 1]} : vector<2x256xf32> to vector<2x128xf32>
    %452 = vector.extract_strided_slice %450 {offsets = [0, 128], sizes = [2, 128], strides = [1, 1]} : vector<2x256xf32> to vector<2x128xf32>
    %453 = vector.extract_strided_slice %437 {offsets = [0, 256], sizes = [2, 128], strides = [1, 1]} : vector<2x384xf32> to vector<2x128xf32>
    %c0_198 = arith.constant 0 : index
    %c0_199 = arith.constant 0 : index
    %454 = vector.load %arg11[%c0_198, %c0_199] : memref<1x128xf32, #tpu.memory_space<vmem>>, vector<1x128xf32>
    %455 = vector.broadcast %454 : vector<1x128xf32> to vector<2x128xf32>
    %456 = arith.addf %453, %455 : vector<2x128xf32>
    %457 = vector.extract_strided_slice %439 {offsets = [0, 256], sizes = [2, 128], strides = [1, 1]} : vector<2x384xf32> to vector<2x128xf32>
    %c0_200 = arith.constant 0 : index
    %c0_201 = arith.constant 0 : index
    %458 = vector.load %arg12[%c0_200, %c0_201] : memref<1x128xf32, #tpu.memory_space<vmem>>, vector<1x128xf32>
    %459 = vector.broadcast %458 : vector<1x128xf32> to vector<2x128xf32>
    %460 = arith.addf %457, %459 : vector<2x128xf32>
    %461 = arith.mulf %451, %460 : vector<2x128xf32>
    %462 = arith.addf %456, %461 : vector<2x128xf32>
    %463 = math.tanh %462 : vector<2x128xf32>
    %cst_202 = arith.constant 1.000000e+00 : f32
    %464 = vector.broadcast %cst_202 : f32 to vector<2x128xf32>
    %465 = arith.subf %464, %452 : vector<2x128xf32>
    %466 = arith.mulf %465, %463 : vector<2x128xf32>
    %467 = arith.mulf %452, %402 : vector<2x128xf32>
    %468 = arith.addf %466, %467 : vector<2x128xf32>
    %c12_203 = arith.constant 12 : index
    %c0_204 = arith.constant 0 : index
    %469 = vector.load %arg25[%c12_203, %c0_204] : memref<16x128xf32, #tpu.memory_space<vmem>>, vector<2x128xf32>
    tpu.vector_store %arg25[%c12_203, %c0_204], %468 {strides = array<i32>} : memref<16x128xf32, #tpu.memory_space<vmem>>, vector<2x128xf32>,
    %c14 = arith.constant 14 : index
    %c0_205 = arith.constant 0 : index
    %470 = vector.load %arg24[%c14, %c0_205] : memref<16x384xf32, #tpu.memory_space<vmem>>, vector<2x384xf32>
    %c0_206 = arith.constant 0 : index
    %c0_207 = arith.constant 0 : index
    %471 = vector.load %arg4[%c0_206, %c0_207] : memref<128x384xf32, #tpu.memory_space<vmem>>, vector<128x384xf32>
    %cst_208 = arith.constant dense<0.000000e+00> : vector<2x384xf32>
    %472 = tpu.matmul %435, %471, %cst_208 {dimension_numbers = #tpu.dot_dimension_numbers<[1], [0], [0], [1], [0, 0, 1, 1], [], []>} : vector<2x128xf32>, vector<128x384xf32>, vector<2x384xf32> -> vector<2x384xf32>
    %473 = vector.extract_strided_slice %470 {offsets = [0, 0], sizes = [2, 256], strides = [1, 1]} : vector<2x384xf32> to vector<2x256xf32>
    %474 = vector.extract_strided_slice %472 {offsets = [0, 0], sizes = [2, 256], strides = [1, 1]} : vector<2x384xf32> to vector<2x256xf32>
    %475 = arith.addf %473, %474 : vector<2x256xf32>
    %c0_209 = arith.constant 0 : index
    %c0_210 = arith.constant 0 : index
    %476 = vector.load %arg5[%c0_209, %c0_210] : memref<1x256xf32, #tpu.memory_space<vmem>>, vector<1x256xf32>
    %477 = vector.broadcast %476 : vector<1x256xf32> to vector<2x256xf32>
    %478 = arith.addf %475, %477 : vector<2x256xf32>
    %479 = arith.negf %478 : vector<2x256xf32>
    %480 = math.exp %479 : vector<2x256xf32>
    %cst_211 = arith.constant 1.000000e+00 : f32
    %481 = vector.broadcast %cst_211 : f32 to vector<2x256xf32>
    %482 = arith.addf %481, %480 : vector<2x256xf32>
    %483 = arith.divf %481, %482 : vector<2x256xf32>
    %484 = vector.extract_strided_slice %483 {offsets = [0, 0], sizes = [2, 128], strides = [1, 1]} : vector<2x256xf32> to vector<2x128xf32>
    %485 = vector.extract_strided_slice %483 {offsets = [0, 128], sizes = [2, 128], strides = [1, 1]} : vector<2x256xf32> to vector<2x128xf32>
    %486 = vector.extract_strided_slice %470 {offsets = [0, 256], sizes = [2, 128], strides = [1, 1]} : vector<2x384xf32> to vector<2x128xf32>
    %c0_212 = arith.constant 0 : index
    %c0_213 = arith.constant 0 : index
    %487 = vector.load %arg6[%c0_212, %c0_213] : memref<1x128xf32, #tpu.memory_space<vmem>>, vector<1x128xf32>
    %488 = vector.broadcast %487 : vector<1x128xf32> to vector<2x128xf32>
    %489 = arith.addf %486, %488 : vector<2x128xf32>
    %490 = vector.extract_strided_slice %472 {offsets = [0, 256], sizes = [2, 128], strides = [1, 1]} : vector<2x384xf32> to vector<2x128xf32>
    %c0_214 = arith.constant 0 : index
    %c0_215 = arith.constant 0 : index
    %491 = vector.load %arg7[%c0_214, %c0_215] : memref<1x128xf32, #tpu.memory_space<vmem>>, vector<1x128xf32>
    %492 = vector.broadcast %491 : vector<1x128xf32> to vector<2x128xf32>
    %493 = arith.addf %490, %492 : vector<2x128xf32>
    %494 = arith.mulf %484, %493 : vector<2x128xf32>
    %495 = arith.addf %489, %494 : vector<2x128xf32>
    %496 = math.tanh %495 : vector<2x128xf32>
    %cst_216 = arith.constant 1.000000e+00 : f32
    %497 = vector.broadcast %cst_216 : f32 to vector<2x128xf32>
    %498 = arith.subf %497, %485 : vector<2x128xf32>
    %499 = arith.mulf %498, %496 : vector<2x128xf32>
    %500 = arith.mulf %485, %435 : vector<2x128xf32>
    %501 = arith.addf %499, %500 : vector<2x128xf32>
    %c0_217 = arith.constant 0 : index
    %c0_218 = arith.constant 0 : index
    %502 = vector.load %arg8[%c0_217, %c0_218] : memref<128x384xf32, #tpu.memory_space<vmem>>, vector<128x384xf32>
    %cst_219 = arith.constant dense<0.000000e+00> : vector<2x384xf32>
    %503 = tpu.matmul %501, %502, %cst_219 {dimension_numbers = #tpu.dot_dimension_numbers<[1], [0], [0], [1], [0, 0, 1, 1], [], []>} : vector<2x128xf32>, vector<128x384xf32>, vector<2x384xf32> -> vector<2x384xf32>
    %c0_220 = arith.constant 0 : index
    %c0_221 = arith.constant 0 : index
    %504 = vector.load %arg9[%c0_220, %c0_221] : memref<128x384xf32, #tpu.memory_space<vmem>>, vector<128x384xf32>
    %cst_222 = arith.constant dense<0.000000e+00> : vector<2x384xf32>
    %505 = tpu.matmul %468, %504, %cst_222 {dimension_numbers = #tpu.dot_dimension_numbers<[1], [0], [0], [1], [0, 0, 1, 1], [], []>} : vector<2x128xf32>, vector<128x384xf32>, vector<2x384xf32> -> vector<2x384xf32>
    %506 = vector.extract_strided_slice %503 {offsets = [0, 0], sizes = [2, 256], strides = [1, 1]} : vector<2x384xf32> to vector<2x256xf32>
    %507 = vector.extract_strided_slice %505 {offsets = [0, 0], sizes = [2, 256], strides = [1, 1]} : vector<2x384xf32> to vector<2x256xf32>
    %508 = arith.addf %506, %507 : vector<2x256xf32>
    %c0_223 = arith.constant 0 : index
    %c0_224 = arith.constant 0 : index
    %509 = vector.load %arg10[%c0_223, %c0_224] : memref<1x256xf32, #tpu.memory_space<vmem>>, vector<1x256xf32>
    %510 = vector.broadcast %509 : vector<1x256xf32> to vector<2x256xf32>
    %511 = arith.addf %508, %510 : vector<2x256xf32>
    %512 = arith.negf %511 : vector<2x256xf32>
    %513 = math.exp %512 : vector<2x256xf32>
    %cst_225 = arith.constant 1.000000e+00 : f32
    %514 = vector.broadcast %cst_225 : f32 to vector<2x256xf32>
    %515 = arith.addf %514, %513 : vector<2x256xf32>
    %516 = arith.divf %514, %515 : vector<2x256xf32>
    %517 = vector.extract_strided_slice %516 {offsets = [0, 0], sizes = [2, 128], strides = [1, 1]} : vector<2x256xf32> to vector<2x128xf32>
    %518 = vector.extract_strided_slice %516 {offsets = [0, 128], sizes = [2, 128], strides = [1, 1]} : vector<2x256xf32> to vector<2x128xf32>
    %519 = vector.extract_strided_slice %503 {offsets = [0, 256], sizes = [2, 128], strides = [1, 1]} : vector<2x384xf32> to vector<2x128xf32>
    %c0_226 = arith.constant 0 : index
    %c0_227 = arith.constant 0 : index
    %520 = vector.load %arg11[%c0_226, %c0_227] : memref<1x128xf32, #tpu.memory_space<vmem>>, vector<1x128xf32>
    %521 = vector.broadcast %520 : vector<1x128xf32> to vector<2x128xf32>
    %522 = arith.addf %519, %521 : vector<2x128xf32>
    %523 = vector.extract_strided_slice %505 {offsets = [0, 256], sizes = [2, 128], strides = [1, 1]} : vector<2x384xf32> to vector<2x128xf32>
    %c0_228 = arith.constant 0 : index
    %c0_229 = arith.constant 0 : index
    %524 = vector.load %arg12[%c0_228, %c0_229] : memref<1x128xf32, #tpu.memory_space<vmem>>, vector<1x128xf32>
    %525 = vector.broadcast %524 : vector<1x128xf32> to vector<2x128xf32>
    %526 = arith.addf %523, %525 : vector<2x128xf32>
    %527 = arith.mulf %517, %526 : vector<2x128xf32>
    %528 = arith.addf %522, %527 : vector<2x128xf32>
    %529 = math.tanh %528 : vector<2x128xf32>
    %cst_230 = arith.constant 1.000000e+00 : f32
    %530 = vector.broadcast %cst_230 : f32 to vector<2x128xf32>
    %531 = arith.subf %530, %518 : vector<2x128xf32>
    %532 = arith.mulf %531, %529 : vector<2x128xf32>
    %533 = arith.mulf %518, %468 : vector<2x128xf32>
    %534 = arith.addf %532, %533 : vector<2x128xf32>
    %c14_231 = arith.constant 14 : index
    %c0_232 = arith.constant 0 : index
    %535 = vector.load %arg25[%c14_231, %c0_232] : memref<16x128xf32, #tpu.memory_space<vmem>>, vector<2x128xf32>
    tpu.vector_store %arg25[%c14_231, %c0_232], %534 {strides = array<i32>} : memref<16x128xf32, #tpu.memory_space<vmem>>, vector<2x128xf32>,
    %c0_233 = arith.constant 0 : index
    %c0_234 = arith.constant 0 : index
    %536 = vector.load %arg22[%c0_233, %c0_234] : memref<2x128xf32, #tpu.memory_space<vmem>>, vector<2x128xf32>
    tpu.vector_store %arg22[%c0_233, %c0_234], %501 {strides = array<i32>} : memref<2x128xf32, #tpu.memory_space<vmem>>, vector<2x128xf32>,
    %c0_235 = arith.constant 0 : index
    %c0_236 = arith.constant 0 : index
    %537 = vector.load %arg23[%c0_235, %c0_236] : memref<2x128xf32, #tpu.memory_space<vmem>>, vector<2x128xf32>
    tpu.vector_store %arg23[%c0_235, %c0_236], %534 {strides = array<i32>} : memref<2x128xf32, #tpu.memory_space<vmem>>, vector<2x128xf32>,
    %538 = tpu.iota {dimensions = array<i32: 1>} : vector<1x128xi32>
    %c64_i32 = arith.constant 64 : i32
    %539 = vector.broadcast %c64_i32 : i32 to vector<1x128xi32>
    %540 = arith.cmpi slt, %538, %539 : vector<1x128xi32>
    %541 = arith.extui %540 : vector<1x128xi1> to vector<1x128xi32>
    %542 = arith.sitofp %541 : vector<1x128xi32> to vector<1x128xf32>
    %c0_237 = arith.constant 0 : index
    %c0_238 = arith.constant 0 : index
    %543 = vector.load %arg25[%c0_237, %c0_238] : memref<16x128xf32, #tpu.memory_space<vmem>>, vector<16x128xf32>
    %544 = vector.broadcast %542 : vector<1x128xf32> to vector<16x128xf32>
    %545 = arith.mulf %543, %544 : vector<16x128xf32>
    %cst_239 = arith.constant dense<0.000000e+00> : vector<16xf32>
    %546 = vector.multi_reduction <add>, %545, %cst_239 [1] : vector<16x128xf32> to vector<16xf32>
    %547 = vector.shape_cast %546 : vector<16xf32> to vector<16x1xf32>
    %cst_240 = arith.constant 1.562500e-02 : f32
    %548 = vector.broadcast %cst_240 : f32 to vector<16x1xf32>
    %549 = arith.mulf %547, %548 : vector<16x1xf32>
    %550 = vector.broadcast %549 : vector<16x1xf32> to vector<16x128xf32>
    %551 = arith.subf %545, %550 : vector<16x128xf32>
    %552 = vector.broadcast %542 : vector<1x128xf32> to vector<16x128xf32>
    %553 = arith.mulf %551, %552 : vector<16x128xf32>
    %554 = arith.mulf %553, %553 : vector<16x128xf32>
    %cst_241 = arith.constant dense<0.000000e+00> : vector<16xf32>
    %555 = vector.multi_reduction <add>, %554, %cst_241 [1] : vector<16x128xf32> to vector<16xf32>
    %556 = vector.shape_cast %555 : vector<16xf32> to vector<16x1xf32>
    %cst_242 = arith.constant 1.562500e-02 : f32
    %557 = vector.broadcast %cst_242 : f32 to vector<16x1xf32>
    %558 = arith.mulf %556, %557 : vector<16x1xf32>
    %cst_243 = arith.constant 9.99999974E-6 : f32
    %559 = vector.broadcast %cst_243 : f32 to vector<16x1xf32>
    %560 = arith.addf %558, %559 : vector<16x1xf32>
    %561 = math.rsqrt %560 : vector<16x1xf32>
    %562 = vector.broadcast %561 : vector<16x1xf32> to vector<16x128xf32>
    %563 = arith.mulf %553, %562 : vector<16x128xf32>
    %c0_244 = arith.constant 0 : index
    %c0_245 = arith.constant 0 : index
    %564 = vector.load %arg13[%c0_244, %c0_245] : memref<1x128xf32, #tpu.memory_space<vmem>>, vector<1x128xf32>
    %565 = vector.broadcast %564 : vector<1x128xf32> to vector<16x128xf32>
    %566 = arith.mulf %563, %565 : vector<16x128xf32>
    %c0_246 = arith.constant 0 : index
    %c0_247 = arith.constant 0 : index
    %567 = vector.load %arg14[%c0_246, %c0_247] : memref<1x128xf32, #tpu.memory_space<vmem>>, vector<1x128xf32>
    %568 = vector.broadcast %567 : vector<1x128xf32> to vector<16x128xf32>
    %569 = arith.addf %566, %568 : vector<16x128xf32>
    %c0_248 = arith.constant 0 : index
    %c0_249 = arith.constant 0 : index
    %570 = vector.load %arg15[%c0_248, %c0_249] : memref<128x128xf32, #tpu.memory_space<vmem>>, vector<128x128xf32>
    %cst_250 = arith.constant dense<0.000000e+00> : vector<16x128xf32>
    %571 = tpu.matmul %569, %570, %cst_250 {dimension_numbers = #tpu.dot_dimension_numbers<[1], [0], [0], [1], [0, 0, 1, 1], [], []>} : vector<16x128xf32>, vector<128x128xf32>, vector<16x128xf32> -> vector<16x128xf32>
    %c0_251 = arith.constant 0 : index
    %c0_252 = arith.constant 0 : index
    %572 = vector.load %arg16[%c0_251, %c0_252] : memref<1x128xf32, #tpu.memory_space<vmem>>, vector<1x128xf32>
    %573 = vector.broadcast %572 : vector<1x128xf32> to vector<16x128xf32>
    %574 = arith.addf %571, %573 : vector<16x128xf32>
    %575 = math.tanh %574 : vector<16x128xf32>
    %c0_253 = arith.constant 0 : index
    %c0_254 = arith.constant 0 : index
    %576 = vector.load %arg17[%c0_253, %c0_254] : memref<128x128xf32, #tpu.memory_space<vmem>>, vector<128x128xf32>
    %cst_255 = arith.constant dense<0.000000e+00> : vector<16x128xf32>
    %577 = tpu.matmul %575, %576, %cst_255 {dimension_numbers = #tpu.dot_dimension_numbers<[1], [0], [0], [1], [0, 0, 1, 1], [], []>} : vector<16x128xf32>, vector<128x128xf32>, vector<16x128xf32> -> vector<16x128xf32>
    %c0_256 = arith.constant 0 : index
    %c0_257 = arith.constant 0 : index
    %578 = vector.load %arg18[%c0_256, %c0_257] : memref<1x128xf32, #tpu.memory_space<vmem>>, vector<1x128xf32>
    %579 = vector.broadcast %578 : vector<1x128xf32> to vector<16x128xf32>
    %580 = arith.addf %577, %579 : vector<16x128xf32>
    %cst_258 = arith.constant 0.000000e+00 : f32
    %581 = vector.broadcast %cst_258 : f32 to vector<16x128xf32>
    %582 = arith.maximumf %580, %581 : vector<16x128xf32>
    %c0_259 = arith.constant 0 : index
    %c0_260 = arith.constant 0 : index
    %583 = vector.load %arg19[%c0_259, %c0_260] : memref<1x128xf32, #tpu.memory_space<vmem>>, vector<1x128xf32>
    %584 = vector.broadcast %583 : vector<1x128xf32> to vector<16x128xf32>
    %585 = arith.mulf %582, %584 : vector<16x128xf32>
    %cst_261 = arith.constant dense<0.000000e+00> : vector<16xf32>
    %586 = vector.multi_reduction <add>, %585, %cst_261 [1] : vector<16x128xf32> to vector<16xf32>
    %587 = vector.shape_cast %586 : vector<16xf32> to vector<16x1xf32>
    %c0_262 = arith.constant 0 : index
    %c0_263 = arith.constant 0 : index
    %588 = vector.load %arg20[%c0_262, %c0_263] : memref<1x1xf32, #tpu.memory_space<vmem>>, vector<1x1xf32>
    %589 = vector.broadcast %588 : vector<1x1xf32> to vector<16x1xf32>
    %590 = arith.addf %587, %589 : vector<16x1xf32>
    %c0_264 = arith.constant 0 : index
    %c0_265 = arith.constant 0 : index
    %591 = vector.load %arg21[%c0_264, %c0_265] : memref<16x1xf32, #tpu.memory_space<vmem>>, vector<16x1xf32>
    tpu.vector_store %arg21[%c0_264, %c0_265], %590 {strides = array<i32>} : memref<16x1xf32, #tpu.memory_space<vmem>>, vector<16x1xf32>,
    return
  }
}

</mosaic_0001>

<bundles_post_ra>
// kernel: _rnn_ode_seq.1
= control target key start
LH: loop header
LB: loop body
LE: loop exit
PB: predicated region body
PF: predicated region fallthrough
CT: control target
= control target key end

     0   :  { %s10963_s0 = inlined_call_operand.vmem [shape: f32[16,1], index: 0, kind: input, shape index: {}]   ;;  %s10964_s1 = inlined_call_operand.vmem [shape: f32[2,128], index: 1, kind: input, shape index: {}, may-alias: {1,22}]   ;;  %s10965_s2 = inlined_call_operand.vmem [shape: f32[2,128], index: 2, kind: input, shape index: {}, may-alias: {2,23}]   ;;  %s10966_s3 = inlined_call_operand.vmem [shape: f32[1,384], index: 3, kind: input, shape index: {}]   ;;  %s10967_s4 = inlined_call_operand.hbm [shape: f32[128,384], index: 4, kind: input, shape index: {}]   ;;  %s10968_s5 = inlined_call_operand.vmem [shape: f32[1,256], index: 5, kind: input, shape index: {}]   ;;  %s10969_s6 = inlined_call_operand.vmem [shape: f32[1,128], index: 6, kind: input, shape index: {}]   ;;  %s10970_s7 = inlined_call_operand.vmem [shape: f32[1,128], index: 7, kind: input, shape index: {}]   ;;  %s10971_s8 = inlined_call_operand.hbm [shape: f32[128,384], index: 8, kind: input, shape index: {}]   ;;  %s10972_s9 = inlined_call_operand.hbm [shape: f32[128,384], index: 9, kind: input, shape index: {}]   ;;  %s10973_s10 = inlined_call_operand.vmem [shape: f32[1,256], index: 10, kind: input, shape index: {}]   ;;  %s10974_s11 = inlined_call_operand.vmem [shape: f32[1,128], index: 11, kind: input, shape index: {}]   ;;  %s10975_s12 = inlined_call_operand.vmem [shape: f32[1,128], index: 12, kind: input, shape index: {}]   ;;  %s10976_s13 = inlined_call_operand.vmem [shape: f32[1,128], index: 13, kind: input, shape index: {}]   ;;  %s10977_s14 = inlined_call_operand.vmem [shape: f32[1,128], index: 14, kind: input, shape index: {}]   ;;  %s10978_s15 = inlined_call_operand.hbm [shape: f32[128,128], index: 15, kind: input, shape index: {}]   ;;  %s10979_s16 = inlined_call_operand.vmem [shape: f32[1,128], index: 16, kind: input, shape index: {}]   ;;  %s10980_s17 = inlined_call_operand.hbm [shape: f32[128,128], index: 17, kind: input, shape index: {}]   ;;  %s10981_s18 = inlined_call_operand.vmem [shape: f32[1,128], index: 18, kind: input, shape index: {}]   ;;  %s10982_s19 = inlined_call_operand.vmem [shape: f32[1,128], index: 19, kind: input, shape index: {}]   ;;  %s10983_s20 = inlined_call_operand.<no memory space> [shape: f32[1,1], index: 20, kind: input, shape index: {}]   ;;  %s10984_s21 = inlined_call_operand.vmem [shape: f32[16,1], index: 21, kind: output, shape index: {0}]   ;;  %s10985_s22 = inlined_call_operand.vmem [shape: f32[2,128], index: 22, kind: output, shape index: {1}, may-alias: {1,22}]   ;;  %s10986_s23 = inlined_call_operand.vmem [shape: f32[2,128], index: 23, kind: output, shape index: {2}, may-alias: {2,23}]  }
   0x1   :  { %11350 = sst [smem:[#allocation106_spill]] %s10963_s0  ;;  %v29_v0 = vstv %s10983_s20 }
   0x2   :  { %11351 = sst [smem:[#allocation107_spill]] %s10964_s1  ;;  %30 = vst [vmem:[#allocation4] sm:$0x1] %v29_v0 }
   0x3   :  { %11352 = sst [smem:[#allocation108_spill]] %s10965_s2 }
   0x4   :  { %11353 = sst [smem:[#allocation109_spill]] %s10966_s3 }
   0x5   :  { %11354 = sst [smem:[#allocation110_spill]] %s10967_s4 }
   0x6   :  { %11355 = sst [smem:[#allocation111_spill]] %s10968_s5 }
   0x7   :  { %11356 = sst [smem:[#allocation112_spill]] %s10969_s6 }
   0x8   :  { %11357 = sst [smem:[#allocation113_spill]] %s10970_s7 }
   0x9   :  { %31 = vsyncpa [#allocation6], 0 }
   0xa   :  { %32 = vsyncpa [#allocation8], 0 }
   0xb   :  { %33 = vsyncpa [#allocation11], 0  ;;  %s7659_s24 = smov [#allocation7]   ;;  %s7660_s5 = smov [#allocation10]  }
   0xc   :  { %s65_s25 = sshll.u32 %s7659_s24, 4  ;;  %s99_s1 = sshll.u32 %s7660_s5, 4  ;;  %s66_s25 = int_to_ptr.vmem [resolvable:$true] %s65_s25  ;;  %s100_s1 = int_to_ptr.vmem [resolvable:$true] %s99_s1 }
   0xd   :  { %s7561_s26 = scalar_lea.vmem %s66_s25, 6144  ;;  %p7566_p1 = scmp.lt.s32.totalorder %s66_s25, %s66_s25 }
   0xe   :  { %p7562_p0 = scmp.ne.s32.totalorder %s66_s25, %s7561_s26  ;;  %p7567_p2 = scmp.lt.s32.totalorder %s7561_s26, %s7561_s26 }
  0x10   :  { %p7568_p3 = por %p7567_p2, %p7566_p1 }
  0x12   :  { %p7569_p4 = pnand %p7568_p3, %p7562_p0 }
  0x14   :  { %7572 = shalt.err (!%p7569_p4)
}
  0x15   :  { %s7661_s2 = smov 384   ;;  %s7662_s6 = smov 24  }
  0x16   :  { %71 = dma.hbm_to_vmem [thread:$0]  %s10971_s8, 6144, %s66_s25, [#allocation8], %s7661_s2, %s7661_s2, %s7662_s6  }
  0x17   :  { %s7581_s7 = scalar_lea.vmem %s100_s1, 2048  ;;  %p7586_p6 = scmp.lt.s32.totalorder %s100_s1, %s100_s1 }
  0x18   :  { %p7582_p5 = scmp.ne.s32.totalorder %s100_s1, %s7581_s7  ;;  %p7587_p7 = scmp.lt.s32.totalorder %s7581_s7, %s7581_s7 }
  0x1a   :  { %p7588_p8 = por %p7587_p7, %p7586_p6 }
  0x1c   :  { %p7589_p9 = pnand %p7588_p8, %p7582_p5 }
  0x1e   :  { %7592 = shalt.err (!%p7589_p9)
}
  0x1f   :  { %s7663_s28 = smov 128   ;;  %s7664_s29 = smov 8  }
  0x20   :  { %105 = dma.hbm_to_vmem [thread:$0]  %s10978_s15, 2048, %s100_s1, [#allocation11], %s7663_s28, %s7663_s28, %s7664_s29  }
  0x21   :  { %s7665_s4 = smov [#allocation5]   ;;  %s7666_s24 = smov [#allocation9]  }
  0x22   :  { %s47_s30 = sshll.u32 %s7665_s4, 4  ;;  %s77_s8 = sshll.u32 %s7666_s24, 4  ;;  %s48_s30 = int_to_ptr.vmem [resolvable:$true] %s47_s30  ;;  %s78_s8 = int_to_ptr.vmem [resolvable:$true] %s77_s8 }
  0x23   :  { %s7601_s25 = scalar_lea.vmem %s48_s30, 6144  ;;  %p7606_p11 = scmp.lt.s32.totalorder %s48_s30, %s48_s30 }
  0x24   :  { %p7602_p10 = scmp.ne.s32.totalorder %s48_s30, %s7601_s25  ;;  %p7607_p12 = scmp.lt.s32.totalorder %s7601_s25, %s7601_s25 }
  0x26   :  { %p7608_p13 = por %p7607_p12, %p7606_p11 }
  0x28   :  { %p7609_p0 = pnand %p7608_p13, %p7602_p10 }
  0x2a   :  { %7612 = shalt.err (!%p7609_p0)
}
  0x2b   :  { %s11358_s20 = sld [smem:[#allocation110_spill]]  ;;  %s7621_s15 = scalar_lea.vmem %s78_s8, 6144 }
  0x2c   :  { %p7622_p1 = scmp.ne.s32.totalorder %s78_s8, %s7621_s15  ;;  %p7626_p2 = scmp.lt.s32.totalorder %s78_s8, %s78_s8 }
  0x2d   :  { %p7627_p3 = scmp.lt.s32.totalorder %s7621_s15, %s7621_s15 }
  0x2f   :  { %p7628_p4 = por %p7627_p3, %p7626_p2 }
  0x31   :  { %53 = dma.hbm_to_vmem [thread:$0]  %s11358_s20, 6144, %s48_s30, [#allocation6], %s7661_s2, %s7661_s2, %s7662_s6  }
  0x32   :  { %p7629_p5 = pnand %p7628_p4, %p7622_p1 }
  0x34   :  { %7632 = shalt.err (!%p7629_p5)
}
  0x35   :  { %83 = dma.hbm_to_vmem [thread:$0]  %s10972_s9, 6144, %s78_s8, [#allocation8], %s7661_s2, %s7661_s2, %s7662_s6  }
  0x36   :  { %s7667_s7 = smov [#allocation12]  }
  0x37   :  { %s113_s3 = sshll.u32 %s7667_s7, 4  ;;  %s114_s3 = int_to_ptr.vmem [resolvable:$true] %s113_s3 }
  0x38   :  { %s7641_s0 = scalar_lea.vmem %s114_s3, 2048  ;;  %p7646_p7 = scmp.lt.s32.totalorder %s114_s3, %s114_s3 }
  0x39   :  { %p7642_p6 = scmp.ne.s32.totalorder %s114_s3, %s7641_s0  ;;  %p7647_p8 = scmp.lt.s32.totalorder %s7641_s0, %s7641_s0 }
  0x3b   :  { %p7648_p9 = por %p7647_p8, %p7646_p7 }
  0x3d   :  { %p7649_p10 = pnand %p7648_p9, %p7642_p6 }
  0x3f   :  { %7652 = shalt.err (!%p7649_p10)
}
  0x40   :  { %119 = dma.hbm_to_vmem [thread:$0]  %s10980_s17, 2048, %s114_s3, [#allocation11], %s7663_s28, %s7663_s28, %s7664_s29  }
  0x41   :  { %7653 = dma.done.wait [#allocation6], 6144  }
  0x42   :  { %7654 = vsyncadd [#allocation6], 4294961152 }
  0x43   :  { %7655 = dma.done.wait [#allocation8], 12288  }
  0x44   :  { %7656 = vsyncadd [#allocation8], 4294955008 }
  0x45   :  { %7657 = dma.done.wait [#allocation11], 4096  }
  0x46   :  { %7658 = vsyncadd [#allocation11], 4294963200  ;;  %v11042_v1 = vmov 0.0   ;;  %vm7669_vm0 = vmmov 0   ;;  %v7670_v2 = vmov 0   ;;  %v7828_v3 = vld [vmem:[#allocation5 + $0x170] sm:$0xff] }
  0x47   :  { %299 = vmatprep.mubr.f32.mxu0 %v11042_v1  ;;  %6462 = vmatprep.subr.mxu1 %v11042_v1  ;;  %v7830_v4 = vld [vmem:[#allocation5 + $0x168] sm:$0xff]  ;;  %v7832_v5 = vld [vmem:[#allocation5 + $0x158] sm:$0xff]  ;;  %v7835_v6 = vld [vmem:[#allocation5 + $0x150] sm:$0xff]  ;;  %s11362_s2 = sld [smem:[#allocation107_spill]]  ;;  %vm5929_vm2 = vcmask 7168  }
  0x48   :  { %6494 = vmatprep.mubr.msk.f32.mxu1 %vm7669_vm0, %v11042_v1  ;;  %7384 = vset.pattern.permute.xlu0 %v7670_v2  ;;  %v7838_v7 = vld [vmem:[#allocation5 + $0x140] sm:$0xff]  ;;  %v7841_v8 = vld [vmem:[#allocation5 + $0x138] sm:$0xff]  ;;  %v7844_v9 = vld [vmem:[#allocation5 + $0x128] sm:$0xff]  ;;  %s11363_s29 = sld [smem:[#allocation106_spill]] }
  0x49   :  { %235 = vmatprep.subr.mxu0 %v7828_v3  ;;  %v7847_v10 = vld [vmem:[#allocation5 + $0x120] sm:$0xff]  ;;  %v7850_v11 = vld [vmem:[#allocation5 + $0x110] sm:$0xff]  ;;  %v7853_v12 = vld [vmem:[#allocation5 + $0x108] sm:$0xff]  ;;  %s11414_s26 = sld [smem:[#allocation109_spill]] }
  0x4a   :  { %236 = vmatpush1.msra.mxu0 %v7830_v4  ;;  %v7856_v13 = vld [vmem:[#allocation5 + $0xf8] sm:$0xff]  ;;  %v7859_v14 = vld [vmem:[#allocation5 + $0xf0] sm:$0xff]  ;;  %v7862_v15 = vld [vmem:[#allocation5 + $0xe0] sm:$0xff]  ;;  %s11418_s1 = sld [smem:[#allocation111_spill]] }
  0x4b   :  { %237 = vmatprep.subr.mxu0 %v7832_v5  ;;  %v7865_v16 = vld [vmem:[#allocation5 + $0xd8] sm:$0xff]  ;;  %v7869_v18 = vld [vmem:[#allocation5 + $0x160] sm:$0xff]  ;;  %v7872_v19 = vld [vmem:[#allocation5 + $0xc8] sm:$0xff]  ;;  %s11419_s3 = sld [smem:[#allocation113_spill]] }
  0x4c   :  { %238 = vmatpush1.msra.mxu0 %v7835_v6  ;;  %v7867_v17 = vld [vmem:[#allocation5 + $0x178] sm:$0xff]  ;;  %v7876_v20 = vld [vmem:[#allocation5 + $0xc0] sm:$0xff]  ;;  %v7879_v21 = vld [vmem:[#allocation5 + $0x148] sm:$0xff]  ;;  %s11420_s30 = sld [smem:[#allocation112_spill]] }
  0x4d   :  { %239 = vmatprep.subr.mxu0 %v7838_v7  ;;  %6463 = vmatpush3.msra.mxu1 %v7867_v17  ;;  %v7882_v22 = vld [vmem:[#allocation5 + $0xb0] sm:$0xff]  ;;  %v7886_v23 = vld [vmem:[#allocation5 + $0xa8] sm:$0xff]  ;;  %v7892_v25 = vld [vmem:[#allocation5 + $0x98] sm:$0xff] }
  0x4e   :  { %240 = vmatpush1.msra.mxu0 %v7841_v8  ;;  %6464 = vmatprep.subr.mxu1 %v11042_v1  ;;  %v7889_v24 = vld [vmem:[#allocation5 + $0x130] sm:$0xff]  ;;  %v7899_v27 = vld [vmem:[#allocation5 + $0x118] sm:$0xff]  ;;  %v7902_v28 = vld [vmem:[#allocation5 + $0x80] sm:$0xff] }
  0x4f   :  { %241 = vmatprep.subr.mxu0 %v7844_v9  ;;  %6465 = vmatpush3.msra.mxu1 %v7869_v18  ;;  %v7896_v26 = vld [vmem:[#allocation5 + $0x90] sm:$0xff]  ;;  %v7906_v29 = vld [vmem:[#allocation5 + $0x78] sm:$0xff]  ;;  %v7909_v30 = vld [vmem:[#allocation5 + $0x100] sm:$0xff] }
  0x50   :  { %242 = vmatpush1.msra.mxu0 %v7847_v10  ;;  %6466 = vmatprep.subr.mxu1 %v11042_v1  ;;  %v7912_v31 = vld [vmem:[#allocation5 + $0x68] sm:$0xff]  ;;  %v7916_v32 = vld [vmem:[#allocation5 + $0x60] sm:$0xff]  ;;  %v7922_v34 = vld [vmem:[#allocation5 + $0x50] sm:$0xff] }
  0x51   :  { %243 = vmatprep.subr.mxu0 %v7850_v11  ;;  %6467 = vmatpush3.msra.mxu1 %v7879_v21  ;;  %v7919_v33 = vld [vmem:[#allocation5 + $0xe8] sm:$0xff]  ;;  %v7929_v36 = vld [vmem:[#allocation5 + $0xd0] sm:$0xff]  ;;  %v7932_v37 = vld [vmem:[#allocation5 + $0x38] sm:$0xff] }
  0x52   :  { %244 = vmatpush1.msra.mxu0 %v7853_v12  ;;  %6468 = vmatprep.subr.mxu1 %v11042_v1  ;;  %v7926_v35 = vld [vmem:[#allocation5 + $0x48] sm:$0xff]  ;;  %v7936_v38 = vld [vmem:[#allocation5 + $0x30] sm:$0xff]  ;;  %v7939_v39 = vld [vmem:[#allocation5 + $0xb8] sm:$0xff] }
  0x53   :  { %245 = vmatprep.subr.mxu0 %v7856_v13  ;;  %6469 = vmatpush3.msra.mxu1 %v7889_v24  ;;  %v7942_v40 = vld [vmem:[#allocation5 + $0x20] sm:$0xff]  ;;  %v7946_v41 = vld [vmem:[#allocation5 + $0x18] sm:$0xff]  ;;  %v7952_v43 = vld [vmem:[#allocation5 + $0x8] sm:$0xff] }
  0x54   :  { %246 = vmatpush1.msra.mxu0 %v7859_v14  ;;  %6470 = vmatprep.subr.mxu1 %v11042_v1  ;;  %11359 = vst [vmem:[#allocation16_spill] sm:$0xff] %v7946_v41  ;;  %v7949_v42 = vld [vmem:[#allocation5 + $0xa0] sm:$0xff]  ;;  %11360 = vst [vmem:[#allocation17_spill] sm:$0xff] %v7952_v43  ;;  %v7959_v45 = vld [vmem:[#allocation5 + $0x88] sm:$0xff] }
  0x55   :  { %247 = vmatprep.subr.mxu0 %v7862_v15  ;;  %6471 = vmatpush3.msra.mxu1 %v7899_v27  ;;  %v7956_v44 = vld [vmem:[#allocation5] sm:$0xff]  ;;  %v7970_v47 = vld [vmem:[#allocation5 + $0x70] sm:$0xff]  ;;  %v7979_v49 = vld [vmem:[#allocation5 + $0x58] sm:$0xff] }
  0x56   :  { %248 = vmatpush1.msra.mxu0 %v7865_v16  ;;  %6472 = vmatprep.subr.mxu1 %v11042_v1  ;;  %11361 = vst [vmem:[#allocation18_spill] sm:$0xff] %v7956_v44  ;;  %v7965_v46 = vld [vmem:[%s11362_s2] sm:$0x3]  ;;  %v142_v51 = vld [vmem:[%s11363_s29 + $0x8] sm:$0xff]  ;;  %v7995_v53 = vld [vmem:[#allocation5 + $0x10] sm:$0xff]  ;;  %s11455_s2 = sld [smem:[#allocation108_spill]] }
  0x57   :  { %249 = vmatprep.subr.mxu0 %v7872_v19  ;;  %6473 = vmatpush3.msra.mxu1 %v7909_v30  ;;  %v141_v48 = vld [vmem:[%s11363_s29] sm:$0xff]  ;;  %v7991_v52 = vld [vmem:[#allocation5 + $0x28] sm:$0xff]  ;;  %11365 = vst [vmem:[#allocation20_spill] sm:$0xff] %v7995_v53  ;;  %v8004_v54 = vld [vmem:[#allocation7 + $0x170] sm:$0xff] }
  0x58   :  { %250 = vmatpush1.msra.mxu0 %v7876_v20  ;;  %6474 = vmatprep.subr.mxu1 %v11042_v1  ;;  %v7983_v50 = vld [vmem:[#allocation5 + $0x40] sm:$0xff]  ;;  %11364 = vst [vmem:[#allocation19_spill] sm:$0xff] %v7991_v52  ;;  %11366 = vst [vmem:[#allocation21_spill] sm:$0xff] %v8004_v54  ;;  %v8006_v55 = vld [vmem:[#allocation7 + $0x168] sm:$0xff] }
  0x59   :  { %251 = vmatprep.subr.mxu0 %v7882_v22  ;;  %6475 = vmatpush3.msra.mxu1 %v7919_v33  ;;  %11367 = vst [vmem:[#allocation22_spill] sm:$0xff] %v8006_v55  ;;  %v8008_v56 = vld [vmem:[#allocation7 + $0x178] sm:$0xff]  ;;  %v8014_v58 = vld [vmem:[#allocation7 + $0x150] sm:$0xff]  ;;  %v8016_v59 = vld [vmem:[#allocation7 + $0x160] sm:$0xff] }
  0x5a   :  { %252 = vmatpush1.msra.mxu0 %v7886_v23  ;;  %6476 = vmatprep.subr.mxu1 %v11042_v1  ;;  %11368 = vst [vmem:[#allocation23_spill] sm:$0xff] %v8008_v56  ;;  %v8012_v57 = vld [vmem:[#allocation7 + $0x158] sm:$0xff]  ;;  %11370 = vst [vmem:[#allocation25_spill] sm:$0xff] %v8014_v58  ;;  %v8020_v60 = vld [vmem:[#allocation7 + $0x140] sm:$0xff] }
  0x5b   :  { %253 = vmatprep.subr.mxu0 %v7892_v25  ;;  %6477 = vmatpush3.msra.mxu1 %v7929_v36  ;;  %11369 = vst [vmem:[#allocation24_spill] sm:$0xff] %v8012_v57  ;;  %11371 = vst [vmem:[#allocation26_spill] sm:$0xff] %v8016_v59  ;;  %v8022_v61 = vld [vmem:[#allocation7 + $0x148] sm:$0xff]  ;;  %v8026_v62 = vld [vmem:[#allocation7 + $0x138] sm:$0xff] }
  0x5c   :  { %254 = vmatpush1.msra.mxu0 %v7896_v26  ;;  %6478 = vmatprep.subr.mxu1 %v11042_v1  ;;  %11372 = vst [vmem:[#allocation27_spill] sm:$0xff] %v8020_v60  ;;  %11373 = vst [vmem:[#allocation28_spill] sm:$0xff] %v8022_v61  ;;  %v8033_v63 = vld [vmem:[#allocation7 + $0x128] sm:$0xff]  ;;  %v8037_v0 = vld [vmem:[#allocation7 + $0x120] sm:$0xff] }
  0x5d   :  { %255 = vmatprep.subr.mxu0 %v7902_v28  ;;  %6479 = vmatpush3.msra.mxu1 %v7939_v39  ;;  %11374 = vst [vmem:[#allocation29_spill] sm:$0xff] %v8026_v62  ;;  %11375 = vst [vmem:[#allocation30_spill] sm:$0xff] %v8033_v63  ;;  %v8039_v2 = vld [vmem:[#allocation7 + $0x130] sm:$0xff] }
  0x5e   :  { %256 = vmatpush1.msra.mxu0 %v7906_v29  ;;  %6480 = vmatprep.subr.mxu1 %v11042_v1  ;;  %11376 = vst [vmem:[#allocation31_spill] sm:$0xff] %v8037_v0  ;;  %11377 = vst [vmem:[#allocation32_spill] sm:$0xff] %v8039_v2 }
  0x5f   :  { %257 = vmatprep.subr.mxu0 %v7912_v31  ;;  %6481 = vmatpush3.msra.mxu1 %v7949_v42 }
  0x60   :  { %258 = vmatpush1.msra.mxu0 %v7916_v32  ;;  %6482 = vmatprep.subr.mxu1 %v11042_v1 }
  0x61   :  { %259 = vmatprep.subr.mxu0 %v7922_v34  ;;  %6483 = vmatpush3.msra.mxu1 %v7959_v45 }
  0x62   :  { %260 = vmatpush1.msra.mxu0 %v7926_v35  ;;  %6484 = vmatprep.subr.mxu1 %v11042_v1 }
  0x63   :  { %261 = vmatprep.subr.mxu0 %v7932_v37  ;;  %6485 = vmatpush3.msra.mxu1 %v7970_v47 }
  0x64   :  { %262 = vmatpush1.msra.mxu0 %v7936_v38  ;;  %146 = vperm.xlu0 %7384, %v141_v48   ;;  %v8043_v48 = vld [vmem:[#allocation7 + $0x110] sm:$0xff] }
  0x65   :  { %263 = vmatprep.subr.mxu0 %v7942_v40  ;;  %6486 = vmatprep.subr.mxu1 %v11042_v1  ;;  %11378 = vst [vmem:[#allocation33_spill] sm:$0xff] %v8043_v48 }
  0x66   :  { %264 = vmatpush1.msra.mxu0 %v7946_v41  ;;  %6487 = vmatpush3.msra.mxu1 %v7979_v49 }
  0x67   :  { %265 = vmatprep.subr.mxu0 %v7952_v43  ;;  %6488 = vmatprep.subr.mxu1 %v11042_v1 }
  0x68   :  { %266 = vmatpush1.msra.mxu0 %v7956_v44  ;;  %6489 = vmatpush3.msra.mxu1 %v7983_v50 }
  0x69   :  { %300 = vmatmul.mubr.f32.vlgmr.msra.gmra.mxu0 %v7965_v46  ;;  %151 = vperm.xlu0 %7384, %v142_v51   ;;  %v8047_v51 = vld [vmem:[#allocation7 + $0x108] sm:$0xff] }
  0x6a   :  { %539 = vmatprep.mubr.f32.mxu0 %v11042_v1  ;;  %6490 = vmatprep.subr.mxu1 %v11042_v1  ;;  %11379 = vst [vmem:[#allocation34_spill] sm:$0xff] %v8047_v51 }
  0x6b   :  { %6491 = vmatpush3.msra.mxu1 %v7991_v52  ;;  %475 = vmatprep.subr.mxu0 %v8004_v54 }
  0x6c   :  { %6492 = vmatprep.subr.mxu1 %v11042_v1  ;;  %476 = vmatpush1.msra.mxu0 %v8006_v55  ;;  %v8163_v55 = vld [vmem:[#allocation7 + $0x10] sm:$0xff] }
  0x6d   :  { %6493 = vmatpush3.msra.mxu1 %v7995_v53  ;;  %477 = vmatprep.subr.mxu0 %v8012_v57  ;;  %v8130_v57 = vld [vmem:[#allocation7 + $0x38] sm:$0xff]  ;;  %11416 = vst [vmem:[#allocation69_spill] sm:$0xff] %v8163_v55 }
  0x6e   :  { %6495 = vmatmul.mubr.f32.vlgmr.msra.gmra.mxu1 %v7965_v46  ;;  %6497 = vmatprep.subr.mxu1 %v11042_v1  ;;  %11406 = vst [vmem:[#allocation60_spill] sm:$0xff] %v8130_v57 }
  0x6f   :  { %6529 = vmatprep.mubr.msk.f32.mxu1 %vm7669_vm0, %v11042_v1  ;;  %6498 = vmatpush3.msra.mxu1 %v8008_v56 }
  0x70   :  { %6499 = vmatprep.subr.mxu1 %v11042_v1  ;;  %478 = vmatpush1.msra.mxu0 %v8014_v58  ;;  %v8109_v58 = vld [vmem:[#allocation7 + $0x68] sm:$0xff] }
  0x71   :  { %6500 = vmatpush3.msra.mxu1 %v8016_v59  ;;  %479 = vmatprep.subr.mxu0 %v8020_v60  ;;  %v8095_v60 = vld [vmem:[#allocation7 + $0xa0] sm:$0xff]  ;;  %11399 = vst [vmem:[#allocation54_spill] sm:$0xff] %v8109_v58  ;;  %v8123_v59 = vld [vmem:[#allocation7 + $0x48] sm:$0xff] }
  0x72   :  { %6501 = vmatprep.subr.mxu1 %v11042_v1  ;;  %480 = vmatpush1.msra.mxu0 %v8026_v62  ;;  %v8085_v62 = vld [vmem:[#allocation7 + $0xa8] sm:$0xff]  ;;  %11395 = vst [vmem:[#allocation50_spill] sm:$0xff] %v8095_v60  ;;  %11403 = vst [vmem:[#allocation58_spill] sm:$0xff] %v8123_v59 }
  0x73   :  { %6502 = vmatpush3.msra.mxu1 %v8022_v61  ;;  %481 = vmatprep.subr.mxu0 %v8033_v63  ;;  %v8049_v61 = vld [vmem:[#allocation7 + $0x118] sm:$0xff]  ;;  %11391 = vst [vmem:[#allocation46_spill] sm:$0xff] %v8085_v62 }
  0x74   :  { %6503 = vmatprep.subr.mxu1 %v11042_v1  ;;  %482 = vmatpush1.msra.mxu0 %v8037_v0  ;;  %11380 = vst [vmem:[#allocation35_spill] sm:$0xff] %v8049_v61  ;;  %v8053_v63 = vld [vmem:[#allocation7 + $0xf8] sm:$0xff]  ;;  %v8059_v0 = vld [vmem:[#allocation7 + $0x100] sm:$0xff] }
  0x75   :  { %6504 = vmatpush3.msra.mxu1 %v8039_v2  ;;  %483 = vmatprep.subr.mxu0 %v8043_v48  ;;  %11381 = vst [vmem:[#allocation36_spill] sm:$0xff] %v8053_v63  ;;  %v8057_v2 = vld [vmem:[#allocation7 + $0xf0] sm:$0xff]  ;;  %11383 = vst [vmem:[#allocation38_spill] sm:$0xff] %v8059_v0  ;;  %v8063_v48 = vld [vmem:[#allocation7 + $0xe0] sm:$0xff] }
  0x76   :  { %6505 = vmatprep.subr.mxu1 %v11042_v1  ;;  %484 = vmatpush1.msra.mxu0 %v8047_v51  ;;  %11382 = vst [vmem:[#allocation37_spill] sm:$0xff] %v8057_v2  ;;  %11384 = vst [vmem:[#allocation39_spill] sm:$0xff] %v8063_v48  ;;  %v8069_v51 = vld [vmem:[#allocation7 + $0xe8] sm:$0xff] }
  0x77   :  { %6506 = vmatpush3.msra.mxu1 %v8049_v61  ;;  %485 = vmatprep.subr.mxu0 %v8053_v63  ;;  %v8067_v61 = vld [vmem:[#allocation7 + $0xd8] sm:$0xff]  ;;  %11386 = vst [vmem:[#allocation41_spill] sm:$0xff] %v8069_v51  ;;  %v8073_v63 = vld [vmem:[#allocation7 + $0xc8] sm:$0xff] }
  0x78   :  { %6507 = vmatprep.subr.mxu1 %v11042_v1  ;;  %486 = vmatpush1.msra.mxu0 %v8057_v2  ;;  %11385 = vst [vmem:[#allocation40_spill] sm:$0xff] %v8067_v61  ;;  %11387 = vst [vmem:[#allocation42_spill] sm:$0xff] %v8073_v63  ;;  %v8079_v2 = vld [vmem:[#allocation7 + $0xd0] sm:$0xff] }
  0x79   :  { %6508 = vmatpush3.msra.mxu1 %v8059_v0  ;;  %487 = vmatprep.subr.mxu0 %v8063_v48  ;;  %v8077_v0 = vld [vmem:[#allocation7 + $0xc0] sm:$0xff]  ;;  %11389 = vst [vmem:[#allocation44_spill] sm:$0xff] %v8079_v2  ;;  %v8083_v48 = vld [vmem:[#allocation7 + $0xb0] sm:$0xff] }
  0x7a   :  { %6509 = vmatprep.subr.mxu1 %v11042_v1  ;;  %488 = vmatpush1.msra.mxu0 %v8067_v61  ;;  %11388 = vst [vmem:[#allocation43_spill] sm:$0xff] %v8077_v0  ;;  %11390 = vst [vmem:[#allocation45_spill] sm:$0xff] %v8083_v48  ;;  %v8087_v61 = vld [vmem:[#allocation7 + $0xb8] sm:$0xff] }
  0x7b   :  { %6510 = vmatpush3.msra.mxu1 %v8069_v51  ;;  %489 = vmatprep.subr.mxu0 %v8073_v63  ;;  %11392 = vst [vmem:[#allocation47_spill] sm:$0xff] %v8087_v61  ;;  %v8091_v63 = vld [vmem:[#allocation7 + $0x98] sm:$0xff]  ;;  %v8093_v51 = vld [vmem:[#allocation7 + $0x90] sm:$0xff] }
  0x7c   :  { %6511 = vmatprep.subr.mxu1 %v11042_v1  ;;  %490 = vmatpush1.msra.mxu0 %v8077_v0  ;;  %11393 = vst [vmem:[#allocation48_spill] sm:$0xff] %v8091_v63  ;;  %11394 = vst [vmem:[#allocation49_spill] sm:$0xff] %v8093_v51  ;;  %v8103_v0 = vld [vmem:[#allocation7 + $0x78] sm:$0xff] }
  0x7d   :  { %6512 = vmatpush3.msra.mxu1 %v8079_v2  ;;  %491 = vmatprep.subr.mxu0 %v8083_v48  ;;  %v8099_v2 = vld [vmem:[#allocation7 + $0x80] sm:$0xff]  ;;  %11397 = vst [vmem:[#allocation52_spill] sm:$0xff] %v8103_v0  ;;  %v8105_v48 = vld [vmem:[#allocation7 + $0x88] sm:$0xff] }
  0x7e   :  { %6513 = vmatprep.subr.mxu1 %v11042_v1  ;;  %492 = vmatpush1.msra.mxu0 %v8085_v62  ;;  %11396 = vst [vmem:[#allocation51_spill] sm:$0xff] %v8099_v2  ;;  %11398 = vst [vmem:[#allocation53_spill] sm:$0xff] %v8105_v48  ;;  %v8119_v62 = vld [vmem:[#allocation7 + $0x50] sm:$0xff] }
  0x7f   :  { %6514 = vmatpush3.msra.mxu1 %v8087_v61  ;;  %493 = vmatprep.subr.mxu0 %v8091_v63  ;;  %v8113_v61 = vld [vmem:[#allocation7 + $0x60] sm:$0xff]  ;;  %v8115_v63 = vld [vmem:[#allocation7 + $0x70] sm:$0xff]  ;;  %11402 = vst [vmem:[#allocation57_spill] sm:$0xff] %v8119_v62 }
  0x80   :  { %6515 = vmatprep.subr.mxu1 %v11042_v1  ;;  %494 = vmatpush1.msra.mxu0 %v8093_v51  ;;  %11400 = vst [vmem:[#allocation55_spill] sm:$0xff] %v8113_v61  ;;  %11401 = vst [vmem:[#allocation56_spill] sm:$0xff] %v8115_v63 }
  0x81   :  { %6516 = vmatpush3.msra.mxu1 %v8095_v60  ;;  %495 = vmatprep.subr.mxu0 %v8099_v2  ;;  %v8125_v60 = vld [vmem:[#allocation7 + $0x58] sm:$0xff]  ;;  %v11405_v2 = vlaneseq }
  0x82   :  { %6517 = vmatprep.subr.mxu1 %v11042_v1  ;;  %496 = vmatpush1.msra.mxu0 %v8103_v0  ;;  %11404 = vst [vmem:[#allocation59_spill] sm:$0xff] %v8125_v60  ;;  %v8140_v0 = vld [vmem:[#allocation7 + $0x20] sm:$0xff] }
  0x83   :  { %6518 = vmatpush3.msra.mxu1 %v8105_v48  ;;  %497 = vmatprep.subr.mxu0 %v8109_v58  ;;  %v156_v51 = vshrl.u32 %v11405_v2, 7  ;;  %v8134_v48 = vld [vmem:[#allocation7 + $0x30] sm:$0xff]  ;;  %v8136_v58 = vld [vmem:[#allocation7 + $0x40] sm:$0xff]  ;;  %11409 = vst [vmem:[#allocation63_spill] sm:$0xff] %v8140_v0  ;;  %v8144_v2 = vld [vmem:[#allocation7 + $0x18] sm:$0xff] }
  0x84   :  { %6519 = vmatprep.subr.mxu1 %v11042_v1  ;;  %498 = vmatpush1.msra.mxu0 %v8113_v61  ;;  %11407 = vst [vmem:[#allocation61_spill] sm:$0xff] %v8134_v48  ;;  %11408 = vst [vmem:[#allocation62_spill] sm:$0xff] %v8136_v58 }
  0x85   :  { %6520 = vmatpush3.msra.mxu1 %v8115_v63  ;;  %499 = vmatprep.subr.mxu0 %v8119_v62  ;;  %11410 = vst [vmem:[#allocation64_spill] sm:$0xff] %v8144_v2  ;;  %v8146_v63 = vld [vmem:[#allocation7 + $0x28] sm:$0xff]  ;;  %v8148_v62 = vsub.s32 0, %v156_v51  ;;  %v8150_v61 = vsub.s32 1, %v156_v51  ;;  %v165_v56 = vsub.s32 2, %v156_v51  ;;  %v8167_v51 = vld [vmem:[#allocation9 + $0x170] sm:$0xff] }
  0x86   :  { %6521 = vmatprep.subr.mxu1 %v11042_v1  ;;  %500 = vmatpush1.msra.mxu0 %v8123_v59  ;;  %11411 = vst [vmem:[#allocation65_spill] sm:$0xff] %v8146_v63  ;;  %v8161_v59 = vld [vmem:[#allocation7] sm:$0xff]  ;;  %11417 = vst [vmem:[#allocation70_spill] sm:$0xff] %v8167_v51 }
  0x87   :  { %6522 = vmatpush3.msra.mxu1 %v8125_v60  ;;  %501 = vmatprep.subr.mxu0 %v8130_v57  ;;  %11412 = vst [vmem:[#allocation66_spill] sm:$0xff] %v8148_v62  ;;  %v8154_v60 = vld [vmem:[#allocation7 + $0x8] sm:$0xff]  ;;  %v143_v57 = vld [vmem:[%s11414_s26] sm:$0x7]  ;;  %11415 = vst [vmem:[#allocation68_spill] sm:$0xff] %v8161_v59 }
  0x88   :  { %6523 = vmatprep.subr.mxu1 %v11042_v1  ;;  %502 = vmatpush1.msra.mxu0 %v8134_v48  ;;  %11413 = vst [vmem:[#allocation67_spill] sm:$0xff] %v8154_v60  ;;  %v166_v48 = vrot.slane %v143_v57, %v165_v56  ;;  %v378_v56 = vld [vmem:[%s11418_s1] sm:$0x3] }
  0x89   :  { %6524 = vmatpush3.msra.mxu1 %v8136_v58  ;;  %503 = vmatprep.subr.mxu0 %v8140_v0  ;;  %v158_v58 = vrot.slane %v143_v57, %v8148_v62  ;;  %v162_v0 = vrot.slane %v143_v57, %v8150_v61 }
  0x8a   :  { %6525 = vmatprep.subr.mxu1 %v11042_v1  ;;  %504 = vmatpush1.msra.mxu0 %v8144_v2 }
  0x8b   :  { %6526 = vmatpush3.msra.mxu1 %v8146_v63  ;;  %505 = vmatprep.subr.mxu0 %v8154_v60 }
  0x8c   :  { %6527 = vmatprep.subr.mxu1 %v11042_v1  ;;  %506 = vmatpush1.msra.mxu0 %v8161_v59 }
  0x8d   :  { %6528 = vmatpush3.msra.mxu1 %v8163_v55  ;;  %664 = vmatprep.subr.mxu0 %v8167_v51 }
  0x8e   :  { %6532 = vmatprep.subr.mxu1 %v11042_v1  ;;  %v383_v1 = vrot.slane %v378_v56, %v8148_v62 }
  0xdf   :  { %v147_v63 = vpop.permute.xlu0 %146 }
  0xe0   :  { %v170_v2 = vmul.f32 %v158_v58, %v147_v63  ;;  %v171_v54 = vmul.f32 %v162_v0, %v147_v63  ;;  %v172_v53 = vmul.f32 %v166_v48, %v147_v63 }
  0xe2   :  { %176 = vst [vmem:[#allocation2 + $0x28] sm:$0xff] %v170_v2  ;;  %177 = vst [vmem:[#allocation2 + $0x10] sm:$0xff] %v171_v54 }
  0xe3   :  { %178 = vst [vmem:[#allocation2 + $0x8] sm:$0xff] %v172_v53 }
  0xe4   :  { %v152_v60 = vpop.permute.xlu0 %151 }
  0xe5   :  { %v173_v44 = vmul.f32 %v158_v58, %v152_v60  ;;  %v174_v43 = vmul.f32 %v162_v0, %v152_v60  ;;  %v175_v52 = vmul.f32 %v166_v48, %v152_v60  ;;  %v387_v58 = vrot.slane %v378_v56, %v8150_v61 }
  0xe7   :  { %179 = vst [vmem:[#allocation2] sm:$0xff] %v173_v44  ;;  %180 = vst [vmem:[#allocation2 + $0x18] sm:$0xff] %v174_v43 }
  0xe8   :  { %181 = vst [vmem:[#allocation2 + $0x20] sm:$0xff] %v175_v52 }
  0xe9   :  { %v184_v57 = vld [vmem:[#allocation2 + $0x28] sm:$0x3]  ;;  %v185_v54 = vld [vmem:[#allocation2 + $0x10] sm:$0x3] }
 0x129   :  { %v301_v51 = vpop.f32.mrf.mxu0 }
 0x12a   :  { %v376_v55 = vadd.f32 %v301_v51, %v184_v57  ;;  %v8185_v51 = vld [vmem:[%s11419_s3] ss:$0 sm:$0xff]  ;;  %v186_v57 = vld [vmem:[#allocation2 + $0x8] sm:$0x3] }
 0x12b   :  { %v303_v63 = vpop.f32.mrf.mxu0 }
 0x12c   :  { %v390_v2 = vadd.f32 %v383_v1, %v376_v55  ;;  %v377_v59 = vadd.f32 %v303_v63, %v185_v54 }
 0x12e   :  { %v5947_v53 = vmul.f32 -1.442695, %v390_v2  ;;  %v391_v44 = vadd.f32 %v387_v58, %v377_v59  ;;  %v372_v43 = vpop.f32.mrf.mxu1  ;;  %v8191_v59 = vld [vmem:[%s11420_s30] ss:$0 sm:$0xff] }
 0x12f   :  { %v419_v55 = vadd.f32 %v8185_v51, %v372_v43  ;;  %v411_v63 = vadd.f32 %v8191_v59, %v186_v57  ;;  %v11421_v57 = vmov 0.0  }
 0x130   :  { %7385 = vpow2.f32 %v5947_v53  ;;  %v6496_v52 = vpop.f32.mrf.mxu1  ;;  %v5948_v60 = vmul.f32 -1.442695, %v391_v44 }
 0x132   :  { %7387 = vpow2.f32 %v5948_v60  ;;  %v8197_v60 = vld [vmem:[#allocation9 + $0x168] sm:$0xff] }
 0x13d   :  { %v7386_v0 = vpop.eup %7385 }
 0x13e   :  { %v398_v48 = vadd.f32 1.0, %v7386_v0  ;;  %v8199_v0 = vld [vmem:[#allocation9 + $0x178] sm:$0xff] }
 0x13f   :  { %v7388_v41 = vpop.eup %7387 }
 0x140   :  { %7389 = vrcp.f32 %v398_v48  ;;  %v399_v1 = vadd.f32 1.0, %v7388_v41  ;;  %v8201_v48 = vld [vmem:[#allocation9 + $0x158] sm:$0xff] }
 0x142   :  { %7391 = vrcp.f32 %v399_v1  ;;  %v8205_v1 = vld [vmem:[#allocation9 + $0x150] sm:$0xff] }
 0x14d   :  { %v7390_v56 = vpop.eup %7389 }
 0x14e   :  { %v420_v2 = vmul.f32 %v7390_v56, %v419_v55  ;;  %v8207_v55 = vld [vmem:[#allocation9 + $0x160] sm:$0xff]  ;;  %v8215_v56 = vld [vmem:[#allocation9 + $0x138] sm:$0xff] }
 0x14f   :  { %v7392_v53 = vpop.eup %7391  ;;  %11422 = vst [vmem:[#allocation71_spill] sm:$0xff] %v8215_v56 }
 0x150   :  { %v421_v54 = vadd.f32 %v420_v2, %v411_v63  ;;  %v423_v58 = vsub.f32 1.0, %v7392_v53  ;;  %v425_v41 = vmul.f32 %v7392_v53, %v7965_v46  ;;  %v8211_v46 = vld [vmem:[#allocation9 + $0x140] sm:$0xff]  ;;  %v8217_v63 = vld [vmem:[#allocation9 + $0x148] sm:$0xff]  ;;  %v8227_v53 = vld [vmem:[#allocation9 + $0x130] sm:$0xff] }
 0x151   :  { %11423 = vst [vmem:[#allocation72_spill] sm:$0xff] %v8217_v63  ;;  %v8221_v2 = vld [vmem:[#allocation9 + $0x128] sm:$0xff]  ;;  %11426 = vst [vmem:[#allocation75_spill] sm:$0xff] %v8227_v53 }
 0x152   :  { %7393 = vtanh.f32 %v421_v54  ;;  %11424 = vst [vmem:[#allocation73_spill] sm:$0xff] %v8221_v2  ;;  %v8225_v54 = vld [vmem:[#allocation9 + $0x120] sm:$0xff] }
 0x153   :  { %11425 = vst [vmem:[#allocation74_spill] sm:$0xff] %v8225_v54 }
 0x15f   :  { %v7394_v44 = vpop.eup %7393 }
 0x160   :  { %v424_v52 = vmul.f32 %v7394_v44, %v423_v58  ;;  %v8231_v58 = vld [vmem:[#allocation9 + $0x110] sm:$0xff]  ;;  %v8235_v44 = vld [vmem:[#allocation9 + $0x108] sm:$0xff] }
 0x161   :  { %11427 = vst [vmem:[#allocation76_spill] sm:$0xff] %v8231_v58  ;;  %11428 = vst [vmem:[#allocation77_spill] sm:$0xff] %v8235_v44 }
 0x162   :  { %v8195_v43 = vadd.f32 %v425_v41, %v424_v52  ;;  %v8237_v52 = vld [vmem:[#allocation9 + $0x118] sm:$0xff] }
 0x163   :  { %11429 = vst [vmem:[#allocation78_spill] sm:$0xff] %v8237_v52  ;;  %v8241_v41 = vld [vmem:[#allocation9 + $0xf8] sm:$0xff] }
 0x164   :  { %540 = vmatmul.mubr.f32.vlgmr.msra.gmra.mxu0 %v8195_v43  ;;  %6530 = vmatmul.mubr.f32.vlgmr.msra.gmra.mxu1 %v8195_v43  ;;  %11430 = vst [vmem:[#allocation79_spill] sm:$0xff] %v8241_v41 }
 0x165   :  { %665 = vmatpush1.msra.mxu0 %v8197_v60  ;;  %6533 = vmatpush3.msra.mxu1 %v8199_v0 }
 0x166   :  { %666 = vmatprep.subr.mxu0 %v8201_v48  ;;  %6534 = vmatprep.subr.mxu1 %v11421_v57 }
 0x167   :  { %667 = vmatpush1.msra.mxu0 %v8205_v1  ;;  %6535 = vmatpush3.msra.mxu1 %v8207_v55 }
 0x168   :  { %668 = vmatprep.subr.mxu0 %v8211_v46  ;;  %6536 = vmatprep.subr.mxu1 %v11421_v57 }
 0x169   :  { %669 = vmatpush1.msra.mxu0 %v8215_v56  ;;  %6537 = vmatpush3.msra.mxu1 %v8217_v63  ;;  %v8245_v63 = vld [vmem:[#allocation9 + $0xf0] sm:$0xff]  ;;  %v8247_v56 = vld [vmem:[#allocation9 + $0x100] sm:$0xff] }
 0x16a   :  { %670 = vmatprep.subr.mxu0 %v8221_v2  ;;  %6538 = vmatprep.subr.mxu1 %v11421_v57  ;;  %11431 = vst [vmem:[#allocation80_spill] sm:$0xff] %v8245_v63  ;;  %11432 = vst [vmem:[#allocation81_spill] sm:$0xff] %v8247_v56  ;;  %v8251_v2 = vld [vmem:[#allocation9 + $0xe0] sm:$0xff] }
 0x16b   :  { %671 = vmatpush1.msra.mxu0 %v8225_v54  ;;  %6539 = vmatpush3.msra.mxu1 %v8227_v53  ;;  %11433 = vst [vmem:[#allocation82_spill] sm:$0xff] %v8251_v2  ;;  %v8255_v53 = vld [vmem:[#allocation9 + $0xd8] sm:$0xff]  ;;  %v8257_v54 = vld [vmem:[#allocation9 + $0xe8] sm:$0xff] }
 0x16c   :  { %672 = vmatprep.subr.mxu0 %v8231_v58  ;;  %6540 = vmatprep.subr.mxu1 %v11421_v57  ;;  %11434 = vst [vmem:[#allocation83_spill] sm:$0xff] %v8255_v53  ;;  %11435 = vst [vmem:[#allocation84_spill] sm:$0xff] %v8257_v54  ;;  %v8261_v58 = vld [vmem:[#allocation9 + $0xc8] sm:$0xff] }
 0x16d   :  { %673 = vmatpush1.msra.mxu0 %v8235_v44  ;;  %6541 = vmatpush3.msra.mxu1 %v8237_v52  ;;  %11436 = vst [vmem:[#allocation85_spill] sm:$0xff] %v8261_v58  ;;  %v8265_v52 = vld [vmem:[#allocation9 + $0xc0] sm:$0xff]  ;;  %v8267_v44 = vld [vmem:[#allocation9 + $0xd0] sm:$0xff] }
 0x16e   :  { %674 = vmatprep.subr.mxu0 %v8241_v41  ;;  %6542 = vmatprep.subr.mxu1 %v11421_v57  ;;  %11437 = vst [vmem:[#allocation86_spill] sm:$0xff] %v8265_v52  ;;  %11438 = vst [vmem:[#allocation87_spill] sm:$0xff] %v8267_v44  ;;  %v8271_v41 = vld [vmem:[#allocation9 + $0xb0] sm:$0xff] }
 0x16f   :  { %675 = vmatpush1.msra.mxu0 %v8245_v63  ;;  %6543 = vmatpush3.msra.mxu1 %v8247_v56  ;;  %11439 = vst [vmem:[#allocation88_spill] sm:$0xff] %v8271_v41  ;;  %v8275_v56 = vld [vmem:[#allocation9 + $0xa8] sm:$0xff]  ;;  %v8277_v63 = vld [vmem:[#allocation9 + $0xb8] sm:$0xff] }
 0x170   :  { %676 = vmatprep.subr.mxu0 %v8251_v2  ;;  %6544 = vmatprep.subr.mxu1 %v11421_v57  ;;  %11440 = vst [vmem:[#allocation89_spill] sm:$0xff] %v8275_v56  ;;  %11441 = vst [vmem:[#allocation90_spill] sm:$0xff] %v8277_v63  ;;  %v8281_v2 = vld [vmem:[#allocation9 + $0x98] sm:$0xff] }
 0x171   :  { %677 = vmatpush1.msra.mxu0 %v8255_v53  ;;  %6545 = vmatpush3.msra.mxu1 %v8257_v54  ;;  %11442 = vst [vmem:[#allocation91_spill] sm:$0xff] %v8281_v2  ;;  %v8285_v54 = vld [vmem:[#allocation9 + $0x90] sm:$0xff]  ;;  %v8287_v53 = vld [vmem:[#allocation9 + $0xa0] sm:$0xff] }
 0x172   :  { %678 = vmatprep.subr.mxu0 %v8261_v58  ;;  %6546 = vmatprep.subr.mxu1 %v11421_v57  ;;  %11443 = vst [vmem:[#allocation92_spill] sm:$0xff] %v8285_v54  ;;  %11444 = vst [vmem:[#allocation93_spill] sm:$0xff] %v8287_v53  ;;  %v8291_v58 = vld [vmem:[#allocation9 + $0x80] sm:$0xff] }
 0x173   :  { %679 = vmatpush1.msra.mxu0 %v8265_v52  ;;  %6547 = vmatpush3.msra.mxu1 %v8267_v44  ;;  %11445 = vst [vmem:[#allocation94_spill] sm:$0xff] %v8291_v58  ;;  %v8295_v44 = vld [vmem:[#allocation9 + $0x78] sm:$0xff]  ;;  %v8297_v52 = vld [vmem:[#allocation9 + $0x88] sm:$0xff] }
 0x174   :  { %680 = vmatprep.subr.mxu0 %v8271_v41  ;;  %6548 = vmatprep.subr.mxu1 %v11421_v57  ;;  %11446 = vst [vmem:[#allocation95_spill] sm:$0xff] %v8295_v44  ;;  %11447 = vst [vmem:[#allocation96_spill] sm:$0xff] %v8297_v52  ;;  %v8301_v41 = vld [vmem:[#allocation9 + $0x68] sm:$0xff] }
 0x175   :  { %681 = vmatpush1.msra.mxu0 %v8275_v56  ;;  %6549 = vmatpush3.msra.mxu1 %v8277_v63  ;;  %11448 = vst [vmem:[#allocation97_spill] sm:$0xff] %v8301_v41  ;;  %v8305_v63 = vld [vmem:[#allocation9 + $0x60] sm:$0xff]  ;;  %v8307_v56 = vld [vmem:[#allocation9 + $0x70] sm:$0xff] }
 0x176   :  { %682 = vmatprep.subr.mxu0 %v8281_v2  ;;  %6550 = vmatprep.subr.mxu1 %v11421_v57  ;;  %11449 = vst [vmem:[#allocation98_spill] sm:$0xff] %v8305_v63  ;;  %11450 = vst [vmem:[#allocation99_spill] sm:$0xff] %v8307_v56  ;;  %v8311_v2 = vld [vmem:[#allocation9 + $0x50] sm:$0xff] }
 0x177   :  { %683 = vmatpush1.msra.mxu0 %v8285_v54  ;;  %6551 = vmatpush3.msra.mxu1 %v8287_v53  ;;  %11451 = vst [vmem:[#allocation100_spill] sm:$0xff] %v8311_v2  ;;  %v8315_v53 = vld [vmem:[#allocation9 + $0x48] sm:$0xff]  ;;  %v8317_v54 = vld [vmem:[#allocation9 + $0x58] sm:$0xff] }
 0x178   :  { %684 = vmatprep.subr.mxu0 %v8291_v58  ;;  %6552 = vmatprep.subr.mxu1 %v11421_v57  ;;  %11452 = vst [vmem:[#allocation101_spill] sm:$0xff] %v8317_v54  ;;  %v8321_v58 = vld [vmem:[#allocation9 + $0x38] sm:$0xff] }
 0x179   :  { %685 = vmatpush1.msra.mxu0 %v8295_v44  ;;  %6553 = vmatpush3.msra.mxu1 %v8297_v52  ;;  %11453 = vst [vmem:[#allocation102_spill] sm:$0xff] %v8321_v58  ;;  %v8325_v52 = vld [vmem:[#allocation9 + $0x30] sm:$0xff]  ;;  %v8327_v44 = vld [vmem:[#allocation9 + $0x40] sm:$0xff] }
 0x17a   :  { %686 = vmatprep.subr.mxu0 %v8301_v41  ;;  %6554 = vmatprep.subr.mxu1 %v11421_v57  ;;  %11454 = vst [vmem:[#allocation103_spill] sm:$0xff] %v8325_v52  ;;  %v8331_v41 = vld [vmem:[#allocation9 + $0x20] sm:$0xff] }
 0x17b   :  { %687 = vmatpush1.msra.mxu0 %v8305_v63  ;;  %6555 = vmatpush3.msra.mxu1 %v8307_v56  ;;  %v8335_v56 = vld [vmem:[#allocation9 + $0x18] sm:$0xff]  ;;  %v8337_v63 = vld [vmem:[#allocation9 + $0x28] sm:$0xff] }
 0x17c   :  { %688 = vmatprep.subr.mxu0 %v8311_v2  ;;  %6556 = vmatprep.subr.mxu1 %v11421_v57  ;;  %v8341_v2 = vld [vmem:[#allocation9 + $0x8] sm:$0xff] }
 0x17d   :  { %689 = vmatpush1.msra.mxu0 %v8315_v53  ;;  %6557 = vmatpush3.msra.mxu1 %v8317_v54  ;;  %v8345_v54 = vld [vmem:[#allocation9] sm:$0xff] }
 0x17e   :  { %690 = vmatprep.subr.mxu0 %v8321_v58  ;;  %6558 = vmatprep.subr.mxu1 %v11421_v57  ;;  %v8349_v58 = vld [vmem:[#allocation9 + $0x10] sm:$0xff] }
 0x17f   :  { %691 = vmatpush1.msra.mxu0 %v8325_v52  ;;  %6559 = vmatpush3.msra.mxu1 %v8327_v44  ;;  %v8354_v52 = vld [vmem:[%s11455_s2] sm:$0x3] }
 0x180   :  { %692 = vmatprep.subr.mxu0 %v8331_v41  ;;  %6560 = vmatprep.subr.mxu1 %v11421_v57 }
 0x181   :  { %693 = vmatpush1.msra.mxu0 %v8335_v56  ;;  %6561 = vmatpush3.msra.mxu1 %v8337_v63 }
 0x182   :  { %694 = vmatprep.subr.mxu0 %v8341_v2  ;;  %6562 = vmatprep.subr.mxu1 %v11421_v57 }
 0x183   :  { %695 = vmatpush1.msra.mxu0 %v8345_v54  ;;  %728 = vmatprep.mubr.f32.mxu0 %v11421_v57 }
 0x184   :  { %6563 = vmatpush3.msra.mxu1 %v8349_v58  ;;  %729 = vmatmul.mubr.f32.vlgmr.msra.gmra.mxu0 %v8354_v52 }
 0x185   :  { %6564 = vmatprep.mubr.msk.f32.mxu1 %vm7669_vm0, %v11421_v57  ;;  %908 = vmatprep.subr.mxu0 %v7828_v3  ;;  %v11456_v3 = vld [vmem:[#allocation16_spill] sm:$0xff] }
 0x186   :  { %6567 = vmatprep.subr.mxu1 %v11421_v57  ;;  %6565 = vmatmul.mubr.f32.vlgmr.msra.gmra.mxu1 %v8354_v52 }
 0x187   :  { %909 = vmatpush1.msra.mxu0 %v7830_v4  ;;  %6568 = vmatpush3.msra.mxu1 %v7867_v17  ;;  %v11457_v4 = vld [vmem:[#allocation19_spill] sm:$0xff]  ;;  %v11470_v17 = vld [vmem:[#allocation30_spill] sm:$0xff] }
 0x188   :  { %910 = vmatprep.subr.mxu0 %v7832_v5  ;;  %6569 = vmatprep.subr.mxu1 %v11421_v57  ;;  %v11458_v5 = vld [vmem:[#allocation17_spill] sm:$0xff] }
 0x189   :  { %911 = vmatpush1.msra.mxu0 %v7835_v6  ;;  %6570 = vmatpush3.msra.mxu1 %v7869_v18  ;;  %v11459_v6 = vld [vmem:[#allocation18_spill] sm:$0xff]  ;;  %v11471_v18 = vld [vmem:[#allocation31_spill] sm:$0xff] }
 0x18a   :  { %912 = vmatprep.subr.mxu0 %v7838_v7  ;;  %6571 = vmatprep.subr.mxu1 %v11421_v57  ;;  %v11460_v7 = vld [vmem:[#allocation20_spill] sm:$0xff] }
 0x18b   :  { %913 = vmatpush1.msra.mxu0 %v7841_v8  ;;  %6572 = vmatpush3.msra.mxu1 %v7879_v21  ;;  %v11461_v8 = vld [vmem:[#allocation21_spill] sm:$0xff]  ;;  %v11474_v21 = vld [vmem:[#allocation34_spill] sm:$0xff] }
 0x18c   :  { %914 = vmatprep.subr.mxu0 %v7844_v9  ;;  %6573 = vmatprep.subr.mxu1 %v11421_v57  ;;  %v11462_v9 = vld [vmem:[#allocation22_spill] sm:$0xff] }
 0x18d   :  { %915 = vmatpush1.msra.mxu0 %v7847_v10  ;;  %6574 = vmatpush3.msra.mxu1 %v7889_v24  ;;  %v11463_v10 = vld [vmem:[#allocation23_spill] sm:$0xff]  ;;  %v11477_v24 = vld [vmem:[#allocation37_spill] sm:$0xff] }
 0x18e   :  { %916 = vmatprep.subr.mxu0 %v7850_v11  ;;  %6575 = vmatprep.subr.mxu1 %v11421_v57  ;;  %v11464_v11 = vld [vmem:[#allocation24_spill] sm:$0xff] }
 0x18f   :  { %917 = vmatpush1.msra.mxu0 %v7853_v12  ;;  %6576 = vmatpush3.msra.mxu1 %v7899_v27  ;;  %v11465_v12 = vld [vmem:[#allocation25_spill] sm:$0xff]  ;;  %v11480_v27 = vld [vmem:[#allocation40_spill] sm:$0xff] }
 0x190   :  { %918 = vmatprep.subr.mxu0 %v7856_v13  ;;  %6577 = vmatprep.subr.mxu1 %v11421_v57  ;;  %v11466_v13 = vld [vmem:[#allocation26_spill] sm:$0xff] }
 0x191   :  { %919 = vmatpush1.msra.mxu0 %v7859_v14  ;;  %6578 = vmatpush3.msra.mxu1 %v7909_v30  ;;  %v11467_v14 = vld [vmem:[#allocation27_spill] sm:$0xff] }
 0x192   :  { %920 = vmatprep.subr.mxu0 %v7862_v15  ;;  %6579 = vmatprep.subr.mxu1 %v11421_v57  ;;  %v11468_v15 = vld [vmem:[#allocation29_spill] sm:$0xff]  ;;  %v11483_v30 = vld [vmem:[#allocation43_spill] sm:$0xff] }
 0x193   :  { %921 = vmatpush1.msra.mxu0 %v7865_v16  ;;  %6580 = vmatpush3.msra.mxu1 %v7919_v33  ;;  %v11469_v16 = vld [vmem:[#allocation28_spill] sm:$0xff]  ;;  %v11486_v33 = vld [vmem:[#allocation46_spill] sm:$0xff] }
 0x194   :  { %922 = vmatprep.subr.mxu0 %v7872_v19  ;;  %6581 = vmatprep.subr.mxu1 %v11421_v57  ;;  %v11472_v19 = vld [vmem:[#allocation32_spill] sm:$0xff] }
 0x195   :  { %923 = vmatpush1.msra.mxu0 %v7876_v20  ;;  %6582 = vmatpush3.msra.mxu1 %v7929_v36  ;;  %v11473_v20 = vld [vmem:[#allocation33_spill] sm:$0xff] }
 0x196   :  { %924 = vmatprep.subr.mxu0 %v7882_v22  ;;  %6583 = vmatprep.subr.mxu1 %v11421_v57  ;;  %v11475_v22 = vld [vmem:[#allocation35_spill] sm:$0xff]  ;;  %v11489_v36 = vld [vmem:[#allocation49_spill] sm:$0xff] }
 0x197   :  { %925 = vmatpush1.msra.mxu0 %v7886_v23  ;;  %6584 = vmatpush3.msra.mxu1 %v7939_v39  ;;  %v11476_v23 = vld [vmem:[#allocation36_spill] sm:$0xff] }
 0x198   :  { %926 = vmatprep.subr.mxu0 %v7892_v25  ;;  %6585 = vmatprep.subr.mxu1 %v11421_v57  ;;  %v11478_v25 = vld [vmem:[#allocation38_spill] sm:$0xff]  ;;  %v11492_v39 = vld [vmem:[#allocation52_spill] sm:$0xff] }
 0x199   :  { %927 = vmatpush1.msra.mxu0 %v7896_v26  ;;  %6586 = vmatpush3.msra.mxu1 %v7949_v42  ;;  %v11479_v26 = vld [vmem:[#allocation39_spill] sm:$0xff]  ;;  %v11494_v42 = vld [vmem:[#allocation54_spill] sm:$0xff] }
 0x19a   :  { %928 = vmatprep.subr.mxu0 %v7902_v28  ;;  %6587 = vmatprep.subr.mxu1 %v11421_v57  ;;  %v11481_v28 = vld [vmem:[#allocation41_spill] sm:$0xff] }
 0x19b   :  { %929 = vmatpush1.msra.mxu0 %v7906_v29  ;;  %6588 = vmatpush3.msra.mxu1 %v7959_v45  ;;  %v11482_v29 = vld [vmem:[#allocation42_spill] sm:$0xff]  ;;  %v11495_v45 = vld [vmem:[#allocation55_spill] sm:$0xff] }
 0x19c   :  { %930 = vmatprep.subr.mxu0 %v7912_v31  ;;  %6589 = vmatprep.subr.mxu1 %v11421_v57  ;;  %v11484_v31 = vld [vmem:[#allocation44_spill] sm:$0xff] }
 0x19d   :  { %931 = vmatpush1.msra.mxu0 %v7916_v32  ;;  %6590 = vmatpush3.msra.mxu1 %v7970_v47  ;;  %v11485_v32 = vld [vmem:[#allocation45_spill] sm:$0xff]  ;;  %v11496_v47 = vld [vmem:[#allocation56_spill] sm:$0xff] }
 0x19e   :  { %932 = vmatprep.subr.mxu0 %v7922_v34  ;;  %6591 = vmatprep.subr.mxu1 %v11421_v57  ;;  %v11487_v34 = vld [vmem:[#allocation47_spill] sm:$0xff] }
 0x19f   :  { %933 = vmatpush1.msra.mxu0 %v7926_v35  ;;  %6592 = vmatpush3.msra.mxu1 %v7979_v49  ;;  %v11488_v35 = vld [vmem:[#allocation48_spill] sm:$0xff]  ;;  %v11497_v49 = vld [vmem:[#allocation57_spill] sm:$0xff] }
 0x1a0   :  { %934 = vmatprep.subr.mxu0 %v7932_v37  ;;  %6593 = vmatprep.subr.mxu1 %v11421_v57  ;;  %v11490_v37 = vld [vmem:[#allocation50_spill] sm:$0xff] }
 0x1a1   :  { %935 = vmatpush1.msra.mxu0 %v7936_v38  ;;  %6594 = vmatpush3.msra.mxu1 %v7983_v50  ;;  %v11491_v38 = vld [vmem:[#allocation51_spill] sm:$0xff]  ;;  %v11498_v50 = vld [vmem:[#allocation58_spill] sm:$0xff] }
 0x1a2   :  { %936 = vmatprep.subr.mxu0 %v7942_v40  ;;  %6595 = vmatprep.subr.mxu1 %v11421_v57  ;;  %v11493_v40 = vld [vmem:[#allocation53_spill] sm:$0xff] }
 0x1a3   :  { %937 = vmatpush1.msra.mxu0 %v11456_v3  ;;  %6596 = vmatpush3.msra.mxu1 %v11457_v4  ;;  %v11499_v3 = vld [vmem:[#allocation59_spill] sm:$0xff]  ;;  %v11500_v4 = vld [vmem:[#allocation60_spill] sm:$0xff] }
 0x1a4   :  { %938 = vmatprep.subr.mxu0 %v11458_v5  ;;  %6597 = vmatprep.subr.mxu1 %v11421_v57  ;;  %v11501_v5 = vld [vmem:[#allocation61_spill] sm:$0xff] }
 0x1a5   :  { %939 = vmatpush1.msra.mxu0 %v11459_v6  ;;  %972 = vmatprep.mubr.f32.mxu0 %v11421_v57  ;;  %v11502_v6 = vld [vmem:[#allocation62_spill] sm:$0xff] }
 0x1a6   :  { %6598 = vmatpush3.msra.mxu1 %v11460_v7  ;;  %6599 = vmatprep.mubr.msk.f32.mxu1 %vm7669_vm0, %v11421_v57  ;;  %v11503_v7 = vld [vmem:[#allocation63_spill] sm:$0xff] }
 0x1a7   :  { %973 = vmatmul.mubr.f32.vlgmr.msra.gmra.mxu0 %v8195_v43  ;;  %6600 = vmatmul.mubr.f32.vlgmr.msra.gmra.mxu1 %v8195_v43 }
 0x1a8   :  { %1163 = vmatprep.subr.mxu0 %v11461_v8  ;;  %6602 = vmatprep.subr.mxu1 %v11421_v57  ;;  %v11504_v8 = vld [vmem:[#allocation64_spill] sm:$0xff] }
 0x1a9   :  { %1164 = vmatpush1.msra.mxu0 %v11462_v9  ;;  %6603 = vmatpush3.msra.mxu1 %v11463_v10  ;;  %v11505_v9 = vld [vmem:[#allocation65_spill] sm:$0xff]  ;;  %v11506_v10 = vld [vmem:[#allocation67_spill] sm:$0xff] }
 0x1aa   :  { %1165 = vmatprep.subr.mxu0 %v11464_v11  ;;  %6604 = vmatprep.subr.mxu1 %v11421_v57  ;;  %v11507_v11 = vld [vmem:[#allocation68_spill] sm:$0xff] }
 0x1ab   :  { %1166 = vmatpush1.msra.mxu0 %v11465_v12  ;;  %6605 = vmatpush3.msra.mxu1 %v11466_v13  ;;  %v11508_v12 = vld [vmem:[#allocation69_spill] sm:$0xff]  ;;  %v11509_v13 = vld [vmem:[#allocation70_spill] sm:$0xff] }
 0x1ac   :  { %1167 = vmatprep.subr.mxu0 %v11467_v14  ;;  %6606 = vmatprep.subr.mxu1 %v11421_v57 }
 0x1ad   :  { %1168 = vmatpush1.msra.mxu0 %v11468_v15  ;;  %6607 = vmatpush3.msra.mxu1 %v11469_v16 }
 0x1ae   :  { %1169 = vmatprep.subr.mxu0 %v11470_v17  ;;  %6608 = vmatprep.subr.mxu1 %v11421_v57  ;;  %v807_v17 = vld [vmem:[%s10973_s10] sm:$0x3] }
 0x1af   :  { %1170 = vmatpush1.msra.mxu0 %v11471_v18  ;;  %6609 = vmatpush3.msra.mxu1 %v11472_v19  ;;  %v812_v19 = vrot.slane %v807_v17, %v8148_v62 }
 0x1b0   :  { %1171 = vmatprep.subr.mxu0 %v11473_v20  ;;  %6610 = vmatprep.subr.mxu1 %v11421_v57 }
 0x1b1   :  { %1172 = vmatpush1.msra.mxu0 %v11474_v21  ;;  %6611 = vmatpush3.msra.mxu1 %v11475_v22 }
 0x1b2   :  { %1173 = vmatprep.subr.mxu0 %v11476_v23  ;;  %6612 = vmatprep.subr.mxu1 %v11421_v57 }
 0x1b3   :  { %1174 = vmatpush1.msra.mxu0 %v11477_v24  ;;  %6613 = vmatpush3.msra.mxu1 %v11478_v25 }
 0x1b4   :  { %1175 = vmatprep.subr.mxu0 %v11479_v26  ;;  %6614 = vmatprep.subr.mxu1 %v11421_v57 }
 0x1b5   :  { %1176 = vmatpush1.msra.mxu0 %v11480_v27  ;;  %6615 = vmatpush3.msra.mxu1 %v11481_v28  ;;  %v816_v28 = vrot.slane %v807_v17, %v8150_v61 }
 0x1b6   :  { %1177 = vmatprep.subr.mxu0 %v11482_v29  ;;  %6616 = vmatprep.subr.mxu1 %v11421_v57 }
 0x1b7   :  { %1178 = vmatpush1.msra.mxu0 %v11483_v30  ;;  %6617 = vmatpush3.msra.mxu1 %v11484_v31 }
 0x1b8   :  { %1179 = vmatprep.subr.mxu0 %v11485_v32  ;;  %6618 = vmatprep.subr.mxu1 %v11421_v57 }
 0x1b9   :  { %1180 = vmatpush1.msra.mxu0 %v11486_v33  ;;  %6619 = vmatpush3.msra.mxu1 %v11487_v34  ;;  %v8511_v34 = vld [vmem:[%s10975_s12] ss:$0 sm:$0xff] }
 0x1ba   :  { %1181 = vmatprep.subr.mxu0 %v11488_v35  ;;  %6620 = vmatprep.subr.mxu1 %v11421_v57 }
 0x1bb   :  { %1182 = vmatpush1.msra.mxu0 %v11489_v36  ;;  %6621 = vmatpush3.msra.mxu1 %v11490_v37  ;;  %v1057_v37 = vld [vmem:[%s11418_s1] sm:$0x3] }
 0x1bc   :  { %1183 = vmatprep.subr.mxu0 %v11491_v38  ;;  %6622 = vmatprep.subr.mxu1 %v11421_v57  ;;  %v8520_v38 = vld [vmem:[%s10974_s11] ss:$0 sm:$0xff] }
 0x1bd   :  { %1184 = vmatpush1.msra.mxu0 %v11492_v39  ;;  %6623 = vmatpush3.msra.mxu1 %v11493_v40 }
 0x1be   :  { %1185 = vmatprep.subr.mxu0 %v11494_v42  ;;  %6624 = vmatprep.subr.mxu1 %v11421_v57 }
 0x1bf   :  { %1186 = vmatpush1.msra.mxu0 %v11495_v45  ;;  %6625 = vmatpush3.msra.mxu1 %v11496_v47  ;;  %v1062_v47 = vrot.slane %v1057_v37, %v8148_v62 }
 0x1c0   :  { %1187 = vmatprep.subr.mxu0 %v11497_v49  ;;  %6626 = vmatprep.subr.mxu1 %v11421_v57 }
 0x1c1   :  { %1188 = vmatpush1.msra.mxu0 %v11498_v50  ;;  %6627 = vmatpush3.msra.mxu1 %v11499_v3  ;;  %v857_v3 = vld [vmem:[#allocation2 + $0x28] sm:$0xc] }
 0x1c2   :  { %1189 = vmatprep.subr.mxu0 %v11500_v4  ;;  %6628 = vmatprep.subr.mxu1 %v11421_v57 }
 0x1c3   :  { %1190 = vmatpush1.msra.mxu0 %v11501_v5  ;;  %6629 = vmatpush3.msra.mxu1 %v11502_v6 }
 0x1c4   :  { %1191 = vmatprep.subr.mxu0 %v11503_v7  ;;  %6630 = vmatprep.subr.mxu1 %v11421_v57 }
 0x1c5   :  { %1192 = vmatpush1.msra.mxu0 %v11504_v8  ;;  %6631 = vmatpush3.msra.mxu1 %v11505_v9 }
 0x1c6   :  { %1193 = vmatprep.subr.mxu0 %v11506_v10  ;;  %6632 = vmatprep.subr.mxu1 %v11421_v57  ;;  %v858_v10 = vld [vmem:[#allocation2 + $0x10] sm:$0xc] }
 0x1c7   :  { %1194 = vmatpush1.msra.mxu0 %v11507_v11  ;;  %6633 = vmatpush3.msra.mxu1 %v11508_v12 }
 0x1c8   :  { %1227 = vmatprep.mubr.f32.mxu0 %v11421_v57  ;;  %6634 = vmatprep.mubr.msk.f32.mxu1 %vm7669_vm0, %v11421_v57 }
 0x1c9   :  { %1352 = vmatprep.subr.mxu0 %v11509_v13  ;;  %6637 = vmatprep.subr.mxu1 %v11421_v57  ;;  %v1066_v13 = vrot.slane %v1057_v37, %v8150_v61 }
 0x224   :  { %v612_v14 = vpop.f32.mrf.mxu1  ;;  %v541_v16 = vpop.f32.mrf.mxu0 }
 0x225   :  { %v840_v49 = vadd.f32 %v8520_v38, %v612_v14 }
 0x226   :  { %v6531_v15 = vpop.f32.mrf.mxu1  ;;  %v543_v18 = vpop.f32.mrf.mxu0 }
 0x244   :  { %v730_v20 = vpop.f32.mrf.mxu0 }
 0x245   :  { %v805_v21 = vadd.f32 %v730_v20, %v541_v16 }
 0x246   :  { %v732_v22 = vpop.f32.mrf.mxu0  ;;  %v801_v23 = vpop.f32.mrf.mxu1 }
 0x247   :  { %v819_v24 = vadd.f32 %v812_v19, %v805_v21  ;;  %v806_v27 = vadd.f32 %v732_v22, %v543_v18  ;;  %v848_v36 = vadd.f32 %v8511_v34, %v801_v23 }
 0x248   :  { %v6566_v25 = vpop.f32.mrf.mxu1 }
 0x249   :  { %v5951_v26 = vmul.f32 -1.442695, %v819_v24  ;;  %v820_v29 = vadd.f32 %v816_v28, %v806_v27  ;;  %v859_v27 = vld [vmem:[#allocation2 + $0x8] sm:$0xc] }
 0x24b   :  { %7395 = vpow2.f32 %v5951_v26  ;;  %v5952_v30 = vmul.f32 -1.442695, %v820_v29 }
 0x24d   :  { %7397 = vpow2.f32 %v5952_v30  ;;  %v1090_v30 = vadd.f32 %v8191_v59, %v859_v27  ;;  %v11510_v59 = vld [vmem:[#allocation71_spill] sm:$0xff]  ;;  %v8638_v27 = vld [vmem:[#allocation5 + $0x130] sm:$0xff] }
 0x258   :  { %v7396_v31 = vpop.eup %7395 }
 0x259   :  { %v827_v32 = vadd.f32 1.0, %v7396_v31 }
 0x25a   :  { %v7398_v33 = vpop.eup %7397 }
 0x25b   :  { %7399 = vrcp.f32 %v827_v32  ;;  %v828_v35 = vadd.f32 1.0, %v7398_v33 }
 0x25d   :  { %7401 = vrcp.f32 %v828_v35  ;;  %v1108_v35 = vrot.slane %v8195_v43, 6  ;;  %v11511_v43 = vld [vmem:[#allocation72_spill] sm:$0xff] }
 0x267   :  { %v974_v39 = vpop.f32.mrf.mxu0  ;;  %v1045_v40 = vpop.f32.mrf.mxu1 }
 0x268   :  { %v7400_v42 = vpop.eup %7399  ;;  %v1051_v45 = vrot.slane %v974_v39, 6  ;;  %v1098_v25 = vadd.f32 %v8185_v51, %v1045_v40  ;;  %v11512_v40 = vld [vmem:[#allocation73_spill] sm:$0xff] }
 0x269   :  { %v849_v50 = vmul.f32 %v7400_v42, %v848_v36  ;;  %v976_v4 = vpop.f32.mrf.mxu0  ;;  %v6601_v5 = vpop.f32.mrf.mxu1 }
 0x26a   :  { %v1055_v6 = vadd.f32 %v1051_v45, %v857_v3  ;;  %v1052_v7 = vrot.slane %v976_v4, 6  ;;  %v7402_v16 = vpop.eup %7401  ;;  %v1100_v28 = vrot.slane %v1098_v25, 6  ;;  %v11519_v45 = vld [vmem:[#allocation80_spill] sm:$0xff]  ;;  %v11524_v4 = vld [vmem:[#allocation85_spill] sm:$0xff]  ;;  %v11525_v5 = vld [vmem:[#allocation86_spill] sm:$0xff] }
 0x26b   :  { %v850_v8 = vadd.f32 %v849_v50, %v840_v49  ;;  %v852_v14 = vsub.f32 1.0, %v7402_v16  ;;  %v854_v20 = vmul.f32 %v7402_v16, %v8354_v52  ;;  %v11521_v49 = vld [vmem:[#allocation82_spill] sm:$0xff]  ;;  %v11522_v50 = vld [vmem:[#allocation83_spill] sm:$0xff]  ;;  %v11523_v3 = vld [vmem:[#allocation84_spill] sm:$0xff] }
 0x26c   :  { %v1069_v9 = vadd.f32 %v1062_v47, %v1055_v6  ;;  %v1056_v12 = vadd.f32 %v1052_v7, %v858_v10  ;;  %v11520_v47 = vld [vmem:[#allocation81_spill] sm:$0xff]  ;;  %v11526_v6 = vld [vmem:[#allocation87_spill] sm:$0xff]  ;;  %v11527_v7 = vld [vmem:[#allocation88_spill] sm:$0xff] }
 0x26d   :  { %7403 = vtanh.f32 %v850_v8  ;;  %v11528_v8 = vld [vmem:[#allocation89_spill] sm:$0xff]  ;;  %v11530_v10 = vld [vmem:[#allocation91_spill] sm:$0xff]  ;;  %v11535_v16 = vld [vmem:[#allocation96_spill] sm:$0xff] }
 0x26e   :  { %v5955_v11 = vmul.f32 -1.442695, %v1069_v9  ;;  %v1070_v15 = vadd.f32 %v1066_v13, %v1056_v12  ;;  %v11529_v9 = vld [vmem:[#allocation90_spill] sm:$0xff]  ;;  %v11532_v12 = vld [vmem:[#allocation93_spill] sm:$0xff] }
 0x26f   :  { %v11533_v13 = vld [vmem:[#allocation94_spill] sm:$0xff]  ;;  %v8632_v25 = vld [vmem:[#allocation5 + $0x128] sm:$0xff] }
 0x270   :  { %7405 = vpow2.f32 %v5955_v11  ;;  %v5956_v17 = vmul.f32 -1.442695, %v1070_v15  ;;  %v11531_v11 = vld [vmem:[#allocation92_spill] sm:$0xff]  ;;  %v11534_v15 = vld [vmem:[#allocation95_spill] sm:$0xff] }
 0x272   :  { %7407 = vpow2.f32 %v5956_v17  ;;  %v11536_v17 = vld [vmem:[#allocation97_spill] sm:$0xff] }
 0x27a   :  { %v7404_v18 = vpop.eup %7403 }
 0x27b   :  { %v853_v19 = vmul.f32 %v7404_v18, %v852_v14  ;;  %v11537_v14 = vld [vmem:[#allocation98_spill] sm:$0xff]  ;;  %v11538_v18 = vld [vmem:[#allocation99_spill] sm:$0xff] }
 0x27d   :  { %v7406_v21 = vpop.eup %7405  ;;  %v8526_v22 = vadd.f32 %v854_v20, %v853_v19  ;;  %v11539_v19 = vld [vmem:[#allocation100_spill] sm:$0xff]  ;;  %v11540_v20 = vld [vmem:[#allocation101_spill] sm:$0xff] }
 0x27e   :  { %v1077_v23 = vadd.f32 1.0, %v7406_v21  ;;  %v11541_v21 = vld [vmem:[#allocation102_spill] sm:$0xff] }
 0x27f   :  { %856 = vst [vmem:[#allocation3] sm:$0x3] %v8526_v22  ;;  %v7408_v24 = vpop.eup %7407 }
 0x280   :  { %7409 = vrcp.f32 %v1077_v23  ;;  %v1078_v26 = vadd.f32 1.0, %v7408_v24  ;;  %v11542_v23 = vld [vmem:[#allocation103_spill] sm:$0xff]  ;;  %v8628_v24 = vld [vmem:[#allocation5 + $0x148] sm:$0xff] }
 0x282   :  { %7411 = vrcp.f32 %v1078_v26  ;;  %v8636_v26 = vld [vmem:[#allocation5 + $0x120] sm:$0xff] }
 0x28d   :  { %v7410_v29 = vpop.eup %7409 }
 0x28e   :  { %v1102_v31 = vmul.f32 %v7410_v29, %v1100_v28  ;;  %v8642_v28 = vld [vmem:[#allocation5 + $0x110] sm:$0xff]  ;;  %v8646_v29 = vld [vmem:[#allocation5 + $0x108] sm:$0xff] }
 0x28f   :  { %v7412_v52 = vpop.eup %7411 }
 0x290   :  { %v1103_v32 = vadd.f32 %v1102_v31, %v1090_v30  ;;  %v1105_v33 = vsub.f32 1.0, %v7412_v52  ;;  %v1110_v39 = vmul.f32 %v7412_v52, %v1108_v35  ;;  %v8648_v30 = vld [vmem:[#allocation5 + $0x118] sm:$0xff]  ;;  %v8658_v52 = vld [vmem:[#allocation5 + $0x100] sm:$0xff] }
 0x291   :  { %v8652_v31 = vld [vmem:[#allocation5 + $0xf8] sm:$0xff] }
 0x292   :  { %7413 = vtanh.f32 %v1103_v32  ;;  %v8656_v32 = vld [vmem:[#allocation5 + $0xf0] sm:$0xff]  ;;  %v8666_v35 = vld [vmem:[#allocation5 + $0xd8] sm:$0xff] }
 0x29f   :  { %v7414_v36 = vpop.eup %7413 }
 0x2a0   :  { %v1106_v37 = vmul.f32 %v7414_v36, %v1105_v33  ;;  %v8662_v33 = vld [vmem:[#allocation5 + $0xe0] sm:$0xff]  ;;  %v8668_v36 = vld [vmem:[#allocation5 + $0xe8] sm:$0xff] }
 0x2a2   :  { %v8532_v42 = vadd.f32 %v1110_v39, %v1106_v37  ;;  %v8672_v37 = vld [vmem:[#allocation5 + $0xc8] sm:$0xff]  ;;  %v8676_v39 = vld [vmem:[#allocation5 + $0xc0] sm:$0xff] }
 0x2a4   :  { %v8535_v51 = vrot.slane %v8532_v42, 2 }
 0x2a6   :  { %1228 = vmatmul.mubr.f32.vlgmr.msra.gmra.mxu0 %v8535_v51  ;;  %6635 = vmatmul.mubr.f32.vlgmr.msra.gmra.mxu1 %v8535_v51 }
 0x2a7   :  { %1353 = vmatpush1.msra.mxu0 %v8197_v60  ;;  %6638 = vmatpush3.msra.mxu1 %v8199_v0  ;;  %v11513_v60 = vld [vmem:[#allocation74_spill] sm:$0xff]  ;;  %v11514_v0 = vld [vmem:[#allocation75_spill] sm:$0xff] }
 0x2a8   :  { %1354 = vmatprep.subr.mxu0 %v8201_v48  ;;  %6639 = vmatprep.subr.mxu1 %v11421_v57  ;;  %v11515_v48 = vld [vmem:[#allocation76_spill] sm:$0xff] }
 0x2a9   :  { %1355 = vmatpush1.msra.mxu0 %v8205_v1  ;;  %6640 = vmatpush3.msra.mxu1 %v8207_v55  ;;  %v11516_v1 = vld [vmem:[#allocation77_spill] sm:$0xff]  ;;  %v11517_v55 = vld [vmem:[#allocation78_spill] sm:$0xff] }
 0x2aa   :  { %1356 = vmatprep.subr.mxu0 %v8211_v46  ;;  %6641 = vmatprep.subr.mxu1 %v11421_v57  ;;  %v11518_v46 = vld [vmem:[#allocation79_spill] sm:$0xff] }
 0x2ab   :  { %1357 = vmatpush1.msra.mxu0 %v11510_v59  ;;  %6642 = vmatpush3.msra.mxu1 %v11511_v43  ;;  %v8678_v59 = vld [vmem:[#allocation5 + $0xd0] sm:$0xff] }
 0x2ac   :  { %1358 = vmatprep.subr.mxu0 %v11512_v40  ;;  %6643 = vmatprep.subr.mxu1 %v11421_v57  ;;  %v8682_v43 = vld [vmem:[#allocation5 + $0xb0] sm:$0xff]  ;;  %v8686_v40 = vld [vmem:[#allocation5 + $0xa8] sm:$0xff] }
 0x2ad   :  { %1359 = vmatpush1.msra.mxu0 %v11513_v60  ;;  %6644 = vmatpush3.msra.mxu1 %v11514_v0  ;;  %v8688_v60 = vld [vmem:[#allocation5 + $0xb8] sm:$0xff] }
 0x2ae   :  { %1360 = vmatprep.subr.mxu0 %v11515_v48  ;;  %6645 = vmatprep.subr.mxu1 %v11421_v57  ;;  %v8692_v0 = vld [vmem:[#allocation5 + $0x98] sm:$0xff]  ;;  %v8696_v48 = vld [vmem:[#allocation5 + $0x90] sm:$0xff] }
 0x2af   :  { %1361 = vmatpush1.msra.mxu0 %v11516_v1  ;;  %6646 = vmatpush3.msra.mxu1 %v11517_v55  ;;  %v8698_v1 = vld [vmem:[#allocation5 + $0xa0] sm:$0xff] }
 0x2b0   :  { %1362 = vmatprep.subr.mxu0 %v11518_v46  ;;  %6647 = vmatprep.subr.mxu1 %v11421_v57  ;;  %v8702_v55 = vld [vmem:[#allocation5 + $0x80] sm:$0xff]  ;;  %v8706_v46 = vld [vmem:[#allocation5 + $0x78] sm:$0xff] }
 0x2b1   :  { %1363 = vmatpush1.msra.mxu0 %v11519_v45  ;;  %6648 = vmatpush3.msra.mxu1 %v11520_v47  ;;  %v8708_v45 = vld [vmem:[#allocation5 + $0x88] sm:$0xff] }
 0x2b2   :  { %1364 = vmatprep.subr.mxu0 %v11521_v49  ;;  %6649 = vmatprep.subr.mxu1 %v11421_v57  ;;  %v8712_v47 = vld [vmem:[#allocation5 + $0x68] sm:$0xff]  ;;  %v8716_v49 = vld [vmem:[#allocation5 + $0x60] sm:$0xff] }
 0x2b3   :  { %1365 = vmatpush1.msra.mxu0 %v11522_v50  ;;  %6650 = vmatpush3.msra.mxu1 %v11523_v3  ;;  %v8718_v50 = vld [vmem:[#allocation5 + $0x70] sm:$0xff] }
 0x2b4   :  { %1366 = vmatprep.subr.mxu0 %v11524_v4  ;;  %6651 = vmatprep.subr.mxu1 %v11421_v57  ;;  %11543 = vst [vmem:[#allocation16_spill] sm:$0xff] %v8718_v50  ;;  %v8722_v3 = vld [vmem:[#allocation5 + $0x50] sm:$0xff]  ;;  %v8726_v4 = vld [vmem:[#allocation5 + $0x48] sm:$0xff] }
 0x2b5   :  { %1367 = vmatpush1.msra.mxu0 %v11525_v5  ;;  %6652 = vmatpush3.msra.mxu1 %v11526_v6  ;;  %11544 = vst [vmem:[#allocation19_spill] sm:$0xff] %v8722_v3  ;;  %11545 = vst [vmem:[#allocation17_spill] sm:$0xff] %v8726_v4  ;;  %v8728_v5 = vld [vmem:[#allocation5 + $0x58] sm:$0xff] }
 0x2b6   :  { %1368 = vmatprep.subr.mxu0 %v11527_v7  ;;  %6653 = vmatprep.subr.mxu1 %v11421_v57  ;;  %11546 = vst [vmem:[#allocation18_spill] sm:$0xff] %v8728_v5  ;;  %v8732_v6 = vld [vmem:[#allocation5 + $0x38] sm:$0xff]  ;;  %v8736_v7 = vld [vmem:[#allocation5 + $0x30] sm:$0xff] }
 0x2b7   :  { %1369 = vmatpush1.msra.mxu0 %v11528_v8  ;;  %6654 = vmatpush3.msra.mxu1 %v11529_v9  ;;  %11547 = vst [vmem:[#allocation20_spill] sm:$0xff] %v8732_v6  ;;  %11548 = vst [vmem:[#allocation21_spill] sm:$0xff] %v8736_v7  ;;  %v8738_v8 = vld [vmem:[#allocation5 + $0x40] sm:$0xff] }
 0x2b8   :  { %1370 = vmatprep.subr.mxu0 %v11530_v10  ;;  %6655 = vmatprep.subr.mxu1 %v11421_v57  ;;  %11549 = vst [vmem:[#allocation22_spill] sm:$0xff] %v8738_v8  ;;  %v8742_v9 = vld [vmem:[#allocation5 + $0x20] sm:$0xff]  ;;  %v8746_v10 = vld [vmem:[#allocation5 + $0x18] sm:$0xff] }
 0x2b9   :  { %1371 = vmatpush1.msra.mxu0 %v11531_v11  ;;  %6656 = vmatpush3.msra.mxu1 %v11532_v12  ;;  %11550 = vst [vmem:[#allocation23_spill] sm:$0xff] %v8742_v9  ;;  %11551 = vst [vmem:[#allocation24_spill] sm:$0xff] %v8746_v10  ;;  %v8748_v11 = vld [vmem:[#allocation5 + $0x28] sm:$0xff] }
 0x2ba   :  { %1372 = vmatprep.subr.mxu0 %v11533_v13  ;;  %6657 = vmatprep.subr.mxu1 %v11421_v57  ;;  %11552 = vst [vmem:[#allocation25_spill] sm:$0xff] %v8748_v11  ;;  %v8752_v12 = vld [vmem:[#allocation5 + $0x8] sm:$0xff]  ;;  %v8756_v13 = vld [vmem:[#allocation5] sm:$0xff] }
 0x2bb   :  { %1373 = vmatpush1.msra.mxu0 %v11534_v15  ;;  %6658 = vmatpush3.msra.mxu1 %v11535_v16  ;;  %11553 = vst [vmem:[#allocation26_spill] sm:$0xff] %v8752_v12  ;;  %11554 = vst [vmem:[#allocation27_spill] sm:$0xff] %v8756_v13  ;;  %v8760_v15 = vld [vmem:[#allocation5 + $0x10] sm:$0xff] }
 0x2bc   :  { %1374 = vmatprep.subr.mxu0 %v11536_v17  ;;  %6659 = vmatprep.subr.mxu1 %v11421_v57  ;;  %11555 = vst [vmem:[#allocation29_spill] sm:$0xff] %v8760_v15  ;;  %v8775_v16 = vld [vmem:[#allocation7 + $0x170] sm:$0xff]  ;;  %v8778_v17 = vld [vmem:[#allocation7 + $0x168] sm:$0xff] }
 0x2bd   :  { %1375 = vmatpush1.msra.mxu0 %v11537_v14  ;;  %6660 = vmatpush3.msra.mxu1 %v11538_v18  ;;  %11556 = vst [vmem:[#allocation28_spill] sm:$0xff] %v8775_v16  ;;  %11557 = vst [vmem:[#allocation30_spill] sm:$0xff] %v8778_v17  ;;  %v8780_v14 = vld [vmem:[#allocation7 + $0x178] sm:$0xff]  ;;  %v8788_v18 = vld [vmem:[#allocation7 + $0x150] sm:$0xff] }
 0x2be   :  { %1376 = vmatprep.subr.mxu0 %v11539_v19  ;;  %6661 = vmatprep.subr.mxu1 %v11421_v57  ;;  %11558 = vst [vmem:[#allocation31_spill] sm:$0xff] %v8780_v14  ;;  %11560 = vst [vmem:[#allocation33_spill] sm:$0xff] %v8788_v18  ;;  %v8790_v19 = vld [vmem:[#allocation7 + $0x160] sm:$0xff] }
 0x2bf   :  { %1377 = vmatpush1.msra.mxu0 %v8315_v53  ;;  %6662 = vmatpush3.msra.mxu1 %v11540_v20  ;;  %v8601_v53 = vld [vmem:[#allocation5 + $0x170] sm:$0xff]  ;;  %11561 = vst [vmem:[#allocation34_spill] sm:$0xff] %v8790_v19  ;;  %v8794_v20 = vld [vmem:[#allocation7 + $0x140] sm:$0xff] }
 0x2c0   :  { %1378 = vmatprep.subr.mxu0 %v11541_v21  ;;  %6663 = vmatprep.subr.mxu1 %v11421_v57  ;;  %11562 = vst [vmem:[#allocation35_spill] sm:$0xff] %v8794_v20  ;;  %v8798_v21 = vld [vmem:[#allocation7 + $0x138] sm:$0xff] }
 0x2c1   :  { %1379 = vmatpush1.msra.mxu0 %v11542_v23  ;;  %6664 = vmatpush3.msra.mxu1 %v8327_v44  ;;  %v8606_v44 = vld [vmem:[#allocation5 + $0x168] sm:$0xff]  ;;  %11563 = vst [vmem:[#allocation36_spill] sm:$0xff] %v8798_v21 }
 0x2c2   :  { %1380 = vmatprep.subr.mxu0 %v8331_v41  ;;  %6665 = vmatprep.subr.mxu1 %v11421_v57  ;;  %v8626_v41 = vld [vmem:[#allocation5 + $0x138] sm:$0xff]  ;;  %v8800_v23 = vld [vmem:[#allocation7 + $0x148] sm:$0xff] }
 0x2c3   :  { %1381 = vmatpush1.msra.mxu0 %v8335_v56  ;;  %6666 = vmatpush3.msra.mxu1 %v8337_v63  ;;  %v8608_v56 = vld [vmem:[#allocation5 + $0x178] sm:$0xff]  ;;  %11564 = vst [vmem:[#allocation37_spill] sm:$0xff] %v8800_v23 }
 0x2c4   :  { %1382 = vmatprep.subr.mxu0 %v8341_v2  ;;  %6667 = vmatprep.subr.mxu1 %v11421_v57  ;;  %v8612_v63 = vld [vmem:[#allocation5 + $0x158] sm:$0xff]  ;;  %v8616_v2 = vld [vmem:[#allocation5 + $0x150] sm:$0xff] }
 0x2c5   :  { %1383 = vmatpush1.msra.mxu0 %v8345_v54  ;;  %1416 = vmatprep.mubr.f32.mxu0 %v11421_v57  ;;  %v8618_v54 = vld [vmem:[#allocation5 + $0x160] sm:$0xff] }
 0x2c6   :  { %6668 = vmatpush3.msra.mxu1 %v8349_v58  ;;  %6669 = vmatprep.mubr.msk.f32.mxu1 %vm7669_vm0, %v11421_v57  ;;  %v8622_v58 = vld [vmem:[#allocation5 + $0x140] sm:$0xff] }
 0x2c7   :  { %1417 = vmatmul.mubr.f32.vlgmr.msra.gmra.mxu0 %v8526_v22  ;;  %6670 = vmatmul.mubr.f32.vlgmr.msra.gmra.mxu1 %v8526_v22 }
 0x2c8   :  { %1596 = vmatprep.subr.mxu0 %v8601_v53  ;;  %6672 = vmatprep.subr.mxu1 %v11421_v57 }
 0x2c9   :  { %1597 = vmatpush1.msra.mxu0 %v8606_v44  ;;  %6673 = vmatpush3.msra.mxu1 %v8608_v56 }
 0x2ca   :  { %1598 = vmatprep.subr.mxu0 %v8612_v63  ;;  %6674 = vmatprep.subr.mxu1 %v11421_v57 }
 0x2cb   :  { %1599 = vmatpush1.msra.mxu0 %v8616_v2  ;;  %6675 = vmatpush3.msra.mxu1 %v8618_v54 }
 0x2cc   :  { %1600 = vmatprep.subr.mxu0 %v8622_v58  ;;  %6676 = vmatprep.subr.mxu1 %v11421_v57 }
 0x2cd   :  { %1601 = vmatpush1.msra.mxu0 %v8626_v41  ;;  %6677 = vmatpush3.msra.mxu1 %v8628_v24 }
 0x2ce   :  { %1602 = vmatprep.subr.mxu0 %v8632_v25  ;;  %6678 = vmatprep.subr.mxu1 %v11421_v57 }
 0x2cf   :  { %1603 = vmatpush1.msra.mxu0 %v8636_v26  ;;  %6679 = vmatpush3.msra.mxu1 %v8638_v27 }
 0x2d0   :  { %1604 = vmatprep.subr.mxu0 %v8642_v28  ;;  %6680 = vmatprep.subr.mxu1 %v11421_v57 }
 0x2d1   :  { %1605 = vmatpush1.msra.mxu0 %v8646_v29  ;;  %6681 = vmatpush3.msra.mxu1 %v8648_v30 }
 0x2d2   :  { %1606 = vmatprep.subr.mxu0 %v8652_v31  ;;  %6682 = vmatprep.subr.mxu1 %v11421_v57 }
 0x2d3   :  { %1607 = vmatpush1.msra.mxu0 %v8656_v32  ;;  %6683 = vmatpush3.msra.mxu1 %v8658_v52 }
 0x2d4   :  { %1608 = vmatprep.subr.mxu0 %v8662_v33  ;;  %6684 = vmatprep.subr.mxu1 %v11421_v57 }
 0x2d5   :  { %1609 = vmatpush1.msra.mxu0 %v8666_v35  ;;  %6685 = vmatpush3.msra.mxu1 %v8668_v36 }
 0x2d6   :  { %1610 = vmatprep.subr.mxu0 %v8672_v37  ;;  %6686 = vmatprep.subr.mxu1 %v11421_v57 }
 0x2d7   :  { %1611 = vmatpush1.msra.mxu0 %v8676_v39  ;;  %6687 = vmatpush3.msra.mxu1 %v8678_v59 }
 0x2d8   :  { %1612 = vmatprep.subr.mxu0 %v8682_v43  ;;  %6688 = vmatprep.subr.mxu1 %v11421_v57 }
 0x2d9   :  { %1613 = vmatpush1.msra.mxu0 %v8686_v40  ;;  %6689 = vmatpush3.msra.mxu1 %v8688_v60 }
 0x2da   :  { %1614 = vmatprep.subr.mxu0 %v8692_v0  ;;  %6690 = vmatprep.subr.mxu1 %v11421_v57 }
 0x2db   :  { %1615 = vmatpush1.msra.mxu0 %v8696_v48  ;;  %6691 = vmatpush3.msra.mxu1 %v8698_v1 }
 0x2dc   :  { %1616 = vmatprep.subr.mxu0 %v8702_v55  ;;  %6692 = vmatprep.subr.mxu1 %v11421_v57 }
 0x2dd   :  { %1617 = vmatpush1.msra.mxu0 %v8706_v46  ;;  %6693 = vmatpush3.msra.mxu1 %v8708_v45 }
 0x2de   :  { %1618 = vmatprep.subr.mxu0 %v8712_v47  ;;  %6694 = vmatprep.subr.mxu1 %v11421_v57 }
 0x2df   :  { %1619 = vmatpush1.msra.mxu0 %v8716_v49  ;;  %6695 = vmatpush3.msra.mxu1 %v8718_v50 }
 0x2e0   :  { %1620 = vmatprep.subr.mxu0 %v8722_v3  ;;  %6696 = vmatprep.subr.mxu1 %v11421_v57 }
 0x2e1   :  { %1621 = vmatpush1.msra.mxu0 %v8726_v4  ;;  %6697 = vmatpush3.msra.mxu1 %v8728_v5  ;;  %v1745_v4 = vld [vmem:[%s11418_s1] sm:$0x3] }
 0x2e2   :  { %1622 = vmatprep.subr.mxu0 %v8732_v6  ;;  %6698 = vmatprep.subr.mxu1 %v11421_v57 }
 0x2e3   :  { %1623 = vmatpush1.msra.mxu0 %v8736_v7  ;;  %6699 = vmatpush3.msra.mxu1 %v8738_v8 }
 0x2e4   :  { %1624 = vmatprep.subr.mxu0 %v8742_v9  ;;  %6700 = vmatprep.subr.mxu1 %v11421_v57 }
 0x2e5   :  { %1625 = vmatpush1.msra.mxu0 %v8746_v10  ;;  %6701 = vmatpush3.msra.mxu1 %v8748_v11 }
 0x2e6   :  { %1626 = vmatprep.subr.mxu0 %v8752_v12  ;;  %6702 = vmatprep.subr.mxu1 %v11421_v57 }
 0x2e7   :  { %1627 = vmatpush1.msra.mxu0 %v8756_v13  ;;  %1660 = vmatprep.mubr.f32.mxu0 %v11421_v57 }
 0x2e8   :  { %6703 = vmatpush3.msra.mxu1 %v8760_v15  ;;  %6704 = vmatprep.mubr.msk.f32.mxu1 %vm7669_vm0, %v11421_v57 }
 0x2e9   :  { %1661 = vmatmul.mubr.f32.vlgmr.msra.gmra.mxu0 %v8535_v51  ;;  %6705 = vmatmul.mubr.f32.vlgmr.msra.gmra.mxu1 %v8535_v51  ;;  %v8784_v51 = vld [vmem:[#allocation7 + $0x158] sm:$0xff] }
 0x2ea   :  { %6707 = vmatprep.subr.mxu1 %v11421_v57  ;;  %1914 = vmatprep.mubr.f32.mxu0 %v11421_v57  ;;  %11559 = vst [vmem:[#allocation32_spill] sm:$0xff] %v8784_v51 }
 0x2eb   :  { %6739 = vmatprep.mubr.msk.f32.mxu1 %vm7669_vm0, %v11421_v57  ;;  %1850 = vmatprep.subr.mxu0 %v8775_v16  ;;  %v8870_v16 = vld [vmem:[#allocation7 + $0x80] sm:$0xff] }
 0x2ec   :  { %1851 = vmatpush1.msra.mxu0 %v8778_v17  ;;  %6708 = vmatpush3.msra.mxu1 %v8780_v14  ;;  %v8846_v14 = vld [vmem:[#allocation7 + $0xc0] sm:$0xff]  ;;  %v8856_v17 = vld [vmem:[#allocation7 + $0xb8] sm:$0xff]  ;;  %11586 = vst [vmem:[#allocation59_spill] sm:$0xff] %v8870_v16 }
 0x2ed   :  { %1852 = vmatprep.subr.mxu0 %v8784_v51  ;;  %6709 = vmatprep.subr.mxu1 %v11421_v57  ;;  %v8804_v51 = vld [vmem:[#allocation7 + $0x128] sm:$0xff]  ;;  %11578 = vst [vmem:[#allocation51_spill] sm:$0xff] %v8846_v14  ;;  %11582 = vst [vmem:[#allocation55_spill] sm:$0xff] %v8856_v17 }
 0x2ee   :  { %1853 = vmatpush1.msra.mxu0 %v8788_v18  ;;  %6710 = vmatpush3.msra.mxu1 %v8790_v19  ;;  %11565 = vst [vmem:[#allocation38_spill] sm:$0xff] %v8804_v51  ;;  %v8808_v19 = vld [vmem:[#allocation7 + $0x120] sm:$0xff]  ;;  %v8810_v18 = vld [vmem:[#allocation7 + $0x130] sm:$0xff] }
 0x2ef   :  { %1854 = vmatprep.subr.mxu0 %v8794_v20  ;;  %6711 = vmatprep.subr.mxu1 %v11421_v57  ;;  %11566 = vst [vmem:[#allocation39_spill] sm:$0xff] %v8808_v19  ;;  %11567 = vst [vmem:[#allocation40_spill] sm:$0xff] %v8810_v18  ;;  %v8814_v20 = vld [vmem:[#allocation7 + $0x110] sm:$0xff] }
 0x2f0   :  { %1855 = vmatpush1.msra.mxu0 %v8798_v21  ;;  %6712 = vmatpush3.msra.mxu1 %v8800_v23  ;;  %11568 = vst [vmem:[#allocation41_spill] sm:$0xff] %v8814_v20  ;;  %v8818_v23 = vld [vmem:[#allocation7 + $0x108] sm:$0xff]  ;;  %v8820_v21 = vld [vmem:[#allocation7 + $0x118] sm:$0xff] }
 0x2f1   :  { %1856 = vmatprep.subr.mxu0 %v8804_v51  ;;  %6713 = vmatprep.subr.mxu1 %v11421_v57  ;;  %11569 = vst [vmem:[#allocation42_spill] sm:$0xff] %v8818_v23  ;;  %11570 = vst [vmem:[#allocation43_spill] sm:$0xff] %v8820_v21  ;;  %v8824_v51 = vld [vmem:[#allocation7 + $0xf8] sm:$0xff] }
 0x2f2   :  { %1857 = vmatpush1.msra.mxu0 %v8808_v19  ;;  %6714 = vmatpush3.msra.mxu1 %v8810_v18  ;;  %11571 = vst [vmem:[#allocation44_spill] sm:$0xff] %v8824_v51  ;;  %v8828_v18 = vld [vmem:[#allocation7 + $0xf0] sm:$0xff]  ;;  %v8830_v19 = vld [vmem:[#allocation7 + $0x100] sm:$0xff] }
 0x2f3   :  { %1858 = vmatprep.subr.mxu0 %v8814_v20  ;;  %6715 = vmatprep.subr.mxu1 %v11421_v57  ;;  %11572 = vst [vmem:[#allocation45_spill] sm:$0xff] %v8828_v18  ;;  %11573 = vst [vmem:[#allocation46_spill] sm:$0xff] %v8830_v19  ;;  %v8834_v20 = vld [vmem:[#allocation7 + $0xe0] sm:$0xff] }
 0x2f4   :  { %1859 = vmatpush1.msra.mxu0 %v8818_v23  ;;  %6716 = vmatpush3.msra.mxu1 %v8820_v21  ;;  %11574 = vst [vmem:[#allocation47_spill] sm:$0xff] %v8834_v20  ;;  %v8838_v21 = vld [vmem:[#allocation7 + $0xd8] sm:$0xff]  ;;  %v8840_v23 = vld [vmem:[#allocation7 + $0xe8] sm:$0xff] }
 0x2f5   :  { %1860 = vmatprep.subr.mxu0 %v8824_v51  ;;  %6717 = vmatprep.subr.mxu1 %v11421_v57  ;;  %11575 = vst [vmem:[#allocation48_spill] sm:$0xff] %v8838_v21  ;;  %11576 = vst [vmem:[#allocation49_spill] sm:$0xff] %v8840_v23  ;;  %v8844_v51 = vld [vmem:[#allocation7 + $0xc8] sm:$0xff] }
 0x2f6   :  { %1861 = vmatpush1.msra.mxu0 %v8828_v18  ;;  %6718 = vmatpush3.msra.mxu1 %v8830_v19  ;;  %11577 = vst [vmem:[#allocation50_spill] sm:$0xff] %v8844_v51  ;;  %v8848_v18 = vld [vmem:[#allocation7 + $0xd0] sm:$0xff]  ;;  %v8854_v19 = vld [vmem:[#allocation7 + $0xa8] sm:$0xff] }
 0x2f7   :  { %1862 = vmatprep.subr.mxu0 %v8834_v20  ;;  %6719 = vmatprep.subr.mxu1 %v11421_v57  ;;  %11579 = vst [vmem:[#allocation52_spill] sm:$0xff] %v8848_v18  ;;  %v8852_v20 = vld [vmem:[#allocation7 + $0xb0] sm:$0xff]  ;;  %11581 = vst [vmem:[#allocation54_spill] sm:$0xff] %v8854_v19 }
 0x2f8   :  { %1863 = vmatpush1.msra.mxu0 %v8838_v21  ;;  %6720 = vmatpush3.msra.mxu1 %v8840_v23  ;;  %11580 = vst [vmem:[#allocation53_spill] sm:$0xff] %v8852_v20  ;;  %v8860_v23 = vld [vmem:[#allocation7 + $0x98] sm:$0xff]  ;;  %v8864_v21 = vld [vmem:[#allocation7 + $0x90] sm:$0xff] }
 0x2f9   :  { %1864 = vmatprep.subr.mxu0 %v8844_v51  ;;  %6721 = vmatprep.subr.mxu1 %v11421_v57  ;;  %11583 = vst [vmem:[#allocation56_spill] sm:$0xff] %v8860_v23  ;;  %11584 = vst [vmem:[#allocation57_spill] sm:$0xff] %v8864_v21  ;;  %v8866_v51 = vld [vmem:[#allocation7 + $0xa0] sm:$0xff] }
 0x2fa   :  { %1865 = vmatpush1.msra.mxu0 %v8846_v14  ;;  %6722 = vmatpush3.msra.mxu1 %v8848_v18  ;;  %11585 = vst [vmem:[#allocation58_spill] sm:$0xff] %v8866_v51  ;;  %v8874_v18 = vld [vmem:[#allocation7 + $0x78] sm:$0xff]  ;;  %v8876_v14 = vld [vmem:[#allocation7 + $0x88] sm:$0xff] }
 0x2fb   :  { %1866 = vmatprep.subr.mxu0 %v8852_v20  ;;  %6723 = vmatprep.subr.mxu1 %v11421_v57  ;;  %11587 = vst [vmem:[#allocation60_spill] sm:$0xff] %v8874_v18  ;;  %11588 = vst [vmem:[#allocation61_spill] sm:$0xff] %v8876_v14  ;;  %v8880_v20 = vld [vmem:[#allocation7 + $0x68] sm:$0xff] }
 0x2fc   :  { %1867 = vmatpush1.msra.mxu0 %v8854_v19  ;;  %6724 = vmatpush3.msra.mxu1 %v8856_v17  ;;  %11589 = vst [vmem:[#allocation62_spill] sm:$0xff] %v8880_v20  ;;  %v8884_v17 = vld [vmem:[#allocation7 + $0x60] sm:$0xff]  ;;  %v8886_v19 = vld [vmem:[#allocation7 + $0x70] sm:$0xff] }
 0x2fd   :  { %1868 = vmatprep.subr.mxu0 %v8860_v23  ;;  %6725 = vmatprep.subr.mxu1 %v11421_v57  ;;  %11590 = vst [vmem:[#allocation63_spill] sm:$0xff] %v8884_v17  ;;  %11591 = vst [vmem:[#allocation64_spill] sm:$0xff] %v8886_v19  ;;  %v8890_v23 = vld [vmem:[#allocation7 + $0x50] sm:$0xff] }
 0x2fe   :  { %1869 = vmatpush1.msra.mxu0 %v8864_v21  ;;  %6726 = vmatpush3.msra.mxu1 %v8866_v51  ;;  %11592 = vst [vmem:[#allocation65_spill] sm:$0xff] %v8890_v23  ;;  %v8894_v51 = vld [vmem:[#allocation7 + $0x48] sm:$0xff]  ;;  %v8896_v21 = vld [vmem:[#allocation7 + $0x58] sm:$0xff] }
 0x2ff   :  { %1870 = vmatprep.subr.mxu0 %v8870_v16  ;;  %6727 = vmatprep.subr.mxu1 %v11421_v57  ;;  %11593 = vst [vmem:[#allocation67_spill] sm:$0xff] %v8894_v51  ;;  %11594 = vst [vmem:[#allocation68_spill] sm:$0xff] %v8896_v21  ;;  %v8900_v16 = vld [vmem:[#allocation7 + $0x38] sm:$0xff] }
 0x300   :  { %1871 = vmatpush1.msra.mxu0 %v8874_v18  ;;  %6728 = vmatpush3.msra.mxu1 %v8876_v14  ;;  %11595 = vst [vmem:[#allocation69_spill] sm:$0xff] %v8900_v16  ;;  %v8904_v14 = vld [vmem:[#allocation7 + $0x30] sm:$0xff]  ;;  %v8906_v18 = vld [vmem:[#allocation7 + $0x40] sm:$0xff] }
 0x301   :  { %1872 = vmatprep.subr.mxu0 %v8880_v20  ;;  %6729 = vmatprep.subr.mxu1 %v11421_v57  ;;  %11596 = vst [vmem:[#allocation70_spill] sm:$0xff] %v8904_v14  ;;  %11597 = vst [vmem:[#allocation71_spill] sm:$0xff] %v8906_v18  ;;  %v8910_v20 = vld [vmem:[#allocation7 + $0x20] sm:$0xff] }
 0x302   :  { %1873 = vmatpush1.msra.mxu0 %v8884_v17  ;;  %6730 = vmatpush3.msra.mxu1 %v8886_v19  ;;  %11598 = vst [vmem:[#allocation72_spill] sm:$0xff] %v8910_v20  ;;  %v8914_v19 = vld [vmem:[#allocation7 + $0x18] sm:$0xff]  ;;  %v8916_v17 = vld [vmem:[#allocation7 + $0x28] sm:$0xff] }
 0x303   :  { %1874 = vmatprep.subr.mxu0 %v8890_v23  ;;  %6731 = vmatprep.subr.mxu1 %v11421_v57  ;;  %11599 = vst [vmem:[#allocation73_spill] sm:$0xff] %v8914_v19  ;;  %11600 = vst [vmem:[#allocation74_spill] sm:$0xff] %v8916_v17  ;;  %v8920_v23 = vld [vmem:[#allocation7 + $0x8] sm:$0xff] }
 0x304   :  { %1875 = vmatpush1.msra.mxu0 %v8894_v51  ;;  %6732 = vmatpush3.msra.mxu1 %v8896_v21  ;;  %11601 = vst [vmem:[#allocation75_spill] sm:$0xff] %v8920_v23  ;;  %v8924_v21 = vld [vmem:[#allocation7] sm:$0xff]  ;;  %v8926_v51 = vld [vmem:[#allocation7 + $0x10] sm:$0xff] }
 0x305   :  { %1876 = vmatprep.subr.mxu0 %v8900_v16  ;;  %6733 = vmatprep.subr.mxu1 %v11421_v57  ;;  %11602 = vst [vmem:[#allocation76_spill] sm:$0xff] %v8924_v21  ;;  %11603 = vst [vmem:[#allocation77_spill] sm:$0xff] %v8926_v51  ;;  %v8930_v16 = vld [vmem:[#allocation9 + $0x170] sm:$0xff] }
 0x306   :  { %1877 = vmatpush1.msra.mxu0 %v8904_v14  ;;  %6734 = vmatpush3.msra.mxu1 %v8906_v18  ;;  %11604 = vst [vmem:[#allocation78_spill] sm:$0xff] %v8930_v16 }
 0x307   :  { %1878 = vmatprep.subr.mxu0 %v8910_v20  ;;  %6735 = vmatprep.subr.mxu1 %v11421_v57 }
 0x308   :  { %1879 = vmatpush1.msra.mxu0 %v8914_v19  ;;  %6736 = vmatpush3.msra.mxu1 %v8916_v17  ;;  %v1495_v17 = vld [vmem:[%s10973_s10] sm:$0x3] }
 0x309   :  { %1880 = vmatprep.subr.mxu0 %v8920_v23  ;;  %6737 = vmatprep.subr.mxu1 %v11421_v57  ;;  %v1500_v23 = vrot.slane %v1495_v17, %v8148_v62 }
 0x30a   :  { %1881 = vmatpush1.msra.mxu0 %v8924_v21  ;;  %6738 = vmatpush3.msra.mxu1 %v8926_v51 }
 0x30b   :  { %2039 = vmatprep.subr.mxu0 %v8930_v16  ;;  %6742 = vmatprep.subr.mxu1 %v11421_v57  ;;  %v1504_v16 = vrot.slane %v1495_v17, %v8150_v61 }
 0x366   :  { %v1300_v18 = vpop.f32.mrf.mxu1  ;;  %v1229_v14 = vpop.f32.mrf.mxu0 }
 0x368   :  { %v6636_v20 = vpop.f32.mrf.mxu1  ;;  %v1231_v19 = vpop.f32.mrf.mxu0 }
 0x387   :  { %v1418_v15 = vpop.f32.mrf.mxu0  ;;  %v1489_v13 = vpop.f32.mrf.mxu1 }
 0x388   :  { %v1493_v12 = vadd.f32 %v1418_v15, %v1229_v14 }
 0x389   :  { %v1420_v11 = vpop.f32.mrf.mxu0  ;;  %v6671_v21 = vpop.f32.mrf.mxu1 }
 0x38a   :  { %v1507_v10 = vadd.f32 %v1500_v23, %v1493_v12  ;;  %v1494_v9 = vadd.f32 %v1420_v11, %v1231_v19  ;;  %v1750_v12 = vrot.slane %v1745_v4, %v8148_v62 }
 0x38c   :  { %v5959_v51 = vmul.f32 -1.442695, %v1507_v10  ;;  %v1508_v20 = vadd.f32 %v1504_v16, %v1494_v9  ;;  %v1536_v10 = vadd.f32 %v8511_v34, %v1489_v13  ;;  %v1528_v9 = vadd.f32 %v8520_v38, %v1300_v18 }
 0x38d   :  { %v1754_v34 = vrot.slane %v1745_v4, %v8150_v61 }
 0x38e   :  { %7415 = vpow2.f32 %v5959_v51  ;;  %v5960_v8 = vmul.f32 -1.442695, %v1508_v20 }
 0x390   :  { %7417 = vpow2.f32 %v5960_v8  ;;  %v1545_v8 = vld [vmem:[#allocation2 + $0x28] sm:$0x30] }
 0x39b   :  { %v7416_v7 = vpop.eup %7415 }
 0x39c   :  { %v1515_v6 = vadd.f32 1.0, %v7416_v7 }
 0x39d   :  { %v7418_v5 = vpop.eup %7417 }
 0x39e   :  { %7419 = vrcp.f32 %v1515_v6  ;;  %v1516_v15 = vadd.f32 1.0, %v7418_v5  ;;  %v1546_v5 = vld [vmem:[#allocation2 + $0x10] sm:$0x30] }
 0x3a0   :  { %7421 = vrcp.f32 %v1516_v15 }
 0x3a9   :  { %v1662_v14 = vpop.f32.mrf.mxu0  ;;  %v1733_v21 = vpop.f32.mrf.mxu1 }
 0x3aa   :  { %v1739_v11 = vrot.slane %v1662_v14, 4 }
 0x3ab   :  { %v7420_v17 = vpop.eup %7419  ;;  %v1664_v16 = vpop.f32.mrf.mxu0 }
 0x3ac   :  { %v6706_v7 = vpop.f32.mrf.mxu1  ;;  %v1537_v6 = vmul.f32 %v7420_v17, %v1536_v10  ;;  %v1743_v51 = vadd.f32 %v1739_v11, %v1545_v8  ;;  %v1740_v19 = vrot.slane %v1664_v16, 4 }
 0x3ad   :  { %v7422_v62 = vpop.eup %7421 }
 0x3ae   :  { %v1538_v23 = vadd.f32 %v1537_v6, %v1528_v9  ;;  %v1757_v20 = vadd.f32 %v1750_v12, %v1743_v51  ;;  %v1744_v50 = vadd.f32 %v1740_v19, %v1546_v5  ;;  %v1540_v38 = vsub.f32 1.0, %v7422_v62  ;;  %v1547_v9 = vld [vmem:[#allocation2 + $0x8] sm:$0x30] }
 0x3af   :  { %v1542_v15 = vmul.f32 %v7422_v62, %v8526_v22  ;;  %v8963_v62 = vld [vmem:[%s11420_s30] ss:$0 sm:$0xff] }
 0x3b0   :  { %7423 = vtanh.f32 %v1538_v23  ;;  %v5963_v3 = vmul.f32 -1.442695, %v1757_v20  ;;  %v1758_v13 = vadd.f32 %v1754_v34, %v1744_v50  ;;  %v1778_v16 = vadd.f32 %v8963_v62, %v1547_v9  ;;  %v9002_v9 = vld [vmem:[#allocation9 + $0x130] sm:$0xff] }
 0x3b1   :  { %v1795_v23 = vrot.slane %v8532_v42, 6  ;;  %v8980_v42 = vld [vmem:[#allocation9 + $0x150] sm:$0xff] }
 0x3b2   :  { %7425 = vpow2.f32 %v5963_v3  ;;  %v5964_v14 = vmul.f32 -1.442695, %v1758_v13  ;;  %v8957_v3 = vld [vmem:[%s11419_s3] ss:$0 sm:$0xff] }
 0x3b3   :  { %v1786_v4 = vadd.f32 %v8957_v3, %v1733_v21 }
 0x3b4   :  { %7427 = vpow2.f32 %v5964_v14 }
 0x3b5   :  { %v1788_v22 = vrot.slane %v1786_v4, 4  ;;  %v8996_v4 = vld [vmem:[#allocation9 + $0x128] sm:$0xff] }
 0x3bd   :  { %v7424_v18 = vpop.eup %7423 }
 0x3be   :  { %v1541_v7 = vmul.f32 %v7424_v18, %v1540_v38  ;;  %v8972_v38 = vld [vmem:[#allocation9 + $0x168] sm:$0xff]  ;;  %v8974_v18 = vld [vmem:[#allocation9 + $0x178] sm:$0xff] }
 0x3bf   :  { %v7426_v10 = vpop.eup %7425 }
 0x3c0   :  { %v1765_v11 = vadd.f32 1.0, %v7426_v10  ;;  %v8951_v17 = vadd.f32 %v1542_v15, %v1541_v7  ;;  %v8976_v7 = vld [vmem:[#allocation9 + $0x158] sm:$0xff]  ;;  %v8982_v15 = vld [vmem:[#allocation9 + $0x160] sm:$0xff] }
 0x3c1   :  { %v7428_v50 = vpop.eup %7427  ;;  %v8986_v10 = vld [vmem:[#allocation9 + $0x140] sm:$0xff] }
 0x3c2   :  { %7429 = vrcp.f32 %v1765_v11  ;;  %1544 = vst [vmem:[#allocation3 + $0x2] sm:$0x3] %v8951_v17  ;;  %v1766_v12 = vadd.f32 1.0, %v7428_v50  ;;  %v8990_v11 = vld [vmem:[#allocation9 + $0x138] sm:$0xff]  ;;  %v8992_v50 = vld [vmem:[#allocation9 + $0x148] sm:$0xff] }
 0x3c4   :  { %7431 = vrcp.f32 %v1766_v12  ;;  %v9000_v12 = vld [vmem:[#allocation9 + $0x120] sm:$0xff] }
 0x3cf   :  { %v7430_v8 = vpop.eup %7429 }
 0x3d0   :  { %v1790_v6 = vmul.f32 %v7430_v8, %v1788_v22  ;;  %v9006_v22 = vld [vmem:[#allocation9 + $0x110] sm:$0xff]  ;;  %v9010_v8 = vld [vmem:[#allocation9 + $0x108] sm:$0xff] }
 0x3d1   :  { %v7432_v19 = vpop.eup %7431 }
 0x3d2   :  { %v1791_v51 = vadd.f32 %v1790_v6, %v1778_v16  ;;  %v1793_v20 = vsub.f32 1.0, %v7432_v19  ;;  %v1797_v34 = vmul.f32 %v7432_v19, %v1795_v23  ;;  %v9012_v16 = vld [vmem:[#allocation9 + $0x118] sm:$0xff]  ;;  %v9022_v19 = vld [vmem:[#allocation9 + $0x100] sm:$0xff] }
 0x3d3   :  { %11605 = vst [vmem:[#allocation79_spill] sm:$0xff] %v9012_v16  ;;  %v9016_v6 = vld [vmem:[#allocation9 + $0xf8] sm:$0xff]  ;;  %11608 = vst [vmem:[#allocation82_spill] sm:$0xff] %v9022_v19  ;;  %v9026_v23 = vld [vmem:[#allocation9 + $0xe0] sm:$0xff] }
 0x3d4   :  { %7433 = vtanh.f32 %v1791_v51  ;;  %11606 = vst [vmem:[#allocation80_spill] sm:$0xff] %v9016_v6  ;;  %v9020_v51 = vld [vmem:[#allocation9 + $0xf0] sm:$0xff]  ;;  %11609 = vst [vmem:[#allocation83_spill] sm:$0xff] %v9026_v23 }
 0x3d5   :  { %11607 = vst [vmem:[#allocation81_spill] sm:$0xff] %v9020_v51 }
 0x3e1   :  { %v7434_v21 = vpop.eup %7433 }
 0x3e2   :  { %v1794_v5 = vmul.f32 %v7434_v21, %v1793_v20  ;;  %v9030_v20 = vld [vmem:[#allocation9 + $0xd8] sm:$0xff]  ;;  %v9032_v21 = vld [vmem:[#allocation9 + $0xe8] sm:$0xff] }
 0x3e3   :  { %11610 = vst [vmem:[#allocation84_spill] sm:$0xff] %v9030_v20  ;;  %11611 = vst [vmem:[#allocation85_spill] sm:$0xff] %v9032_v21 }
 0x3e4   :  { %v8967_v13 = vadd.f32 %v1797_v34, %v1794_v5  ;;  %v9036_v5 = vld [vmem:[#allocation9 + $0xc8] sm:$0xff]  ;;  %v9040_v34 = vld [vmem:[#allocation9 + $0xc0] sm:$0xff] }
 0x3e5   :  { %11612 = vst [vmem:[#allocation86_spill] sm:$0xff] %v9036_v5  ;;  %11613 = vst [vmem:[#allocation87_spill] sm:$0xff] %v9040_v34 }
 0x3e6   :  { %v8970_v14 = vrot.slane %v8967_v13, 4 }
 0x3e8   :  { %1915 = vmatmul.mubr.f32.vlgmr.msra.gmra.mxu0 %v8970_v14  ;;  %6740 = vmatmul.mubr.f32.vlgmr.msra.gmra.mxu1 %v8970_v14 }
 0x3e9   :  { %2040 = vmatpush1.msra.mxu0 %v8972_v38  ;;  %6743 = vmatpush3.msra.mxu1 %v8974_v18 }
 0x3ea   :  { %2041 = vmatprep.subr.mxu0 %v8976_v7  ;;  %6744 = vmatprep.subr.mxu1 %v11421_v57 }
 0x3eb   :  { %2042 = vmatpush1.msra.mxu0 %v8980_v42  ;;  %6745 = vmatpush3.msra.mxu1 %v8982_v15 }
 0x3ec   :  { %2043 = vmatprep.subr.mxu0 %v8986_v10  ;;  %6746 = vmatprep.subr.mxu1 %v11421_v57 }
 0x3ed   :  { %2044 = vmatpush1.msra.mxu0 %v8990_v11  ;;  %6747 = vmatpush3.msra.mxu1 %v8992_v50 }
 0x3ee   :  { %2045 = vmatprep.subr.mxu0 %v8996_v4  ;;  %6748 = vmatprep.subr.mxu1 %v11421_v57 }
 0x3ef   :  { %2046 = vmatpush1.msra.mxu0 %v9000_v12  ;;  %6749 = vmatpush3.msra.mxu1 %v9002_v9 }
 0x3f0   :  { %2047 = vmatprep.subr.mxu0 %v9006_v22  ;;  %6750 = vmatprep.subr.mxu1 %v11421_v57 }
 0x3f1   :  { %2048 = vmatpush1.msra.mxu0 %v9010_v8  ;;  %6751 = vmatpush3.msra.mxu1 %v9012_v16  ;;  %v9042_v16 = vld [vmem:[#allocation9 + $0xd0] sm:$0xff] }
 0x3f2   :  { %2049 = vmatprep.subr.mxu0 %v9016_v6  ;;  %6752 = vmatprep.subr.mxu1 %v11421_v57  ;;  %11614 = vst [vmem:[#allocation88_spill] sm:$0xff] %v9042_v16  ;;  %v9046_v6 = vld [vmem:[#allocation9 + $0xb0] sm:$0xff] }
 0x3f3   :  { %2050 = vmatpush1.msra.mxu0 %v9020_v51  ;;  %6753 = vmatpush3.msra.mxu1 %v9022_v19  ;;  %11615 = vst [vmem:[#allocation89_spill] sm:$0xff] %v9046_v6  ;;  %v9050_v19 = vld [vmem:[#allocation9 + $0xa8] sm:$0xff]  ;;  %v9052_v51 = vld [vmem:[#allocation9 + $0xb8] sm:$0xff] }
 0x3f4   :  { %2051 = vmatprep.subr.mxu0 %v9026_v23  ;;  %6754 = vmatprep.subr.mxu1 %v11421_v57  ;;  %11616 = vst [vmem:[#allocation90_spill] sm:$0xff] %v9050_v19  ;;  %11617 = vst [vmem:[#allocation91_spill] sm:$0xff] %v9052_v51  ;;  %v9056_v23 = vld [vmem:[#allocation9 + $0x98] sm:$0xff] }
 0x3f5   :  { %2052 = vmatpush1.msra.mxu0 %v9030_v20  ;;  %6755 = vmatpush3.msra.mxu1 %v9032_v21  ;;  %11618 = vst [vmem:[#allocation92_spill] sm:$0xff] %v9056_v23  ;;  %v9060_v21 = vld [vmem:[#allocation9 + $0x90] sm:$0xff]  ;;  %v9062_v20 = vld [vmem:[#allocation9 + $0xa0] sm:$0xff] }
 0x3f6   :  { %2053 = vmatprep.subr.mxu0 %v9036_v5  ;;  %6756 = vmatprep.subr.mxu1 %v11421_v57  ;;  %11619 = vst [vmem:[#allocation93_spill] sm:$0xff] %v9060_v21  ;;  %11620 = vst [vmem:[#allocation94_spill] sm:$0xff] %v9062_v20  ;;  %v9066_v5 = vld [vmem:[#allocation9 + $0x80] sm:$0xff] }
 0x3f7   :  { %2054 = vmatpush1.msra.mxu0 %v9040_v34  ;;  %6757 = vmatpush3.msra.mxu1 %v9042_v16  ;;  %11621 = vst [vmem:[#allocation95_spill] sm:$0xff] %v9066_v5  ;;  %v9070_v16 = vld [vmem:[#allocation9 + $0x78] sm:$0xff]  ;;  %v9072_v34 = vld [vmem:[#allocation9 + $0x88] sm:$0xff] }
 0x3f8   :  { %2055 = vmatprep.subr.mxu0 %v9046_v6  ;;  %6758 = vmatprep.subr.mxu1 %v11421_v57  ;;  %11622 = vst [vmem:[#allocation96_spill] sm:$0xff] %v9070_v16  ;;  %11623 = vst [vmem:[#allocation97_spill] sm:$0xff] %v9072_v34  ;;  %v9076_v6 = vld [vmem:[#allocation9 + $0x68] sm:$0xff] }
 0x3f9   :  { %2056 = vmatpush1.msra.mxu0 %v9050_v19  ;;  %6759 = vmatpush3.msra.mxu1 %v9052_v51  ;;  %11624 = vst [vmem:[#allocation98_spill] sm:$0xff] %v9076_v6  ;;  %v9080_v51 = vld [vmem:[#allocation9 + $0x60] sm:$0xff]  ;;  %v9082_v19 = vld [vmem:[#allocation9 + $0x70] sm:$0xff] }
 0x3fa   :  { %2057 = vmatprep.subr.mxu0 %v9056_v23  ;;  %6760 = vmatprep.subr.mxu1 %v11421_v57  ;;  %11625 = vst [vmem:[#allocation99_spill] sm:$0xff] %v9080_v51  ;;  %11626 = vst [vmem:[#allocation100_spill] sm:$0xff] %v9082_v19  ;;  %v9086_v23 = vld [vmem:[#allocation9 + $0x50] sm:$0xff] }
 0x3fb   :  { %2058 = vmatpush1.msra.mxu0 %v9060_v21  ;;  %6761 = vmatpush3.msra.mxu1 %v9062_v20  ;;  %11627 = vst [vmem:[#allocation101_spill] sm:$0xff] %v9086_v23  ;;  %v9090_v20 = vld [vmem:[#allocation9 + $0x48] sm:$0xff]  ;;  %v9092_v21 = vld [vmem:[#allocation9 + $0x58] sm:$0xff] }
 0x3fc   :  { %2059 = vmatprep.subr.mxu0 %v9066_v5  ;;  %6762 = vmatprep.subr.mxu1 %v11421_v57  ;;  %11628 = vst [vmem:[#allocation102_spill] sm:$0xff] %v9092_v21  ;;  %v9096_v5 = vld [vmem:[#allocation9 + $0x38] sm:$0xff] }
 0x3fd   :  { %2060 = vmatpush1.msra.mxu0 %v9070_v16  ;;  %6763 = vmatpush3.msra.mxu1 %v9072_v34  ;;  %11629 = vst [vmem:[#allocation103_spill] sm:$0xff] %v9096_v5  ;;  %v9100_v34 = vld [vmem:[#allocation9 + $0x30] sm:$0xff]  ;;  %v9102_v16 = vld [vmem:[#allocation9 + $0x40] sm:$0xff] }
 0x3fe   :  { %2061 = vmatprep.subr.mxu0 %v9076_v6  ;;  %6764 = vmatprep.subr.mxu1 %v11421_v57  ;;  %v9106_v6 = vld [vmem:[#allocation9 + $0x20] sm:$0xff] }
 0x3ff   :  { %2062 = vmatpush1.msra.mxu0 %v9080_v51  ;;  %6765 = vmatpush3.msra.mxu1 %v9082_v19  ;;  %v9110_v19 = vld [vmem:[#allocation9 + $0x18] sm:$0xff]  ;;  %v9112_v51 = vld [vmem:[#allocation9 + $0x28] sm:$0xff] }
 0x400   :  { %2063 = vmatprep.subr.mxu0 %v9086_v23  ;;  %6766 = vmatprep.subr.mxu1 %v11421_v57  ;;  %v9116_v23 = vld [vmem:[#allocation9 + $0x8] sm:$0xff] }
 0x401   :  { %2064 = vmatpush1.msra.mxu0 %v9090_v20  ;;  %6767 = vmatpush3.msra.mxu1 %v9092_v21  ;;  %v9120_v21 = vld [vmem:[#allocation9] sm:$0xff] }
 0x402   :  { %2065 = vmatprep.subr.mxu0 %v9096_v5  ;;  %6768 = vmatprep.subr.mxu1 %v11421_v57  ;;  %v9124_v5 = vld [vmem:[#allocation9 + $0x10] sm:$0xff] }
 0x403   :  { %2066 = vmatpush1.msra.mxu0 %v9100_v34  ;;  %6769 = vmatpush3.msra.mxu1 %v9102_v16 }
 0x404   :  { %2067 = vmatprep.subr.mxu0 %v9106_v6  ;;  %6770 = vmatprep.subr.mxu1 %v11421_v57 }
 0x405   :  { %2068 = vmatpush1.msra.mxu0 %v9110_v19  ;;  %6771 = vmatpush3.msra.mxu1 %v9112_v51 }
 0x406   :  { %2069 = vmatprep.subr.mxu0 %v9116_v23  ;;  %6772 = vmatprep.subr.mxu1 %v11421_v57 }
 0x407   :  { %2070 = vmatpush1.msra.mxu0 %v9120_v21  ;;  %2103 = vmatprep.mubr.f32.mxu0 %v11421_v57 }
 0x408   :  { %6773 = vmatpush3.msra.mxu1 %v9124_v5  ;;  %6774 = vmatprep.mubr.msk.f32.mxu1 %vm7669_vm0, %v11421_v57 }
 0x409   :  { %2104 = vmatmul.mubr.f32.vlgmr.msra.gmra.mxu0 %v8951_v17  ;;  %6775 = vmatmul.mubr.f32.vlgmr.msra.gmra.mxu1 %v8951_v17 }
 0x40a   :  { %2283 = vmatprep.subr.mxu0 %v8601_v53  ;;  %6777 = vmatprep.subr.mxu1 %v11421_v57  ;;  %v11630_v53 = vld [vmem:[#allocation16_spill] sm:$0xff] }
 0x40b   :  { %2284 = vmatpush1.msra.mxu0 %v8606_v44  ;;  %6778 = vmatpush3.msra.mxu1 %v8608_v56  ;;  %v11631_v44 = vld [vmem:[#allocation19_spill] sm:$0xff]  ;;  %v11632_v56 = vld [vmem:[#allocation17_spill] sm:$0xff] }
 0x40c   :  { %2285 = vmatprep.subr.mxu0 %v8612_v63  ;;  %6779 = vmatprep.subr.mxu1 %v11421_v57  ;;  %v11633_v63 = vld [vmem:[#allocation18_spill] sm:$0xff] }
 0x40d   :  { %2286 = vmatpush1.msra.mxu0 %v8616_v2  ;;  %6780 = vmatpush3.msra.mxu1 %v8618_v54  ;;  %v11634_v2 = vld [vmem:[#allocation20_spill] sm:$0xff]  ;;  %v11635_v54 = vld [vmem:[#allocation21_spill] sm:$0xff] }
 0x40e   :  { %2287 = vmatprep.subr.mxu0 %v8622_v58  ;;  %6781 = vmatprep.subr.mxu1 %v11421_v57  ;;  %v11636_v58 = vld [vmem:[#allocation22_spill] sm:$0xff] }
 0x40f   :  { %2288 = vmatpush1.msra.mxu0 %v8626_v41  ;;  %6782 = vmatpush3.msra.mxu1 %v8628_v24  ;;  %v11637_v41 = vld [vmem:[#allocation23_spill] sm:$0xff]  ;;  %v11638_v24 = vld [vmem:[#allocation24_spill] sm:$0xff] }
 0x410   :  { %2289 = vmatprep.subr.mxu0 %v8632_v25  ;;  %6783 = vmatprep.subr.mxu1 %v11421_v57  ;;  %v11639_v25 = vld [vmem:[#allocation25_spill] sm:$0xff] }
 0x411   :  { %2290 = vmatpush1.msra.mxu0 %v8636_v26  ;;  %6784 = vmatpush3.msra.mxu1 %v8638_v27  ;;  %v11640_v26 = vld [vmem:[#allocation26_spill] sm:$0xff]  ;;  %v11641_v27 = vld [vmem:[#allocation27_spill] sm:$0xff] }
 0x412   :  { %2291 = vmatprep.subr.mxu0 %v8642_v28  ;;  %6785 = vmatprep.subr.mxu1 %v11421_v57  ;;  %v11642_v28 = vld [vmem:[#allocation29_spill] sm:$0xff] }
 0x413   :  { %2292 = vmatpush1.msra.mxu0 %v8646_v29  ;;  %6786 = vmatpush3.msra.mxu1 %v8648_v30  ;;  %v11643_v29 = vld [vmem:[#allocation28_spill] sm:$0xff]  ;;  %v11644_v30 = vld [vmem:[#allocation30_spill] sm:$0xff] }
 0x414   :  { %2293 = vmatprep.subr.mxu0 %v8652_v31  ;;  %6787 = vmatprep.subr.mxu1 %v11421_v57  ;;  %v11645_v31 = vld [vmem:[#allocation31_spill] sm:$0xff] }
 0x415   :  { %2294 = vmatpush1.msra.mxu0 %v8656_v32  ;;  %6788 = vmatpush3.msra.mxu1 %v8658_v52  ;;  %v11646_v32 = vld [vmem:[#allocation32_spill] sm:$0xff]  ;;  %v11647_v52 = vld [vmem:[#allocation33_spill] sm:$0xff] }
 0x416   :  { %2295 = vmatprep.subr.mxu0 %v8662_v33  ;;  %6789 = vmatprep.subr.mxu1 %v11421_v57  ;;  %v11648_v33 = vld [vmem:[#allocation34_spill] sm:$0xff] }
 0x417   :  { %2296 = vmatpush1.msra.mxu0 %v8666_v35  ;;  %6790 = vmatpush3.msra.mxu1 %v8668_v36  ;;  %v11649_v35 = vld [vmem:[#allocation35_spill] sm:$0xff]  ;;  %v11650_v36 = vld [vmem:[#allocation36_spill] sm:$0xff] }
 0x418   :  { %2297 = vmatprep.subr.mxu0 %v8672_v37  ;;  %6791 = vmatprep.subr.mxu1 %v11421_v57  ;;  %v11651_v37 = vld [vmem:[#allocation37_spill] sm:$0xff] }
 0x419   :  { %2298 = vmatpush1.msra.mxu0 %v8676_v39  ;;  %6792 = vmatpush3.msra.mxu1 %v8678_v59  ;;  %v11652_v39 = vld [vmem:[#allocation38_spill] sm:$0xff]  ;;  %v11653_v59 = vld [vmem:[#allocation39_spill] sm:$0xff] }
 0x41a   :  { %2299 = vmatprep.subr.mxu0 %v8682_v43  ;;  %6793 = vmatprep.subr.mxu1 %v11421_v57  ;;  %v11654_v43 = vld [vmem:[#allocation40_spill] sm:$0xff] }
 0x41b   :  { %2300 = vmatpush1.msra.mxu0 %v8686_v40  ;;  %6794 = vmatpush3.msra.mxu1 %v8688_v60  ;;  %v11655_v40 = vld [vmem:[#allocation41_spill] sm:$0xff]  ;;  %v11656_v60 = vld [vmem:[#allocation42_spill] sm:$0xff] }
 0x41c   :  { %2301 = vmatprep.subr.mxu0 %v8692_v0  ;;  %6795 = vmatprep.subr.mxu1 %v11421_v57  ;;  %v11657_v0 = vld [vmem:[#allocation43_spill] sm:$0xff] }
 0x41d   :  { %2302 = vmatpush1.msra.mxu0 %v8696_v48  ;;  %6796 = vmatpush3.msra.mxu1 %v8698_v1  ;;  %v11658_v48 = vld [vmem:[#allocation44_spill] sm:$0xff]  ;;  %v11659_v1 = vld [vmem:[#allocation45_spill] sm:$0xff] }
 0x41e   :  { %2303 = vmatprep.subr.mxu0 %v8702_v55  ;;  %6797 = vmatprep.subr.mxu1 %v11421_v57  ;;  %v11660_v55 = vld [vmem:[#allocation46_spill] sm:$0xff] }
 0x41f   :  { %2304 = vmatpush1.msra.mxu0 %v8706_v46  ;;  %6798 = vmatpush3.msra.mxu1 %v8708_v45  ;;  %v11661_v46 = vld [vmem:[#allocation47_spill] sm:$0xff]  ;;  %v11662_v45 = vld [vmem:[#allocation48_spill] sm:$0xff] }
 0x420   :  { %2305 = vmatprep.subr.mxu0 %v8712_v47  ;;  %6799 = vmatprep.subr.mxu1 %v11421_v57  ;;  %v11663_v47 = vld [vmem:[#allocation49_spill] sm:$0xff] }
 0x421   :  { %2306 = vmatpush1.msra.mxu0 %v8716_v49  ;;  %6800 = vmatpush3.msra.mxu1 %v11630_v53  ;;  %v11664_v49 = vld [vmem:[#allocation50_spill] sm:$0xff]  ;;  %v11666_v53 = vld [vmem:[#allocation52_spill] sm:$0xff] }
 0x422   :  { %2307 = vmatprep.subr.mxu0 %v11631_v44  ;;  %6801 = vmatprep.subr.mxu1 %v11421_v57  ;;  %v11667_v44 = vld [vmem:[#allocation53_spill] sm:$0xff] }
 0x423   :  { %2308 = vmatpush1.msra.mxu0 %v11632_v56  ;;  %6802 = vmatpush3.msra.mxu1 %v11633_v63  ;;  %v11668_v56 = vld [vmem:[#allocation54_spill] sm:$0xff]  ;;  %v11669_v63 = vld [vmem:[#allocation55_spill] sm:$0xff] }
 0x424   :  { %2309 = vmatprep.subr.mxu0 %v11634_v2  ;;  %6803 = vmatprep.subr.mxu1 %v11421_v57  ;;  %v11670_v2 = vld [vmem:[#allocation56_spill] sm:$0xff] }
 0x425   :  { %2310 = vmatpush1.msra.mxu0 %v11635_v54  ;;  %6804 = vmatpush3.msra.mxu1 %v11636_v58  ;;  %v11671_v54 = vld [vmem:[#allocation57_spill] sm:$0xff]  ;;  %v11672_v58 = vld [vmem:[#allocation58_spill] sm:$0xff] }
 0x426   :  { %2311 = vmatprep.subr.mxu0 %v11637_v41  ;;  %6805 = vmatprep.subr.mxu1 %v11421_v57  ;;  %v11673_v41 = vld [vmem:[#allocation59_spill] sm:$0xff] }
 0x427   :  { %2312 = vmatpush1.msra.mxu0 %v11638_v24  ;;  %6806 = vmatpush3.msra.mxu1 %v11639_v25  ;;  %v11674_v24 = vld [vmem:[#allocation60_spill] sm:$0xff]  ;;  %v11675_v25 = vld [vmem:[#allocation61_spill] sm:$0xff] }
 0x428   :  { %2313 = vmatprep.subr.mxu0 %v11640_v26  ;;  %6807 = vmatprep.subr.mxu1 %v11421_v57  ;;  %v11676_v26 = vld [vmem:[#allocation62_spill] sm:$0xff] }
 0x429   :  { %2314 = vmatpush1.msra.mxu0 %v11641_v27  ;;  %2347 = vmatprep.mubr.f32.mxu0 %v11421_v57  ;;  %v11677_v27 = vld [vmem:[#allocation63_spill] sm:$0xff] }
 0x42a   :  { %6808 = vmatpush3.msra.mxu1 %v11642_v28  ;;  %6809 = vmatprep.mubr.msk.f32.mxu1 %vm7669_vm0, %v11421_v57  ;;  %v11678_v28 = vld [vmem:[#allocation64_spill] sm:$0xff] }
 0x42b   :  { %2348 = vmatmul.mubr.f32.vlgmr.msra.gmra.mxu0 %v8970_v14  ;;  %6810 = vmatmul.mubr.f32.vlgmr.msra.gmra.mxu1 %v8970_v14  ;;  %v11665_v14 = vld [vmem:[#allocation51_spill] sm:$0xff] }
 0x42c   :  { %2537 = vmatprep.subr.mxu0 %v11643_v29  ;;  %6812 = vmatprep.subr.mxu1 %v11421_v57  ;;  %v11679_v29 = vld [vmem:[#allocation65_spill] sm:$0xff] }
 0x42d   :  { %2538 = vmatpush1.msra.mxu0 %v11644_v30  ;;  %6813 = vmatpush3.msra.mxu1 %v11645_v31  ;;  %v11680_v30 = vld [vmem:[#allocation67_spill] sm:$0xff]  ;;  %v11681_v31 = vld [vmem:[#allocation68_spill] sm:$0xff] }
 0x42e   :  { %2539 = vmatprep.subr.mxu0 %v11646_v32  ;;  %6814 = vmatprep.subr.mxu1 %v11421_v57  ;;  %v11682_v32 = vld [vmem:[#allocation69_spill] sm:$0xff] }
 0x42f   :  { %2540 = vmatpush1.msra.mxu0 %v11647_v52  ;;  %6815 = vmatpush3.msra.mxu1 %v11648_v33  ;;  %v11683_v52 = vld [vmem:[#allocation70_spill] sm:$0xff]  ;;  %v11684_v33 = vld [vmem:[#allocation71_spill] sm:$0xff] }
 0x430   :  { %2541 = vmatprep.subr.mxu0 %v11649_v35  ;;  %6816 = vmatprep.subr.mxu1 %v11421_v57  ;;  %v11685_v35 = vld [vmem:[#allocation72_spill] sm:$0xff] }
 0x431   :  { %2542 = vmatpush1.msra.mxu0 %v11650_v36  ;;  %6817 = vmatpush3.msra.mxu1 %v11651_v37  ;;  %v11686_v36 = vld [vmem:[#allocation73_spill] sm:$0xff]  ;;  %v11687_v37 = vld [vmem:[#allocation74_spill] sm:$0xff] }
 0x432   :  { %2543 = vmatprep.subr.mxu0 %v11652_v39  ;;  %6818 = vmatprep.subr.mxu1 %v11421_v57  ;;  %v11688_v39 = vld [vmem:[#allocation75_spill] sm:$0xff] }
 0x433   :  { %2544 = vmatpush1.msra.mxu0 %v11653_v59  ;;  %6819 = vmatpush3.msra.mxu1 %v11654_v43  ;;  %v11689_v59 = vld [vmem:[#allocation76_spill] sm:$0xff]  ;;  %v11690_v43 = vld [vmem:[#allocation77_spill] sm:$0xff] }
 0x434   :  { %2545 = vmatprep.subr.mxu0 %v11655_v40  ;;  %6820 = vmatprep.subr.mxu1 %v11421_v57  ;;  %v11691_v40 = vld [vmem:[#allocation78_spill] sm:$0xff] }
 0x435   :  { %2546 = vmatpush1.msra.mxu0 %v11656_v60  ;;  %6821 = vmatpush3.msra.mxu1 %v11657_v0 }
 0x436   :  { %2547 = vmatprep.subr.mxu0 %v11658_v48  ;;  %6822 = vmatprep.subr.mxu1 %v11421_v57 }
 0x437   :  { %2548 = vmatpush1.msra.mxu0 %v11659_v1  ;;  %6823 = vmatpush3.msra.mxu1 %v11660_v55  ;;  %v2182_v1 = vld [vmem:[%s10973_s10] sm:$0x3] }
 0x438   :  { %2549 = vmatprep.subr.mxu0 %v11661_v46  ;;  %6824 = vmatprep.subr.mxu1 %v11421_v57  ;;  %v11692_v46 = vld [vmem:[#allocation66_spill] sm:$0xff] }
 0x439   :  { %2550 = vmatpush1.msra.mxu0 %v11662_v45  ;;  %6825 = vmatpush3.msra.mxu1 %v11663_v47  ;;  %v2187_v45 = vrot.slane %v2182_v1, %v11692_v46 }
 0x43a   :  { %2551 = vmatprep.subr.mxu0 %v11664_v49  ;;  %6826 = vmatprep.subr.mxu1 %v11421_v57 }
 0x43b   :  { %2552 = vmatpush1.msra.mxu0 %v11665_v14  ;;  %6827 = vmatpush3.msra.mxu1 %v11666_v53 }
 0x43c   :  { %2553 = vmatprep.subr.mxu0 %v11667_v44  ;;  %6828 = vmatprep.subr.mxu1 %v11421_v57 }
 0x43d   :  { %2554 = vmatpush1.msra.mxu0 %v11668_v56  ;;  %6829 = vmatpush3.msra.mxu1 %v11669_v63 }
 0x43e   :  { %2555 = vmatprep.subr.mxu0 %v11670_v2  ;;  %6830 = vmatprep.subr.mxu1 %v11421_v57 }
 0x43f   :  { %2556 = vmatpush1.msra.mxu0 %v11671_v54  ;;  %6831 = vmatpush3.msra.mxu1 %v11672_v58  ;;  %v2191_v54 = vrot.slane %v2182_v1, %v8150_v61 }
 0x440   :  { %2557 = vmatprep.subr.mxu0 %v11673_v41  ;;  %6832 = vmatprep.subr.mxu1 %v11421_v57 }
 0x441   :  { %2558 = vmatpush1.msra.mxu0 %v11674_v24  ;;  %6833 = vmatpush3.msra.mxu1 %v11675_v25 }
 0x442   :  { %2559 = vmatprep.subr.mxu0 %v11676_v26  ;;  %6834 = vmatprep.subr.mxu1 %v11421_v57 }
 0x443   :  { %2560 = vmatpush1.msra.mxu0 %v11677_v27  ;;  %6835 = vmatpush3.msra.mxu1 %v11678_v28  ;;  %v9281_v27 = vld [vmem:[%s10975_s12] ss:$0 sm:$0xff] }
 0x444   :  { %2561 = vmatprep.subr.mxu0 %v11679_v29  ;;  %6836 = vmatprep.subr.mxu1 %v11421_v57  ;;  %v2432_v28 = vld [vmem:[%s11418_s1] sm:$0x3] }
 0x445   :  { %2562 = vmatpush1.msra.mxu0 %v11680_v30  ;;  %6837 = vmatpush3.msra.mxu1 %v11681_v31  ;;  %v9289_v29 = vld [vmem:[%s10974_s11] ss:$0 sm:$0xff] }
 0x446   :  { %2563 = vmatprep.subr.mxu0 %v11682_v32  ;;  %6838 = vmatprep.subr.mxu1 %v11421_v57 }
 0x447   :  { %2564 = vmatpush1.msra.mxu0 %v11683_v52  ;;  %6839 = vmatpush3.msra.mxu1 %v11684_v33 }
 0x448   :  { %2565 = vmatprep.subr.mxu0 %v11685_v35  ;;  %6840 = vmatprep.subr.mxu1 %v11421_v57  ;;  %v2437_v35 = vrot.slane %v2432_v28, %v11692_v46 }
 0x449   :  { %2566 = vmatpush1.msra.mxu0 %v11686_v36  ;;  %6841 = vmatpush3.msra.mxu1 %v11687_v37 }
 0x44a   :  { %2567 = vmatprep.subr.mxu0 %v11688_v39  ;;  %6842 = vmatprep.subr.mxu1 %v11421_v57  ;;  %v2232_v39 = vld [vmem:[#allocation2 + $0x28] sm:$0xc0] }
 0x44b   :  { %2568 = vmatpush1.msra.mxu0 %v11689_v59  ;;  %6843 = vmatpush3.msra.mxu1 %v11690_v43 }
 0x44c   :  { %2601 = vmatprep.mubr.f32.mxu0 %v11421_v57  ;;  %6844 = vmatprep.mubr.msk.f32.mxu1 %vm7669_vm0, %v11421_v57 }
 0x44d   :  { %2726 = vmatprep.subr.mxu0 %v11691_v40  ;;  %6847 = vmatprep.subr.mxu1 %v11421_v57 }
 0x4a8   :  { %v1987_v60 = vpop.f32.mrf.mxu1  ;;  %v1916_v48 = vpop.f32.mrf.mxu0 }
 0x4a9   :  { %v2215_v37 = vadd.f32 %v9289_v29, %v1987_v60 }
 0x4aa   :  { %v6741_v0 = vpop.f32.mrf.mxu1  ;;  %v1918_v55 = vpop.f32.mrf.mxu0 }
 0x4c9   :  { %v2105_v47 = vpop.f32.mrf.mxu0  ;;  %v2176_v49 = vpop.f32.mrf.mxu1 }
 0x4ca   :  { %v2180_v14 = vadd.f32 %v2105_v47, %v1916_v48  ;;  %v2223_v52 = vadd.f32 %v9281_v27, %v2176_v49  ;;  %v2441_v49 = vrot.slane %v2432_v28, %v8150_v61 }
 0x4cb   :  { %v2107_v53 = vpop.f32.mrf.mxu0  ;;  %v6776_v44 = vpop.f32.mrf.mxu1 }
 0x4cc   :  { %v2194_v56 = vadd.f32 %v2187_v45, %v2180_v14  ;;  %v2181_v2 = vadd.f32 %v2107_v53, %v1918_v55  ;;  %v2233_v45 = vld [vmem:[#allocation2 + $0x10] sm:$0xc0] }
 0x4ce   :  { %v5967_v63 = vmul.f32 -1.442695, %v2194_v56  ;;  %v2195_v58 = vadd.f32 %v2191_v54, %v2181_v2 }
 0x4d0   :  { %7435 = vpow2.f32 %v5967_v63  ;;  %v5968_v41 = vmul.f32 -1.442695, %v2195_v58 }
 0x4d2   :  { %7437 = vpow2.f32 %v5968_v41 }
 0x4dd   :  { %v7436_v24 = vpop.eup %7435 }
 0x4de   :  { %v2202_v25 = vadd.f32 1.0, %v7436_v24 }
 0x4df   :  { %v7438_v26 = vpop.eup %7437 }
 0x4e0   :  { %7439 = vrcp.f32 %v2202_v25  ;;  %v2203_v30 = vadd.f32 1.0, %v7438_v26 }
 0x4e2   :  { %7441 = vrcp.f32 %v2203_v30  ;;  %v2234_v30 = vld [vmem:[#allocation2 + $0x8] sm:$0xc0] }
 0x4eb   :  { %v2349_v31 = vpop.f32.mrf.mxu0  ;;  %v2420_v32 = vpop.f32.mrf.mxu1 }
 0x4ec   :  { %v2426_v33 = vrot.slane %v2349_v31, 2  ;;  %v2473_v26 = vadd.f32 %v8957_v3, %v2420_v32  ;;  %v11693_v3 = vld [vmem:[#allocation79_spill] sm:$0xff] }
 0x4ed   :  { %v7440_v36 = vpop.eup %7439  ;;  %v2351_v59 = vpop.f32.mrf.mxu0  ;;  %v11709_v32 = vld [vmem:[#allocation95_spill] sm:$0xff] }
 0x4ee   :  { %v6811_v43 = vpop.f32.mrf.mxu1  ;;  %v2224_v40 = vmul.f32 %v7440_v36, %v2223_v52  ;;  %v2430_v0 = vadd.f32 %v2426_v33, %v2232_v39  ;;  %v2427_v48 = vrot.slane %v2351_v59, 2  ;;  %v2475_v31 = vrot.slane %v2473_v26, 2  ;;  %v9425_v26 = vld [vmem:[#allocation5 + $0x100] sm:$0xff] }
 0x4ef   :  { %v7442_v56 = vpop.eup %7441  ;;  %v2465_v33 = vadd.f32 %v8963_v62, %v2234_v30  ;;  %v11694_v62 = vld [vmem:[#allocation80_spill] sm:$0xff]  ;;  %v9433_v30 = vld [vmem:[#allocation5 + $0xd8] sm:$0xff] }
 0x4f0   :  { %v2225_v1 = vadd.f32 %v2224_v40, %v2215_v37  ;;  %v2444_v55 = vadd.f32 %v2437_v35, %v2430_v0  ;;  %v2431_v14 = vadd.f32 %v2427_v48, %v2233_v45  ;;  %v2227_v60 = vsub.f32 1.0, %v7442_v56  ;;  %v11712_v45 = vld [vmem:[#allocation98_spill] sm:$0xff] }
 0x4f1   :  { %v2229_v54 = vmul.f32 %v7442_v56, %v8951_v17  ;;  %v2482_v37 = vrot.slane %v8967_v13, 6  ;;  %v11695_v13 = vld [vmem:[#allocation81_spill] sm:$0xff] }
 0x4f2   :  { %7443 = vtanh.f32 %v2225_v1  ;;  %v5971_v47 = vmul.f32 -1.442695, %v2444_v55  ;;  %v2445_v53 = vadd.f32 %v2441_v49, %v2431_v14  ;;  %v11710_v1 = vld [vmem:[#allocation96_spill] sm:$0xff]  ;;  %v11711_v55 = vld [vmem:[#allocation97_spill] sm:$0xff] }
 0x4f3   :  { %v11714_v14 = vld [vmem:[#allocation100_spill] sm:$0xff]  ;;  %v11715_v49 = vld [vmem:[#allocation101_spill] sm:$0xff] }
 0x4f4   :  { %7445 = vpow2.f32 %v5971_v47  ;;  %v5972_v44 = vmul.f32 -1.442695, %v2445_v53  ;;  %v11713_v47 = vld [vmem:[#allocation99_spill] sm:$0xff]  ;;  %v11716_v53 = vld [vmem:[#allocation102_spill] sm:$0xff]  ;;  %v9399_v56 = vld [vmem:[#allocation5 + $0x128] sm:$0xff] }
 0x4f6   :  { %7447 = vpow2.f32 %v5972_v44  ;;  %v11717_v44 = vld [vmem:[#allocation103_spill] sm:$0xff] }
 0x4ff   :  { %v7444_v63 = vpop.eup %7443 }
 0x500   :  { %v2228_v2 = vmul.f32 %v7444_v63, %v2227_v60  ;;  %v9403_v60 = vld [vmem:[#allocation5 + $0x120] sm:$0xff]  ;;  %v9405_v63 = vld [vmem:[#allocation5 + $0x130] sm:$0xff] }
 0x501   :  { %v7446_v58 = vpop.eup %7445 }
 0x502   :  { %v2452_v41 = vadd.f32 1.0, %v7446_v58  ;;  %v9296_v24 = vadd.f32 %v2229_v54, %v2228_v2  ;;  %v9409_v2 = vld [vmem:[#allocation5 + $0x110] sm:$0xff]  ;;  %v9413_v54 = vld [vmem:[#allocation5 + $0x108] sm:$0xff]  ;;  %v9415_v58 = vld [vmem:[#allocation5 + $0x118] sm:$0xff] }
 0x503   :  { %v7448_v25 = vpop.eup %7447 }
 0x504   :  { %7449 = vrcp.f32 %v2452_v41  ;;  %2231 = vst [vmem:[#allocation3 + $0x4] sm:$0x3] %v9296_v24  ;;  %v2453_v28 = vadd.f32 1.0, %v7448_v25  ;;  %v9419_v41 = vld [vmem:[#allocation5 + $0xf8] sm:$0xff]  ;;  %v9423_v25 = vld [vmem:[#allocation5 + $0xf0] sm:$0xff] }
 0x506   :  { %7451 = vrcp.f32 %v2453_v28  ;;  %v9429_v28 = vld [vmem:[#allocation5 + $0xe0] sm:$0xff] }
 0x511   :  { %v7450_v52 = vpop.eup %7449 }
 0x512   :  { %v2477_v35 = vmul.f32 %v7450_v52, %v2475_v31  ;;  %v9435_v31 = vld [vmem:[#allocation5 + $0xe8] sm:$0xff] }
 0x513   :  { %v7452_v17 = vpop.eup %7451  ;;  %v9439_v52 = vld [vmem:[#allocation5 + $0xc8] sm:$0xff] }
 0x514   :  { %v2478_v36 = vadd.f32 %v2477_v35, %v2465_v33  ;;  %v2480_v39 = vsub.f32 1.0, %v7452_v17  ;;  %v2484_v40 = vmul.f32 %v7452_v17, %v2482_v37  ;;  %v9443_v33 = vld [vmem:[#allocation5 + $0xc0] sm:$0xff]  ;;  %v9445_v35 = vld [vmem:[#allocation5 + $0xd0] sm:$0xff]  ;;  %v9453_v17 = vld [vmem:[#allocation5 + $0xa8] sm:$0xff] }
 0x515   :  { %v9455_v37 = vld [vmem:[#allocation5 + $0xb8] sm:$0xff] }
 0x516   :  { %7453 = vtanh.f32 %v2478_v36  ;;  %v9449_v36 = vld [vmem:[#allocation5 + $0xb0] sm:$0xff] }
 0x523   :  { %v7454_v59 = vpop.eup %7453 }
 0x524   :  { %v2481_v43 = vmul.f32 %v7454_v59, %v2480_v39  ;;  %v9459_v39 = vld [vmem:[#allocation5 + $0x98] sm:$0xff]  ;;  %v9463_v59 = vld [vmem:[#allocation5 + $0x90] sm:$0xff] }
 0x526   :  { %v2485_v0 = vadd.f32 %v2484_v40, %v2481_v43  ;;  %v9465_v43 = vld [vmem:[#allocation5 + $0xa0] sm:$0xff] }
 0x527   :  { %v9469_v40 = vld [vmem:[#allocation5 + $0x80] sm:$0xff] }
 0x528   :  { %v9302_v48 = vrot.slane %v2485_v0, 6  ;;  %v9473_v0 = vld [vmem:[#allocation5 + $0x78] sm:$0xff] }
 0x52a   :  { %2602 = vmatmul.mubr.f32.vlgmr.msra.gmra.mxu0 %v9302_v48  ;;  %6845 = vmatmul.mubr.f32.vlgmr.msra.gmra.mxu1 %v9302_v48 }
 0x52b   :  { %2727 = vmatpush1.msra.mxu0 %v8972_v38  ;;  %6848 = vmatpush3.msra.mxu1 %v8974_v18  ;;  %v11696_v38 = vld [vmem:[#allocation82_spill] sm:$0xff]  ;;  %v11697_v18 = vld [vmem:[#allocation83_spill] sm:$0xff] }
 0x52c   :  { %2728 = vmatprep.subr.mxu0 %v8976_v7  ;;  %6849 = vmatprep.subr.mxu1 %v11421_v57  ;;  %v11698_v7 = vld [vmem:[#allocation84_spill] sm:$0xff] }
 0x52d   :  { %2729 = vmatpush1.msra.mxu0 %v8980_v42  ;;  %6850 = vmatpush3.msra.mxu1 %v8982_v15  ;;  %v11699_v42 = vld [vmem:[#allocation85_spill] sm:$0xff]  ;;  %v11700_v15 = vld [vmem:[#allocation86_spill] sm:$0xff] }
 0x52e   :  { %2730 = vmatprep.subr.mxu0 %v8986_v10  ;;  %6851 = vmatprep.subr.mxu1 %v11421_v57  ;;  %v11701_v10 = vld [vmem:[#allocation87_spill] sm:$0xff] }
 0x52f   :  { %2731 = vmatpush1.msra.mxu0 %v8990_v11  ;;  %6852 = vmatpush3.msra.mxu1 %v8992_v50  ;;  %v11702_v11 = vld [vmem:[#allocation88_spill] sm:$0xff]  ;;  %v11703_v50 = vld [vmem:[#allocation89_spill] sm:$0xff] }
 0x530   :  { %2732 = vmatprep.subr.mxu0 %v8996_v4  ;;  %6853 = vmatprep.subr.mxu1 %v11421_v57  ;;  %v11704_v4 = vld [vmem:[#allocation90_spill] sm:$0xff] }
 0x531   :  { %2733 = vmatpush1.msra.mxu0 %v9000_v12  ;;  %6854 = vmatpush3.msra.mxu1 %v9002_v9  ;;  %v11705_v12 = vld [vmem:[#allocation91_spill] sm:$0xff]  ;;  %v11706_v9 = vld [vmem:[#allocation92_spill] sm:$0xff] }
 0x532   :  { %2734 = vmatprep.subr.mxu0 %v9006_v22  ;;  %6855 = vmatprep.subr.mxu1 %v11421_v57  ;;  %v11707_v22 = vld [vmem:[#allocation93_spill] sm:$0xff] }
 0x533   :  { %2735 = vmatpush1.msra.mxu0 %v9010_v8  ;;  %6856 = vmatpush3.msra.mxu1 %v11693_v3  ;;  %v11708_v8 = vld [vmem:[#allocation94_spill] sm:$0xff]  ;;  %v9475_v3 = vld [vmem:[#allocation5 + $0x88] sm:$0xff] }
 0x534   :  { %2736 = vmatprep.subr.mxu0 %v11694_v62  ;;  %6857 = vmatprep.subr.mxu1 %v11421_v57  ;;  %v9479_v62 = vld [vmem:[#allocation5 + $0x68] sm:$0xff] }
 0x535   :  { %2737 = vmatpush1.msra.mxu0 %v11695_v13  ;;  %6858 = vmatpush3.msra.mxu1 %v11696_v38  ;;  %v9483_v13 = vld [vmem:[#allocation5 + $0x60] sm:$0xff]  ;;  %v9485_v38 = vld [vmem:[#allocation5 + $0x70] sm:$0xff] }
 0x536   :  { %2738 = vmatprep.subr.mxu0 %v11697_v18  ;;  %6859 = vmatprep.subr.mxu1 %v11421_v57  ;;  %11718 = vst [vmem:[#allocation16_spill] sm:$0xff] %v9485_v38  ;;  %v9489_v18 = vld [vmem:[#allocation5 + $0x50] sm:$0xff] }
 0x537   :  { %2739 = vmatpush1.msra.mxu0 %v11698_v7  ;;  %6860 = vmatpush3.msra.mxu1 %v11699_v42  ;;  %11719 = vst [vmem:[#allocation19_spill] sm:$0xff] %v9489_v18  ;;  %v9493_v7 = vld [vmem:[#allocation5 + $0x48] sm:$0xff]  ;;  %v9495_v42 = vld [vmem:[#allocation5 + $0x58] sm:$0xff] }
 0x538   :  { %2740 = vmatprep.subr.mxu0 %v11700_v15  ;;  %6861 = vmatprep.subr.mxu1 %v11421_v57  ;;  %11720 = vst [vmem:[#allocation17_spill] sm:$0xff] %v9493_v7  ;;  %11721 = vst [vmem:[#allocation18_spill] sm:$0xff] %v9495_v42  ;;  %v9499_v15 = vld [vmem:[#allocation5 + $0x38] sm:$0xff] }
 0x539   :  { %2741 = vmatpush1.msra.mxu0 %v11701_v10  ;;  %6862 = vmatpush3.msra.mxu1 %v11702_v11  ;;  %11722 = vst [vmem:[#allocation20_spill] sm:$0xff] %v9499_v15  ;;  %v9503_v10 = vld [vmem:[#allocation5 + $0x30] sm:$0xff]  ;;  %v9505_v11 = vld [vmem:[#allocation5 + $0x40] sm:$0xff] }
 0x53a   :  { %2742 = vmatprep.subr.mxu0 %v11703_v50  ;;  %6863 = vmatprep.subr.mxu1 %v11421_v57  ;;  %11723 = vst [vmem:[#allocation21_spill] sm:$0xff] %v9503_v10  ;;  %11724 = vst [vmem:[#allocation22_spill] sm:$0xff] %v9505_v11  ;;  %v9509_v50 = vld [vmem:[#allocation5 + $0x20] sm:$0xff] }
 0x53b   :  { %2743 = vmatpush1.msra.mxu0 %v11704_v4  ;;  %6864 = vmatpush3.msra.mxu1 %v11705_v12  ;;  %11725 = vst [vmem:[#allocation23_spill] sm:$0xff] %v9509_v50  ;;  %v9513_v4 = vld [vmem:[#allocation5 + $0x18] sm:$0xff]  ;;  %v9515_v12 = vld [vmem:[#allocation5 + $0x28] sm:$0xff] }
 0x53c   :  { %2744 = vmatprep.subr.mxu0 %v11706_v9  ;;  %6865 = vmatprep.subr.mxu1 %v11421_v57  ;;  %11726 = vst [vmem:[#allocation24_spill] sm:$0xff] %v9513_v4  ;;  %11727 = vst [vmem:[#allocation25_spill] sm:$0xff] %v9515_v12  ;;  %v9519_v9 = vld [vmem:[#allocation5 + $0x8] sm:$0xff] }
 0x53d   :  { %2745 = vmatpush1.msra.mxu0 %v11707_v22  ;;  %6866 = vmatpush3.msra.mxu1 %v11708_v8  ;;  %11728 = vst [vmem:[#allocation26_spill] sm:$0xff] %v9519_v9  ;;  %v9523_v22 = vld [vmem:[#allocation5] sm:$0xff]  ;;  %v9527_v8 = vld [vmem:[#allocation5 + $0x10] sm:$0xff] }
 0x53e   :  { %2746 = vmatprep.subr.mxu0 %v11709_v32  ;;  %6867 = vmatprep.subr.mxu1 %v11421_v57  ;;  %11729 = vst [vmem:[#allocation27_spill] sm:$0xff] %v9523_v22  ;;  %11730 = vst [vmem:[#allocation29_spill] sm:$0xff] %v9527_v8  ;;  %v9542_v32 = vld [vmem:[#allocation7 + $0x170] sm:$0xff] }
 0x53f   :  { %2747 = vmatpush1.msra.mxu0 %v11710_v1  ;;  %6868 = vmatpush3.msra.mxu1 %v11711_v55  ;;  %11731 = vst [vmem:[#allocation28_spill] sm:$0xff] %v9542_v32  ;;  %v9545_v1 = vld [vmem:[#allocation7 + $0x168] sm:$0xff]  ;;  %v9547_v55 = vld [vmem:[#allocation7 + $0x178] sm:$0xff] }
 0x540   :  { %2748 = vmatprep.subr.mxu0 %v11712_v45  ;;  %6869 = vmatprep.subr.mxu1 %v11421_v57  ;;  %11732 = vst [vmem:[#allocation30_spill] sm:$0xff] %v9545_v1  ;;  %11733 = vst [vmem:[#allocation31_spill] sm:$0xff] %v9547_v55  ;;  %v9551_v45 = vld [vmem:[#allocation7 + $0x158] sm:$0xff] }
 0x541   :  { %2749 = vmatpush1.msra.mxu0 %v11713_v47  ;;  %6870 = vmatpush3.msra.mxu1 %v11714_v14  ;;  %11734 = vst [vmem:[#allocation32_spill] sm:$0xff] %v9551_v45  ;;  %v9555_v47 = vld [vmem:[#allocation7 + $0x150] sm:$0xff]  ;;  %v9557_v14 = vld [vmem:[#allocation7 + $0x160] sm:$0xff] }
 0x542   :  { %2750 = vmatprep.subr.mxu0 %v11715_v49  ;;  %6871 = vmatprep.subr.mxu1 %v11421_v57  ;;  %11735 = vst [vmem:[#allocation33_spill] sm:$0xff] %v9555_v47  ;;  %11736 = vst [vmem:[#allocation34_spill] sm:$0xff] %v9557_v14  ;;  %v9561_v49 = vld [vmem:[#allocation7 + $0x140] sm:$0xff] }
 0x543   :  { %2751 = vmatpush1.msra.mxu0 %v9090_v20  ;;  %6872 = vmatpush3.msra.mxu1 %v11716_v53  ;;  %v9368_v20 = vld [vmem:[#allocation5 + $0x170] sm:$0xff]  ;;  %11737 = vst [vmem:[#allocation35_spill] sm:$0xff] %v9561_v49  ;;  %v9565_v53 = vld [vmem:[#allocation7 + $0x138] sm:$0xff] }
 0x544   :  { %2752 = vmatprep.subr.mxu0 %v11717_v44  ;;  %6873 = vmatprep.subr.mxu1 %v11421_v57  ;;  %11738 = vst [vmem:[#allocation36_spill] sm:$0xff] %v9565_v53  ;;  %v9567_v44 = vld [vmem:[#allocation7 + $0x148] sm:$0xff] }
 0x545   :  { %2753 = vmatpush1.msra.mxu0 %v9100_v34  ;;  %6874 = vmatpush3.msra.mxu1 %v9102_v16  ;;  %v9373_v16 = vld [vmem:[#allocation5 + $0x168] sm:$0xff]  ;;  %11739 = vst [vmem:[#allocation37_spill] sm:$0xff] %v9567_v44 }
 0x546   :  { %2754 = vmatprep.subr.mxu0 %v9106_v6  ;;  %6875 = vmatprep.subr.mxu1 %v11421_v57  ;;  %v9375_v6 = vld [vmem:[#allocation5 + $0x178] sm:$0xff]  ;;  %v9395_v34 = vld [vmem:[#allocation5 + $0x148] sm:$0xff] }
 0x547   :  { %2755 = vmatpush1.msra.mxu0 %v9110_v19  ;;  %6876 = vmatpush3.msra.mxu1 %v9112_v51  ;;  %v9379_v51 = vld [vmem:[#allocation5 + $0x158] sm:$0xff]  ;;  %v9383_v19 = vld [vmem:[#allocation5 + $0x150] sm:$0xff] }
 0x548   :  { %2756 = vmatprep.subr.mxu0 %v9116_v23  ;;  %6877 = vmatprep.subr.mxu1 %v11421_v57  ;;  %v9385_v23 = vld [vmem:[#allocation5 + $0x160] sm:$0xff] }
 0x549   :  { %2757 = vmatpush1.msra.mxu0 %v9120_v21  ;;  %2790 = vmatprep.mubr.f32.mxu0 %v11421_v57  ;;  %v9389_v21 = vld [vmem:[#allocation5 + $0x140] sm:$0xff] }
 0x54a   :  { %6878 = vmatpush3.msra.mxu1 %v9124_v5  ;;  %6879 = vmatprep.mubr.msk.f32.mxu1 %vm7669_vm0, %v11421_v57  ;;  %v9393_v5 = vld [vmem:[#allocation5 + $0x138] sm:$0xff] }
 0x54b   :  { %2791 = vmatmul.mubr.f32.vlgmr.msra.gmra.mxu0 %v9296_v24  ;;  %6880 = vmatmul.mubr.f32.vlgmr.msra.gmra.mxu1 %v9296_v24 }
 0x54c   :  { %2970 = vmatprep.subr.mxu0 %v9368_v20  ;;  %6882 = vmatprep.subr.mxu1 %v11421_v57 }
 0x54d   :  { %2971 = vmatpush1.msra.mxu0 %v9373_v16  ;;  %6883 = vmatpush3.msra.mxu1 %v9375_v6 }
 0x54e   :  { %2972 = vmatprep.subr.mxu0 %v9379_v51  ;;  %6884 = vmatprep.subr.mxu1 %v11421_v57 }
 0x54f   :  { %2973 = vmatpush1.msra.mxu0 %v9383_v19  ;;  %6885 = vmatpush3.msra.mxu1 %v9385_v23 }
 0x550   :  { %2974 = vmatprep.subr.mxu0 %v9389_v21  ;;  %6886 = vmatprep.subr.mxu1 %v11421_v57 }
 0x551   :  { %2975 = vmatpush1.msra.mxu0 %v9393_v5  ;;  %6887 = vmatpush3.msra.mxu1 %v9395_v34 }
 0x552   :  { %2976 = vmatprep.subr.mxu0 %v9399_v56  ;;  %6888 = vmatprep.subr.mxu1 %v11421_v57 }
 0x553   :  { %2977 = vmatpush1.msra.mxu0 %v9403_v60  ;;  %6889 = vmatpush3.msra.mxu1 %v9405_v63 }
 0x554   :  { %2978 = vmatprep.subr.mxu0 %v9409_v2  ;;  %6890 = vmatprep.subr.mxu1 %v11421_v57 }
 0x555   :  { %2979 = vmatpush1.msra.mxu0 %v9413_v54  ;;  %6891 = vmatpush3.msra.mxu1 %v9415_v58 }
 0x556   :  { %2980 = vmatprep.subr.mxu0 %v9419_v41  ;;  %6892 = vmatprep.subr.mxu1 %v11421_v57 }
 0x557   :  { %2981 = vmatpush1.msra.mxu0 %v9423_v25  ;;  %6893 = vmatpush3.msra.mxu1 %v9425_v26 }
 0x558   :  { %2982 = vmatprep.subr.mxu0 %v9429_v28  ;;  %6894 = vmatprep.subr.mxu1 %v11421_v57 }
 0x559   :  { %2983 = vmatpush1.msra.mxu0 %v9433_v30  ;;  %6895 = vmatpush3.msra.mxu1 %v9435_v31 }
 0x55a   :  { %2984 = vmatprep.subr.mxu0 %v9439_v52  ;;  %6896 = vmatprep.subr.mxu1 %v11421_v57 }
 0x55b   :  { %2985 = vmatpush1.msra.mxu0 %v9443_v33  ;;  %6897 = vmatpush3.msra.mxu1 %v9445_v35 }
 0x55c   :  { %2986 = vmatprep.subr.mxu0 %v9449_v36  ;;  %6898 = vmatprep.subr.mxu1 %v11421_v57 }
 0x55d   :  { %2987 = vmatpush1.msra.mxu0 %v9453_v17  ;;  %6899 = vmatpush3.msra.mxu1 %v9455_v37 }
 0x55e   :  { %2988 = vmatprep.subr.mxu0 %v9459_v39  ;;  %6900 = vmatprep.subr.mxu1 %v11421_v57 }
 0x55f   :  { %2989 = vmatpush1.msra.mxu0 %v9463_v59  ;;  %6901 = vmatpush3.msra.mxu1 %v9465_v43 }
 0x560   :  { %2990 = vmatprep.subr.mxu0 %v9469_v40  ;;  %6902 = vmatprep.subr.mxu1 %v11421_v57 }
 0x561   :  { %2991 = vmatpush1.msra.mxu0 %v9473_v0  ;;  %6903 = vmatpush3.msra.mxu1 %v9475_v3 }
 0x562   :  { %2992 = vmatprep.subr.mxu0 %v9479_v62  ;;  %6904 = vmatprep.subr.mxu1 %v11421_v57 }
 0x563   :  { %2993 = vmatpush1.msra.mxu0 %v9483_v13  ;;  %6905 = vmatpush3.msra.mxu1 %v9485_v38 }
 0x564   :  { %2994 = vmatprep.subr.mxu0 %v9489_v18  ;;  %6906 = vmatprep.subr.mxu1 %v11421_v57 }
 0x565   :  { %2995 = vmatpush1.msra.mxu0 %v9493_v7  ;;  %6907 = vmatpush3.msra.mxu1 %v9495_v42  ;;  %v3113_v7 = vld [vmem:[%s11418_s1] sm:$0x3] }
 0x566   :  { %2996 = vmatprep.subr.mxu0 %v9499_v15  ;;  %6908 = vmatprep.subr.mxu1 %v11421_v57 }
 0x567   :  { %2997 = vmatpush1.msra.mxu0 %v9503_v10  ;;  %6909 = vmatpush3.msra.mxu1 %v9505_v11 }
 0x568   :  { %2998 = vmatprep.subr.mxu0 %v9509_v50  ;;  %6910 = vmatprep.subr.mxu1 %v11421_v57 }
 0x569   :  { %2999 = vmatpush1.msra.mxu0 %v9513_v4  ;;  %6911 = vmatpush3.msra.mxu1 %v9515_v12 }
 0x56a   :  { %3000 = vmatprep.subr.mxu0 %v9519_v9  ;;  %6912 = vmatprep.subr.mxu1 %v11421_v57 }
 0x56b   :  { %3001 = vmatpush1.msra.mxu0 %v9523_v22  ;;  %3034 = vmatprep.mubr.f32.mxu0 %v11421_v57 }
 0x56c   :  { %6913 = vmatpush3.msra.mxu1 %v9527_v8  ;;  %6914 = vmatprep.mubr.msk.f32.mxu1 %vm7669_vm0, %v11421_v57 }
 0x56d   :  { %3035 = vmatmul.mubr.f32.vlgmr.msra.gmra.mxu0 %v9302_v48  ;;  %6915 = vmatmul.mubr.f32.vlgmr.msra.gmra.mxu1 %v9302_v48 }
 0x56e   :  { %6917 = vmatprep.subr.mxu1 %v11421_v57  ;;  %3274 = vmatprep.mubr.f32.mxu0 %v11421_v57 }
 0x56f   :  { %6949 = vmatprep.mubr.msk.f32.mxu1 %vm7669_vm0, %v11421_v57  ;;  %3210 = vmatprep.subr.mxu0 %v9542_v32  ;;  %v9647_v32 = vld [vmem:[#allocation7 + $0x68] sm:$0xff] }
 0x570   :  { %3211 = vmatpush1.msra.mxu0 %v9545_v1  ;;  %6918 = vmatpush3.msra.mxu1 %v9547_v55  ;;  %v9623_v55 = vld [vmem:[#allocation7 + $0xa8] sm:$0xff]  ;;  %v9633_v1 = vld [vmem:[#allocation7 + $0xa0] sm:$0xff]  ;;  %11764 = vst [vmem:[#allocation62_spill] sm:$0xff] %v9647_v32 }
 0x571   :  { %3212 = vmatprep.subr.mxu0 %v9551_v45  ;;  %6919 = vmatprep.subr.mxu1 %v11421_v57  ;;  %v9571_v45 = vld [vmem:[#allocation7 + $0x128] sm:$0xff]  ;;  %11756 = vst [vmem:[#allocation54_spill] sm:$0xff] %v9623_v55  ;;  %11760 = vst [vmem:[#allocation58_spill] sm:$0xff] %v9633_v1 }
 0x572   :  { %3213 = vmatpush1.msra.mxu0 %v9555_v47  ;;  %6920 = vmatpush3.msra.mxu1 %v9557_v14  ;;  %11740 = vst [vmem:[#allocation38_spill] sm:$0xff] %v9571_v45  ;;  %v9575_v14 = vld [vmem:[#allocation7 + $0x120] sm:$0xff]  ;;  %v9577_v47 = vld [vmem:[#allocation7 + $0x130] sm:$0xff] }
 0x573   :  { %3214 = vmatprep.subr.mxu0 %v9561_v49  ;;  %6921 = vmatprep.subr.mxu1 %v11421_v57  ;;  %11741 = vst [vmem:[#allocation39_spill] sm:$0xff] %v9575_v14  ;;  %11742 = vst [vmem:[#allocation40_spill] sm:$0xff] %v9577_v47  ;;  %v9581_v49 = vld [vmem:[#allocation7 + $0x110] sm:$0xff] }
 0x574   :  { %3215 = vmatpush1.msra.mxu0 %v9565_v53  ;;  %6922 = vmatpush3.msra.mxu1 %v9567_v44  ;;  %11743 = vst [vmem:[#allocation41_spill] sm:$0xff] %v9581_v49  ;;  %v9585_v44 = vld [vmem:[#allocation7 + $0x108] sm:$0xff]  ;;  %v9587_v53 = vld [vmem:[#allocation7 + $0x118] sm:$0xff] }
 0x575   :  { %3216 = vmatprep.subr.mxu0 %v9571_v45  ;;  %6923 = vmatprep.subr.mxu1 %v11421_v57  ;;  %11744 = vst [vmem:[#allocation42_spill] sm:$0xff] %v9585_v44  ;;  %11745 = vst [vmem:[#allocation43_spill] sm:$0xff] %v9587_v53  ;;  %v9591_v45 = vld [vmem:[#allocation7 + $0xf8] sm:$0xff] }
 0x576   :  { %3217 = vmatpush1.msra.mxu0 %v9575_v14  ;;  %6924 = vmatpush3.msra.mxu1 %v9577_v47  ;;  %11746 = vst [vmem:[#allocation44_spill] sm:$0xff] %v9591_v45  ;;  %v9595_v47 = vld [vmem:[#allocation7 + $0xf0] sm:$0xff]  ;;  %v9597_v14 = vld [vmem:[#allocation7 + $0x100] sm:$0xff] }
 0x577   :  { %3218 = vmatprep.subr.mxu0 %v9581_v49  ;;  %6925 = vmatprep.subr.mxu1 %v11421_v57  ;;  %11747 = vst [vmem:[#allocation45_spill] sm:$0xff] %v9595_v47  ;;  %11748 = vst [vmem:[#allocation46_spill] sm:$0xff] %v9597_v14  ;;  %v9601_v49 = vld [vmem:[#allocation7 + $0xe0] sm:$0xff] }
 0x578   :  { %3219 = vmatpush1.msra.mxu0 %v9585_v44  ;;  %6926 = vmatpush3.msra.mxu1 %v9587_v53  ;;  %11749 = vst [vmem:[#allocation47_spill] sm:$0xff] %v9601_v49  ;;  %v9605_v53 = vld [vmem:[#allocation7 + $0xd8] sm:$0xff]  ;;  %v9607_v44 = vld [vmem:[#allocation7 + $0xe8] sm:$0xff] }
 0x579   :  { %3220 = vmatprep.subr.mxu0 %v9591_v45  ;;  %6927 = vmatprep.subr.mxu1 %v11421_v57  ;;  %11750 = vst [vmem:[#allocation48_spill] sm:$0xff] %v9605_v53  ;;  %11751 = vst [vmem:[#allocation49_spill] sm:$0xff] %v9607_v44  ;;  %v9611_v45 = vld [vmem:[#allocation7 + $0xc8] sm:$0xff] }
 0x57a   :  { %3221 = vmatpush1.msra.mxu0 %v9595_v47  ;;  %6928 = vmatpush3.msra.mxu1 %v9597_v14  ;;  %11752 = vst [vmem:[#allocation50_spill] sm:$0xff] %v9611_v45  ;;  %v9615_v14 = vld [vmem:[#allocation7 + $0xc0] sm:$0xff]  ;;  %v9617_v47 = vld [vmem:[#allocation7 + $0xd0] sm:$0xff] }
 0x57b   :  { %3222 = vmatprep.subr.mxu0 %v9601_v49  ;;  %6929 = vmatprep.subr.mxu1 %v11421_v57  ;;  %11753 = vst [vmem:[#allocation51_spill] sm:$0xff] %v9615_v14  ;;  %11754 = vst [vmem:[#allocation52_spill] sm:$0xff] %v9617_v47  ;;  %v9621_v49 = vld [vmem:[#allocation7 + $0xb0] sm:$0xff] }
 0x57c   :  { %3223 = vmatpush1.msra.mxu0 %v9605_v53  ;;  %6930 = vmatpush3.msra.mxu1 %v9607_v44  ;;  %11755 = vst [vmem:[#allocation53_spill] sm:$0xff] %v9621_v49  ;;  %v9625_v53 = vld [vmem:[#allocation7 + $0xb8] sm:$0xff]  ;;  %v9631_v44 = vld [vmem:[#allocation7 + $0x90] sm:$0xff] }
 0x57d   :  { %3224 = vmatprep.subr.mxu0 %v9611_v45  ;;  %6931 = vmatprep.subr.mxu1 %v11421_v57  ;;  %11757 = vst [vmem:[#allocation55_spill] sm:$0xff] %v9625_v53  ;;  %v9629_v45 = vld [vmem:[#allocation7 + $0x98] sm:$0xff]  ;;  %11759 = vst [vmem:[#allocation57_spill] sm:$0xff] %v9631_v44 }
 0x57e   :  { %3225 = vmatpush1.msra.mxu0 %v9615_v14  ;;  %6932 = vmatpush3.msra.mxu1 %v9617_v47  ;;  %11758 = vst [vmem:[#allocation56_spill] sm:$0xff] %v9629_v45  ;;  %v9637_v47 = vld [vmem:[#allocation7 + $0x80] sm:$0xff]  ;;  %v9641_v14 = vld [vmem:[#allocation7 + $0x78] sm:$0xff] }
 0x57f   :  { %3226 = vmatprep.subr.mxu0 %v9621_v49  ;;  %6933 = vmatprep.subr.mxu1 %v11421_v57  ;;  %11761 = vst [vmem:[#allocation59_spill] sm:$0xff] %v9637_v47  ;;  %11762 = vst [vmem:[#allocation60_spill] sm:$0xff] %v9641_v14  ;;  %v9643_v49 = vld [vmem:[#allocation7 + $0x88] sm:$0xff] }
 0x580   :  { %3227 = vmatpush1.msra.mxu0 %v9623_v55  ;;  %6934 = vmatpush3.msra.mxu1 %v9625_v53  ;;  %11763 = vst [vmem:[#allocation61_spill] sm:$0xff] %v9643_v49  ;;  %v9651_v53 = vld [vmem:[#allocation7 + $0x60] sm:$0xff]  ;;  %v9653_v55 = vld [vmem:[#allocation7 + $0x70] sm:$0xff] }
 0x581   :  { %3228 = vmatprep.subr.mxu0 %v9629_v45  ;;  %6935 = vmatprep.subr.mxu1 %v11421_v57  ;;  %11765 = vst [vmem:[#allocation63_spill] sm:$0xff] %v9651_v53  ;;  %11766 = vst [vmem:[#allocation64_spill] sm:$0xff] %v9653_v55  ;;  %v9657_v45 = vld [vmem:[#allocation7 + $0x50] sm:$0xff] }
 0x582   :  { %3229 = vmatpush1.msra.mxu0 %v9631_v44  ;;  %6936 = vmatpush3.msra.mxu1 %v9633_v1  ;;  %11767 = vst [vmem:[#allocation65_spill] sm:$0xff] %v9657_v45  ;;  %v9661_v1 = vld [vmem:[#allocation7 + $0x48] sm:$0xff]  ;;  %v9663_v44 = vld [vmem:[#allocation7 + $0x58] sm:$0xff] }
 0x583   :  { %3230 = vmatprep.subr.mxu0 %v9637_v47  ;;  %6937 = vmatprep.subr.mxu1 %v11421_v57  ;;  %11768 = vst [vmem:[#allocation67_spill] sm:$0xff] %v9661_v1  ;;  %11769 = vst [vmem:[#allocation68_spill] sm:$0xff] %v9663_v44  ;;  %v9667_v47 = vld [vmem:[#allocation7 + $0x38] sm:$0xff] }
 0x584   :  { %3231 = vmatpush1.msra.mxu0 %v9641_v14  ;;  %6938 = vmatpush3.msra.mxu1 %v9643_v49  ;;  %11770 = vst [vmem:[#allocation69_spill] sm:$0xff] %v9667_v47  ;;  %v9671_v49 = vld [vmem:[#allocation7 + $0x30] sm:$0xff]  ;;  %v9673_v14 = vld [vmem:[#allocation7 + $0x40] sm:$0xff] }
 0x585   :  { %3232 = vmatprep.subr.mxu0 %v9647_v32  ;;  %6939 = vmatprep.subr.mxu1 %v11421_v57  ;;  %11771 = vst [vmem:[#allocation70_spill] sm:$0xff] %v9671_v49  ;;  %11772 = vst [vmem:[#allocation71_spill] sm:$0xff] %v9673_v14  ;;  %v9677_v32 = vld [vmem:[#allocation7 + $0x20] sm:$0xff] }
 0x586   :  { %3233 = vmatpush1.msra.mxu0 %v9651_v53  ;;  %6940 = vmatpush3.msra.mxu1 %v9653_v55  ;;  %11773 = vst [vmem:[#allocation72_spill] sm:$0xff] %v9677_v32  ;;  %v9681_v55 = vld [vmem:[#allocation7 + $0x18] sm:$0xff]  ;;  %v9683_v53 = vld [vmem:[#allocation7 + $0x28] sm:$0xff] }
 0x587   :  { %3234 = vmatprep.subr.mxu0 %v9657_v45  ;;  %6941 = vmatprep.subr.mxu1 %v11421_v57  ;;  %11774 = vst [vmem:[#allocation73_spill] sm:$0xff] %v9681_v55  ;;  %11775 = vst [vmem:[#allocation74_spill] sm:$0xff] %v9683_v53  ;;  %v9687_v45 = vld [vmem:[#allocation7 + $0x8] sm:$0xff] }
 0x588   :  { %3235 = vmatpush1.msra.mxu0 %v9661_v1  ;;  %6942 = vmatpush3.msra.mxu1 %v9663_v44  ;;  %11776 = vst [vmem:[#allocation75_spill] sm:$0xff] %v9687_v45  ;;  %v9691_v44 = vld [vmem:[#allocation7] sm:$0xff]  ;;  %v9693_v1 = vld [vmem:[#allocation7 + $0x10] sm:$0xff] }
 0x589   :  { %3236 = vmatprep.subr.mxu0 %v9667_v47  ;;  %6943 = vmatprep.subr.mxu1 %v11421_v57  ;;  %11777 = vst [vmem:[#allocation76_spill] sm:$0xff] %v9691_v44  ;;  %11778 = vst [vmem:[#allocation77_spill] sm:$0xff] %v9693_v1  ;;  %v9697_v47 = vld [vmem:[#allocation9 + $0x170] sm:$0xff] }
 0x58a   :  { %3237 = vmatpush1.msra.mxu0 %v9671_v49  ;;  %6944 = vmatpush3.msra.mxu1 %v9673_v14  ;;  %11779 = vst [vmem:[#allocation78_spill] sm:$0xff] %v9697_v47 }
 0x58b   :  { %3238 = vmatprep.subr.mxu0 %v9677_v32  ;;  %6945 = vmatprep.subr.mxu1 %v11421_v57 }
 0x58c   :  { %3239 = vmatpush1.msra.mxu0 %v9681_v55  ;;  %6946 = vmatpush3.msra.mxu1 %v9683_v53  ;;  %v2869_v53 = vld [vmem:[%s10973_s10] sm:$0x3] }
 0x58d   :  { %3240 = vmatprep.subr.mxu0 %v9687_v45  ;;  %6947 = vmatprep.subr.mxu1 %v11421_v57  ;;  %v2874_v45 = vrot.slane %v2869_v53, %v11692_v46  ;;  %v2878_v50 = vrot.slane %v2869_v53, %v8150_v61 }
 0x58e   :  { %3241 = vmatpush1.msra.mxu0 %v9691_v44  ;;  %6948 = vmatpush3.msra.mxu1 %v9693_v1 }
 0x58f   :  { %3399 = vmatprep.subr.mxu0 %v9697_v47  ;;  %6952 = vmatprep.subr.mxu1 %v11421_v57 }
 0x5ea   :  { %v2674_v32 = vpop.f32.mrf.mxu1  ;;  %v2603_v49 = vpop.f32.mrf.mxu0 }
 0x5ec   :  { %v6846_v14 = vpop.f32.mrf.mxu1  ;;  %v2605_v55 = vpop.f32.mrf.mxu0 }
 0x60b   :  { %v2792_v8 = vpop.f32.mrf.mxu0  ;;  %v2863_v22 = vpop.f32.mrf.mxu1 }
 0x60c   :  { %v2867_v9 = vadd.f32 %v2792_v8, %v2603_v49 }
 0x60d   :  { %v2794_v44 = vpop.f32.mrf.mxu0  ;;  %v6881_v12 = vpop.f32.mrf.mxu1 }
 0x60e   :  { %v2881_v1 = vadd.f32 %v2874_v45, %v2867_v9  ;;  %v2868_v47 = vadd.f32 %v2794_v44, %v2605_v55  ;;  %v3118_v12 = vrot.slane %v3113_v7, %v11692_v46  ;;  %v2919_v9 = vld [vmem:[#allocation2] sm:$0x3]  ;;  %v2910_v45 = vadd.f32 %v9281_v27, %v2863_v22 }
 0x60f   :  { %v3122_v46 = vrot.slane %v3113_v7, %v8150_v61  ;;  %v9728_v7 = vld [vmem:[%s11419_s3] ss:$0 sm:$0xff] }
 0x610   :  { %v5975_v4 = vmul.f32 -1.442695, %v2881_v1  ;;  %v2882_v14 = vadd.f32 %v2878_v50, %v2868_v47 }
 0x612   :  { %7455 = vpow2.f32 %v5975_v4  ;;  %v5976_v11 = vmul.f32 -1.442695, %v2882_v14  ;;  %v2920_v14 = vld [vmem:[#allocation2 + $0x18] sm:$0x3] }
 0x614   :  { %7457 = vpow2.f32 %v5976_v11  ;;  %v2902_v11 = vadd.f32 %v9289_v29, %v2674_v32 }
 0x61f   :  { %v7456_v10 = vpop.eup %7455 }
 0x620   :  { %v2889_v15 = vadd.f32 1.0, %v7456_v10 }
 0x621   :  { %v7458_v42 = vpop.eup %7457 }
 0x622   :  { %7459 = vrcp.f32 %v2889_v15  ;;  %v2890_v8 = vadd.f32 1.0, %v7458_v42 }
 0x624   :  { %7461 = vrcp.f32 %v2890_v8 }
 0x62d   :  { %v3036_v1 = vpop.f32.mrf.mxu0  ;;  %v3107_v55 = vpop.f32.mrf.mxu1 }
 0x62e   :  { %v3111_v4 = vadd.f32 %v3036_v1, %v2919_v9 }
 0x62f   :  { %v7460_v50 = vpop.eup %7459  ;;  %v6916_v47 = vpop.f32.mrf.mxu1 }
 0x630   :  { %v2911_v10 = vmul.f32 %v7460_v50, %v2910_v45  ;;  %v3125_v15 = vadd.f32 %v3118_v12, %v3111_v4  ;;  %v3038_v49 = vpop.f32.mrf.mxu0  ;;  %v11780_v45 = vlaneseq  ;;  %v2921_v47 = vld [vmem:[#allocation2 + $0x20] sm:$0x3] }
 0x631   :  { %v3112_v42 = vadd.f32 %v3038_v49, %v2920_v14  ;;  %v7462_v27 = vpop.eup %7461 }
 0x632   :  { %v2912_v53 = vadd.f32 %v2911_v10, %v2902_v11  ;;  %v5979_v44 = vmul.f32 -1.442695, %v3125_v15  ;;  %v2914_v22 = vsub.f32 1.0, %v7462_v27  ;;  %v2916_v32 = vmul.f32 %v7462_v27, %v9296_v24  ;;  %v9736_v11 = vld [vmem:[%s11420_s30] ss:$0 sm:$0xff] }
 0x633   :  { %v3126_v18 = vadd.f32 %v3122_v46, %v3112_v42  ;;  %v5657_v4 = vand.u32 127, %v11780_v45  ;;  %v3154_v10 = vadd.f32 %v9728_v7, %v3107_v55  ;;  %v3146_v49 = vadd.f32 %v9736_v11, %v2921_v47  ;;  %v9748_v55 = vld [vmem:[#allocation9 + $0x158] sm:$0xff]  ;;  %v9754_v45 = vld [vmem:[#allocation9 + $0x160] sm:$0xff]  ;;  %v9774_v47 = vld [vmem:[#allocation9 + $0x130] sm:$0xff] }
 0x634   :  { %7463 = vtanh.f32 %v2912_v53 }
 0x635   :  { %7465 = vpow2.f32 %v5979_v44  ;;  %v5980_v38 = vmul.f32 -1.442695, %v3126_v18  ;;  %vm5658_vm1 = vcmp.lt.s32.totalorder %v5657_v4, 64  ;;  %v9762_v4 = vld [vmem:[#allocation9 + $0x138] sm:$0xff] }
 0x636   :  { %v9723_v46 = vsel %vm5658_vm1, 1.0, %v11421_v57 }
 0x637   :  { %7467 = vpow2.f32 %v5980_v38  ;;  %11781 = vst [vmem:[#allocation79_spill] sm:$0xff] %v9723_v46 }
 0x641   :  { %v7464_v9 = vpop.eup %7463 }
 0x642   :  { %v7466_v1 = vpop.eup %7465  ;;  %v2915_v29 = vmul.f32 %v7464_v9, %v2914_v22 }
 0x643   :  { %v3133_v8 = vadd.f32 1.0, %v7466_v1 }
 0x644   :  { %v9718_v12 = vadd.f32 %v2916_v32, %v2915_v29  ;;  %v7468_v18 = vpop.eup %7467  ;;  %v9744_v29 = vld [vmem:[#allocation9 + $0x168] sm:$0xff]  ;;  %v9746_v32 = vld [vmem:[#allocation9 + $0x178] sm:$0xff] }
 0x645   :  { %7469 = vrcp.f32 %v3133_v8  ;;  %v3134_v50 = vadd.f32 1.0, %v7468_v18  ;;  %v9752_v8 = vld [vmem:[#allocation9 + $0x150] sm:$0xff]  ;;  %v9764_v18 = vld [vmem:[#allocation9 + $0x148] sm:$0xff] }
 0x646   :  { %2918 = vst [vmem:[#allocation3 + $0x6] sm:$0x3] %v9718_v12 }
 0x647   :  { %7471 = vrcp.f32 %v3134_v50  ;;  %v9772_v50 = vld [vmem:[#allocation9 + $0x120] sm:$0xff] }
 0x64d   :  { %v5661_v38 = vld [vmem:[#allocation3] sm:$0xff] }
 0x64e   :  { %v9731_v24 = vmul.f32 %v9723_v46, %v5661_v38  ;;  %v9768_v38 = vld [vmem:[#allocation9 + $0x128] sm:$0xff] }
 0x650   :  { %5665 = vadd.xlane.f32.xlu1 %v9731_v24 }
 0x652   :  { %v7470_v15 = vpop.eup %7469 }
 0x653   :  { %v3155_v53 = vmul.f32 %v7470_v15, %v3154_v10  ;;  %v9778_v10 = vld [vmem:[#allocation9 + $0x110] sm:$0xff]  ;;  %v9782_v15 = vld [vmem:[#allocation9 + $0x108] sm:$0xff] }
 0x654   :  { %v7472_v14 = vpop.eup %7471  ;;  %11782 = vst [vmem:[#allocation80_spill] sm:$0xff] %v9782_v15 }
 0x655   :  { %v3156_v44 = vadd.f32 %v3155_v53, %v3146_v49  ;;  %v3158_v42 = vsub.f32 1.0, %v7472_v14  ;;  %v3160_v9 = vmul.f32 %v7472_v14, %v9302_v48  ;;  %v9758_v48 = vld [vmem:[#allocation9 + $0x140] sm:$0xff]  ;;  %v9784_v49 = vld [vmem:[#allocation9 + $0x118] sm:$0xff] }
 0x656   :  { %11783 = vst [vmem:[#allocation81_spill] sm:$0xff] %v9784_v49  ;;  %v9788_v53 = vld [vmem:[#allocation9 + $0xf8] sm:$0xff]  ;;  %v9794_v14 = vld [vmem:[#allocation9 + $0x100] sm:$0xff] }
 0x657   :  { %7473 = vtanh.f32 %v3156_v44  ;;  %11784 = vst [vmem:[#allocation82_spill] sm:$0xff] %v9788_v53  ;;  %v9792_v44 = vld [vmem:[#allocation9 + $0xf0] sm:$0xff]  ;;  %11786 = vst [vmem:[#allocation84_spill] sm:$0xff] %v9794_v14 }
 0x658   :  { %11785 = vst [vmem:[#allocation83_spill] sm:$0xff] %v9792_v44 }
 0x664   :  { %v7474_v27 = vpop.eup %7473 }
 0x665   :  { %v3159_v22 = vmul.f32 %v7474_v27, %v3158_v42  ;;  %v9798_v42 = vld [vmem:[#allocation9 + $0xe0] sm:$0xff]  ;;  %v9802_v27 = vld [vmem:[#allocation9 + $0xd8] sm:$0xff] }
 0x666   :  { %11787 = vst [vmem:[#allocation85_spill] sm:$0xff] %v9798_v42  ;;  %11788 = vst [vmem:[#allocation86_spill] sm:$0xff] %v9802_v27 }
 0x667   :  { %v9742_v1 = vadd.f32 %v3160_v9, %v3159_v22  ;;  %v9804_v22 = vld [vmem:[#allocation9 + $0xe8] sm:$0xff] }
 0x668   :  { %11789 = vst [vmem:[#allocation87_spill] sm:$0xff] %v9804_v22  ;;  %v9808_v9 = vld [vmem:[#allocation9 + $0xc8] sm:$0xff] }
 0x669   :  { %3275 = vmatmul.mubr.f32.vlgmr.msra.gmra.mxu0 %v9742_v1  ;;  %6950 = vmatmul.mubr.f32.vlgmr.msra.gmra.mxu1 %v9742_v1  ;;  %11790 = vst [vmem:[#allocation88_spill] sm:$0xff] %v9808_v9 }
 0x66a   :  { %3400 = vmatpush1.msra.mxu0 %v9744_v29  ;;  %6953 = vmatpush3.msra.mxu1 %v9746_v32 }
 0x66b   :  { %3401 = vmatprep.subr.mxu0 %v9748_v55  ;;  %6954 = vmatprep.subr.mxu1 %v11421_v57 }
 0x66c   :  { %3402 = vmatpush1.msra.mxu0 %v9752_v8  ;;  %6955 = vmatpush3.msra.mxu1 %v9754_v45 }
 0x66d   :  { %3403 = vmatprep.subr.mxu0 %v9758_v48  ;;  %6956 = vmatprep.subr.mxu1 %v11421_v57 }
 0x66e   :  { %3404 = vmatpush1.msra.mxu0 %v9762_v4  ;;  %6957 = vmatpush3.msra.mxu1 %v9764_v18 }
 0x66f   :  { %3405 = vmatprep.subr.mxu0 %v9768_v38  ;;  %6958 = vmatprep.subr.mxu1 %v11421_v57 }
 0x670   :  { %3406 = vmatpush1.msra.mxu0 %v9772_v50  ;;  %6959 = vmatpush3.msra.mxu1 %v9774_v47 }
 0x671   :  { %3407 = vmatprep.subr.mxu0 %v9778_v10  ;;  %6960 = vmatprep.subr.mxu1 %v11421_v57 }
 0x672   :  { %3408 = vmatpush1.msra.mxu0 %v9782_v15  ;;  %6961 = vmatpush3.msra.mxu1 %v9784_v49  ;;  %v9812_v49 = vld [vmem:[#allocation9 + $0xc0] sm:$0xff]  ;;  %v9814_v15 = vld [vmem:[#allocation9 + $0xd0] sm:$0xff] }
 0x673   :  { %3409 = vmatprep.subr.mxu0 %v9788_v53  ;;  %6962 = vmatprep.subr.mxu1 %v11421_v57  ;;  %11791 = vst [vmem:[#allocation89_spill] sm:$0xff] %v9812_v49  ;;  %11792 = vst [vmem:[#allocation90_spill] sm:$0xff] %v9814_v15  ;;  %v9818_v53 = vld [vmem:[#allocation9 + $0xb0] sm:$0xff] }
 0x674   :  { %3410 = vmatpush1.msra.mxu0 %v9792_v44  ;;  %6963 = vmatpush3.msra.mxu1 %v9794_v14  ;;  %11793 = vst [vmem:[#allocation91_spill] sm:$0xff] %v9818_v53  ;;  %v9822_v14 = vld [vmem:[#allocation9 + $0xa8] sm:$0xff]  ;;  %v9824_v44 = vld [vmem:[#allocation9 + $0xb8] sm:$0xff] }
 0x675   :  { %3411 = vmatprep.subr.mxu0 %v9798_v42  ;;  %6964 = vmatprep.subr.mxu1 %v11421_v57  ;;  %11794 = vst [vmem:[#allocation92_spill] sm:$0xff] %v9822_v14  ;;  %11795 = vst [vmem:[#allocation93_spill] sm:$0xff] %v9824_v44  ;;  %v9828_v42 = vld [vmem:[#allocation9 + $0x98] sm:$0xff] }
 0x676   :  { %3412 = vmatpush1.msra.mxu0 %v9802_v27  ;;  %6965 = vmatpush3.msra.mxu1 %v9804_v22  ;;  %11796 = vst [vmem:[#allocation94_spill] sm:$0xff] %v9828_v42  ;;  %v9832_v22 = vld [vmem:[#allocation9 + $0x90] sm:$0xff]  ;;  %v9834_v27 = vld [vmem:[#allocation9 + $0xa0] sm:$0xff] }
 0x677   :  { %3413 = vmatprep.subr.mxu0 %v9808_v9  ;;  %6966 = vmatprep.subr.mxu1 %v11421_v57  ;;  %11797 = vst [vmem:[#allocation95_spill] sm:$0xff] %v9832_v22  ;;  %11798 = vst [vmem:[#allocation96_spill] sm:$0xff] %v9834_v27  ;;  %v9838_v9 = vld [vmem:[#allocation9 + $0x80] sm:$0xff] }
 0x678   :  { %3414 = vmatpush1.msra.mxu0 %v9812_v49  ;;  %6967 = vmatpush3.msra.mxu1 %v9814_v15  ;;  %11799 = vst [vmem:[#allocation97_spill] sm:$0xff] %v9838_v9  ;;  %v9842_v15 = vld [vmem:[#allocation9 + $0x78] sm:$0xff]  ;;  %v9844_v49 = vld [vmem:[#allocation9 + $0x88] sm:$0xff] }
 0x679   :  { %3415 = vmatprep.subr.mxu0 %v9818_v53  ;;  %6968 = vmatprep.subr.mxu1 %v11421_v57  ;;  %11800 = vst [vmem:[#allocation98_spill] sm:$0xff] %v9842_v15  ;;  %11801 = vst [vmem:[#allocation99_spill] sm:$0xff] %v9844_v49  ;;  %v9848_v53 = vld [vmem:[#allocation9 + $0x68] sm:$0xff] }
 0x67a   :  { %3416 = vmatpush1.msra.mxu0 %v9822_v14  ;;  %6969 = vmatpush3.msra.mxu1 %v9824_v44  ;;  %11802 = vst [vmem:[#allocation100_spill] sm:$0xff] %v9848_v53  ;;  %v9852_v44 = vld [vmem:[#allocation9 + $0x60] sm:$0xff]  ;;  %v9854_v14 = vld [vmem:[#allocation9 + $0x70] sm:$0xff] }
 0x67b   :  { %3417 = vmatprep.subr.mxu0 %v9828_v42  ;;  %6970 = vmatprep.subr.mxu1 %v11421_v57  ;;  %11803 = vst [vmem:[#allocation101_spill] sm:$0xff] %v9852_v44  ;;  %11804 = vst [vmem:[#allocation102_spill] sm:$0xff] %v9854_v14  ;;  %v9858_v42 = vld [vmem:[#allocation9 + $0x50] sm:$0xff] }
 0x67c   :  { %3418 = vmatpush1.msra.mxu0 %v9832_v22  ;;  %6971 = vmatpush3.msra.mxu1 %v9834_v27  ;;  %11805 = vst [vmem:[#allocation103_spill] sm:$0xff] %v9858_v42  ;;  %v9862_v27 = vld [vmem:[#allocation9 + $0x48] sm:$0xff]  ;;  %v9864_v22 = vld [vmem:[#allocation9 + $0x58] sm:$0xff] }
 0x67d   :  { %3419 = vmatprep.subr.mxu0 %v9838_v9  ;;  %6972 = vmatprep.subr.mxu1 %v11421_v57  ;;  %11806 = vst [vmem:[#allocation104_spill] sm:$0xff] %v9864_v22  ;;  %v9868_v9 = vld [vmem:[#allocation9 + $0x38] sm:$0xff] }
 0x67e   :  { %3420 = vmatpush1.msra.mxu0 %v9842_v15  ;;  %6973 = vmatpush3.msra.mxu1 %v9844_v49  ;;  %11807 = vst [vmem:[#allocation105_spill] sm:$0xff] %v9868_v9  ;;  %v9872_v49 = vld [vmem:[#allocation9 + $0x30] sm:$0xff]  ;;  %v9874_v15 = vld [vmem:[#allocation9 + $0x40] sm:$0xff] }
 0x67f   :  { %3421 = vmatprep.subr.mxu0 %v9848_v53  ;;  %6974 = vmatprep.subr.mxu1 %v11421_v57  ;;  %v9878_v53 = vld [vmem:[#allocation9 + $0x20] sm:$0xff] }
 0x680   :  { %3422 = vmatpush1.msra.mxu0 %v9852_v44  ;;  %6975 = vmatpush3.msra.mxu1 %v9854_v14  ;;  %v9882_v14 = vld [vmem:[#allocation9 + $0x18] sm:$0xff]  ;;  %v9884_v44 = vld [vmem:[#allocation9 + $0x28] sm:$0xff] }
 0x681   :  { %3423 = vmatprep.subr.mxu0 %v9858_v42  ;;  %6976 = vmatprep.subr.mxu1 %v11421_v57  ;;  %v9888_v42 = vld [vmem:[#allocation9 + $0x8] sm:$0xff] }
 0x682   :  { %3424 = vmatpush1.msra.mxu0 %v9862_v27  ;;  %6977 = vmatpush3.msra.mxu1 %v9864_v22  ;;  %v9892_v22 = vld [vmem:[#allocation9] sm:$0xff] }
 0x683   :  { %3425 = vmatprep.subr.mxu0 %v9868_v9  ;;  %6978 = vmatprep.subr.mxu1 %v11421_v57  ;;  %v9896_v9 = vld [vmem:[#allocation9 + $0x10] sm:$0xff] }
 0x684   :  { %3426 = vmatpush1.msra.mxu0 %v9872_v49  ;;  %6979 = vmatpush3.msra.mxu1 %v9874_v15 }
 0x685   :  { %3427 = vmatprep.subr.mxu0 %v9878_v53  ;;  %6980 = vmatprep.subr.mxu1 %v11421_v57 }
 0x686   :  { %3428 = vmatpush1.msra.mxu0 %v9882_v14  ;;  %6981 = vmatpush3.msra.mxu1 %v9884_v44 }
 0x687   :  { %3429 = vmatprep.subr.mxu0 %v9888_v42  ;;  %6982 = vmatprep.subr.mxu1 %v11421_v57 }
 0x688   :  { %3430 = vmatpush1.msra.mxu0 %v9892_v22  ;;  %3463 = vmatprep.mubr.f32.mxu0 %v11421_v57 }
 0x689   :  { %6983 = vmatpush3.msra.mxu1 %v9896_v9  ;;  %6984 = vmatprep.mubr.msk.f32.mxu1 %vm7669_vm0, %v11421_v57 }
 0x68a   :  { %3464 = vmatmul.mubr.f32.vlgmr.msra.gmra.mxu0 %v9718_v12  ;;  %6985 = vmatmul.mubr.f32.vlgmr.msra.gmra.mxu1 %v9718_v12 }
 0x68b   :  { %3643 = vmatprep.subr.mxu0 %v9368_v20  ;;  %6987 = vmatprep.subr.mxu1 %v11421_v57  ;;  %v11808_v20 = vld [vmem:[#allocation16_spill] sm:$0xff] }
 0x68c   :  { %3644 = vmatpush1.msra.mxu0 %v9373_v16  ;;  %6988 = vmatpush3.msra.mxu1 %v9375_v6  ;;  %v11809_v16 = vld [vmem:[#allocation19_spill] sm:$0xff]  ;;  %v11810_v6 = vld [vmem:[#allocation17_spill] sm:$0xff] }
 0x68d   :  { %3645 = vmatprep.subr.mxu0 %v9379_v51  ;;  %6989 = vmatprep.subr.mxu1 %v11421_v57  ;;  %v11811_v51 = vld [vmem:[#allocation18_spill] sm:$0xff] }
 0x68e   :  { %3646 = vmatpush1.msra.mxu0 %v9383_v19  ;;  %6990 = vmatpush3.msra.mxu1 %v9385_v23  ;;  %v11812_v19 = vld [vmem:[#allocation20_spill] sm:$0xff]  ;;  %v11813_v23 = vld [vmem:[#allocation21_spill] sm:$0xff] }
 0x68f   :  { %3647 = vmatprep.subr.mxu0 %v9389_v21  ;;  %6991 = vmatprep.subr.mxu1 %v11421_v57  ;;  %v11814_v21 = vld [vmem:[#allocation22_spill] sm:$0xff] }
 0x690   :  { %3648 = vmatpush1.msra.mxu0 %v9393_v5  ;;  %6992 = vmatpush3.msra.mxu1 %v9395_v34  ;;  %v11815_v5 = vld [vmem:[#allocation23_spill] sm:$0xff]  ;;  %v11816_v34 = vld [vmem:[#allocation24_spill] sm:$0xff] }
 0x691   :  { %3649 = vmatprep.subr.mxu0 %v9399_v56  ;;  %6993 = vmatprep.subr.mxu1 %v11421_v57  ;;  %v11817_v56 = vld [vmem:[#allocation25_spill] sm:$0xff] }
 0x692   :  { %3650 = vmatpush1.msra.mxu0 %v9403_v60  ;;  %6994 = vmatpush3.msra.mxu1 %v9405_v63  ;;  %v11818_v60 = vld [vmem:[#allocation26_spill] sm:$0xff]  ;;  %v11819_v63 = vld [vmem:[#allocation27_spill] sm:$0xff] }
 0x693   :  { %3651 = vmatprep.subr.mxu0 %v9409_v2  ;;  %6995 = vmatprep.subr.mxu1 %v11421_v57  ;;  %v11820_v2 = vld [vmem:[#allocation29_spill] sm:$0xff] }
 0x694   :  { %3652 = vmatpush1.msra.mxu0 %v9413_v54  ;;  %6996 = vmatpush3.msra.mxu1 %v9415_v58  ;;  %v11821_v54 = vld [vmem:[#allocation28_spill] sm:$0xff]  ;;  %v11822_v58 = vld [vmem:[#allocation30_spill] sm:$0xff] }
 0x695   :  { %3653 = vmatprep.subr.mxu0 %v9419_v41  ;;  %6997 = vmatprep.subr.mxu1 %v11421_v57  ;;  %v11823_v41 = vld [vmem:[#allocation31_spill] sm:$0xff] }
 0x696   :  { %3654 = vmatpush1.msra.mxu0 %v9423_v25  ;;  %6998 = vmatpush3.msra.mxu1 %v9425_v26  ;;  %v11824_v25 = vld [vmem:[#allocation32_spill] sm:$0xff]  ;;  %v11825_v26 = vld [vmem:[#allocation33_spill] sm:$0xff] }
 0x697   :  { %3655 = vmatprep.subr.mxu0 %v9429_v28  ;;  %6999 = vmatprep.subr.mxu1 %v11421_v57  ;;  %v11826_v28 = vld [vmem:[#allocation34_spill] sm:$0xff] }
 0x698   :  { %3656 = vmatpush1.msra.mxu0 %v9433_v30  ;;  %7000 = vmatpush3.msra.mxu1 %v9435_v31  ;;  %v11827_v30 = vld [vmem:[#allocation35_spill] sm:$0xff]  ;;  %v11828_v31 = vld [vmem:[#allocation36_spill] sm:$0xff] }
 0x699   :  { %3657 = vmatprep.subr.mxu0 %v9439_v52  ;;  %7001 = vmatprep.subr.mxu1 %v11421_v57  ;;  %v11829_v52 = vld [vmem:[#allocation37_spill] sm:$0xff] }
 0x69a   :  { %3658 = vmatpush1.msra.mxu0 %v9443_v33  ;;  %7002 = vmatpush3.msra.mxu1 %v9445_v35  ;;  %v11830_v33 = vld [vmem:[#allocation38_spill] sm:$0xff]  ;;  %v11831_v35 = vld [vmem:[#allocation39_spill] sm:$0xff] }
 0x69b   :  { %3659 = vmatprep.subr.mxu0 %v9449_v36  ;;  %7003 = vmatprep.subr.mxu1 %v11421_v57  ;;  %v11832_v36 = vld [vmem:[#allocation40_spill] sm:$0xff] }
 0x69c   :  { %3660 = vmatpush1.msra.mxu0 %v9453_v17  ;;  %7004 = vmatpush3.msra.mxu1 %v9455_v37  ;;  %v11833_v17 = vld [vmem:[#allocation41_spill] sm:$0xff]  ;;  %v11834_v37 = vld [vmem:[#allocation42_spill] sm:$0xff] }
 0x69d   :  { %3661 = vmatprep.subr.mxu0 %v9459_v39  ;;  %7005 = vmatprep.subr.mxu1 %v11421_v57  ;;  %v11835_v39 = vld [vmem:[#allocation43_spill] sm:$0xff] }
 0x69e   :  { %3662 = vmatpush1.msra.mxu0 %v9463_v59  ;;  %7006 = vmatpush3.msra.mxu1 %v9465_v43  ;;  %v11836_v59 = vld [vmem:[#allocation44_spill] sm:$0xff]  ;;  %v11837_v43 = vld [vmem:[#allocation45_spill] sm:$0xff] }
 0x69f   :  { %3663 = vmatprep.subr.mxu0 %v9469_v40  ;;  %7007 = vmatprep.subr.mxu1 %v11421_v57  ;;  %v11838_v40 = vld [vmem:[#allocation46_spill] sm:$0xff] }
 0x6a0   :  { %3664 = vmatpush1.msra.mxu0 %v9473_v0  ;;  %7008 = vmatpush3.msra.mxu1 %v9475_v3  ;;  %v11839_v0 = vld [vmem:[#allocation47_spill] sm:$0xff]  ;;  %v11840_v3 = vld [vmem:[#allocation48_spill] sm:$0xff] }
 0x6a1   :  { %3665 = vmatprep.subr.mxu0 %v9479_v62  ;;  %7009 = vmatprep.subr.mxu1 %v11421_v57  ;;  %v11841_v62 = vld [vmem:[#allocation49_spill] sm:$0xff] }
 0x6a2   :  { %3666 = vmatpush1.msra.mxu0 %v9483_v13  ;;  %7010 = vmatpush3.msra.mxu1 %v11808_v20  ;;  %v11842_v13 = vld [vmem:[#allocation50_spill] sm:$0xff]  ;;  %v11843_v20 = vld [vmem:[#allocation51_spill] sm:$0xff] }
 0x6a3   :  { %3667 = vmatprep.subr.mxu0 %v11809_v16  ;;  %7011 = vmatprep.subr.mxu1 %v11421_v57  ;;  %v11844_v16 = vld [vmem:[#allocation52_spill] sm:$0xff] }
 0x6a4   :  { %3668 = vmatpush1.msra.mxu0 %v11810_v6  ;;  %7012 = vmatpush3.msra.mxu1 %v11811_v51  ;;  %v11845_v6 = vld [vmem:[#allocation53_spill] sm:$0xff]  ;;  %v11846_v51 = vld [vmem:[#allocation54_spill] sm:$0xff] }
 0x6a5   :  { %3669 = vmatprep.subr.mxu0 %v11812_v19  ;;  %7013 = vmatprep.subr.mxu1 %v11421_v57  ;;  %v11847_v19 = vld [vmem:[#allocation55_spill] sm:$0xff] }
 0x6a6   :  { %3670 = vmatpush1.msra.mxu0 %v11813_v23  ;;  %7014 = vmatpush3.msra.mxu1 %v11814_v21  ;;  %v11848_v23 = vld [vmem:[#allocation56_spill] sm:$0xff]  ;;  %v11849_v21 = vld [vmem:[#allocation57_spill] sm:$0xff] }
 0x6a7   :  { %3671 = vmatprep.subr.mxu0 %v11815_v5  ;;  %7015 = vmatprep.subr.mxu1 %v11421_v57  ;;  %v11850_v5 = vld [vmem:[#allocation58_spill] sm:$0xff] }
 0x6a8   :  { %3672 = vmatpush1.msra.mxu0 %v11816_v34  ;;  %7016 = vmatpush3.msra.mxu1 %v11817_v56  ;;  %v11851_v34 = vld [vmem:[#allocation59_spill] sm:$0xff]  ;;  %v11852_v56 = vld [vmem:[#allocation60_spill] sm:$0xff] }
 0x6a9   :  { %3673 = vmatprep.subr.mxu0 %v11818_v60  ;;  %7017 = vmatprep.subr.mxu1 %v11421_v57  ;;  %v11853_v60 = vld [vmem:[#allocation61_spill] sm:$0xff] }
 0x6aa   :  { %3674 = vmatpush1.msra.mxu0 %v11819_v63  ;;  %3707 = vmatprep.mubr.f32.mxu0 %v11421_v57  ;;  %v11854_v63 = vld [vmem:[#allocation62_spill] sm:$0xff] }
 0x6ab   :  { %7018 = vmatpush3.msra.mxu1 %v11820_v2  ;;  %7019 = vmatprep.mubr.msk.f32.mxu1 %vm7669_vm0, %v11421_v57  ;;  %v11855_v2 = vld [vmem:[#allocation63_spill] sm:$0xff] }
 0x6ac   :  { %3708 = vmatmul.mubr.f32.vlgmr.msra.gmra.mxu0 %v9742_v1  ;;  %7020 = vmatmul.mubr.f32.vlgmr.msra.gmra.mxu1 %v9742_v1 }
 0x6ad   :  { %3898 = vmatprep.subr.mxu0 %v11821_v54  ;;  %7022 = vmatprep.subr.mxu1 %v11421_v57  ;;  %v11856_v54 = vld [vmem:[#allocation64_spill] sm:$0xff] }
 0x6ae   :  { %3899 = vmatpush1.msra.mxu0 %v11822_v58  ;;  %7023 = vmatpush3.msra.mxu1 %v11823_v41  ;;  %v11857_v58 = vld [vmem:[#allocation65_spill] sm:$0xff]  ;;  %v11858_v41 = vld [vmem:[#allocation67_spill] sm:$0xff] }
 0x6af   :  { %3900 = vmatprep.subr.mxu0 %v11824_v25  ;;  %7024 = vmatprep.subr.mxu1 %v11421_v57  ;;  %v11859_v25 = vld [vmem:[#allocation68_spill] sm:$0xff] }
 0x6b0   :  { %3901 = vmatpush1.msra.mxu0 %v11825_v26  ;;  %7025 = vmatpush3.msra.mxu1 %v11826_v28  ;;  %v11860_v26 = vld [vmem:[#allocation69_spill] sm:$0xff]  ;;  %v11861_v28 = vld [vmem:[#allocation70_spill] sm:$0xff] }
 0x6b1   :  { %3902 = vmatprep.subr.mxu0 %v11827_v30  ;;  %7026 = vmatprep.subr.mxu1 %v11421_v57  ;;  %v11862_v30 = vld [vmem:[#allocation71_spill] sm:$0xff] }
 0x6b2   :  { %3903 = vmatpush1.msra.mxu0 %v11828_v31  ;;  %7027 = vmatpush3.msra.mxu1 %v11829_v52  ;;  %v11863_v31 = vld [vmem:[#allocation72_spill] sm:$0xff]  ;;  %v11864_v52 = vld [vmem:[#allocation73_spill] sm:$0xff] }
 0x6b3   :  { %3904 = vmatprep.subr.mxu0 %v11830_v33  ;;  %7028 = vmatprep.subr.mxu1 %v11421_v57  ;;  %v11865_v33 = vld [vmem:[#allocation74_spill] sm:$0xff] }
 0x6b4   :  { %3905 = vmatpush1.msra.mxu0 %v11831_v35  ;;  %7029 = vmatpush3.msra.mxu1 %v11832_v36  ;;  %v11866_v35 = vld [vmem:[#allocation75_spill] sm:$0xff]  ;;  %v11867_v36 = vld [vmem:[#allocation76_spill] sm:$0xff] }
 0x6b5   :  { %3906 = vmatprep.subr.mxu0 %v11833_v17  ;;  %7030 = vmatprep.subr.mxu1 %v11421_v57  ;;  %v11868_v17 = vld [vmem:[#allocation77_spill] sm:$0xff] }
 0x6b6   :  { %3907 = vmatpush1.msra.mxu0 %v11834_v37  ;;  %7031 = vmatpush3.msra.mxu1 %v11835_v39  ;;  %v11869_v37 = vld [vmem:[#allocation78_spill] sm:$0xff] }
 0x6b7   :  { %3908 = vmatprep.subr.mxu0 %v11836_v59  ;;  %7032 = vmatprep.subr.mxu1 %v11421_v57 }
 0x6b8   :  { %3909 = vmatpush1.msra.mxu0 %v11837_v43  ;;  %7033 = vmatpush3.msra.mxu1 %v11838_v40 }
 0x6b9   :  { %3910 = vmatprep.subr.mxu0 %v11839_v0  ;;  %7034 = vmatprep.subr.mxu1 %v11421_v57 }
 0x6ba   :  { %3911 = vmatpush1.msra.mxu0 %v11840_v3  ;;  %7035 = vmatpush3.msra.mxu1 %v11841_v62 }
 0x6bb   :  { %3912 = vmatprep.subr.mxu0 %v11842_v13  ;;  %7036 = vmatprep.subr.mxu1 %v11421_v57 }
 0x6bc   :  { %3913 = vmatpush1.msra.mxu0 %v11843_v20  ;;  %7037 = vmatpush3.msra.mxu1 %v11844_v16  ;;  %v3542_v20 = vld [vmem:[%s10973_s10] sm:$0x3] }
 0x6bd   :  { %3914 = vmatprep.subr.mxu0 %v11845_v6  ;;  %7038 = vmatprep.subr.mxu1 %v11421_v57  ;;  %v11871_v6 = vld [vmem:[#allocation66_spill] sm:$0xff] }
 0x6be   :  { %3915 = vmatpush1.msra.mxu0 %v11846_v51  ;;  %7039 = vmatpush3.msra.mxu1 %v11847_v19  ;;  %v3547_v51 = vrot.slane %v3542_v20, %v11871_v6 }
 0x6bf   :  { %3916 = vmatprep.subr.mxu0 %v11848_v23  ;;  %7040 = vmatprep.subr.mxu1 %v11421_v57 }
 0x6c0   :  { %3917 = vmatpush1.msra.mxu0 %v11849_v21  ;;  %7041 = vmatpush3.msra.mxu1 %v11850_v5 }
 0x6c1   :  { %3918 = vmatprep.subr.mxu0 %v11851_v34  ;;  %7042 = vmatprep.subr.mxu1 %v11421_v57 }
 0x6c2   :  { %3919 = vmatpush1.msra.mxu0 %v11852_v56  ;;  %7043 = vmatpush3.msra.mxu1 %v11853_v60 }
 0x6c3   :  { %3920 = vmatprep.subr.mxu0 %v11854_v63  ;;  %7044 = vmatprep.subr.mxu1 %v11421_v57  ;;  %v3551_v63 = vrot.slane %v3542_v20, %v8150_v61 }
 0x6c4   :  { %3921 = vmatpush1.msra.mxu0 %v11855_v2  ;;  %7045 = vmatpush3.msra.mxu1 %v11856_v54 }
 0x6c5   :  { %3922 = vmatprep.subr.mxu0 %v11857_v58  ;;  %7046 = vmatprep.subr.mxu1 %v11421_v57 }
 0x6c6   :  { %3923 = vmatpush1.msra.mxu0 %v11858_v41  ;;  %7047 = vmatpush3.msra.mxu1 %v11859_v25 }
 0x6c7   :  { %3924 = vmatprep.subr.mxu0 %v11860_v26  ;;  %7048 = vmatprep.subr.mxu1 %v11421_v57  ;;  %v10059_v26 = vld [vmem:[%s10975_s12] ss:$0 sm:$0xff] }
 0x6c8   :  { %3925 = vmatpush1.msra.mxu0 %v11861_v28  ;;  %7049 = vmatpush3.msra.mxu1 %v11862_v30  ;;  %v3792_v28 = vld [vmem:[%s11418_s1] sm:$0x3] }
 0x6c9   :  { %3926 = vmatprep.subr.mxu0 %v11863_v31  ;;  %7050 = vmatprep.subr.mxu1 %v11421_v57  ;;  %v10067_v30 = vld [vmem:[%s10974_s11] ss:$0 sm:$0xff] }
 0x6ca   :  { %3927 = vmatpush1.msra.mxu0 %v11864_v52  ;;  %7051 = vmatpush3.msra.mxu1 %v11865_v33 }
 0x6cb   :  { %3928 = vmatprep.subr.mxu0 %v11866_v35  ;;  %7052 = vmatprep.subr.mxu1 %v11421_v57 }
 0x6cc   :  { %3929 = vmatpush1.msra.mxu0 %v11867_v36  ;;  %7053 = vmatpush3.msra.mxu1 %v11868_v17  ;;  %v3797_v17 = vrot.slane %v3792_v28, %v11871_v6 }
 0x6cd   :  { %3962 = vmatprep.mubr.f32.mxu0 %v11421_v57  ;;  %7054 = vmatprep.mubr.msk.f32.mxu1 %vm7669_vm0, %v11421_v57 }
 0x6ce   :  { %4087 = vmatprep.subr.mxu0 %v11869_v37  ;;  %7057 = vmatprep.subr.mxu1 %v11421_v57 }
 0x6d9   :  { %v5666_v39 = vpop.xlane.xlu1 %5665 }
 0x6da   :  { %v5669_v59 = vmul.f32 0.015625, %v5666_v39 }
 0x6dc   :  { %v5671_v43 = vsub.f32 %v9731_v24, %v5669_v59  ;;  %v3592_v59 = vld [vmem:[#allocation2] sm:$0xc] }
 0x6de   :  { %v10047_v40 = vmul.f32 %v9723_v46, %v5671_v43  ;;  %v10346_v46 = vld [vmem:[#allocation7 + $0x138] sm:$0xff] }
 0x6df   :  { %11918 = vst [vmem:[#allocation37_spill] sm:$0xff] %v10346_v46 }
 0x6e0   :  { %11870 = vst [vmem:[#allocation16_spill] sm:$0xff] %v10047_v40  ;;  %v5675_v0 = vmul.f32 %v10047_v40, %v10047_v40  ;;  %v10348_v40 = vld [vmem:[#allocation7 + $0x148] sm:$0xff] }
 0x6e1   :  { %11919 = vst [vmem:[#allocation38_spill] sm:$0xff] %v10348_v40 }
 0x6e2   :  { %5677 = vadd.xlane.f32.xlu0 %v5675_v0 }
 0x729   :  { %v3347_v3 = vpop.f32.mrf.mxu1  ;;  %v3276_v13 = vpop.f32.mrf.mxu0 }
 0x72a   :  { %v3575_v39 = vadd.f32 %v10067_v30, %v3347_v3 }
 0x72b   :  { %v6951_v62 = vpop.f32.mrf.mxu1  ;;  %v3278_v16 = vpop.f32.mrf.mxu0 }
 0x74a   :  { %v3465_v19 = vpop.f32.mrf.mxu0  ;;  %v3536_v23 = vpop.f32.mrf.mxu1 }
 0x74b   :  { %v3540_v24 = vadd.f32 %v3465_v19, %v3276_v13  ;;  %v3583_v35 = vadd.f32 %v10059_v26, %v3536_v23  ;;  %v3593_v19 = vld [vmem:[#allocation2 + $0x18] sm:$0xc]  ;;  %v3801_v23 = vrot.slane %v3792_v28, %v8150_v61 }
 0x74c   :  { %v3467_v21 = vpop.f32.mrf.mxu0  ;;  %v6986_v5 = vpop.f32.mrf.mxu1 }
 0x74d   :  { %v3554_v34 = vadd.f32 %v3547_v51, %v3540_v24  ;;  %v3541_v60 = vadd.f32 %v3467_v21, %v3278_v16 }
 0x74f   :  { %v5983_v56 = vmul.f32 -1.442695, %v3554_v34  ;;  %v3555_v2 = vadd.f32 %v3551_v63, %v3541_v60 }
 0x751   :  { %7475 = vpow2.f32 %v5983_v56  ;;  %v5984_v54 = vmul.f32 -1.442695, %v3555_v2 }
 0x753   :  { %7477 = vpow2.f32 %v5984_v54 }
 0x75e   :  { %v7476_v58 = vpop.eup %7475 }
 0x75f   :  { %v3562_v41 = vadd.f32 1.0, %v7476_v58 }
 0x760   :  { %v7478_v25 = vpop.eup %7477 }
 0x761   :  { %7479 = vrcp.f32 %v3562_v41  ;;  %v3563_v31 = vadd.f32 1.0, %v7478_v25 }
 0x763   :  { %7481 = vrcp.f32 %v3563_v31 }
 0x76c   :  { %v3709_v52 = vpop.f32.mrf.mxu0  ;;  %v3780_v33 = vpop.f32.mrf.mxu1 }
 0x76d   :  { %v3786_v36 = vrot.slane %v3709_v52, 6  ;;  %v3833_v28 = vadd.f32 %v9728_v7, %v3780_v33  ;;  %v3594_v52 = vld [vmem:[#allocation2 + $0x20] sm:$0xc]  ;;  %v11886_v33 = vld [vmem:[#allocation94_spill] sm:$0xff] }
 0x76e   :  { %v7480_v37 = vpop.eup %7479  ;;  %v3711_v43 = vpop.f32.mrf.mxu0 }
 0x76f   :  { %v7021_v0 = vpop.f32.mrf.mxu1  ;;  %v3584_v62 = vmul.f32 %v7480_v37, %v3583_v35  ;;  %v3790_v13 = vadd.f32 %v3786_v36, %v3592_v59  ;;  %v3787_v20 = vrot.slane %v3711_v43, 6  ;;  %v3835_v35 = vrot.slane %v3833_v28, 6  ;;  %v10196_v28 = vld [vmem:[#allocation5 + $0x118] sm:$0xff] }
 0x770   :  { %v7482_v56 = vpop.eup %7481  ;;  %v3843_v43 = vrot.slane %v9742_v1, 6  ;;  %v11873_v1 = vld [vmem:[#allocation81_spill] sm:$0xff] }
 0x771   :  { %v3585_v16 = vadd.f32 %v3584_v62, %v3575_v39  ;;  %v3804_v51 = vadd.f32 %v3797_v17, %v3790_v13  ;;  %v3791_v21 = vadd.f32 %v3787_v20, %v3593_v19  ;;  %v3587_v3 = vsub.f32 1.0, %v7482_v56  ;;  %v11889_v19 = vld [vmem:[#allocation97_spill] sm:$0xff] }
 0x772   :  { %v3589_v2 = vmul.f32 %v7482_v56, %v9718_v12  ;;  %v3825_v17 = vadd.f32 %v9736_v11, %v3594_v52  ;;  %v11872_v11 = vld [vmem:[#allocation80_spill] sm:$0xff]  ;;  %v11895_v56 = vld [vmem:[#allocation103_spill] sm:$0xff]  ;;  %v10204_v52 = vld [vmem:[#allocation5 + $0xf0] sm:$0xff] }
 0x773   :  { %7483 = vtanh.f32 %v3585_v16  ;;  %v5987_v24 = vmul.f32 -1.442695, %v3804_v51  ;;  %v3805_v5 = vadd.f32 %v3801_v23, %v3791_v21  ;;  %v11887_v16 = vld [vmem:[#allocation95_spill] sm:$0xff]  ;;  %v11888_v51 = vld [vmem:[#allocation96_spill] sm:$0xff] }
 0x774   :  { %v11891_v21 = vld [vmem:[#allocation99_spill] sm:$0xff]  ;;  %v11892_v23 = vld [vmem:[#allocation100_spill] sm:$0xff] }
 0x775   :  { %7485 = vpow2.f32 %v5987_v24  ;;  %v5988_v34 = vmul.f32 -1.442695, %v3805_v5  ;;  %v11890_v24 = vld [vmem:[#allocation98_spill] sm:$0xff]  ;;  %v11893_v5 = vld [vmem:[#allocation101_spill] sm:$0xff] }
 0x777   :  { %7487 = vpow2.f32 %v5988_v34  ;;  %v11894_v34 = vld [vmem:[#allocation102_spill] sm:$0xff] }
 0x780   :  { %v7484_v60 = vpop.eup %7483 }
 0x781   :  { %v3588_v63 = vmul.f32 %v7484_v60, %v3587_v3  ;;  %v11896_v3 = vld [vmem:[#allocation104_spill] sm:$0xff]  ;;  %v11897_v60 = vld [vmem:[#allocation105_spill] sm:$0xff] }
 0x782   :  { %v7486_v54 = vpop.eup %7485 }
 0x783   :  { %v3812_v58 = vadd.f32 1.0, %v7486_v54  ;;  %v10074_v41 = vadd.f32 %v3589_v2, %v3588_v63  ;;  %v10180_v63 = vld [vmem:[#allocation5 + $0x128] sm:$0xff]  ;;  %v10184_v2 = vld [vmem:[#allocation5 + $0x120] sm:$0xff]  ;;  %v10186_v54 = vld [vmem:[#allocation5 + $0x130] sm:$0xff] }
 0x784   :  { %v7488_v25 = vpop.eup %7487 }
 0x785   :  { %7489 = vrcp.f32 %v3812_v58  ;;  %3591 = vst [vmem:[#allocation3 + $0x8] sm:$0x3] %v10074_v41  ;;  %v3813_v31 = vadd.f32 1.0, %v7488_v25  ;;  %v10190_v58 = vld [vmem:[#allocation5 + $0x110] sm:$0xff]  ;;  %v10194_v25 = vld [vmem:[#allocation5 + $0x108] sm:$0xff] }
 0x787   :  { %7491 = vrcp.f32 %v3813_v31  ;;  %v10200_v31 = vld [vmem:[#allocation5 + $0xf8] sm:$0xff] }
 0x792   :  { %v7490_v36 = vpop.eup %7489 }
 0x793   :  { %v3837_v37 = vmul.f32 %v7490_v36, %v3835_v35  ;;  %v10206_v35 = vld [vmem:[#allocation5 + $0x100] sm:$0xff] }
 0x794   :  { %v7492_v12 = vpop.eup %7491  ;;  %v10210_v36 = vld [vmem:[#allocation5 + $0xe0] sm:$0xff] }
 0x795   :  { %v3838_v39 = vadd.f32 %v3837_v37, %v3825_v17  ;;  %v3840_v59 = vsub.f32 1.0, %v7492_v12  ;;  %v3845_v13 = vmul.f32 %v7492_v12, %v3843_v43  ;;  %v10214_v17 = vld [vmem:[#allocation5 + $0xd8] sm:$0xff]  ;;  %v10216_v37 = vld [vmem:[#allocation5 + $0xe8] sm:$0xff]  ;;  %v10224_v12 = vld [vmem:[#allocation5 + $0xc0] sm:$0xff] }
 0x796   :  { %v10230_v43 = vld [vmem:[#allocation5 + $0xb0] sm:$0xff] }
 0x797   :  { %7493 = vtanh.f32 %v3838_v39  ;;  %v10220_v39 = vld [vmem:[#allocation5 + $0xc8] sm:$0xff] }
 0x7a4   :  { %v7494_v0 = vpop.eup %7493 }
 0x7a5   :  { %v3841_v62 = vmul.f32 %v7494_v0, %v3840_v59  ;;  %v10226_v59 = vld [vmem:[#allocation5 + $0xd0] sm:$0xff]  ;;  %v10234_v0 = vld [vmem:[#allocation5 + $0xa8] sm:$0xff] }
 0x7a7   :  { %v10080_v20 = vadd.f32 %v3845_v13, %v3841_v62  ;;  %v10236_v62 = vld [vmem:[#allocation5 + $0xb8] sm:$0xff] }
 0x7a8   :  { %v10240_v13 = vld [vmem:[#allocation5 + $0x98] sm:$0xff] }
 0x7a9   :  { %v10083_v7 = vrot.slane %v10080_v20, 2 }
 0x7ab   :  { %3963 = vmatmul.mubr.f32.vlgmr.msra.gmra.mxu0 %v10083_v7  ;;  %7055 = vmatmul.mubr.f32.vlgmr.msra.gmra.mxu1 %v10083_v7 }
 0x7ac   :  { %4088 = vmatpush1.msra.mxu0 %v9744_v29  ;;  %7058 = vmatpush3.msra.mxu1 %v9746_v32  ;;  %v11874_v29 = vld [vmem:[#allocation82_spill] sm:$0xff]  ;;  %v11875_v32 = vld [vmem:[#allocation83_spill] sm:$0xff] }
 0x7ad   :  { %4089 = vmatprep.subr.mxu0 %v9748_v55  ;;  %7059 = vmatprep.subr.mxu1 %v11421_v57  ;;  %v11876_v55 = vld [vmem:[#allocation84_spill] sm:$0xff] }
 0x7ae   :  { %4090 = vmatpush1.msra.mxu0 %v9752_v8  ;;  %7060 = vmatpush3.msra.mxu1 %v9754_v45  ;;  %v11877_v8 = vld [vmem:[#allocation85_spill] sm:$0xff]  ;;  %v11878_v45 = vld [vmem:[#allocation86_spill] sm:$0xff] }
 0x7af   :  { %4091 = vmatprep.subr.mxu0 %v9758_v48  ;;  %7061 = vmatprep.subr.mxu1 %v11421_v57  ;;  %v11879_v48 = vld [vmem:[#allocation87_spill] sm:$0xff] }
 0x7b0   :  { %4092 = vmatpush1.msra.mxu0 %v9762_v4  ;;  %7062 = vmatpush3.msra.mxu1 %v9764_v18  ;;  %v11880_v4 = vld [vmem:[#allocation88_spill] sm:$0xff]  ;;  %v11881_v18 = vld [vmem:[#allocation89_spill] sm:$0xff] }
 0x7b1   :  { %4093 = vmatprep.subr.mxu0 %v9768_v38  ;;  %7063 = vmatprep.subr.mxu1 %v11421_v57  ;;  %v11882_v38 = vld [vmem:[#allocation90_spill] sm:$0xff] }
 0x7b2   :  { %4094 = vmatpush1.msra.mxu0 %v9772_v50  ;;  %7064 = vmatpush3.msra.mxu1 %v9774_v47  ;;  %v11883_v50 = vld [vmem:[#allocation91_spill] sm:$0xff]  ;;  %v11884_v47 = vld [vmem:[#allocation92_spill] sm:$0xff] }
 0x7b3   :  { %4095 = vmatprep.subr.mxu0 %v9778_v10  ;;  %7065 = vmatprep.subr.mxu1 %v11421_v57  ;;  %v11885_v10 = vld [vmem:[#allocation93_spill] sm:$0xff] }
 0x7b4   :  { %4096 = vmatpush1.msra.mxu0 %v11872_v11  ;;  %7066 = vmatpush3.msra.mxu1 %v11873_v1  ;;  %v10244_v11 = vld [vmem:[#allocation5 + $0x90] sm:$0xff]  ;;  %v10246_v1 = vld [vmem:[#allocation5 + $0xa0] sm:$0xff] }
 0x7b5   :  { %4097 = vmatprep.subr.mxu0 %v11874_v29  ;;  %7067 = vmatprep.subr.mxu1 %v11421_v57  ;;  %v10250_v29 = vld [vmem:[#allocation5 + $0x80] sm:$0xff] }
 0x7b6   :  { %4098 = vmatpush1.msra.mxu0 %v11875_v32  ;;  %7068 = vmatpush3.msra.mxu1 %v11876_v55  ;;  %v10254_v32 = vld [vmem:[#allocation5 + $0x78] sm:$0xff]  ;;  %v10256_v55 = vld [vmem:[#allocation5 + $0x88] sm:$0xff] }
 0x7b7   :  { %4099 = vmatprep.subr.mxu0 %v11877_v8  ;;  %7069 = vmatprep.subr.mxu1 %v11421_v57  ;;  %v10260_v8 = vld [vmem:[#allocation5 + $0x68] sm:$0xff] }
 0x7b8   :  { %4100 = vmatpush1.msra.mxu0 %v11878_v45  ;;  %7070 = vmatpush3.msra.mxu1 %v11879_v48  ;;  %v10264_v45 = vld [vmem:[#allocation5 + $0x60] sm:$0xff]  ;;  %v10266_v48 = vld [vmem:[#allocation5 + $0x70] sm:$0xff] }
 0x7b9   :  { %4101 = vmatprep.subr.mxu0 %v11880_v4  ;;  %7071 = vmatprep.subr.mxu1 %v11421_v57  ;;  %11898 = vst [vmem:[#allocation19_spill] sm:$0xff] %v10266_v48  ;;  %v10270_v4 = vld [vmem:[#allocation5 + $0x50] sm:$0xff] }
 0x7ba   :  { %4102 = vmatpush1.msra.mxu0 %v11881_v18  ;;  %7072 = vmatpush3.msra.mxu1 %v11882_v38  ;;  %11899 = vst [vmem:[#allocation17_spill] sm:$0xff] %v10270_v4  ;;  %v10274_v18 = vld [vmem:[#allocation5 + $0x48] sm:$0xff]  ;;  %v10276_v38 = vld [vmem:[#allocation5 + $0x58] sm:$0xff] }
 0x7bb   :  { %4103 = vmatprep.subr.mxu0 %v11883_v50  ;;  %7073 = vmatprep.subr.mxu1 %v11421_v57  ;;  %11900 = vst [vmem:[#allocation18_spill] sm:$0xff] %v10274_v18  ;;  %11901 = vst [vmem:[#allocation20_spill] sm:$0xff] %v10276_v38  ;;  %v10280_v50 = vld [vmem:[#allocation5 + $0x38] sm:$0xff] }
 0x7bc   :  { %4104 = vmatpush1.msra.mxu0 %v11884_v47  ;;  %7074 = vmatpush3.msra.mxu1 %v11885_v10  ;;  %11902 = vst [vmem:[#allocation21_spill] sm:$0xff] %v10280_v50  ;;  %v10284_v47 = vld [vmem:[#allocation5 + $0x30] sm:$0xff]  ;;  %v10286_v10 = vld [vmem:[#allocation5 + $0x40] sm:$0xff] }
 0x7bd   :  { %4105 = vmatprep.subr.mxu0 %v11886_v33  ;;  %7075 = vmatprep.subr.mxu1 %v11421_v57  ;;  %11903 = vst [vmem:[#allocation22_spill] sm:$0xff] %v10284_v47  ;;  %11904 = vst [vmem:[#allocation23_spill] sm:$0xff] %v10286_v10  ;;  %v10290_v33 = vld [vmem:[#allocation5 + $0x20] sm:$0xff] }
 0x7be   :  { %4106 = vmatpush1.msra.mxu0 %v11887_v16  ;;  %7076 = vmatpush3.msra.mxu1 %v11888_v51  ;;  %11905 = vst [vmem:[#allocation24_spill] sm:$0xff] %v10290_v33  ;;  %v10294_v16 = vld [vmem:[#allocation5 + $0x18] sm:$0xff]  ;;  %v10296_v51 = vld [vmem:[#allocation5 + $0x28] sm:$0xff] }
 0x7bf   :  { %4107 = vmatprep.subr.mxu0 %v11889_v19  ;;  %7077 = vmatprep.subr.mxu1 %v11421_v57  ;;  %11906 = vst [vmem:[#allocation25_spill] sm:$0xff] %v10294_v16  ;;  %11907 = vst [vmem:[#allocation26_spill] sm:$0xff] %v10296_v51  ;;  %v10300_v19 = vld [vmem:[#allocation5 + $0x8] sm:$0xff] }
 0x7c0   :  { %4108 = vmatpush1.msra.mxu0 %v11890_v24  ;;  %7078 = vmatpush3.msra.mxu1 %v11891_v21  ;;  %11908 = vst [vmem:[#allocation27_spill] sm:$0xff] %v10300_v19  ;;  %v10304_v24 = vld [vmem:[#allocation5] sm:$0xff]  ;;  %v10308_v21 = vld [vmem:[#allocation5 + $0x10] sm:$0xff] }
 0x7c1   :  { %4109 = vmatprep.subr.mxu0 %v11892_v23  ;;  %7079 = vmatprep.subr.mxu1 %v11421_v57  ;;  %11909 = vst [vmem:[#allocation29_spill] sm:$0xff] %v10304_v24  ;;  %11910 = vst [vmem:[#allocation28_spill] sm:$0xff] %v10308_v21  ;;  %v10323_v23 = vld [vmem:[#allocation7 + $0x170] sm:$0xff] }
 0x7c2   :  { %4110 = vmatpush1.msra.mxu0 %v11893_v5  ;;  %7080 = vmatpush3.msra.mxu1 %v11894_v34  ;;  %11911 = vst [vmem:[#allocation30_spill] sm:$0xff] %v10323_v23  ;;  %v10326_v5 = vld [vmem:[#allocation7 + $0x168] sm:$0xff]  ;;  %v10328_v34 = vld [vmem:[#allocation7 + $0x178] sm:$0xff] }
 0x7c3   :  { %4111 = vmatprep.subr.mxu0 %v11895_v56  ;;  %7081 = vmatprep.subr.mxu1 %v11421_v57  ;;  %11912 = vst [vmem:[#allocation31_spill] sm:$0xff] %v10326_v5  ;;  %11913 = vst [vmem:[#allocation32_spill] sm:$0xff] %v10328_v34  ;;  %v10336_v56 = vld [vmem:[#allocation7 + $0x150] sm:$0xff] }
 0x7c4   :  { %4112 = vmatpush1.msra.mxu0 %v9862_v27  ;;  %7082 = vmatpush3.msra.mxu1 %v11896_v3  ;;  %v10149_v27 = vld [vmem:[#allocation5 + $0x170] sm:$0xff]  ;;  %11915 = vst [vmem:[#allocation34_spill] sm:$0xff] %v10336_v56  ;;  %v10338_v3 = vld [vmem:[#allocation7 + $0x160] sm:$0xff] }
 0x7c5   :  { %4113 = vmatprep.subr.mxu0 %v11897_v60  ;;  %7083 = vmatprep.subr.mxu1 %v11421_v57  ;;  %11916 = vst [vmem:[#allocation35_spill] sm:$0xff] %v10338_v3  ;;  %v10342_v60 = vld [vmem:[#allocation7 + $0x140] sm:$0xff] }
 0x7c6   :  { %4114 = vmatpush1.msra.mxu0 %v9872_v49  ;;  %7084 = vmatpush3.msra.mxu1 %v9874_v15  ;;  %v10154_v15 = vld [vmem:[#allocation5 + $0x168] sm:$0xff]  ;;  %v10156_v49 = vld [vmem:[#allocation5 + $0x178] sm:$0xff]  ;;  %11917 = vst [vmem:[#allocation36_spill] sm:$0xff] %v10342_v60 }
 0x7c7   :  { %4115 = vmatprep.subr.mxu0 %v9878_v53  ;;  %7085 = vmatprep.subr.mxu1 %v11421_v57  ;;  %v10160_v53 = vld [vmem:[#allocation5 + $0x158] sm:$0xff] }
 0x7c8   :  { %4116 = vmatpush1.msra.mxu0 %v9882_v14  ;;  %7086 = vmatpush3.msra.mxu1 %v9884_v44  ;;  %v10164_v44 = vld [vmem:[#allocation5 + $0x150] sm:$0xff]  ;;  %v10166_v14 = vld [vmem:[#allocation5 + $0x160] sm:$0xff] }
 0x7c9   :  { %4117 = vmatprep.subr.mxu0 %v9888_v42  ;;  %7087 = vmatprep.subr.mxu1 %v11421_v57  ;;  %v10170_v42 = vld [vmem:[#allocation5 + $0x140] sm:$0xff] }
 0x7ca   :  { %4118 = vmatpush1.msra.mxu0 %v9892_v22  ;;  %4151 = vmatprep.mubr.f32.mxu0 %v11421_v57  ;;  %v10174_v22 = vld [vmem:[#allocation5 + $0x138] sm:$0xff] }
 0x7cb   :  { %7088 = vmatpush3.msra.mxu1 %v9896_v9  ;;  %7089 = vmatprep.mubr.msk.f32.mxu1 %vm7669_vm0, %v11421_v57  ;;  %v10176_v9 = vld [vmem:[#allocation5 + $0x148] sm:$0xff] }
 0x7cc   :  { %4152 = vmatmul.mubr.f32.vlgmr.msra.gmra.mxu0 %v10074_v41  ;;  %7090 = vmatmul.mubr.f32.vlgmr.msra.gmra.mxu1 %v10074_v41 }
 0x7cd   :  { %4331 = vmatprep.subr.mxu0 %v10149_v27  ;;  %7092 = vmatprep.subr.mxu1 %v11421_v57 }
 0x7ce   :  { %4332 = vmatpush1.msra.mxu0 %v10154_v15  ;;  %7093 = vmatpush3.msra.mxu1 %v10156_v49 }
 0x7cf   :  { %4333 = vmatprep.subr.mxu0 %v10160_v53  ;;  %7094 = vmatprep.subr.mxu1 %v11421_v57 }
 0x7d0   :  { %4334 = vmatpush1.msra.mxu0 %v10164_v44  ;;  %7095 = vmatpush3.msra.mxu1 %v10166_v14 }
 0x7d1   :  { %4335 = vmatprep.subr.mxu0 %v10170_v42  ;;  %7096 = vmatprep.subr.mxu1 %v11421_v57 }
 0x7d2   :  { %4336 = vmatpush1.msra.mxu0 %v10174_v22  ;;  %7097 = vmatpush3.msra.mxu1 %v10176_v9 }
 0x7d3   :  { %4337 = vmatprep.subr.mxu0 %v10180_v63  ;;  %7098 = vmatprep.subr.mxu1 %v11421_v57 }
 0x7d4   :  { %4338 = vmatpush1.msra.mxu0 %v10184_v2  ;;  %7099 = vmatpush3.msra.mxu1 %v10186_v54 }
 0x7d5   :  { %4339 = vmatprep.subr.mxu0 %v10190_v58  ;;  %7100 = vmatprep.subr.mxu1 %v11421_v57 }
 0x7d6   :  { %4340 = vmatpush1.msra.mxu0 %v10194_v25  ;;  %7101 = vmatpush3.msra.mxu1 %v10196_v28 }
 0x7d7   :  { %4341 = vmatprep.subr.mxu0 %v10200_v31  ;;  %7102 = vmatprep.subr.mxu1 %v11421_v57 }
 0x7d8   :  { %4342 = vmatpush1.msra.mxu0 %v10204_v52  ;;  %7103 = vmatpush3.msra.mxu1 %v10206_v35 }
 0x7d9   :  { %4343 = vmatprep.subr.mxu0 %v10210_v36  ;;  %7104 = vmatprep.subr.mxu1 %v11421_v57 }
 0x7da   :  { %4344 = vmatpush1.msra.mxu0 %v10214_v17  ;;  %7105 = vmatpush3.msra.mxu1 %v10216_v37 }
 0x7db   :  { %4345 = vmatprep.subr.mxu0 %v10220_v39  ;;  %7106 = vmatprep.subr.mxu1 %v11421_v57 }
 0x7dc   :  { %4346 = vmatpush1.msra.mxu0 %v10224_v12  ;;  %7107 = vmatpush3.msra.mxu1 %v10226_v59 }
 0x7dd   :  { %4347 = vmatprep.subr.mxu0 %v10230_v43  ;;  %7108 = vmatprep.subr.mxu1 %v11421_v57 }
 0x7de   :  { %4348 = vmatpush1.msra.mxu0 %v10234_v0  ;;  %7109 = vmatpush3.msra.mxu1 %v10236_v62 }
 0x7df   :  { %4349 = vmatprep.subr.mxu0 %v10240_v13  ;;  %7110 = vmatprep.subr.mxu1 %v11421_v57 }
 0x7e0   :  { %4350 = vmatpush1.msra.mxu0 %v10244_v11  ;;  %7111 = vmatpush3.msra.mxu1 %v10246_v1 }
 0x7e1   :  { %4351 = vmatprep.subr.mxu0 %v10250_v29  ;;  %7112 = vmatprep.subr.mxu1 %v11421_v57 }
 0x7e2   :  { %4352 = vmatpush1.msra.mxu0 %v10254_v32  ;;  %7113 = vmatpush3.msra.mxu1 %v10256_v55 }
 0x7e3   :  { %4353 = vmatprep.subr.mxu0 %v10260_v8  ;;  %7114 = vmatprep.subr.mxu1 %v11421_v57 }
 0x7e4   :  { %4354 = vmatpush1.msra.mxu0 %v10264_v45  ;;  %7115 = vmatpush3.msra.mxu1 %v10266_v48 }
 0x7e5   :  { %4355 = vmatprep.subr.mxu0 %v10270_v4  ;;  %7116 = vmatprep.subr.mxu1 %v11421_v57 }
 0x7e6   :  { %4356 = vmatpush1.msra.mxu0 %v10274_v18  ;;  %7117 = vmatpush3.msra.mxu1 %v10276_v38  ;;  %v4480_v18 = vld [vmem:[%s11418_s1] sm:$0x3] }
 0x7e7   :  { %4357 = vmatprep.subr.mxu0 %v10280_v50  ;;  %7118 = vmatprep.subr.mxu1 %v11421_v57 }
 0x7e8   :  { %4358 = vmatpush1.msra.mxu0 %v10284_v47  ;;  %7119 = vmatpush3.msra.mxu1 %v10286_v10 }
 0x7e9   :  { %4359 = vmatprep.subr.mxu0 %v10290_v33  ;;  %7120 = vmatprep.subr.mxu1 %v11421_v57 }
 0x7ea   :  { %4360 = vmatpush1.msra.mxu0 %v10294_v16  ;;  %7121 = vmatpush3.msra.mxu1 %v10296_v51 }
 0x7eb   :  { %4361 = vmatprep.subr.mxu0 %v10300_v19  ;;  %7122 = vmatprep.subr.mxu1 %v11421_v57 }
 0x7ec   :  { %4362 = vmatpush1.msra.mxu0 %v10304_v24  ;;  %4395 = vmatprep.mubr.f32.mxu0 %v11421_v57 }
 0x7ed   :  { %7123 = vmatpush3.msra.mxu1 %v10308_v21  ;;  %7124 = vmatprep.mubr.msk.f32.mxu1 %vm7669_vm0, %v11421_v57 }
 0x7ee   :  { %4396 = vmatmul.mubr.f32.vlgmr.msra.gmra.mxu0 %v10083_v7  ;;  %7125 = vmatmul.mubr.f32.vlgmr.msra.gmra.mxu1 %v10083_v7  ;;  %v10332_v7 = vld [vmem:[#allocation7 + $0x158] sm:$0xff] }
 0x7ef   :  { %7127 = vmatprep.subr.mxu1 %v11421_v57  ;;  %4649 = vmatprep.mubr.f32.mxu0 %v11421_v57  ;;  %11914 = vst [vmem:[#allocation33_spill] sm:$0xff] %v10332_v7 }
 0x7f0   :  { %7159 = vmatprep.mubr.msk.f32.mxu1 %vm7669_vm0, %v11421_v57  ;;  %4585 = vmatprep.subr.mxu0 %v10323_v23  ;;  %v10418_v23 = vld [vmem:[#allocation7 + $0x80] sm:$0xff] }
 0x7f1   :  { %4586 = vmatpush1.msra.mxu0 %v10326_v5  ;;  %7128 = vmatpush3.msra.mxu1 %v10328_v34  ;;  %v10394_v34 = vld [vmem:[#allocation7 + $0xc0] sm:$0xff]  ;;  %v10404_v5 = vld [vmem:[#allocation7 + $0xb8] sm:$0xff]  ;;  %11941 = vst [vmem:[#allocation60_spill] sm:$0xff] %v10418_v23 }
 0x7f2   :  { %4587 = vmatprep.subr.mxu0 %v10332_v7  ;;  %7129 = vmatprep.subr.mxu1 %v11421_v57  ;;  %v10352_v7 = vld [vmem:[#allocation7 + $0x128] sm:$0xff]  ;;  %11933 = vst [vmem:[#allocation52_spill] sm:$0xff] %v10394_v34  ;;  %11937 = vst [vmem:[#allocation56_spill] sm:$0xff] %v10404_v5 }
 0x7f3   :  { %4588 = vmatpush1.msra.mxu0 %v10336_v56  ;;  %7130 = vmatpush3.msra.mxu1 %v10338_v3  ;;  %11920 = vst [vmem:[#allocation39_spill] sm:$0xff] %v10352_v7  ;;  %v10356_v3 = vld [vmem:[#allocation7 + $0x120] sm:$0xff]  ;;  %v10358_v56 = vld [vmem:[#allocation7 + $0x130] sm:$0xff] }
 0x7f4   :  { %4589 = vmatprep.subr.mxu0 %v10342_v60  ;;  %7131 = vmatprep.subr.mxu1 %v11421_v57  ;;  %11921 = vst [vmem:[#allocation40_spill] sm:$0xff] %v10356_v3  ;;  %11922 = vst [vmem:[#allocation41_spill] sm:$0xff] %v10358_v56  ;;  %v10362_v60 = vld [vmem:[#allocation7 + $0x110] sm:$0xff] }
 0x7f5   :  { %4590 = vmatpush1.msra.mxu0 %v10346_v46  ;;  %7132 = vmatpush3.msra.mxu1 %v10348_v40  ;;  %11923 = vst [vmem:[#allocation42_spill] sm:$0xff] %v10362_v60  ;;  %v10366_v40 = vld [vmem:[#allocation7 + $0x108] sm:$0xff]  ;;  %v10368_v46 = vld [vmem:[#allocation7 + $0x118] sm:$0xff] }
 0x7f6   :  { %4591 = vmatprep.subr.mxu0 %v10352_v7  ;;  %7133 = vmatprep.subr.mxu1 %v11421_v57  ;;  %11924 = vst [vmem:[#allocation43_spill] sm:$0xff] %v10366_v40  ;;  %11925 = vst [vmem:[#allocation44_spill] sm:$0xff] %v10368_v46  ;;  %v10372_v7 = vld [vmem:[#allocation7 + $0xf8] sm:$0xff] }
 0x7f7   :  { %4592 = vmatpush1.msra.mxu0 %v10356_v3  ;;  %7134 = vmatpush3.msra.mxu1 %v10358_v56  ;;  %11926 = vst [vmem:[#allocation45_spill] sm:$0xff] %v10372_v7  ;;  %v10376_v56 = vld [vmem:[#allocation7 + $0xf0] sm:$0xff]  ;;  %v10378_v3 = vld [vmem:[#allocation7 + $0x100] sm:$0xff] }
 0x7f8   :  { %4593 = vmatprep.subr.mxu0 %v10362_v60  ;;  %7135 = vmatprep.subr.mxu1 %v11421_v57  ;;  %11927 = vst [vmem:[#allocation46_spill] sm:$0xff] %v10376_v56  ;;  %11928 = vst [vmem:[#allocation47_spill] sm:$0xff] %v10378_v3  ;;  %v10382_v60 = vld [vmem:[#allocation7 + $0xe0] sm:$0xff] }
 0x7f9   :  { %4594 = vmatpush1.msra.mxu0 %v10366_v40  ;;  %7136 = vmatpush3.msra.mxu1 %v10368_v46  ;;  %11929 = vst [vmem:[#allocation48_spill] sm:$0xff] %v10382_v60  ;;  %v10386_v46 = vld [vmem:[#allocation7 + $0xd8] sm:$0xff]  ;;  %v10388_v40 = vld [vmem:[#allocation7 + $0xe8] sm:$0xff] }
 0x7fa   :  { %4595 = vmatprep.subr.mxu0 %v10372_v7  ;;  %7137 = vmatprep.subr.mxu1 %v11421_v57  ;;  %11930 = vst [vmem:[#allocation49_spill] sm:$0xff] %v10386_v46  ;;  %11931 = vst [vmem:[#allocation50_spill] sm:$0xff] %v10388_v40  ;;  %v10392_v7 = vld [vmem:[#allocation7 + $0xc8] sm:$0xff] }
 0x7fb   :  { %4596 = vmatpush1.msra.mxu0 %v10376_v56  ;;  %7138 = vmatpush3.msra.mxu1 %v10378_v3  ;;  %11932 = vst [vmem:[#allocation51_spill] sm:$0xff] %v10392_v7  ;;  %v10396_v56 = vld [vmem:[#allocation7 + $0xd0] sm:$0xff]  ;;  %v10402_v3 = vld [vmem:[#allocation7 + $0xa8] sm:$0xff] }
 0x7fc   :  { %4597 = vmatprep.subr.mxu0 %v10382_v60  ;;  %7139 = vmatprep.subr.mxu1 %v11421_v57  ;;  %11934 = vst [vmem:[#allocation53_spill] sm:$0xff] %v10396_v56  ;;  %v10400_v60 = vld [vmem:[#allocation7 + $0xb0] sm:$0xff]  ;;  %11936 = vst [vmem:[#allocation55_spill] sm:$0xff] %v10402_v3 }
 0x7fd   :  { %4598 = vmatpush1.msra.mxu0 %v10386_v46  ;;  %7140 = vmatpush3.msra.mxu1 %v10388_v40  ;;  %11935 = vst [vmem:[#allocation54_spill] sm:$0xff] %v10400_v60  ;;  %v10408_v40 = vld [vmem:[#allocation7 + $0x98] sm:$0xff]  ;;  %v10412_v46 = vld [vmem:[#allocation7 + $0x90] sm:$0xff] }
 0x7fe   :  { %4599 = vmatprep.subr.mxu0 %v10392_v7  ;;  %7141 = vmatprep.subr.mxu1 %v11421_v57  ;;  %11938 = vst [vmem:[#allocation57_spill] sm:$0xff] %v10408_v40  ;;  %11939 = vst [vmem:[#allocation58_spill] sm:$0xff] %v10412_v46  ;;  %v10414_v7 = vld [vmem:[#allocation7 + $0xa0] sm:$0xff] }
 0x7ff   :  { %4600 = vmatpush1.msra.mxu0 %v10394_v34  ;;  %7142 = vmatpush3.msra.mxu1 %v10396_v56  ;;  %11940 = vst [vmem:[#allocation59_spill] sm:$0xff] %v10414_v7  ;;  %v10422_v56 = vld [vmem:[#allocation7 + $0x78] sm:$0xff]  ;;  %v10424_v34 = vld [vmem:[#allocation7 + $0x88] sm:$0xff] }
 0x800   :  { %4601 = vmatprep.subr.mxu0 %v10400_v60  ;;  %7143 = vmatprep.subr.mxu1 %v11421_v57  ;;  %11942 = vst [vmem:[#allocation61_spill] sm:$0xff] %v10422_v56  ;;  %11943 = vst [vmem:[#allocation62_spill] sm:$0xff] %v10424_v34  ;;  %v10428_v60 = vld [vmem:[#allocation7 + $0x68] sm:$0xff] }
 0x801   :  { %4602 = vmatpush1.msra.mxu0 %v10402_v3  ;;  %7144 = vmatpush3.msra.mxu1 %v10404_v5  ;;  %11944 = vst [vmem:[#allocation63_spill] sm:$0xff] %v10428_v60  ;;  %v10432_v5 = vld [vmem:[#allocation7 + $0x60] sm:$0xff]  ;;  %v10434_v3 = vld [vmem:[#allocation7 + $0x70] sm:$0xff] }
 0x802   :  { %4603 = vmatprep.subr.mxu0 %v10408_v40  ;;  %7145 = vmatprep.subr.mxu1 %v11421_v57  ;;  %11945 = vst [vmem:[#allocation64_spill] sm:$0xff] %v10432_v5  ;;  %11946 = vst [vmem:[#allocation65_spill] sm:$0xff] %v10434_v3  ;;  %v10438_v40 = vld [vmem:[#allocation7 + $0x50] sm:$0xff] }
 0x803   :  { %4604 = vmatpush1.msra.mxu0 %v10412_v46  ;;  %7146 = vmatpush3.msra.mxu1 %v10414_v7  ;;  %11947 = vst [vmem:[#allocation67_spill] sm:$0xff] %v10438_v40  ;;  %v10442_v7 = vld [vmem:[#allocation7 + $0x48] sm:$0xff]  ;;  %v10444_v46 = vld [vmem:[#allocation7 + $0x58] sm:$0xff] }
 0x804   :  { %4605 = vmatprep.subr.mxu0 %v10418_v23  ;;  %7147 = vmatprep.subr.mxu1 %v11421_v57  ;;  %11948 = vst [vmem:[#allocation68_spill] sm:$0xff] %v10442_v7  ;;  %11949 = vst [vmem:[#allocation69_spill] sm:$0xff] %v10444_v46  ;;  %v10448_v23 = vld [vmem:[#allocation7 + $0x38] sm:$0xff] }
 0x805   :  { %4606 = vmatpush1.msra.mxu0 %v10422_v56  ;;  %7148 = vmatpush3.msra.mxu1 %v10424_v34  ;;  %11950 = vst [vmem:[#allocation70_spill] sm:$0xff] %v10448_v23  ;;  %v10452_v34 = vld [vmem:[#allocation7 + $0x30] sm:$0xff]  ;;  %v10454_v56 = vld [vmem:[#allocation7 + $0x40] sm:$0xff] }
 0x806   :  { %4607 = vmatprep.subr.mxu0 %v10428_v60  ;;  %7149 = vmatprep.subr.mxu1 %v11421_v57  ;;  %11951 = vst [vmem:[#allocation71_spill] sm:$0xff] %v10452_v34  ;;  %11952 = vst [vmem:[#allocation72_spill] sm:$0xff] %v10454_v56  ;;  %v10458_v60 = vld [vmem:[#allocation7 + $0x20] sm:$0xff] }
 0x807   :  { %4608 = vmatpush1.msra.mxu0 %v10432_v5  ;;  %7150 = vmatpush3.msra.mxu1 %v10434_v3  ;;  %11953 = vst [vmem:[#allocation73_spill] sm:$0xff] %v10458_v60  ;;  %v10462_v3 = vld [vmem:[#allocation7 + $0x18] sm:$0xff]  ;;  %v10464_v5 = vld [vmem:[#allocation7 + $0x28] sm:$0xff] }
 0x808   :  { %4609 = vmatprep.subr.mxu0 %v10438_v40  ;;  %7151 = vmatprep.subr.mxu1 %v11421_v57  ;;  %11954 = vst [vmem:[#allocation74_spill] sm:$0xff] %v10462_v3  ;;  %11955 = vst [vmem:[#allocation75_spill] sm:$0xff] %v10464_v5  ;;  %v10468_v40 = vld [vmem:[#allocation7 + $0x8] sm:$0xff] }
 0x809   :  { %4610 = vmatpush1.msra.mxu0 %v10442_v7  ;;  %7152 = vmatpush3.msra.mxu1 %v10444_v46  ;;  %11956 = vst [vmem:[#allocation76_spill] sm:$0xff] %v10468_v40  ;;  %v10472_v46 = vld [vmem:[#allocation7] sm:$0xff]  ;;  %v10474_v7 = vld [vmem:[#allocation7 + $0x10] sm:$0xff] }
 0x80a   :  { %4611 = vmatprep.subr.mxu0 %v10448_v23  ;;  %7153 = vmatprep.subr.mxu1 %v11421_v57  ;;  %11957 = vst [vmem:[#allocation77_spill] sm:$0xff] %v10472_v46  ;;  %11958 = vst [vmem:[#allocation78_spill] sm:$0xff] %v10474_v7  ;;  %v10478_v23 = vld [vmem:[#allocation9 + $0x170] sm:$0xff] }
 0x80b   :  { %4612 = vmatpush1.msra.mxu0 %v10452_v34  ;;  %7154 = vmatpush3.msra.mxu1 %v10454_v56  ;;  %11959 = vst [vmem:[#allocation80_spill] sm:$0xff] %v10478_v23 }
 0x80c   :  { %4613 = vmatprep.subr.mxu0 %v10458_v60  ;;  %7155 = vmatprep.subr.mxu1 %v11421_v57 }
 0x80d   :  { %4614 = vmatpush1.msra.mxu0 %v10462_v3  ;;  %7156 = vmatpush3.msra.mxu1 %v10464_v5  ;;  %v4230_v5 = vld [vmem:[%s10973_s10] sm:$0x3] }
 0x80e   :  { %4615 = vmatprep.subr.mxu0 %v10468_v40  ;;  %7157 = vmatprep.subr.mxu1 %v11421_v57  ;;  %v4235_v40 = vrot.slane %v4230_v5, %v11871_v6 }
 0x80f   :  { %4616 = vmatpush1.msra.mxu0 %v10472_v46  ;;  %7158 = vmatpush3.msra.mxu1 %v10474_v7 }
 0x810   :  { %4774 = vmatprep.subr.mxu0 %v10478_v23  ;;  %7162 = vmatprep.subr.mxu1 %v11421_v57  ;;  %v4239_v23 = vrot.slane %v4230_v5, %v8150_v61 }
 0x86b   :  { %v4035_v56 = vpop.f32.mrf.mxu1  ;;  %v3964_v34 = vpop.f32.mrf.mxu0 }
 0x86d   :  { %v7056_v60 = vpop.f32.mrf.mxu1  ;;  %v3966_v3 = vpop.f32.mrf.mxu0 }
 0x88c   :  { %v4153_v21 = vpop.f32.mrf.mxu0  ;;  %v4224_v24 = vpop.f32.mrf.mxu1 }
 0x88d   :  { %v4228_v19 = vadd.f32 %v4153_v21, %v3964_v34 }
 0x88e   :  { %v4155_v51 = vpop.f32.mrf.mxu0  ;;  %v7091_v46 = vpop.f32.mrf.mxu1 }
 0x88f   :  { %v4242_v16 = vadd.f32 %v4235_v40, %v4228_v19  ;;  %v4229_v33 = vadd.f32 %v4155_v51, %v3966_v3  ;;  %v4271_v40 = vadd.f32 %v10059_v26, %v4224_v24  ;;  %v4485_v51 = vrot.slane %v4480_v18, %v11871_v6 }
 0x890   :  { %v4489_v26 = vrot.slane %v4480_v18, %v8150_v61 }
 0x891   :  { %v5991_v7 = vmul.f32 -1.442695, %v4242_v16  ;;  %v4243_v60 = vadd.f32 %v4239_v23, %v4229_v33  ;;  %v4263_v33 = vadd.f32 %v10067_v30, %v4035_v56 }
 0x893   :  { %7495 = vpow2.f32 %v5991_v7  ;;  %v5992_v10 = vmul.f32 -1.442695, %v4243_v60 }
 0x895   :  { %7497 = vpow2.f32 %v5992_v10  ;;  %v4280_v10 = vld [vmem:[#allocation2] sm:$0x30] }
 0x8a0   :  { %v7496_v47 = vpop.eup %7495 }
 0x8a1   :  { %v4250_v50 = vadd.f32 1.0, %v7496_v47 }
 0x8a2   :  { %v7498_v38 = vpop.eup %7497 }
 0x8a3   :  { %7499 = vrcp.f32 %v4250_v50  ;;  %v4251_v21 = vadd.f32 1.0, %v7498_v38  ;;  %v4281_v38 = vld [vmem:[#allocation2 + $0x18] sm:$0x30] }
 0x8a5   :  { %7501 = vrcp.f32 %v4251_v21 }
 0x8ae   :  { %v4397_v34 = vpop.f32.mrf.mxu0  ;;  %v4468_v46 = vpop.f32.mrf.mxu1 }
 0x8af   :  { %v4474_v16 = vrot.slane %v4397_v34, 4 }
 0x8b0   :  { %v7500_v19 = vpop.eup %7499  ;;  %v4399_v23 = vpop.f32.mrf.mxu0 }
 0x8b1   :  { %v7126_v47 = vpop.f32.mrf.mxu1  ;;  %v4272_v50 = vmul.f32 %v7500_v19, %v4271_v40  ;;  %v4478_v5 = vadd.f32 %v4474_v16, %v4280_v10  ;;  %v4475_v7 = vrot.slane %v4399_v23, 4 }
 0x8b2   :  { %v7502_v6 = vpop.eup %7501 }
 0x8b3   :  { %v4273_v3 = vadd.f32 %v4272_v50, %v4263_v33  ;;  %v4492_v60 = vadd.f32 %v4485_v51, %v4478_v5  ;;  %v4479_v48 = vadd.f32 %v4475_v7, %v4281_v38  ;;  %v4275_v30 = vsub.f32 1.0, %v7502_v6  ;;  %v4282_v33 = vld [vmem:[#allocation2 + $0x20] sm:$0x30] }
 0x8b4   :  { %v4277_v21 = vmul.f32 %v7502_v6, %v10074_v41  ;;  %v10511_v6 = vld [vmem:[%s11420_s30] ss:$0 sm:$0xff] }
 0x8b5   :  { %7503 = vtanh.f32 %v4273_v3  ;;  %v5995_v4 = vmul.f32 -1.442695, %v4492_v60  ;;  %v4493_v24 = vadd.f32 %v4489_v26, %v4479_v48  ;;  %v4513_v23 = vadd.f32 %v10511_v6, %v4282_v33  ;;  %v10550_v33 = vld [vmem:[#allocation9 + $0x130] sm:$0xff] }
 0x8b6   :  { %v4530_v3 = vrot.slane %v10080_v20, 6  ;;  %v10528_v20 = vld [vmem:[#allocation9 + $0x150] sm:$0xff] }
 0x8b7   :  { %7505 = vpow2.f32 %v5995_v4  ;;  %v5996_v34 = vmul.f32 -1.442695, %v4493_v24  ;;  %v10505_v4 = vld [vmem:[%s11419_s3] ss:$0 sm:$0xff] }
 0x8b8   :  { %v4521_v18 = vadd.f32 %v10505_v4, %v4468_v46 }
 0x8b9   :  { %7507 = vpow2.f32 %v5996_v34 }
 0x8ba   :  { %v4523_v41 = vrot.slane %v4521_v18, 4  ;;  %v10544_v18 = vld [vmem:[#allocation9 + $0x128] sm:$0xff] }
 0x8c2   :  { %v7504_v56 = vpop.eup %7503 }
 0x8c3   :  { %v4276_v47 = vmul.f32 %v7504_v56, %v4275_v30  ;;  %v10520_v30 = vld [vmem:[#allocation9 + $0x168] sm:$0xff]  ;;  %v10522_v56 = vld [vmem:[#allocation9 + $0x178] sm:$0xff] }
 0x8c4   :  { %v7506_v40 = vpop.eup %7505 }
 0x8c5   :  { %v4500_v16 = vadd.f32 1.0, %v7506_v40  ;;  %v10499_v19 = vadd.f32 %v4277_v21, %v4276_v47  ;;  %v10524_v47 = vld [vmem:[#allocation9 + $0x158] sm:$0xff]  ;;  %v10530_v21 = vld [vmem:[#allocation9 + $0x160] sm:$0xff] }
 0x8c6   :  { %v7508_v48 = vpop.eup %7507  ;;  %v10534_v40 = vld [vmem:[#allocation9 + $0x140] sm:$0xff] }
 0x8c7   :  { %7509 = vrcp.f32 %v4500_v16  ;;  %4279 = vst [vmem:[#allocation3 + $0xa] sm:$0x3] %v10499_v19  ;;  %v4501_v51 = vadd.f32 1.0, %v7508_v48  ;;  %v10538_v16 = vld [vmem:[#allocation9 + $0x138] sm:$0xff]  ;;  %v10540_v48 = vld [vmem:[#allocation9 + $0x148] sm:$0xff] }
 0x8c9   :  { %7511 = vrcp.f32 %v4501_v51  ;;  %v10548_v51 = vld [vmem:[#allocation9 + $0x120] sm:$0xff] }
 0x8d4   :  { %v7510_v10 = vpop.eup %7509 }
 0x8d5   :  { %v4525_v50 = vmul.f32 %v7510_v10, %v4523_v41  ;;  %v10554_v41 = vld [vmem:[#allocation9 + $0x110] sm:$0xff]  ;;  %v10558_v10 = vld [vmem:[#allocation9 + $0x108] sm:$0xff] }
 0x8d6   :  { %v7512_v7 = vpop.eup %7511 }
 0x8d7   :  { %v4526_v5 = vadd.f32 %v4525_v50, %v4513_v23  ;;  %v4528_v60 = vsub.f32 1.0, %v7512_v7  ;;  %v4532_v26 = vmul.f32 %v7512_v7, %v4530_v3  ;;  %v10560_v23 = vld [vmem:[#allocation9 + $0x118] sm:$0xff]  ;;  %v10570_v7 = vld [vmem:[#allocation9 + $0x100] sm:$0xff] }
 0x8d8   :  { %11960 = vst [vmem:[#allocation81_spill] sm:$0xff] %v10560_v23  ;;  %v10564_v50 = vld [vmem:[#allocation9 + $0xf8] sm:$0xff]  ;;  %11963 = vst [vmem:[#allocation84_spill] sm:$0xff] %v10570_v7  ;;  %v10574_v3 = vld [vmem:[#allocation9 + $0xe0] sm:$0xff] }
 0x8d9   :  { %7513 = vtanh.f32 %v4526_v5  ;;  %11961 = vst [vmem:[#allocation82_spill] sm:$0xff] %v10564_v50  ;;  %v10568_v5 = vld [vmem:[#allocation9 + $0xf0] sm:$0xff]  ;;  %11964 = vst [vmem:[#allocation85_spill] sm:$0xff] %v10574_v3 }
 0x8da   :  { %11962 = vst [vmem:[#allocation83_spill] sm:$0xff] %v10568_v5 }
 0x8e6   :  { %v7514_v46 = vpop.eup %7513 }
 0x8e7   :  { %v4529_v38 = vmul.f32 %v7514_v46, %v4528_v60  ;;  %v10578_v60 = vld [vmem:[#allocation9 + $0xd8] sm:$0xff]  ;;  %v10580_v46 = vld [vmem:[#allocation9 + $0xe8] sm:$0xff] }
 0x8e8   :  { %11965 = vst [vmem:[#allocation86_spill] sm:$0xff] %v10578_v60  ;;  %11966 = vst [vmem:[#allocation87_spill] sm:$0xff] %v10580_v46 }
 0x8e9   :  { %v10515_v24 = vadd.f32 %v4532_v26, %v4529_v38  ;;  %v10584_v38 = vld [vmem:[#allocation9 + $0xc8] sm:$0xff]  ;;  %v10588_v26 = vld [vmem:[#allocation9 + $0xc0] sm:$0xff] }
 0x8ea   :  { %11967 = vst [vmem:[#allocation88_spill] sm:$0xff] %v10584_v38  ;;  %11968 = vst [vmem:[#allocation89_spill] sm:$0xff] %v10588_v26 }
 0x8eb   :  { %v10518_v34 = vrot.slane %v10515_v24, 4 }
 0x8ed   :  { %4650 = vmatmul.mubr.f32.vlgmr.msra.gmra.mxu0 %v10518_v34  ;;  %7160 = vmatmul.mubr.f32.vlgmr.msra.gmra.mxu1 %v10518_v34 }
 0x8ee   :  { %4775 = vmatpush1.msra.mxu0 %v10520_v30  ;;  %7163 = vmatpush3.msra.mxu1 %v10522_v56 }
 0x8ef   :  { %4776 = vmatprep.subr.mxu0 %v10524_v47  ;;  %7164 = vmatprep.subr.mxu1 %v11421_v57 }
 0x8f0   :  { %4777 = vmatpush1.msra.mxu0 %v10528_v20  ;;  %7165 = vmatpush3.msra.mxu1 %v10530_v21 }
 0x8f1   :  { %4778 = vmatprep.subr.mxu0 %v10534_v40  ;;  %7166 = vmatprep.subr.mxu1 %v11421_v57 }
 0x8f2   :  { %4779 = vmatpush1.msra.mxu0 %v10538_v16  ;;  %7167 = vmatpush3.msra.mxu1 %v10540_v48 }
 0x8f3   :  { %4780 = vmatprep.subr.mxu0 %v10544_v18  ;;  %7168 = vmatprep.subr.mxu1 %v11421_v57 }
 0x8f4   :  { %4781 = vmatpush1.msra.mxu0 %v10548_v51  ;;  %7169 = vmatpush3.msra.mxu1 %v10550_v33 }
 0x8f5   :  { %4782 = vmatprep.subr.mxu0 %v10554_v41  ;;  %7170 = vmatprep.subr.mxu1 %v11421_v57 }
 0x8f6   :  { %4783 = vmatpush1.msra.mxu0 %v10558_v10  ;;  %7171 = vmatpush3.msra.mxu1 %v10560_v23  ;;  %v10590_v23 = vld [vmem:[#allocation9 + $0xd0] sm:$0xff] }
 0x8f7   :  { %4784 = vmatprep.subr.mxu0 %v10564_v50  ;;  %7172 = vmatprep.subr.mxu1 %v11421_v57  ;;  %11969 = vst [vmem:[#allocation90_spill] sm:$0xff] %v10590_v23  ;;  %v10594_v50 = vld [vmem:[#allocation9 + $0xb0] sm:$0xff] }
 0x8f8   :  { %4785 = vmatpush1.msra.mxu0 %v10568_v5  ;;  %7173 = vmatpush3.msra.mxu1 %v10570_v7  ;;  %11970 = vst [vmem:[#allocation91_spill] sm:$0xff] %v10594_v50  ;;  %v10598_v7 = vld [vmem:[#allocation9 + $0xa8] sm:$0xff]  ;;  %v10600_v5 = vld [vmem:[#allocation9 + $0xb8] sm:$0xff] }
 0x8f9   :  { %4786 = vmatprep.subr.mxu0 %v10574_v3  ;;  %7174 = vmatprep.subr.mxu1 %v11421_v57  ;;  %11971 = vst [vmem:[#allocation92_spill] sm:$0xff] %v10598_v7  ;;  %11972 = vst [vmem:[#allocation93_spill] sm:$0xff] %v10600_v5  ;;  %v10604_v3 = vld [vmem:[#allocation9 + $0x98] sm:$0xff] }
 0x8fa   :  { %4787 = vmatpush1.msra.mxu0 %v10578_v60  ;;  %7175 = vmatpush3.msra.mxu1 %v10580_v46  ;;  %11973 = vst [vmem:[#allocation94_spill] sm:$0xff] %v10604_v3  ;;  %v10608_v46 = vld [vmem:[#allocation9 + $0x90] sm:$0xff]  ;;  %v10610_v60 = vld [vmem:[#allocation9 + $0xa0] sm:$0xff] }
 0x8fb   :  { %4788 = vmatprep.subr.mxu0 %v10584_v38  ;;  %7176 = vmatprep.subr.mxu1 %v11421_v57  ;;  %11974 = vst [vmem:[#allocation95_spill] sm:$0xff] %v10608_v46  ;;  %11975 = vst [vmem:[#allocation96_spill] sm:$0xff] %v10610_v60  ;;  %v10614_v38 = vld [vmem:[#allocation9 + $0x80] sm:$0xff] }
 0x8fc   :  { %4789 = vmatpush1.msra.mxu0 %v10588_v26  ;;  %7177 = vmatpush3.msra.mxu1 %v10590_v23  ;;  %11976 = vst [vmem:[#allocation97_spill] sm:$0xff] %v10614_v38  ;;  %v10618_v23 = vld [vmem:[#allocation9 + $0x78] sm:$0xff]  ;;  %v10620_v26 = vld [vmem:[#allocation9 + $0x88] sm:$0xff] }
 0x8fd   :  { %4790 = vmatprep.subr.mxu0 %v10594_v50  ;;  %7178 = vmatprep.subr.mxu1 %v11421_v57  ;;  %11977 = vst [vmem:[#allocation98_spill] sm:$0xff] %v10618_v23  ;;  %11978 = vst [vmem:[#allocation99_spill] sm:$0xff] %v10620_v26  ;;  %v10624_v50 = vld [vmem:[#allocation9 + $0x68] sm:$0xff] }
 0x8fe   :  { %4791 = vmatpush1.msra.mxu0 %v10598_v7  ;;  %7179 = vmatpush3.msra.mxu1 %v10600_v5  ;;  %11979 = vst [vmem:[#allocation100_spill] sm:$0xff] %v10624_v50  ;;  %v10628_v5 = vld [vmem:[#allocation9 + $0x60] sm:$0xff]  ;;  %v10630_v7 = vld [vmem:[#allocation9 + $0x70] sm:$0xff] }
 0x8ff   :  { %4792 = vmatprep.subr.mxu0 %v10604_v3  ;;  %7180 = vmatprep.subr.mxu1 %v11421_v57  ;;  %11980 = vst [vmem:[#allocation101_spill] sm:$0xff] %v10628_v5  ;;  %11981 = vst [vmem:[#allocation102_spill] sm:$0xff] %v10630_v7  ;;  %v10634_v3 = vld [vmem:[#allocation9 + $0x50] sm:$0xff] }
 0x900   :  { %4793 = vmatpush1.msra.mxu0 %v10608_v46  ;;  %7181 = vmatpush3.msra.mxu1 %v10610_v60  ;;  %11982 = vst [vmem:[#allocation103_spill] sm:$0xff] %v10634_v3  ;;  %v10638_v60 = vld [vmem:[#allocation9 + $0x48] sm:$0xff]  ;;  %v10640_v46 = vld [vmem:[#allocation9 + $0x58] sm:$0xff] }
 0x901   :  { %4794 = vmatprep.subr.mxu0 %v10614_v38  ;;  %7182 = vmatprep.subr.mxu1 %v11421_v57  ;;  %11983 = vst [vmem:[#allocation104_spill] sm:$0xff] %v10640_v46  ;;  %v10644_v38 = vld [vmem:[#allocation9 + $0x38] sm:$0xff] }
 0x902   :  { %4795 = vmatpush1.msra.mxu0 %v10618_v23  ;;  %7183 = vmatpush3.msra.mxu1 %v10620_v26  ;;  %11984 = vst [vmem:[#allocation105_spill] sm:$0xff] %v10644_v38  ;;  %v10648_v26 = vld [vmem:[#allocation9 + $0x30] sm:$0xff]  ;;  %v10650_v23 = vld [vmem:[#allocation9 + $0x40] sm:$0xff] }
 0x903   :  { %4796 = vmatprep.subr.mxu0 %v10624_v50  ;;  %7184 = vmatprep.subr.mxu1 %v11421_v57  ;;  %v10654_v50 = vld [vmem:[#allocation9 + $0x20] sm:$0xff] }
 0x904   :  { %4797 = vmatpush1.msra.mxu0 %v10628_v5  ;;  %7185 = vmatpush3.msra.mxu1 %v10630_v7  ;;  %v10658_v7 = vld [vmem:[#allocation9 + $0x18] sm:$0xff]  ;;  %v10660_v5 = vld [vmem:[#allocation9 + $0x28] sm:$0xff] }
 0x905   :  { %4798 = vmatprep.subr.mxu0 %v10634_v3  ;;  %7186 = vmatprep.subr.mxu1 %v11421_v57  ;;  %v10664_v3 = vld [vmem:[#allocation9 + $0x8] sm:$0xff] }
 0x906   :  { %4799 = vmatpush1.msra.mxu0 %v10638_v60  ;;  %7187 = vmatpush3.msra.mxu1 %v10640_v46  ;;  %v10668_v46 = vld [vmem:[#allocation9] sm:$0xff] }
 0x907   :  { %4800 = vmatprep.subr.mxu0 %v10644_v38  ;;  %7188 = vmatprep.subr.mxu1 %v11421_v57  ;;  %v10672_v38 = vld [vmem:[#allocation9 + $0x10] sm:$0xff] }
 0x908   :  { %4801 = vmatpush1.msra.mxu0 %v10648_v26  ;;  %7189 = vmatpush3.msra.mxu1 %v10650_v23 }
 0x909   :  { %4802 = vmatprep.subr.mxu0 %v10654_v50  ;;  %7190 = vmatprep.subr.mxu1 %v11421_v57 }
 0x90a   :  { %4803 = vmatpush1.msra.mxu0 %v10658_v7  ;;  %7191 = vmatpush3.msra.mxu1 %v10660_v5 }
 0x90b   :  { %4804 = vmatprep.subr.mxu0 %v10664_v3  ;;  %7192 = vmatprep.subr.mxu1 %v11421_v57 }
 0x90c   :  { %4805 = vmatpush1.msra.mxu0 %v10668_v46  ;;  %4838 = vmatprep.mubr.f32.mxu0 %v11421_v57 }
 0x90d   :  { %7193 = vmatpush3.msra.mxu1 %v10672_v38  ;;  %7194 = vmatprep.mubr.msk.f32.mxu1 %vm7669_vm0, %v11421_v57 }
 0x90e   :  { %4839 = vmatmul.mubr.f32.vlgmr.msra.gmra.mxu0 %v10499_v19  ;;  %7195 = vmatmul.mubr.f32.vlgmr.msra.gmra.mxu1 %v10499_v19 }
 0x90f   :  { %5018 = vmatprep.subr.mxu0 %v10149_v27  ;;  %7197 = vmatprep.subr.mxu1 %v11421_v57  ;;  %v11985_v27 = vld [vmem:[#allocation19_spill] sm:$0xff] }
 0x910   :  { %5019 = vmatpush1.msra.mxu0 %v10154_v15  ;;  %7198 = vmatpush3.msra.mxu1 %v10156_v49  ;;  %v11986_v15 = vld [vmem:[#allocation17_spill] sm:$0xff]  ;;  %v11987_v49 = vld [vmem:[#allocation18_spill] sm:$0xff] }
 0x911   :  { %5020 = vmatprep.subr.mxu0 %v10160_v53  ;;  %7199 = vmatprep.subr.mxu1 %v11421_v57  ;;  %v11988_v53 = vld [vmem:[#allocation20_spill] sm:$0xff] }
 0x912   :  { %5021 = vmatpush1.msra.mxu0 %v10164_v44  ;;  %7200 = vmatpush3.msra.mxu1 %v10166_v14  ;;  %v11989_v44 = vld [vmem:[#allocation21_spill] sm:$0xff]  ;;  %v11990_v14 = vld [vmem:[#allocation22_spill] sm:$0xff] }
 0x913   :  { %5022 = vmatprep.subr.mxu0 %v10170_v42  ;;  %7201 = vmatprep.subr.mxu1 %v11421_v57  ;;  %v11991_v42 = vld [vmem:[#allocation23_spill] sm:$0xff] }
 0x914   :  { %5023 = vmatpush1.msra.mxu0 %v10174_v22  ;;  %7202 = vmatpush3.msra.mxu1 %v10176_v9  ;;  %v11992_v22 = vld [vmem:[#allocation24_spill] sm:$0xff]  ;;  %v11993_v9 = vld [vmem:[#allocation25_spill] sm:$0xff] }
 0x915   :  { %5024 = vmatprep.subr.mxu0 %v10180_v63  ;;  %7203 = vmatprep.subr.mxu1 %v11421_v57  ;;  %v11994_v63 = vld [vmem:[#allocation26_spill] sm:$0xff] }
 0x916   :  { %5025 = vmatpush1.msra.mxu0 %v10184_v2  ;;  %7204 = vmatpush3.msra.mxu1 %v10186_v54  ;;  %v11995_v2 = vld [vmem:[#allocation27_spill] sm:$0xff]  ;;  %v11996_v54 = vld [vmem:[#allocation29_spill] sm:$0xff] }
 0x917   :  { %5026 = vmatprep.subr.mxu0 %v10190_v58  ;;  %7205 = vmatprep.subr.mxu1 %v11421_v57  ;;  %v11997_v58 = vld [vmem:[#allocation28_spill] sm:$0xff] }
 0x918   :  { %5027 = vmatpush1.msra.mxu0 %v10194_v25  ;;  %7206 = vmatpush3.msra.mxu1 %v10196_v28  ;;  %v11998_v25 = vld [vmem:[#allocation30_spill] sm:$0xff]  ;;  %v11999_v28 = vld [vmem:[#allocation31_spill] sm:$0xff] }
 0x919   :  { %5028 = vmatprep.subr.mxu0 %v10200_v31  ;;  %7207 = vmatprep.subr.mxu1 %v11421_v57  ;;  %v12000_v31 = vld [vmem:[#allocation32_spill] sm:$0xff] }
 0x91a   :  { %5029 = vmatpush1.msra.mxu0 %v10204_v52  ;;  %7208 = vmatpush3.msra.mxu1 %v10206_v35  ;;  %v12001_v52 = vld [vmem:[#allocation33_spill] sm:$0xff]  ;;  %v12002_v35 = vld [vmem:[#allocation34_spill] sm:$0xff] }
 0x91b   :  { %5030 = vmatprep.subr.mxu0 %v10210_v36  ;;  %7209 = vmatprep.subr.mxu1 %v11421_v57  ;;  %v12003_v36 = vld [vmem:[#allocation35_spill] sm:$0xff] }
 0x91c   :  { %5031 = vmatpush1.msra.mxu0 %v10214_v17  ;;  %7210 = vmatpush3.msra.mxu1 %v10216_v37  ;;  %v12004_v17 = vld [vmem:[#allocation36_spill] sm:$0xff]  ;;  %v12005_v37 = vld [vmem:[#allocation37_spill] sm:$0xff] }
 0x91d   :  { %5032 = vmatprep.subr.mxu0 %v10220_v39  ;;  %7211 = vmatprep.subr.mxu1 %v11421_v57  ;;  %v12006_v39 = vld [vmem:[#allocation38_spill] sm:$0xff] }
 0x91e   :  { %5033 = vmatpush1.msra.mxu0 %v10224_v12  ;;  %7212 = vmatpush3.msra.mxu1 %v10226_v59  ;;  %v12007_v12 = vld [vmem:[#allocation39_spill] sm:$0xff]  ;;  %v12008_v59 = vld [vmem:[#allocation40_spill] sm:$0xff] }
 0x91f   :  { %5034 = vmatprep.subr.mxu0 %v10230_v43  ;;  %7213 = vmatprep.subr.mxu1 %v11421_v57  ;;  %v12009_v43 = vld [vmem:[#allocation41_spill] sm:$0xff] }
 0x920   :  { %5035 = vmatpush1.msra.mxu0 %v10234_v0  ;;  %7214 = vmatpush3.msra.mxu1 %v10236_v62  ;;  %v12010_v0 = vld [vmem:[#allocation42_spill] sm:$0xff]  ;;  %v12011_v62 = vld [vmem:[#allocation43_spill] sm:$0xff] }
 0x921   :  { %5036 = vmatprep.subr.mxu0 %v10240_v13  ;;  %7215 = vmatprep.subr.mxu1 %v11421_v57  ;;  %v12012_v13 = vld [vmem:[#allocation44_spill] sm:$0xff] }
 0x922   :  { %5037 = vmatpush1.msra.mxu0 %v10244_v11  ;;  %7216 = vmatpush3.msra.mxu1 %v10246_v1  ;;  %v12013_v11 = vld [vmem:[#allocation45_spill] sm:$0xff]  ;;  %v12014_v1 = vld [vmem:[#allocation46_spill] sm:$0xff] }
 0x923   :  { %5038 = vmatprep.subr.mxu0 %v10250_v29  ;;  %7217 = vmatprep.subr.mxu1 %v11421_v57  ;;  %v12015_v29 = vld [vmem:[#allocation47_spill] sm:$0xff] }
 0x924   :  { %5039 = vmatpush1.msra.mxu0 %v10254_v32  ;;  %7218 = vmatpush3.msra.mxu1 %v10256_v55  ;;  %v12016_v32 = vld [vmem:[#allocation48_spill] sm:$0xff]  ;;  %v12017_v55 = vld [vmem:[#allocation49_spill] sm:$0xff] }
 0x925   :  { %5040 = vmatprep.subr.mxu0 %v10260_v8  ;;  %7219 = vmatprep.subr.mxu1 %v11421_v57  ;;  %v12018_v8 = vld [vmem:[#allocation50_spill] sm:$0xff] }
 0x926   :  { %5041 = vmatpush1.msra.mxu0 %v10264_v45  ;;  %7220 = vmatpush3.msra.mxu1 %v11985_v27  ;;  %v12019_v45 = vld [vmem:[#allocation51_spill] sm:$0xff]  ;;  %v12021_v27 = vld [vmem:[#allocation53_spill] sm:$0xff] }
 0x927   :  { %5042 = vmatprep.subr.mxu0 %v11986_v15  ;;  %7221 = vmatprep.subr.mxu1 %v11421_v57  ;;  %v12022_v15 = vld [vmem:[#allocation54_spill] sm:$0xff] }
 0x928   :  { %5043 = vmatpush1.msra.mxu0 %v11987_v49  ;;  %7222 = vmatpush3.msra.mxu1 %v11988_v53  ;;  %v12023_v49 = vld [vmem:[#allocation55_spill] sm:$0xff]  ;;  %v12024_v53 = vld [vmem:[#allocation56_spill] sm:$0xff] }
 0x929   :  { %5044 = vmatprep.subr.mxu0 %v11989_v44  ;;  %7223 = vmatprep.subr.mxu1 %v11421_v57  ;;  %v12025_v44 = vld [vmem:[#allocation57_spill] sm:$0xff] }
 0x92a   :  { %5045 = vmatpush1.msra.mxu0 %v11990_v14  ;;  %7224 = vmatpush3.msra.mxu1 %v11991_v42  ;;  %v12026_v14 = vld [vmem:[#allocation58_spill] sm:$0xff]  ;;  %v12027_v42 = vld [vmem:[#allocation59_spill] sm:$0xff] }
 0x92b   :  { %5046 = vmatprep.subr.mxu0 %v11992_v22  ;;  %7225 = vmatprep.subr.mxu1 %v11421_v57  ;;  %v12028_v22 = vld [vmem:[#allocation60_spill] sm:$0xff] }
 0x92c   :  { %5047 = vmatpush1.msra.mxu0 %v11993_v9  ;;  %7226 = vmatpush3.msra.mxu1 %v11994_v63  ;;  %v12029_v9 = vld [vmem:[#allocation61_spill] sm:$0xff]  ;;  %v12030_v63 = vld [vmem:[#allocation62_spill] sm:$0xff] }
 0x92d   :  { %5048 = vmatprep.subr.mxu0 %v11995_v2  ;;  %7227 = vmatprep.subr.mxu1 %v11421_v57  ;;  %v12031_v2 = vld [vmem:[#allocation63_spill] sm:$0xff] }
 0x92e   :  { %5049 = vmatpush1.msra.mxu0 %v11996_v54  ;;  %5082 = vmatprep.mubr.f32.mxu0 %v11421_v57  ;;  %v12032_v54 = vld [vmem:[#allocation64_spill] sm:$0xff] }
 0x92f   :  { %7228 = vmatpush3.msra.mxu1 %v11997_v58  ;;  %7229 = vmatprep.mubr.msk.f32.mxu1 %vm7669_vm0, %v11421_v57  ;;  %v12033_v58 = vld [vmem:[#allocation65_spill] sm:$0xff] }
 0x930   :  { %5083 = vmatmul.mubr.f32.vlgmr.msra.gmra.mxu0 %v10518_v34  ;;  %7230 = vmatmul.mubr.f32.vlgmr.msra.gmra.mxu1 %v10518_v34  ;;  %v12020_v34 = vld [vmem:[#allocation52_spill] sm:$0xff] }
 0x931   :  { %5272 = vmatprep.subr.mxu0 %v11998_v25  ;;  %7232 = vmatprep.subr.mxu1 %v11421_v57  ;;  %v12034_v25 = vld [vmem:[#allocation67_spill] sm:$0xff] }
 0x932   :  { %5273 = vmatpush1.msra.mxu0 %v11999_v28  ;;  %7233 = vmatpush3.msra.mxu1 %v12000_v31  ;;  %v12035_v28 = vld [vmem:[#allocation68_spill] sm:$0xff]  ;;  %v12036_v31 = vld [vmem:[#allocation69_spill] sm:$0xff] }
 0x933   :  { %5274 = vmatprep.subr.mxu0 %v12001_v52  ;;  %7234 = vmatprep.subr.mxu1 %v11421_v57  ;;  %v12037_v52 = vld [vmem:[#allocation70_spill] sm:$0xff] }
 0x934   :  { %5275 = vmatpush1.msra.mxu0 %v12002_v35  ;;  %7235 = vmatpush3.msra.mxu1 %v12003_v36  ;;  %v12038_v35 = vld [vmem:[#allocation71_spill] sm:$0xff]  ;;  %v12039_v36 = vld [vmem:[#allocation72_spill] sm:$0xff] }
 0x935   :  { %5276 = vmatprep.subr.mxu0 %v12004_v17  ;;  %7236 = vmatprep.subr.mxu1 %v11421_v57  ;;  %v12040_v17 = vld [vmem:[#allocation73_spill] sm:$0xff] }
 0x936   :  { %5277 = vmatpush1.msra.mxu0 %v12005_v37  ;;  %7237 = vmatpush3.msra.mxu1 %v12006_v39  ;;  %v12041_v37 = vld [vmem:[#allocation74_spill] sm:$0xff]  ;;  %v12042_v39 = vld [vmem:[#allocation75_spill] sm:$0xff] }
 0x937   :  { %5278 = vmatprep.subr.mxu0 %v12007_v12  ;;  %7238 = vmatprep.subr.mxu1 %v11421_v57  ;;  %v12043_v12 = vld [vmem:[#allocation76_spill] sm:$0xff] }
 0x938   :  { %5279 = vmatpush1.msra.mxu0 %v12008_v59  ;;  %7239 = vmatpush3.msra.mxu1 %v12009_v43  ;;  %v12044_v59 = vld [vmem:[#allocation77_spill] sm:$0xff]  ;;  %v12045_v43 = vld [vmem:[#allocation78_spill] sm:$0xff] }
 0x939   :  { %5280 = vmatprep.subr.mxu0 %v12010_v0  ;;  %7240 = vmatprep.subr.mxu1 %v11421_v57  ;;  %v12046_v0 = vld [vmem:[#allocation80_spill] sm:$0xff] }
 0x93a   :  { %5281 = vmatpush1.msra.mxu0 %v12011_v62  ;;  %7241 = vmatpush3.msra.mxu1 %v12012_v13 }
 0x93b   :  { %5282 = vmatprep.subr.mxu0 %v12013_v11  ;;  %7242 = vmatprep.subr.mxu1 %v11421_v57 }
 0x93c   :  { %5283 = vmatpush1.msra.mxu0 %v12014_v1  ;;  %7243 = vmatpush3.msra.mxu1 %v12015_v29  ;;  %v4917_v1 = vld [vmem:[%s10973_s10] sm:$0x3] }
 0x93d   :  { %5284 = vmatprep.subr.mxu0 %v12016_v32  ;;  %7244 = vmatprep.subr.mxu1 %v11421_v57  ;;  %v12047_v32 = vld [vmem:[#allocation66_spill] sm:$0xff] }
 0x93e   :  { %5285 = vmatpush1.msra.mxu0 %v12017_v55  ;;  %7245 = vmatpush3.msra.mxu1 %v12018_v8  ;;  %v4922_v55 = vrot.slane %v4917_v1, %v12047_v32 }
 0x93f   :  { %5286 = vmatprep.subr.mxu0 %v12019_v45  ;;  %7246 = vmatprep.subr.mxu1 %v11421_v57 }
 0x940   :  { %5287 = vmatpush1.msra.mxu0 %v12020_v34  ;;  %7247 = vmatpush3.msra.mxu1 %v12021_v27 }
 0x941   :  { %5288 = vmatprep.subr.mxu0 %v12022_v15  ;;  %7248 = vmatprep.subr.mxu1 %v11421_v57 }
 0x942   :  { %5289 = vmatpush1.msra.mxu0 %v12023_v49  ;;  %7249 = vmatpush3.msra.mxu1 %v12024_v53 }
 0x943   :  { %5290 = vmatprep.subr.mxu0 %v12025_v44  ;;  %7250 = vmatprep.subr.mxu1 %v11421_v57 }
 0x944   :  { %5291 = vmatpush1.msra.mxu0 %v12026_v14  ;;  %7251 = vmatpush3.msra.mxu1 %v12027_v42  ;;  %v4926_v14 = vrot.slane %v4917_v1, %v8150_v61 }
 0x945   :  { %5292 = vmatprep.subr.mxu0 %v12028_v22  ;;  %7252 = vmatprep.subr.mxu1 %v11421_v57 }
 0x946   :  { %5293 = vmatpush1.msra.mxu0 %v12029_v9  ;;  %7253 = vmatpush3.msra.mxu1 %v12030_v63 }
 0x947   :  { %5294 = vmatprep.subr.mxu0 %v12031_v2  ;;  %7254 = vmatprep.subr.mxu1 %v11421_v57 }
 0x948   :  { %5295 = vmatpush1.msra.mxu0 %v12032_v54  ;;  %7255 = vmatpush3.msra.mxu1 %v12033_v58  ;;  %v10829_v54 = vld [vmem:[%s10975_s12] ss:$0 sm:$0xff] }
 0x949   :  { %5296 = vmatprep.subr.mxu0 %v12034_v25  ;;  %7256 = vmatprep.subr.mxu1 %v11421_v57  ;;  %v5167_v58 = vld [vmem:[%s11418_s1] sm:$0x3] }
 0x94a   :  { %5297 = vmatpush1.msra.mxu0 %v12035_v28  ;;  %7257 = vmatpush3.msra.mxu1 %v12036_v31  ;;  %v10837_v25 = vld [vmem:[%s10974_s11] ss:$0 sm:$0xff] }
 0x94b   :  { %5298 = vmatprep.subr.mxu0 %v12037_v52  ;;  %7258 = vmatprep.subr.mxu1 %v11421_v57 }
 0x94c   :  { %5299 = vmatpush1.msra.mxu0 %v12038_v35  ;;  %7259 = vmatpush3.msra.mxu1 %v12039_v36 }
 0x94d   :  { %5300 = vmatprep.subr.mxu0 %v12040_v17  ;;  %7260 = vmatprep.subr.mxu1 %v11421_v57  ;;  %v5172_v17 = vrot.slane %v5167_v58, %v12047_v32 }
 0x94e   :  { %5301 = vmatpush1.msra.mxu0 %v12041_v37  ;;  %7261 = vmatpush3.msra.mxu1 %v12042_v39 }
 0x94f   :  { %5302 = vmatprep.subr.mxu0 %v12043_v12  ;;  %7262 = vmatprep.subr.mxu1 %v11421_v57  ;;  %v4967_v12 = vld [vmem:[#allocation2] sm:$0xc0] }
 0x950   :  { %5303 = vmatpush1.msra.mxu0 %v12044_v59  ;;  %7263 = vmatpush3.msra.mxu1 %v12045_v43 }
 0x951   :  { %5336 = vmatprep.mubr.f32.mxu0 %v11421_v57  ;;  %7264 = vmatprep.mubr.msk.f32.mxu1 %vm7669_vm0, %v11421_v57 }
 0x952   :  { %5461 = vmatprep.subr.mxu0 %v12046_v0  ;;  %7267 = vmatprep.subr.mxu1 %v11421_v57 }
 0x9ad   :  { %v4722_v62 = vpop.f32.mrf.mxu1  ;;  %v4651_v11 = vpop.f32.mrf.mxu0 }
 0x9ae   :  { %v4950_v39 = vadd.f32 %v10837_v25, %v4722_v62 }
 0x9af   :  { %v7161_v13 = vpop.f32.mrf.mxu1  ;;  %v4653_v29 = vpop.f32.mrf.mxu0 }
 0x9ce   :  { %v4840_v8 = vpop.f32.mrf.mxu0  ;;  %v4911_v45 = vpop.f32.mrf.mxu1 }
 0x9cf   :  { %v4915_v34 = vadd.f32 %v4840_v8, %v4651_v11  ;;  %v4958_v35 = vadd.f32 %v10829_v54, %v4911_v45  ;;  %v5176_v45 = vrot.slane %v5167_v58, %v8150_v61 }
 0x9d0   :  { %v4842_v27 = vpop.f32.mrf.mxu0  ;;  %v7196_v15 = vpop.f32.mrf.mxu1 }
 0x9d1   :  { %v4929_v49 = vadd.f32 %v4922_v55, %v4915_v34  ;;  %v4916_v44 = vadd.f32 %v4842_v27, %v4653_v29  ;;  %v4968_v55 = vld [vmem:[#allocation2 + $0x18] sm:$0xc0] }
 0x9d3   :  { %v5999_v53 = vmul.f32 -1.442695, %v4929_v49  ;;  %v4930_v42 = vadd.f32 %v4926_v14, %v4916_v44 }
 0x9d5   :  { %7515 = vpow2.f32 %v5999_v53  ;;  %v6000_v22 = vmul.f32 -1.442695, %v4930_v42 }
 0x9d7   :  { %7517 = vpow2.f32 %v6000_v22 }
 0x9e2   :  { %v7516_v9 = vpop.eup %7515 }
 0x9e3   :  { %v4937_v63 = vadd.f32 1.0, %v7516_v9 }
 0x9e4   :  { %v7518_v2 = vpop.eup %7517 }
 0x9e5   :  { %7519 = vrcp.f32 %v4937_v63  ;;  %v4938_v28 = vadd.f32 1.0, %v7518_v2 }
 0x9e7   :  { %7521 = vrcp.f32 %v4938_v28  ;;  %v4969_v28 = vld [vmem:[#allocation2 + $0x20] sm:$0xc0] }
 0x9f0   :  { %v5084_v31 = vpop.f32.mrf.mxu0  ;;  %v5155_v52 = vpop.f32.mrf.mxu1 }
 0x9f1   :  { %v5161_v36 = vrot.slane %v5084_v31, 2  ;;  %v5208_v2 = vadd.f32 %v10505_v4, %v5155_v52 }
 0x9f2   :  { %v7520_v37 = vpop.eup %7519  ;;  %v5086_v59 = vpop.f32.mrf.mxu0 }
 0x9f3   :  { %v7231_v43 = vpop.f32.mrf.mxu1  ;;  %v4959_v0 = vmul.f32 %v7520_v37, %v4958_v35  ;;  %v5165_v13 = vadd.f32 %v5161_v36, %v4967_v12  ;;  %v5162_v11 = vrot.slane %v5086_v59, 2  ;;  %v5210_v31 = vrot.slane %v5208_v2, 2 }
 0x9f4   :  { %v7522_v49 = vpop.eup %7521  ;;  %v5200_v36 = vadd.f32 %v10511_v6, %v4969_v28 }
 0x9f5   :  { %v4960_v1 = vadd.f32 %v4959_v0, %v4950_v39  ;;  %v5179_v29 = vadd.f32 %v5172_v17, %v5165_v13  ;;  %v5166_v34 = vadd.f32 %v5162_v11, %v4968_v55  ;;  %v4962_v62 = vsub.f32 1.0, %v7522_v49  ;;  %v5678_v11 = vpop.xlane.xlu0 %5677  ;;  %v12064_v55 = vld [vmem:[#allocation97_spill] sm:$0xff] }
 0x9f6   :  { %v4964_v14 = vmul.f32 %v7522_v49, %v10499_v19  ;;  %v5217_v39 = vrot.slane %v10515_v24, 6  ;;  %v5681_v52 = vmul.f32 0.015625, %v5678_v11  ;;  %v12048_v24 = vld [vmem:[#allocation81_spill] sm:$0xff]  ;;  %v12069_v49 = vld [vmem:[#allocation102_spill] sm:$0xff] }
 0x9f7   :  { %7523 = vtanh.f32 %v4960_v1  ;;  %v6003_v8 = vmul.f32 -1.442695, %v5179_v29  ;;  %v5180_v27 = vadd.f32 %v5176_v45, %v5166_v34  ;;  %v12062_v1 = vld [vmem:[#allocation95_spill] sm:$0xff]  ;;  %v12063_v29 = vld [vmem:[#allocation96_spill] sm:$0xff]  ;;  %v12065_v34 = vld [vmem:[#allocation98_spill] sm:$0xff] }
 0x9f8   :  { %v5683_v6 = vadd.f32 1e-05, %v5681_v52  ;;  %v12066_v45 = vld [vmem:[#allocation99_spill] sm:$0xff] }
 0x9f9   :  { %7525 = vpow2.f32 %v6003_v8  ;;  %v6004_v15 = vmul.f32 -1.442695, %v5180_v27  ;;  %v12067_v27 = vld [vmem:[#allocation100_spill] sm:$0xff] }
 0x9fb   :  { %7527 = vpow2.f32 %v6004_v15  ;;  %v12068_v15 = vld [vmem:[#allocation101_spill] sm:$0xff] }
 0xa04   :  { %v7524_v53 = vpop.eup %7523 }
 0xa05   :  { %v4963_v44 = vmul.f32 %v7524_v53, %v4962_v62  ;;  %v12070_v62 = vld [vmem:[#allocation103_spill] sm:$0xff]  ;;  %v12071_v53 = vld [vmem:[#allocation16_spill] sm:$0xff] }
 0xa06   :  { %v7526_v42 = vpop.eup %7525 }
 0xa07   :  { %v5187_v22 = vadd.f32 1.0, %v7526_v42  ;;  %v10844_v9 = vadd.f32 %v4964_v14, %v4963_v44  ;;  %v12072_v14 = vld [vmem:[#allocation104_spill] sm:$0xff]  ;;  %v10907_v42 = vld [vmem:[%s10976_s13] ss:$0 sm:$0xff] }
 0xa08   :  { %v7528_v63 = vpop.eup %7527 }
 0xa09   :  { %7529 = vrcp.f32 %v5187_v22  ;;  %4966 = vst [vmem:[#allocation3 + $0xc] sm:$0x3] %v10844_v9  ;;  %v5188_v58 = vadd.f32 1.0, %v7528_v63  ;;  %v12073_v22 = vld [vmem:[#allocation105_spill] sm:$0xff]  ;;  %v10921_v63 = vld [vmem:[%s10977_s14] ss:$0 sm:$0xff] }
 0xa0b   :  { %7531 = vrcp.f32 %v5188_v58 }
 0xa16   :  { %v7530_v35 = vpop.eup %7529 }
 0xa17   :  { %v5212_v17 = vmul.f32 %v7530_v35, %v5210_v31 }
 0xa18   :  { %v7532_v19 = vpop.eup %7531 }
 0xa19   :  { %v5213_v37 = vadd.f32 %v5212_v17, %v5200_v36  ;;  %v5215_v12 = vsub.f32 1.0, %v7532_v19  ;;  %v5219_v0 = vmul.f32 %v7532_v19, %v5217_v39 }
 0xa1b   :  { %7533 = vtanh.f32 %v5213_v37 }
 0xa1c   :  { %7535 = vrsqrt.f32 %v5683_v6 }
 0xa28   :  { %v7534_v59 = vpop.eup %7533 }
 0xa29   :  { %v5216_v43 = vmul.f32 %v7534_v59, %v5215_v12  ;;  %v7536_v8 = vpop.eup %7535 }
 0xa2a   :  { %v5687_v44 = vmul.f32 %v7536_v8, %v12071_v53  ;;  %v5713_v8 = vld [vmem:[#allocation10 + $0x30] sm:$0xff]  ;;  %v5822_v53 = vld [vmem:[#allocation12 + $0x78] sm:$0xff] }
 0xa2b   :  { %v5220_v13 = vadd.f32 %v5219_v0, %v5216_v43 }
 0xa2d   :  { %v5270_v4 = vrot.slane %v5220_v13, 6  ;;  %5654 = vst [vmem:[%s10985_s22 - $0x6] sm:$0xc0] %v5220_v13 }
 0xa2f   :  { %5337 = vmatmul.mubr.f32.vlgmr.msra.gmra.mxu0 %v5270_v4  ;;  %7265 = vmatmul.mubr.f32.vlgmr.msra.gmra.mxu1 %v5270_v4 }
 0xa30   :  { %5462 = vmatpush1.msra.mxu0 %v10520_v30  ;;  %7268 = vmatpush3.msra.mxu1 %v10522_v56  ;;  %v12049_v30 = vld [vmem:[#allocation82_spill] sm:$0xff]  ;;  %v12050_v56 = vld [vmem:[#allocation83_spill] sm:$0xff] }
 0xa31   :  { %5463 = vmatprep.subr.mxu0 %v10524_v47  ;;  %7269 = vmatprep.subr.mxu1 %v11421_v57  ;;  %v12051_v47 = vld [vmem:[#allocation84_spill] sm:$0xff] }
 0xa32   :  { %5464 = vmatpush1.msra.mxu0 %v10528_v20  ;;  %7270 = vmatpush3.msra.mxu1 %v10530_v21  ;;  %v12052_v20 = vld [vmem:[#allocation85_spill] sm:$0xff]  ;;  %v12053_v21 = vld [vmem:[#allocation86_spill] sm:$0xff] }
 0xa33   :  { %5465 = vmatprep.subr.mxu0 %v10534_v40  ;;  %7271 = vmatprep.subr.mxu1 %v11421_v57  ;;  %v12054_v40 = vld [vmem:[#allocation87_spill] sm:$0xff] }
 0xa34   :  { %5466 = vmatpush1.msra.mxu0 %v10538_v16  ;;  %7272 = vmatpush3.msra.mxu1 %v10540_v48  ;;  %v12055_v16 = vld [vmem:[#allocation88_spill] sm:$0xff]  ;;  %v12056_v48 = vld [vmem:[#allocation89_spill] sm:$0xff] }
 0xa35   :  { %5467 = vmatprep.subr.mxu0 %v10544_v18  ;;  %7273 = vmatprep.subr.mxu1 %v11421_v57  ;;  %v12057_v18 = vld [vmem:[#allocation90_spill] sm:$0xff] }
 0xa36   :  { %5468 = vmatpush1.msra.mxu0 %v10548_v51  ;;  %7274 = vmatpush3.msra.mxu1 %v10550_v33  ;;  %v12058_v51 = vld [vmem:[#allocation91_spill] sm:$0xff]  ;;  %v12059_v33 = vld [vmem:[#allocation92_spill] sm:$0xff] }
 0xa37   :  { %5469 = vmatprep.subr.mxu0 %v10554_v41  ;;  %7275 = vmatprep.subr.mxu1 %v11421_v57  ;;  %v12060_v41 = vld [vmem:[#allocation93_spill] sm:$0xff] }
 0xa38   :  { %5470 = vmatpush1.msra.mxu0 %v10558_v10  ;;  %7276 = vmatpush3.msra.mxu1 %v12048_v24  ;;  %v12061_v10 = vld [vmem:[#allocation94_spill] sm:$0xff] }
 0xa39   :  { %5471 = vmatprep.subr.mxu0 %v12049_v30  ;;  %7277 = vmatprep.subr.mxu1 %v11421_v57 }
 0xa3a   :  { %5472 = vmatpush1.msra.mxu0 %v12050_v56  ;;  %7278 = vmatpush3.msra.mxu1 %v12051_v47  ;;  %v12074_v47 = vld [vmem:[#allocation79_spill] sm:$0xff] }
 0xa3b   :  { %5473 = vmatprep.subr.mxu0 %v12052_v20  ;;  %7279 = vmatprep.subr.mxu1 %v11421_v57 }
 0xa3c   :  { %5474 = vmatpush1.msra.mxu0 %v12053_v21  ;;  %7280 = vmatpush3.msra.mxu1 %v12054_v40  ;;  %v5721_v21 = vld [vmem:[#allocation10 + $0x70] sm:$0xff]  ;;  %v5720_v40 = vld [vmem:[#allocation10 + $0x68] sm:$0xff] }
 0xa3d   :  { %5475 = vmatprep.subr.mxu0 %v12055_v16  ;;  %7281 = vmatprep.subr.mxu1 %v11421_v57  ;;  %v5719_v16 = vld [vmem:[#allocation10 + $0x60] sm:$0xff] }
 0xa3e   :  { %5476 = vmatpush1.msra.mxu0 %v12056_v48  ;;  %7282 = vmatpush3.msra.mxu1 %v12057_v18 }
 0xa3f   :  { %5477 = vmatprep.subr.mxu0 %v12058_v51  ;;  %7283 = vmatprep.subr.mxu1 %v11421_v57 }
 0xa40   :  { %5478 = vmatpush1.msra.mxu0 %v12059_v33  ;;  %7284 = vmatpush3.msra.mxu1 %v12060_v41  ;;  %v5718_v41 = vld [vmem:[#allocation10 + $0x58] sm:$0xff] }
 0xa41   :  { %5479 = vmatprep.subr.mxu0 %v12061_v10  ;;  %7285 = vmatprep.subr.mxu1 %v11421_v57  ;;  %v5717_v10 = vld [vmem:[#allocation10 + $0x50] sm:$0xff] }
 0xa42   :  { %5480 = vmatpush1.msra.mxu0 %v12062_v1  ;;  %7286 = vmatpush3.msra.mxu1 %v12063_v29  ;;  %v5716_v1 = vld [vmem:[#allocation10 + $0x48] sm:$0xff]  ;;  %v5715_v29 = vld [vmem:[#allocation10 + $0x40] sm:$0xff] }
 0xa43   :  { %5481 = vmatprep.subr.mxu0 %v12064_v55  ;;  %7287 = vmatprep.subr.mxu1 %v11421_v57  ;;  %v5714_v55 = vld [vmem:[#allocation10 + $0x38] sm:$0xff] }
 0xa44   :  { %5482 = vmatpush1.msra.mxu0 %v12065_v34  ;;  %7288 = vmatpush3.msra.mxu1 %v12066_v45  ;;  %v5712_v34 = vld [vmem:[#allocation10 + $0x28] sm:$0xff]  ;;  %v5711_v45 = vld [vmem:[#allocation10 + $0x20] sm:$0xff] }
 0xa45   :  { %5483 = vmatprep.subr.mxu0 %v12067_v27  ;;  %7289 = vmatprep.subr.mxu1 %v11421_v57  ;;  %v5710_v27 = vld [vmem:[#allocation10 + $0x18] sm:$0xff] }
 0xa46   :  { %5484 = vmatpush1.msra.mxu0 %v12068_v15  ;;  %7290 = vmatpush3.msra.mxu1 %v12069_v49  ;;  %v5709_v15 = vld [vmem:[#allocation10 + $0x10] sm:$0xff]  ;;  %v5708_v49 = vld [vmem:[#allocation10 + $0x8] sm:$0xff] }
 0xa47   :  { %5485 = vmatprep.subr.mxu0 %v12070_v62  ;;  %7291 = vmatprep.subr.mxu1 %v11421_v57  ;;  %v5707_v62 = vld [vmem:[#allocation10] sm:$0xff] }
 0xa48   :  { %5486 = vmatpush1.msra.mxu0 %v10638_v60  ;;  %7292 = vmatpush3.msra.mxu1 %v12072_v14  ;;  %v5696_v60 = vmul.f32 %v10907_v42, %v5687_v44  ;;  %v5821_v44 = vld [vmem:[#allocation12 + $0x70] sm:$0xff]  ;;  %v5820_v14 = vld [vmem:[#allocation12 + $0x68] sm:$0xff] }
 0xa49   :  { %5487 = vmatprep.subr.mxu0 %v12073_v22  ;;  %7293 = vmatprep.subr.mxu1 %v11421_v57  ;;  %v5819_v22 = vld [vmem:[#allocation12 + $0x60] sm:$0xff] }
 0xa4a   :  { %5488 = vmatpush1.msra.mxu0 %v10648_v26  ;;  %7294 = vmatpush3.msra.mxu1 %v10650_v23  ;;  %v5705_v23 = vadd.f32 %v10921_v63, %v5696_v60  ;;  %v5818_v60 = vld [vmem:[#allocation12 + $0x58] sm:$0xff] }
 0xa4b   :  { %5489 = vmatprep.subr.mxu0 %v10654_v50  ;;  %7295 = vmatprep.subr.mxu1 %v11421_v57 }
 0xa4c   :  { %5490 = vmatpush1.msra.mxu0 %v10658_v7  ;;  %7296 = vmatpush3.msra.mxu1 %v10660_v5 }
 0xa4d   :  { %5491 = vmatprep.subr.mxu0 %v10664_v3  ;;  %7297 = vmatprep.subr.mxu1 %v11421_v57  ;;  %v5604_v3 = vld [vmem:[%s10973_s10] sm:$0x3] }
 0xa4e   :  { %5492 = vmatpush1.msra.mxu0 %v10668_v46  ;;  %5525 = vmatprep.mubr.f32.mxu0 %v11421_v57  ;;  %v5613_v17 = vrot.slane %v5604_v3, %v8150_v61 }
 0xa4f   :  { %7298 = vmatpush3.msra.mxu1 %v10672_v38  ;;  %7299 = vmatprep.mubr.msk.f32.mxu1 %vm7669_vm0, %v11421_v57  ;;  %v5609_v38 = vrot.slane %v5604_v3, %v12047_v32 }
 0xa50   :  { %5526 = vmatmul.mubr.f32.vlgmr.msra.gmra.mxu0 %v10844_v9  ;;  %7300 = vmatmul.mubr.f32.vlgmr.msra.gmra.mxu1 %v10844_v9 }
 0xa51   :  { %7334 = vmatprep.mubr.f32.mxu0 %v5705_v23  ;;  %7337 = vmatprep.subr.mxu1 %v5822_v53  ;;  %v5817_v23 = vld [vmem:[#allocation12 + $0x50] sm:$0xff] }
 0xa52   :  { %7338 = vmatpush3.msra.mxu1 %v5822_v53 }
 0xa53   :  { %7339 = vmatprep.subr.mxu1 %v5821_v44 }
 0xa54   :  { %7340 = vmatpush3.msra.mxu1 %v5821_v44 }
 0xa55   :  { %7341 = vmatprep.subr.mxu1 %v5820_v14 }
 0xa56   :  { %7342 = vmatpush3.msra.mxu1 %v5820_v14 }
 0xa57   :  { %7343 = vmatprep.subr.mxu1 %v5819_v22 }
 0xa58   :  { %7344 = vmatpush3.msra.mxu1 %v5819_v22 }
 0xa59   :  { %7345 = vmatprep.subr.mxu1 %v5818_v60 }
 0xa5a   :  { %7346 = vmatpush3.msra.mxu1 %v5818_v60 }
 0xa5b   :  { %7347 = vmatprep.subr.mxu1 %v5817_v23 }
 0xa5c   :  { %7348 = vmatpush3.msra.mxu1 %v5817_v23 }
 0xaef   :  { %v5409_v50 = vpop.f32.mrf.mxu1  ;;  %v5338_v7 = vpop.f32.mrf.mxu0 }
 0xaf0   :  { %v5637_v13 = vadd.f32 %v10837_v25, %v5409_v50  ;;  %v5722_v25 = vld [vmem:[#allocation10 + $0x78] sm:$0xff] }
 0xaf1   :  { %v7266_v5 = vpop.f32.mrf.mxu1  ;;  %v5340_v46 = vpop.f32.mrf.mxu0  ;;  %7302 = vmatprep.subr.mxu0 %v5722_v25 }
 0xaf2   :  { %7303 = vmatpush3.msra.mxu0 %v5722_v25 }
 0xaf3   :  { %7304 = vmatprep.subr.mxu0 %v5721_v21 }
 0xaf4   :  { %7305 = vmatpush3.msra.mxu0 %v5721_v21 }
 0xaf5   :  { %7306 = vmatprep.subr.mxu0 %v5720_v40 }
 0xaf6   :  { %7307 = vmatpush3.msra.mxu0 %v5720_v40 }
 0xaf7   :  { %7308 = vmatprep.subr.mxu0 %v5719_v16 }
 0xaf8   :  { %7309 = vmatpush3.msra.mxu0 %v5719_v16 }
 0xaf9   :  { %7310 = vmatprep.subr.mxu0 %v5718_v41 }
 0xafa   :  { %7311 = vmatpush3.msra.mxu0 %v5718_v41 }
 0xafb   :  { %7312 = vmatprep.subr.mxu0 %v5717_v10 }
 0xafc   :  { %7313 = vmatpush3.msra.mxu0 %v5717_v10 }
 0xafd   :  { %7314 = vmatprep.subr.mxu0 %v5716_v1 }
 0xafe   :  { %7315 = vmatpush3.msra.mxu0 %v5716_v1 }
 0xaff   :  { %7316 = vmatprep.subr.mxu0 %v5715_v29 }
 0xb00   :  { %7317 = vmatpush3.msra.mxu0 %v5715_v29 }
 0xb01   :  { %7318 = vmatprep.subr.mxu0 %v5714_v55 }
 0xb02   :  { %7319 = vmatpush3.msra.mxu0 %v5714_v55 }
 0xb03   :  { %7320 = vmatprep.subr.mxu0 %v5713_v8 }
 0xb04   :  { %7321 = vmatpush3.msra.mxu0 %v5713_v8 }
 0xb05   :  { %7322 = vmatprep.subr.mxu0 %v5712_v34 }
 0xb06   :  { %7323 = vmatpush3.msra.mxu0 %v5712_v34 }
 0xb07   :  { %7324 = vmatprep.subr.mxu0 %v5711_v45 }
 0xb08   :  { %7325 = vmatpush3.msra.mxu0 %v5711_v45 }
 0xb09   :  { %7326 = vmatprep.subr.mxu0 %v5710_v27 }
 0xb0a   :  { %7327 = vmatpush3.msra.mxu0 %v5710_v27 }
 0xb0b   :  { %7328 = vmatprep.subr.mxu0 %v5709_v15 }
 0xb0c   :  { %7329 = vmatpush3.msra.mxu0 %v5709_v15 }
 0xb0d   :  { %7330 = vmatprep.subr.mxu0 %v5708_v49 }
 0xb0e   :  { %7331 = vmatpush3.msra.mxu0 %v5708_v49 }
 0xb0f   :  { %7332 = vmatprep.subr.mxu0 %v5707_v62 }
 0xb10   :  { %v5527_v26 = vpop.f32.mrf.mxu0  ;;  %v5598_v2 = vpop.f32.mrf.mxu1  ;;  %7333 = vmatpush3.msra.mxu0 %v5707_v62 }
 0xb11   :  { %v5602_v57 = vadd.f32 %v5527_v26, %v5338_v7  ;;  %v5645_v32 = vadd.f32 %v10829_v54, %v5598_v2  ;;  %v5816_v2 = vld [vmem:[#allocation12 + $0x48] sm:$0xff] }
 0xb12   :  { %v5529_v58 = vpop.f32.mrf.mxu0  ;;  %v7301_v28 = vpop.f32.mrf.mxu1  ;;  %7349 = vmatprep.subr.mxu1 %v5816_v2 }
 0xb13   :  { %v5616_v31 = vadd.f32 %v5609_v38, %v5602_v57  ;;  %v5603_v36 = vadd.f32 %v5529_v58, %v5340_v46  ;;  %7350 = vmatpush3.msra.mxu1 %v5816_v2  ;;  %v5815_v57 = vld [vmem:[#allocation12 + $0x40] sm:$0xff]  ;;  %v5814_v58 = vld [vmem:[#allocation12 + $0x38] sm:$0xff]  ;;  %v5813_v28 = vld [vmem:[#allocation12 + $0x30] sm:$0xff] }
 0xb14   :  { %7351 = vmatprep.subr.mxu1 %v5815_v57 }
 0xb15   :  { %v6007_v35 = vmul.f32 -1.442695, %v5616_v31  ;;  %v5617_v37 = vadd.f32 %v5613_v17, %v5603_v36  ;;  %7352 = vmatpush3.msra.mxu1 %v5815_v57  ;;  %v5812_v31 = vld [vmem:[#allocation12 + $0x28] sm:$0xff]  ;;  %v5807_v17 = vld [vmem:[#allocation12] sm:$0xff] }
 0xb16   :  { %7353 = vmatprep.subr.mxu1 %v5814_v58  ;;  %v5808_v36 = vld [vmem:[#allocation12 + $0x8] sm:$0xff] }
 0xb17   :  { %7537 = vpow2.f32 %v6007_v35  ;;  %v6008_v19 = vmul.f32 -1.442695, %v5617_v37  ;;  %7354 = vmatpush3.msra.mxu1 %v5814_v58  ;;  %v5811_v35 = vld [vmem:[#allocation12 + $0x20] sm:$0xff]  ;;  %v6014_v37 = vld [vmem:[%s10979_s16] ss:$0 sm:$0xff] }
 0xb18   :  { %7355 = vmatprep.subr.mxu1 %v5813_v28 }
 0xb19   :  { %7539 = vpow2.f32 %v6008_v19  ;;  %7356 = vmatpush3.msra.mxu1 %v5813_v28 }
 0xb1a   :  { %7357 = vmatprep.subr.mxu1 %v5812_v31 }
 0xb1b   :  { %7358 = vmatpush3.msra.mxu1 %v5812_v31 }
 0xb1c   :  { %7359 = vmatprep.subr.mxu1 %v5811_v35 }
 0xb1d   :  { %7360 = vmatpush3.msra.mxu1 %v5811_v35 }
 0xb24   :  { %v7538_v39 = vpop.eup %7537 }
 0xb25   :  { %v5624_v12 = vadd.f32 1.0, %v7538_v39 }
 0xb26   :  { %v7540_v59 = vpop.eup %7539 }
 0xb27   :  { %7541 = vrcp.f32 %v5624_v12  ;;  %v5625_v43 = vadd.f32 1.0, %v7540_v59 }
 0xb29   :  { %7543 = vrcp.f32 %v5625_v43 }
 0xb34   :  { %v7542_v0 = vpop.eup %7541 }
 0xb35   :  { %v5646_v11 = vmul.f32 %v7542_v0, %v5645_v32 }
 0xb36   :  { %v7544_v52 = vpop.eup %7543 }
 0xb37   :  { %v5647_v4 = vadd.f32 %v5646_v11, %v5637_v13  ;;  %v5649_v61 = vsub.f32 1.0, %v7544_v52  ;;  %v5651_v30 = vmul.f32 %v7544_v52, %v10844_v9  ;;  %v6015_v13 = vld [vmem:[%s10981_s18] ss:$0 sm:$0xff] }
 0xb39   :  { %7545 = vtanh.f32 %v5647_v4 }
 0xb46   :  { %v7546_v6 = vpop.eup %7545 }
 0xb47   :  { %v5650_v24 = vmul.f32 %v7546_v6, %v5649_v61  ;;  %v6016_v6 = vld [vmem:[%s10982_s19] ss:$0 sm:$0xff] }
 0xb49   :  { %v5652_v56 = vadd.f32 %v5651_v30, %v5650_v24 }
 0xb4b   :  { %5653 = vst [vmem:[#allocation3 + $0xe] sm:$0x3] %v5652_v56  ;;  %5655 = vst [vmem:[%s10986_s23] sm:$0x3] %v5652_v56 }
 0xb52   :  { %v5662_v54 = vld [vmem:[#allocation3 + $0x8] sm:$0xff] }
 0xb53   :  { %v5664_v20 = vmul.f32 %v12074_v47, %v5662_v54  ;;  %v6017_v54 = vld [vmem:[#allocation4] ss:$0 sm:$0xff] }
 0xb55   :  { %5667 = vadd.xlane.f32.xlu1 %v5664_v20 }
 0xbde   :  { %v5668_v9 = vpop.xlane.xlu1 %5667 }
 0xbdf   :  { %v5670_v48 = vmul.f32 0.015625, %v5668_v9 }
 0xbe1   :  { %v5672_v18 = vsub.f32 %v5664_v20, %v5670_v48 }
 0xbe3   :  { %v5674_v51 = vmul.f32 %v12074_v47, %v5672_v18 }
 0xbe5   :  { %v5676_v33 = vmul.f32 %v5674_v51, %v5674_v51 }
 0xbe7   :  { %5679 = vadd.xlane.f32.xlu1 %v5676_v33 }
 0xc70   :  { %v5680_v50 = vpop.xlane.xlu1 %5679 }
 0xc71   :  { %v5682_v5 = vmul.f32 0.015625, %v5680_v50 }
 0xc73   :  { %v5684_v7 = vadd.f32 1e-05, %v5682_v5 }
 0xc75   :  { %7547 = vrsqrt.f32 %v5684_v7 }
 0xc82   :  { %v7548_v3 = vpop.eup %7547 }
 0xc83   :  { %v5688_v46 = vmul.f32 %v7548_v3, %v5674_v51 }
 0xc85   :  { %v5697_v38 = vmul.f32 %v10907_v42, %v5688_v46  ;;  %v5810_v42 = vld [vmem:[#allocation12 + $0x18] sm:$0xff] }
 0xc86   :  { %7361 = vmatprep.subr.mxu1 %v5810_v42 }
 0xc87   :  { %v5706_v26 = vadd.f32 %v10921_v63, %v5697_v38  ;;  %v5809_v63 = vld [vmem:[#allocation12 + $0x10] sm:$0xff]  ;;  %7362 = vmatpush3.msra.mxu1 %v5810_v42 }
 0xc88   :  { %7363 = vmatprep.subr.mxu1 %v5809_v63 }
 0xc89   :  { %7335 = vmatmul.mubr.f32.vlgmr.msra.gmra.mxu0 %v5706_v26  ;;  %7364 = vmatpush3.msra.mxu1 %v5809_v63 }
 0xc8a   :  { %7365 = vmatprep.subr.mxu1 %v5808_v36 }
 0xc8b   :  { %7366 = vmatpush3.msra.mxu1 %v5808_v36 }
 0xc8c   :  { %7367 = vmatprep.subr.mxu1 %v5807_v17 }
 0xc8d   :  { %7368 = vmatpush3.msra.mxu1 %v5807_v17 }
 0xd49   :  { %v7336_v19 = vpop.f32.mrf.mxu0 }
 0xd4a   :  { %v5802_v39 = vadd.f32 %v7336_v19, %v6014_v37 }
 0xd4b   :  { %v5796_v12 = vpop.f32.mrf.mxu0 }
 0xd4c   :  { %v5797_v59 = vadd.f32 %v6014_v37, %v5796_v12 }
 0xd4e   :  { %7549 = vtanh.f32 %v5797_v59 }
 0xd4f   :  { %7551 = vtanh.f32 %v5802_v39 }
 0xd5b   :  { %v7550_v43 = vpop.eup %7549 }
 0xd5c   :  { %v7552_v32 = vpop.eup %7551  ;;  %7369 = vmatprep.mubr.f32.mxu1 %v7550_v43 }
 0xd5d   :  { %7370 = vmatmul.mubr.f32.vlgmr.msra.gmra.mxu1 %v7552_v32 }
 0xe1d   :  { %v7371_v0 = vpop.f32.mrf.mxu1 }
 0xe1e   :  { %v5902_v4 = vadd.f32 %v7371_v0, %v6015_v13 }
 0xe1f   :  { %v5896_v11 = vpop.f32.mrf.mxu1 }
 0xe20   :  { %v5897_v52 = vadd.f32 %v6015_v13, %v5896_v11  ;;  %v5906_v24 = vmax.f32 %v5902_v4, 0.0 }
 0xe22   :  { %v5905_v61 = vmax.f32 %v5897_v52, 0.0  ;;  %v5915_v56 = vmul.f32 %v6016_v6, %v5906_v24 }
 0xe24   :  { %v5914_v30 = vmul.f32 %v6016_v6, %v5905_v61 }
 0xe26   :  { %5916 = vadd.xlane.f32.xlu1 %v5914_v30 }
 0xe2a   :  { %5918 = vadd.xlane.f32.xlu1 %v5915_v56 }
 0xeaf   :  { %v5917_v47 = vpop.xlane.xlu1 %5916 }
 0xeb0   :  { %v5927_v20 = vadd.f32 %v6017_v54, %v5917_v47 }
 0xeb2   :  { %5930 = vst.msk [vmem:[%s10984_s21] sm:$0xff] %vm5929_vm2, %v5927_v20 }
 0xeb3   :  { %v5919_v25 = vpop.xlane.xlu1 %5918 }
 0xeb4   :  { %v5928_v21 = vadd.f32 %v6017_v54, %v5919_v25 }
 0xeb6   :  { %5931 = vst.msk [vmem:[%s10984_s21 + $0x8] sm:$0xff] %vm5929_vm2, %v5928_v21 }
 0xeb7   :  { %5944 = vsyncpa [#allocation6], 1 }
 0xeb8   :  { %5945 = vsyncpa [#allocation8], 1 }
 0xeb9   :  { %5946 = vsyncpa [#allocation11], 1 }

</bundles_post_ra>
